<compile_context>
chip_gen: v7x
topology: tpu7x:2x2x1
jax: 0.10.0
libtpu: 0.0.40
codegen_flags: <defaults>
</compile_context>

<pallas_src>
import math

import jax
import jax.numpy as jnp
from jax.experimental import pallas as pl
from jax.experimental.pallas import tpu as pltpu


def _make_rir_kernel(H, W, C, N, B):
    L = N * W * C

    def kernel(x_ref, w1_ref, w2_ref, o_ref):
        x0 = x_ref[...].astype(jnp.float32)

        # Row masks implementing padding=1 along H (hoisted; reused by all
        # 2*B convs -- JAX does not CSE broadcasts, so build them once).
        row = jax.lax.broadcasted_iota(jnp.int32, (H, L), 0)
        not_top = (row > 0).astype(jnp.float32)       # zeroes row 0
        not_bot = (row < H - 1).astype(jnp.float32)   # zeroes row H-1

        def dwconv(inp, w_ref, b):
            # Depthwise 3x3, stride 1, padding 1.
            # Taps along H (kh): tap_kh[h, :] = inp[h + kh - 1, :] (zero pad).
            # pltpu.roll follows jnp.roll semantics: out[i] = in[i - shift].
            r_top = pltpu.roll(inp, 1, axis=0) * not_top        # kh = 0
            r_bot = pltpu.roll(inp, H - 1, axis=0) * not_bot    # kh = 2
            rows = (r_top, inp, r_bot)

            # Init accumulator from the center tap (kh=1, kw=1) -- saves an add.
            acc = inp * w_ref[b, 4]
            for kh in range(3):
                r = rows[kh]
                for kw in range(3):
                    if kh == 1 and kw == 1:
                        continue
                    if kw == 0:           # needs in[..., w-1]  -> roll lanes +C
                        t = pltpu.roll(r, C, axis=1)
                    elif kw == 2:         # needs in[..., w+1]  -> roll lanes -C
                        t = pltpu.roll(r, L - C, axis=1)
                    else:                 # kw == 1, no lane shift
                        t = r
                    # w_ref[b, tap] is a (1, L) lane row with the kw padding /
                    # image-boundary mask already baked in (sublane broadcast).
                    acc = acc + t * w_ref[b, kh * 3 + kw]
            return acc

        out = x0
        for b in range(B):                       # fully unrolled ResBlock chain
            t = jnp.maximum(dwconv(out, w1_ref, b), 0.0)   # relu(conv1(x))
            t = dwconv(t, w2_ref, b)                       # conv2(.)
            out = jnp.maximum(t + out, 0.0)                # relu(out + residual)

        o_ref[...] = (out + x0).astype(o_ref.dtype)        # RIR outer residual

    return kernel


def rir_forward(x_nchw, w1, w2):
    """x_nchw: (N, C, H, W) f32.  w1, w2: (B, C, 3, 3) depthwise kernels."""
    N, C, H, W = x_nchw.shape
    B = w1.shape[0]
    L = N * W * C

    # glue: NCHW -> lane-dense (H, N*W*C), lane order (n, w, c) with c fastest.
    x_l = jnp.transpose(x_nchw, (2, 0, 3, 1)).reshape(H, L)

    # kw padding masks per lane (also isolate neighbouring images fused on the
    # lane axis: the positions that would receive cross-image data under a
    # +/-C lane roll are exactly the padded w==0 / w==W-1 positions).
    w_pos = (jnp.arange(L) // C) % W                             # w coord per lane
    kw_masks = jnp.stack([
        (w_pos != 0).astype(jnp.float32),                        # kw=0 reads w-1
        jnp.ones((L,), jnp.float32),                             # kw=1
        (w_pos != W - 1).astype(jnp.float32),                    # kw=2 reads w+1
    ])                                                           # (3, L)
    tap_masks = kw_masks[jnp.arange(9) % 3]                      # (9, L)

    # glue: (B, C, 3, 3) -> per-tap lane rows (B, 9, 1, L), channel pattern
    # repeated N*W times to line up with the fused (n, w, c) lane ordering,
    # with the kw masks pre-multiplied in.
    def to_lane_rows(w):
        wt = jnp.transpose(w, (0, 2, 3, 1)).reshape(B, 9, 1, C)  # (B, 9, 1, C)
        wt = jnp.tile(wt, (1, 1, 1, N * W))                      # (B, 9, 1, L)
        return wt * tap_masks[None, :, None, :]

    w1_l = to_lane_rows(w1)
    w2_l = to_lane_rows(w2)

    kernel = _make_rir_kernel(H, W, C, N, B)
    out_l = pl.pallas_call(
        kernel,
        out_shape=jax.ShapeDtypeStruct((H, L), x_nchw.dtype),
        grid_spec=pltpu.PrefetchScalarGridSpec(
            num_scalar_prefetch=0,
            grid=(1,),                                   # single step: no per-step overhead
            in_specs=[
                pl.BlockSpec((H, L), lambda i: (0, 0)),
                pl.BlockSpec((B, 9, 1, L), lambda i: (0, 0, 0, 0)),
                pl.BlockSpec((B, 9, 1, L), lambda i: (0, 0, 0, 0)),
            ],
            out_specs=pl.BlockSpec((H, L), lambda i: (0, 0)),
        ),
        compiler_params=pltpu.CompilerParams(dimension_semantics=("arbitrary",)),
    )(x_l, w1_l, w2_l)

    # glue: lane-dense (H, N*W*C) -> NCHW
    return out_l.reshape(H, N, W, C).transpose(1, 3, 0, 2)


# ----------------------- pure-JAX reference (for checking) -----------------------
def _dwconv_ref(x, w):
    # x: (N, C, H, W); w: (C, 3, 3) depthwise
    return jax.lax.conv_general_dilated(
        x, w[:, None, :, :], window_strides=(1, 1), padding=((1, 1), (1, 1)),
        feature_group_count=x.shape[1],
        dimension_numbers=("NCHW", "OIHW", "NCHW"))


def _rir_reference(x, w1, w2):
    out = x
    for b in range(w1.shape[0]):
        residual = out
        t = jax.nn.relu(_dwconv_ref(out, w1[b]))
        t = _dwconv_ref(t, w2[b])
        out = jax.nn.relu(t + residual)
    return out + x


if __name__ == "__main__":
    N, C, H, W = 2, 4, 16, 16          # expert_featsize = 4
    B = 12                             # num_Resblocks (PyTorch default)

    key = jax.random.PRNGKey(0)
    kx, k1, k2 = jax.random.split(key, 3)
    x = jax.random.normal(kx, (N, C, H, W), dtype=jnp.float32)

    # deterministic init, PyTorch-Conv2d-like U(-1/sqrt(fan_in), 1/sqrt(fan_in));
    # depthwise fan_in = (C_in/groups) * k * k = 9
    bound = 1.0 / math.sqrt(9.0)
    w1 = jax.random.uniform(k1, (B, C, 3, 3), minval=-bound, maxval=bound,
                            dtype=jnp.float32)
    w2 = jax.random.uniform(k2, (B, C, 3, 3), minval=-bound, maxval=bound,
                            dtype=jnp.float32)

    out = jax.block_until_ready(rir_forward(x, w1, w2))

    ref = jax.block_until_ready(_rir_reference(x, w1, w2))
    assert out.shape == ref.shape == (N, C, H, W)
    max_err = float(jnp.max(jnp.abs(out - ref)))
    assert jnp.allclose(out, ref, atol=1e-4, rtol=1e-4), f"max_err={max_err}"
    print("KERNEL_OK")
</pallas_src>

<mosaic_0001>
module attributes {stable_mosaic.version = 11 : i64} {
  func.func @kernel(%arg0: i32, %arg1: memref<16x128xf32, #tpu.memory_space<vmem>>, %arg2: memref<12x9x1x128xf32, #tpu.memory_space<vmem>>, %arg3: memref<12x9x1x128xf32, #tpu.memory_space<vmem>>, %arg4: memref<16x128xf32, #tpu.memory_space<vmem>>) attributes {dimension_semantics = [#tpu.dimension_semantics<arbitrary>], iteration_bounds = array<i64: 1>, scalar_prefetch = 0 : i64, scratch_operands = 0 : i64, tpu.core_type = #tpu.core_type<tc>, window_params = [{pipeline_mode = #tpu.pipeline_mode<synchronous>, transform_indices = @transform_0, window_bounds = array<i64: 16, 128>}, {pipeline_mode = #tpu.pipeline_mode<synchronous>, transform_indices = @transform_1, window_bounds = array<i64: 12, 9, 1, 128>}, {pipeline_mode = #tpu.pipeline_mode<synchronous>, transform_indices = @transform_2, window_bounds = array<i64: 12, 9, 1, 128>}, {pipeline_mode = #tpu.pipeline_mode<synchronous>, transform_indices = @transform_3, window_bounds = array<i64: 16, 128>}]} {
    %c0 = arith.constant 0 : index
    %c0_0 = arith.constant 0 : index
    %0 = vector.load %arg1[%c0, %c0_0] : memref<16x128xf32, #tpu.memory_space<vmem>>, vector<16x128xf32>
    %1 = tpu.iota {dimensions = array<i32: 0>} : vector<16x128xi32>
    %c0_i32 = arith.constant 0 : i32
    %2 = vector.broadcast %c0_i32 : i32 to vector<16x128xi32>
    %3 = arith.cmpi sgt, %1, %2 : vector<16x128xi32>
    %4 = arith.extui %3 : vector<16x128xi1> to vector<16x128xi32>
    %5 = arith.sitofp %4 : vector<16x128xi32> to vector<16x128xf32>
    %c15_i32 = arith.constant 15 : i32
    %6 = vector.broadcast %c15_i32 : i32 to vector<16x128xi32>
    %7 = arith.cmpi slt, %1, %6 : vector<16x128xi32>
    %8 = arith.extui %7 : vector<16x128xi1> to vector<16x128xi32>
    %9 = arith.sitofp %8 : vector<16x128xi32> to vector<16x128xf32>
    %c1_i32 = arith.constant 1 : i32
    %10 = tpu.dynamic_rotate %0 by %c1_i32 dim 0 : vector<16x128xf32>, i32 -> vector<16x128xf32>
    %11 = arith.mulf %10, %5 : vector<16x128xf32>
    %c15_i32_1 = arith.constant 15 : i32
    %12 = tpu.dynamic_rotate %0 by %c15_i32_1 dim 0 : vector<16x128xf32>, i32 -> vector<16x128xf32>
    %13 = arith.mulf %12, %9 : vector<16x128xf32>
    %c0_2 = arith.constant 0 : index
    %c4 = arith.constant 4 : index
    %c0_3 = arith.constant 0 : index
    %c0_4 = arith.constant 0 : index
    %14 = vector.load %arg2[%c0_2, %c4, %c0_3, %c0_4] : memref<12x9x1x128xf32, #tpu.memory_space<vmem>>, vector<1x1x1x128xf32>
    %15 = vector.shape_cast %14 : vector<1x1x1x128xf32> to vector<1x128xf32>
    %16 = vector.broadcast %15 : vector<1x128xf32> to vector<16x128xf32>
    %17 = arith.mulf %0, %16 : vector<16x128xf32>
    %c4_i32 = arith.constant 4 : i32
    %18 = tpu.dynamic_rotate %11 by %c4_i32 dim 1 : vector<16x128xf32>, i32 -> vector<16x128xf32>
    %c0_5 = arith.constant 0 : index
    %c0_6 = arith.constant 0 : index
    %c0_7 = arith.constant 0 : index
    %c0_8 = arith.constant 0 : index
    %19 = vector.load %arg2[%c0_5, %c0_6, %c0_7, %c0_8] : memref<12x9x1x128xf32, #tpu.memory_space<vmem>>, vector<1x1x1x128xf32>
    %20 = vector.shape_cast %19 : vector<1x1x1x128xf32> to vector<1x128xf32>
    %21 = vector.broadcast %20 : vector<1x128xf32> to vector<16x128xf32>
    %22 = arith.mulf %18, %21 : vector<16x128xf32>
    %23 = arith.addf %17, %22 : vector<16x128xf32>
    %c0_9 = arith.constant 0 : index
    %c1 = arith.constant 1 : index
    %c0_10 = arith.constant 0 : index
    %c0_11 = arith.constant 0 : index
    %24 = vector.load %arg2[%c0_9, %c1, %c0_10, %c0_11] : memref<12x9x1x128xf32, #tpu.memory_space<vmem>>, vector<1x1x1x128xf32>
    %25 = vector.shape_cast %24 : vector<1x1x1x128xf32> to vector<1x128xf32>
    %26 = vector.broadcast %25 : vector<1x128xf32> to vector<16x128xf32>
    %27 = arith.mulf %11, %26 : vector<16x128xf32>
    %28 = arith.addf %23, %27 : vector<16x128xf32>
    %c124_i32 = arith.constant 124 : i32
    %29 = tpu.dynamic_rotate %11 by %c124_i32 dim 1 : vector<16x128xf32>, i32 -> vector<16x128xf32>
    %c0_12 = arith.constant 0 : index
    %c2 = arith.constant 2 : index
    %c0_13 = arith.constant 0 : index
    %c0_14 = arith.constant 0 : index
    %30 = vector.load %arg2[%c0_12, %c2, %c0_13, %c0_14] : memref<12x9x1x128xf32, #tpu.memory_space<vmem>>, vector<1x1x1x128xf32>
    %31 = vector.shape_cast %30 : vector<1x1x1x128xf32> to vector<1x128xf32>
    %32 = vector.broadcast %31 : vector<1x128xf32> to vector<16x128xf32>
    %33 = arith.mulf %29, %32 : vector<16x128xf32>
    %34 = arith.addf %28, %33 : vector<16x128xf32>
    %c4_i32_15 = arith.constant 4 : i32
    %35 = tpu.dynamic_rotate %0 by %c4_i32_15 dim 1 : vector<16x128xf32>, i32 -> vector<16x128xf32>
    %c0_16 = arith.constant 0 : index
    %c3 = arith.constant 3 : index
    %c0_17 = arith.constant 0 : index
    %c0_18 = arith.constant 0 : index
    %36 = vector.load %arg2[%c0_16, %c3, %c0_17, %c0_18] : memref<12x9x1x128xf32, #tpu.memory_space<vmem>>, vector<1x1x1x128xf32>
    %37 = vector.shape_cast %36 : vector<1x1x1x128xf32> to vector<1x128xf32>
    %38 = vector.broadcast %37 : vector<1x128xf32> to vector<16x128xf32>
    %39 = arith.mulf %35, %38 : vector<16x128xf32>
    %40 = arith.addf %34, %39 : vector<16x128xf32>
    %c124_i32_19 = arith.constant 124 : i32
    %41 = tpu.dynamic_rotate %0 by %c124_i32_19 dim 1 : vector<16x128xf32>, i32 -> vector<16x128xf32>
    %c0_20 = arith.constant 0 : index
    %c5 = arith.constant 5 : index
    %c0_21 = arith.constant 0 : index
    %c0_22 = arith.constant 0 : index
    %42 = vector.load %arg2[%c0_20, %c5, %c0_21, %c0_22] : memref<12x9x1x128xf32, #tpu.memory_space<vmem>>, vector<1x1x1x128xf32>
    %43 = vector.shape_cast %42 : vector<1x1x1x128xf32> to vector<1x128xf32>
    %44 = vector.broadcast %43 : vector<1x128xf32> to vector<16x128xf32>
    %45 = arith.mulf %41, %44 : vector<16x128xf32>
    %46 = arith.addf %40, %45 : vector<16x128xf32>
    %c4_i32_23 = arith.constant 4 : i32
    %47 = tpu.dynamic_rotate %13 by %c4_i32_23 dim 1 : vector<16x128xf32>, i32 -> vector<16x128xf32>
    %c0_24 = arith.constant 0 : index
    %c6 = arith.constant 6 : index
    %c0_25 = arith.constant 0 : index
    %c0_26 = arith.constant 0 : index
    %48 = vector.load %arg2[%c0_24, %c6, %c0_25, %c0_26] : memref<12x9x1x128xf32, #tpu.memory_space<vmem>>, vector<1x1x1x128xf32>
    %49 = vector.shape_cast %48 : vector<1x1x1x128xf32> to vector<1x128xf32>
    %50 = vector.broadcast %49 : vector<1x128xf32> to vector<16x128xf32>
    %51 = arith.mulf %47, %50 : vector<16x128xf32>
    %52 = arith.addf %46, %51 : vector<16x128xf32>
    %c0_27 = arith.constant 0 : index
    %c7 = arith.constant 7 : index
    %c0_28 = arith.constant 0 : index
    %c0_29 = arith.constant 0 : index
    %53 = vector.load %arg2[%c0_27, %c7, %c0_28, %c0_29] : memref<12x9x1x128xf32, #tpu.memory_space<vmem>>, vector<1x1x1x128xf32>
    %54 = vector.shape_cast %53 : vector<1x1x1x128xf32> to vector<1x128xf32>
    %55 = vector.broadcast %54 : vector<1x128xf32> to vector<16x128xf32>
    %56 = arith.mulf %13, %55 : vector<16x128xf32>
    %57 = arith.addf %52, %56 : vector<16x128xf32>
    %c124_i32_30 = arith.constant 124 : i32
    %58 = tpu.dynamic_rotate %13 by %c124_i32_30 dim 1 : vector<16x128xf32>, i32 -> vector<16x128xf32>
    %c0_31 = arith.constant 0 : index
    %c8 = arith.constant 8 : index
    %c0_32 = arith.constant 0 : index
    %c0_33 = arith.constant 0 : index
    %59 = vector.load %arg2[%c0_31, %c8, %c0_32, %c0_33] : memref<12x9x1x128xf32, #tpu.memory_space<vmem>>, vector<1x1x1x128xf32>
    %60 = vector.shape_cast %59 : vector<1x1x1x128xf32> to vector<1x128xf32>
    %61 = vector.broadcast %60 : vector<1x128xf32> to vector<16x128xf32>
    %62 = arith.mulf %58, %61 : vector<16x128xf32>
    %63 = arith.addf %57, %62 : vector<16x128xf32>
    %cst = arith.constant 0.000000e+00 : f32
    %64 = vector.broadcast %cst : f32 to vector<16x128xf32>
    %65 = arith.maximumf %63, %64 : vector<16x128xf32>
    %c1_i32_34 = arith.constant 1 : i32
    %66 = tpu.dynamic_rotate %65 by %c1_i32_34 dim 0 : vector<16x128xf32>, i32 -> vector<16x128xf32>
    %67 = arith.mulf %66, %5 : vector<16x128xf32>
    %c15_i32_35 = arith.constant 15 : i32
    %68 = tpu.dynamic_rotate %65 by %c15_i32_35 dim 0 : vector<16x128xf32>, i32 -> vector<16x128xf32>
    %69 = arith.mulf %68, %9 : vector<16x128xf32>
    %c0_36 = arith.constant 0 : index
    %c4_37 = arith.constant 4 : index
    %c0_38 = arith.constant 0 : index
    %c0_39 = arith.constant 0 : index
    %70 = vector.load %arg3[%c0_36, %c4_37, %c0_38, %c0_39] : memref<12x9x1x128xf32, #tpu.memory_space<vmem>>, vector<1x1x1x128xf32>
    %71 = vector.shape_cast %70 : vector<1x1x1x128xf32> to vector<1x128xf32>
    %72 = vector.broadcast %71 : vector<1x128xf32> to vector<16x128xf32>
    %73 = arith.mulf %65, %72 : vector<16x128xf32>
    %c4_i32_40 = arith.constant 4 : i32
    %74 = tpu.dynamic_rotate %67 by %c4_i32_40 dim 1 : vector<16x128xf32>, i32 -> vector<16x128xf32>
    %c0_41 = arith.constant 0 : index
    %c0_42 = arith.constant 0 : index
    %c0_43 = arith.constant 0 : index
    %c0_44 = arith.constant 0 : index
    %75 = vector.load %arg3[%c0_41, %c0_42, %c0_43, %c0_44] : memref<12x9x1x128xf32, #tpu.memory_space<vmem>>, vector<1x1x1x128xf32>
    %76 = vector.shape_cast %75 : vector<1x1x1x128xf32> to vector<1x128xf32>
    %77 = vector.broadcast %76 : vector<1x128xf32> to vector<16x128xf32>
    %78 = arith.mulf %74, %77 : vector<16x128xf32>
    %79 = arith.addf %73, %78 : vector<16x128xf32>
    %c0_45 = arith.constant 0 : index
    %c1_46 = arith.constant 1 : index
    %c0_47 = arith.constant 0 : index
    %c0_48 = arith.constant 0 : index
    %80 = vector.load %arg3[%c0_45, %c1_46, %c0_47, %c0_48] : memref<12x9x1x128xf32, #tpu.memory_space<vmem>>, vector<1x1x1x128xf32>
    %81 = vector.shape_cast %80 : vector<1x1x1x128xf32> to vector<1x128xf32>
    %82 = vector.broadcast %81 : vector<1x128xf32> to vector<16x128xf32>
    %83 = arith.mulf %67, %82 : vector<16x128xf32>
    %84 = arith.addf %79, %83 : vector<16x128xf32>
    %c124_i32_49 = arith.constant 124 : i32
    %85 = tpu.dynamic_rotate %67 by %c124_i32_49 dim 1 : vector<16x128xf32>, i32 -> vector<16x128xf32>
    %c0_50 = arith.constant 0 : index
    %c2_51 = arith.constant 2 : index
    %c0_52 = arith.constant 0 : index
    %c0_53 = arith.constant 0 : index
    %86 = vector.load %arg3[%c0_50, %c2_51, %c0_52, %c0_53] : memref<12x9x1x128xf32, #tpu.memory_space<vmem>>, vector<1x1x1x128xf32>
    %87 = vector.shape_cast %86 : vector<1x1x1x128xf32> to vector<1x128xf32>
    %88 = vector.broadcast %87 : vector<1x128xf32> to vector<16x128xf32>
    %89 = arith.mulf %85, %88 : vector<16x128xf32>
    %90 = arith.addf %84, %89 : vector<16x128xf32>
    %c4_i32_54 = arith.constant 4 : i32
    %91 = tpu.dynamic_rotate %65 by %c4_i32_54 dim 1 : vector<16x128xf32>, i32 -> vector<16x128xf32>
    %c0_55 = arith.constant 0 : index
    %c3_56 = arith.constant 3 : index
    %c0_57 = arith.constant 0 : index
    %c0_58 = arith.constant 0 : index
    %92 = vector.load %arg3[%c0_55, %c3_56, %c0_57, %c0_58] : memref<12x9x1x128xf32, #tpu.memory_space<vmem>>, vector<1x1x1x128xf32>
    %93 = vector.shape_cast %92 : vector<1x1x1x128xf32> to vector<1x128xf32>
    %94 = vector.broadcast %93 : vector<1x128xf32> to vector<16x128xf32>
    %95 = arith.mulf %91, %94 : vector<16x128xf32>
    %96 = arith.addf %90, %95 : vector<16x128xf32>
    %c124_i32_59 = arith.constant 124 : i32
    %97 = tpu.dynamic_rotate %65 by %c124_i32_59 dim 1 : vector<16x128xf32>, i32 -> vector<16x128xf32>
    %c0_60 = arith.constant 0 : index
    %c5_61 = arith.constant 5 : index
    %c0_62 = arith.constant 0 : index
    %c0_63 = arith.constant 0 : index
    %98 = vector.load %arg3[%c0_60, %c5_61, %c0_62, %c0_63] : memref<12x9x1x128xf32, #tpu.memory_space<vmem>>, vector<1x1x1x128xf32>
    %99 = vector.shape_cast %98 : vector<1x1x1x128xf32> to vector<1x128xf32>
    %100 = vector.broadcast %99 : vector<1x128xf32> to vector<16x128xf32>
    %101 = arith.mulf %97, %100 : vector<16x128xf32>
    %102 = arith.addf %96, %101 : vector<16x128xf32>
    %c4_i32_64 = arith.constant 4 : i32
    %103 = tpu.dynamic_rotate %69 by %c4_i32_64 dim 1 : vector<16x128xf32>, i32 -> vector<16x128xf32>
    %c0_65 = arith.constant 0 : index
    %c6_66 = arith.constant 6 : index
    %c0_67 = arith.constant 0 : index
    %c0_68 = arith.constant 0 : index
    %104 = vector.load %arg3[%c0_65, %c6_66, %c0_67, %c0_68] : memref<12x9x1x128xf32, #tpu.memory_space<vmem>>, vector<1x1x1x128xf32>
    %105 = vector.shape_cast %104 : vector<1x1x1x128xf32> to vector<1x128xf32>
    %106 = vector.broadcast %105 : vector<1x128xf32> to vector<16x128xf32>
    %107 = arith.mulf %103, %106 : vector<16x128xf32>
    %108 = arith.addf %102, %107 : vector<16x128xf32>
    %c0_69 = arith.constant 0 : index
    %c7_70 = arith.constant 7 : index
    %c0_71 = arith.constant 0 : index
    %c0_72 = arith.constant 0 : index
    %109 = vector.load %arg3[%c0_69, %c7_70, %c0_71, %c0_72] : memref<12x9x1x128xf32, #tpu.memory_space<vmem>>, vector<1x1x1x128xf32>
    %110 = vector.shape_cast %109 : vector<1x1x1x128xf32> to vector<1x128xf32>
    %111 = vector.broadcast %110 : vector<1x128xf32> to vector<16x128xf32>
    %112 = arith.mulf %69, %111 : vector<16x128xf32>
    %113 = arith.addf %108, %112 : vector<16x128xf32>
    %c124_i32_73 = arith.constant 124 : i32
    %114 = tpu.dynamic_rotate %69 by %c124_i32_73 dim 1 : vector<16x128xf32>, i32 -> vector<16x128xf32>
    %c0_74 = arith.constant 0 : index
    %c8_75 = arith.constant 8 : index
    %c0_76 = arith.constant 0 : index
    %c0_77 = arith.constant 0 : index
    %115 = vector.load %arg3[%c0_74, %c8_75, %c0_76, %c0_77] : memref<12x9x1x128xf32, #tpu.memory_space<vmem>>, vector<1x1x1x128xf32>
    %116 = vector.shape_cast %115 : vector<1x1x1x128xf32> to vector<1x128xf32>
    %117 = vector.broadcast %116 : vector<1x128xf32> to vector<16x128xf32>
    %118 = arith.mulf %114, %117 : vector<16x128xf32>
    %119 = arith.addf %113, %118 : vector<16x128xf32>
    %120 = arith.addf %119, %0 : vector<16x128xf32>
    %cst_78 = arith.constant 0.000000e+00 : f32
    %121 = vector.broadcast %cst_78 : f32 to vector<16x128xf32>
    %122 = arith.maximumf %120, %121 : vector<16x128xf32>
    %c1_i32_79 = arith.constant 1 : i32
    %123 = tpu.dynamic_rotate %122 by %c1_i32_79 dim 0 : vector<16x128xf32>, i32 -> vector<16x128xf32>
    %124 = arith.mulf %123, %5 : vector<16x128xf32>
    %c15_i32_80 = arith.constant 15 : i32
    %125 = tpu.dynamic_rotate %122 by %c15_i32_80 dim 0 : vector<16x128xf32>, i32 -> vector<16x128xf32>
    %126 = arith.mulf %125, %9 : vector<16x128xf32>
    %c1_81 = arith.constant 1 : index
    %c4_82 = arith.constant 4 : index
    %c0_83 = arith.constant 0 : index
    %c0_84 = arith.constant 0 : index
    %127 = vector.load %arg2[%c1_81, %c4_82, %c0_83, %c0_84] : memref<12x9x1x128xf32, #tpu.memory_space<vmem>>, vector<1x1x1x128xf32>
    %128 = vector.shape_cast %127 : vector<1x1x1x128xf32> to vector<1x128xf32>
    %129 = vector.broadcast %128 : vector<1x128xf32> to vector<16x128xf32>
    %130 = arith.mulf %122, %129 : vector<16x128xf32>
    %c4_i32_85 = arith.constant 4 : i32
    %131 = tpu.dynamic_rotate %124 by %c4_i32_85 dim 1 : vector<16x128xf32>, i32 -> vector<16x128xf32>
    %c1_86 = arith.constant 1 : index
    %c0_87 = arith.constant 0 : index
    %c0_88 = arith.constant 0 : index
    %c0_89 = arith.constant 0 : index
    %132 = vector.load %arg2[%c1_86, %c0_87, %c0_88, %c0_89] : memref<12x9x1x128xf32, #tpu.memory_space<vmem>>, vector<1x1x1x128xf32>
    %133 = vector.shape_cast %132 : vector<1x1x1x128xf32> to vector<1x128xf32>
    %134 = vector.broadcast %133 : vector<1x128xf32> to vector<16x128xf32>
    %135 = arith.mulf %131, %134 : vector<16x128xf32>
    %136 = arith.addf %130, %135 : vector<16x128xf32>
    %c1_90 = arith.constant 1 : index
    %c1_91 = arith.constant 1 : index
    %c0_92 = arith.constant 0 : index
    %c0_93 = arith.constant 0 : index
    %137 = vector.load %arg2[%c1_90, %c1_91, %c0_92, %c0_93] : memref<12x9x1x128xf32, #tpu.memory_space<vmem>>, vector<1x1x1x128xf32>
    %138 = vector.shape_cast %137 : vector<1x1x1x128xf32> to vector<1x128xf32>
    %139 = vector.broadcast %138 : vector<1x128xf32> to vector<16x128xf32>
    %140 = arith.mulf %124, %139 : vector<16x128xf32>
    %141 = arith.addf %136, %140 : vector<16x128xf32>
    %c124_i32_94 = arith.constant 124 : i32
    %142 = tpu.dynamic_rotate %124 by %c124_i32_94 dim 1 : vector<16x128xf32>, i32 -> vector<16x128xf32>
    %c1_95 = arith.constant 1 : index
    %c2_96 = arith.constant 2 : index
    %c0_97 = arith.constant 0 : index
    %c0_98 = arith.constant 0 : index
    %143 = vector.load %arg2[%c1_95, %c2_96, %c0_97, %c0_98] : memref<12x9x1x128xf32, #tpu.memory_space<vmem>>, vector<1x1x1x128xf32>
    %144 = vector.shape_cast %143 : vector<1x1x1x128xf32> to vector<1x128xf32>
    %145 = vector.broadcast %144 : vector<1x128xf32> to vector<16x128xf32>
    %146 = arith.mulf %142, %145 : vector<16x128xf32>
    %147 = arith.addf %141, %146 : vector<16x128xf32>
    %c4_i32_99 = arith.constant 4 : i32
    %148 = tpu.dynamic_rotate %122 by %c4_i32_99 dim 1 : vector<16x128xf32>, i32 -> vector<16x128xf32>
    %c1_100 = arith.constant 1 : index
    %c3_101 = arith.constant 3 : index
    %c0_102 = arith.constant 0 : index
    %c0_103 = arith.constant 0 : index
    %149 = vector.load %arg2[%c1_100, %c3_101, %c0_102, %c0_103] : memref<12x9x1x128xf32, #tpu.memory_space<vmem>>, vector<1x1x1x128xf32>
    %150 = vector.shape_cast %149 : vector<1x1x1x128xf32> to vector<1x128xf32>
    %151 = vector.broadcast %150 : vector<1x128xf32> to vector<16x128xf32>
    %152 = arith.mulf %148, %151 : vector<16x128xf32>
    %153 = arith.addf %147, %152 : vector<16x128xf32>
    %c124_i32_104 = arith.constant 124 : i32
    %154 = tpu.dynamic_rotate %122 by %c124_i32_104 dim 1 : vector<16x128xf32>, i32 -> vector<16x128xf32>
    %c1_105 = arith.constant 1 : index
    %c5_106 = arith.constant 5 : index
    %c0_107 = arith.constant 0 : index
    %c0_108 = arith.constant 0 : index
    %155 = vector.load %arg2[%c1_105, %c5_106, %c0_107, %c0_108] : memref<12x9x1x128xf32, #tpu.memory_space<vmem>>, vector<1x1x1x128xf32>
    %156 = vector.shape_cast %155 : vector<1x1x1x128xf32> to vector<1x128xf32>
    %157 = vector.broadcast %156 : vector<1x128xf32> to vector<16x128xf32>
    %158 = arith.mulf %154, %157 : vector<16x128xf32>
    %159 = arith.addf %153, %158 : vector<16x128xf32>
    %c4_i32_109 = arith.constant 4 : i32
    %160 = tpu.dynamic_rotate %126 by %c4_i32_109 dim 1 : vector<16x128xf32>, i32 -> vector<16x128xf32>
    %c1_110 = arith.constant 1 : index
    %c6_111 = arith.constant 6 : index
    %c0_112 = arith.constant 0 : index
    %c0_113 = arith.constant 0 : index
    %161 = vector.load %arg2[%c1_110, %c6_111, %c0_112, %c0_113] : memref<12x9x1x128xf32, #tpu.memory_space<vmem>>, vector<1x1x1x128xf32>
    %162 = vector.shape_cast %161 : vector<1x1x1x128xf32> to vector<1x128xf32>
    %163 = vector.broadcast %162 : vector<1x128xf32> to vector<16x128xf32>
    %164 = arith.mulf %160, %163 : vector<16x128xf32>
    %165 = arith.addf %159, %164 : vector<16x128xf32>
    %c1_114 = arith.constant 1 : index
    %c7_115 = arith.constant 7 : index
    %c0_116 = arith.constant 0 : index
    %c0_117 = arith.constant 0 : index
    %166 = vector.load %arg2[%c1_114, %c7_115, %c0_116, %c0_117] : memref<12x9x1x128xf32, #tpu.memory_space<vmem>>, vector<1x1x1x128xf32>
    %167 = vector.shape_cast %166 : vector<1x1x1x128xf32> to vector<1x128xf32>
    %168 = vector.broadcast %167 : vector<1x128xf32> to vector<16x128xf32>
    %169 = arith.mulf %126, %168 : vector<16x128xf32>
    %170 = arith.addf %165, %169 : vector<16x128xf32>
    %c124_i32_118 = arith.constant 124 : i32
    %171 = tpu.dynamic_rotate %126 by %c124_i32_118 dim 1 : vector<16x128xf32>, i32 -> vector<16x128xf32>
    %c1_119 = arith.constant 1 : index
    %c8_120 = arith.constant 8 : index
    %c0_121 = arith.constant 0 : index
    %c0_122 = arith.constant 0 : index
    %172 = vector.load %arg2[%c1_119, %c8_120, %c0_121, %c0_122] : memref<12x9x1x128xf32, #tpu.memory_space<vmem>>, vector<1x1x1x128xf32>
    %173 = vector.shape_cast %172 : vector<1x1x1x128xf32> to vector<1x128xf32>
    %174 = vector.broadcast %173 : vector<1x128xf32> to vector<16x128xf32>
    %175 = arith.mulf %171, %174 : vector<16x128xf32>
    %176 = arith.addf %170, %175 : vector<16x128xf32>
    %cst_123 = arith.constant 0.000000e+00 : f32
    %177 = vector.broadcast %cst_123 : f32 to vector<16x128xf32>
    %178 = arith.maximumf %176, %177 : vector<16x128xf32>
    %c1_i32_124 = arith.constant 1 : i32
    %179 = tpu.dynamic_rotate %178 by %c1_i32_124 dim 0 : vector<16x128xf32>, i32 -> vector<16x128xf32>
    %180 = arith.mulf %179, %5 : vector<16x128xf32>
    %c15_i32_125 = arith.constant 15 : i32
    %181 = tpu.dynamic_rotate %178 by %c15_i32_125 dim 0 : vector<16x128xf32>, i32 -> vector<16x128xf32>
    %182 = arith.mulf %181, %9 : vector<16x128xf32>
    %c1_126 = arith.constant 1 : index
    %c4_127 = arith.constant 4 : index
    %c0_128 = arith.constant 0 : index
    %c0_129 = arith.constant 0 : index
    %183 = vector.load %arg3[%c1_126, %c4_127, %c0_128, %c0_129] : memref<12x9x1x128xf32, #tpu.memory_space<vmem>>, vector<1x1x1x128xf32>
    %184 = vector.shape_cast %183 : vector<1x1x1x128xf32> to vector<1x128xf32>
    %185 = vector.broadcast %184 : vector<1x128xf32> to vector<16x128xf32>
    %186 = arith.mulf %178, %185 : vector<16x128xf32>
    %c4_i32_130 = arith.constant 4 : i32
    %187 = tpu.dynamic_rotate %180 by %c4_i32_130 dim 1 : vector<16x128xf32>, i32 -> vector<16x128xf32>
    %c1_131 = arith.constant 1 : index
    %c0_132 = arith.constant 0 : index
    %c0_133 = arith.constant 0 : index
    %c0_134 = arith.constant 0 : index
    %188 = vector.load %arg3[%c1_131, %c0_132, %c0_133, %c0_134] : memref<12x9x1x128xf32, #tpu.memory_space<vmem>>, vector<1x1x1x128xf32>
    %189 = vector.shape_cast %188 : vector<1x1x1x128xf32> to vector<1x128xf32>
    %190 = vector.broadcast %189 : vector<1x128xf32> to vector<16x128xf32>
    %191 = arith.mulf %187, %190 : vector<16x128xf32>
    %192 = arith.addf %186, %191 : vector<16x128xf32>
    %c1_135 = arith.constant 1 : index
    %c1_136 = arith.constant 1 : index
    %c0_137 = arith.constant 0 : index
    %c0_138 = arith.constant 0 : index
    %193 = vector.load %arg3[%c1_135, %c1_136, %c0_137, %c0_138] : memref<12x9x1x128xf32, #tpu.memory_space<vmem>>, vector<1x1x1x128xf32>
    %194 = vector.shape_cast %193 : vector<1x1x1x128xf32> to vector<1x128xf32>
    %195 = vector.broadcast %194 : vector<1x128xf32> to vector<16x128xf32>
    %196 = arith.mulf %180, %195 : vector<16x128xf32>
    %197 = arith.addf %192, %196 : vector<16x128xf32>
    %c124_i32_139 = arith.constant 124 : i32
    %198 = tpu.dynamic_rotate %180 by %c124_i32_139 dim 1 : vector<16x128xf32>, i32 -> vector<16x128xf32>
    %c1_140 = arith.constant 1 : index
    %c2_141 = arith.constant 2 : index
    %c0_142 = arith.constant 0 : index
    %c0_143 = arith.constant 0 : index
    %199 = vector.load %arg3[%c1_140, %c2_141, %c0_142, %c0_143] : memref<12x9x1x128xf32, #tpu.memory_space<vmem>>, vector<1x1x1x128xf32>
    %200 = vector.shape_cast %199 : vector<1x1x1x128xf32> to vector<1x128xf32>
    %201 = vector.broadcast %200 : vector<1x128xf32> to vector<16x128xf32>
    %202 = arith.mulf %198, %201 : vector<16x128xf32>
    %203 = arith.addf %197, %202 : vector<16x128xf32>
    %c4_i32_144 = arith.constant 4 : i32
    %204 = tpu.dynamic_rotate %178 by %c4_i32_144 dim 1 : vector<16x128xf32>, i32 -> vector<16x128xf32>
    %c1_145 = arith.constant 1 : index
    %c3_146 = arith.constant 3 : index
    %c0_147 = arith.constant 0 : index
    %c0_148 = arith.constant 0 : index
    %205 = vector.load %arg3[%c1_145, %c3_146, %c0_147, %c0_148] : memref<12x9x1x128xf32, #tpu.memory_space<vmem>>, vector<1x1x1x128xf32>
    %206 = vector.shape_cast %205 : vector<1x1x1x128xf32> to vector<1x128xf32>
    %207 = vector.broadcast %206 : vector<1x128xf32> to vector<16x128xf32>
    %208 = arith.mulf %204, %207 : vector<16x128xf32>
    %209 = arith.addf %203, %208 : vector<16x128xf32>
    %c124_i32_149 = arith.constant 124 : i32
    %210 = tpu.dynamic_rotate %178 by %c124_i32_149 dim 1 : vector<16x128xf32>, i32 -> vector<16x128xf32>
    %c1_150 = arith.constant 1 : index
    %c5_151 = arith.constant 5 : index
    %c0_152 = arith.constant 0 : index
    %c0_153 = arith.constant 0 : index
    %211 = vector.load %arg3[%c1_150, %c5_151, %c0_152, %c0_153] : memref<12x9x1x128xf32, #tpu.memory_space<vmem>>, vector<1x1x1x128xf32>
    %212 = vector.shape_cast %211 : vector<1x1x1x128xf32> to vector<1x128xf32>
    %213 = vector.broadcast %212 : vector<1x128xf32> to vector<16x128xf32>
    %214 = arith.mulf %210, %213 : vector<16x128xf32>
    %215 = arith.addf %209, %214 : vector<16x128xf32>
    %c4_i32_154 = arith.constant 4 : i32
    %216 = tpu.dynamic_rotate %182 by %c4_i32_154 dim 1 : vector<16x128xf32>, i32 -> vector<16x128xf32>
    %c1_155 = arith.constant 1 : index
    %c6_156 = arith.constant 6 : index
    %c0_157 = arith.constant 0 : index
    %c0_158 = arith.constant 0 : index
    %217 = vector.load %arg3[%c1_155, %c6_156, %c0_157, %c0_158] : memref<12x9x1x128xf32, #tpu.memory_space<vmem>>, vector<1x1x1x128xf32>
    %218 = vector.shape_cast %217 : vector<1x1x1x128xf32> to vector<1x128xf32>
    %219 = vector.broadcast %218 : vector<1x128xf32> to vector<16x128xf32>
    %220 = arith.mulf %216, %219 : vector<16x128xf32>
    %221 = arith.addf %215, %220 : vector<16x128xf32>
    %c1_159 = arith.constant 1 : index
    %c7_160 = arith.constant 7 : index
    %c0_161 = arith.constant 0 : index
    %c0_162 = arith.constant 0 : index
    %222 = vector.load %arg3[%c1_159, %c7_160, %c0_161, %c0_162] : memref<12x9x1x128xf32, #tpu.memory_space<vmem>>, vector<1x1x1x128xf32>
    %223 = vector.shape_cast %222 : vector<1x1x1x128xf32> to vector<1x128xf32>
    %224 = vector.broadcast %223 : vector<1x128xf32> to vector<16x128xf32>
    %225 = arith.mulf %182, %224 : vector<16x128xf32>
    %226 = arith.addf %221, %225 : vector<16x128xf32>
    %c124_i32_163 = arith.constant 124 : i32
    %227 = tpu.dynamic_rotate %182 by %c124_i32_163 dim 1 : vector<16x128xf32>, i32 -> vector<16x128xf32>
    %c1_164 = arith.constant 1 : index
    %c8_165 = arith.constant 8 : index
    %c0_166 = arith.constant 0 : index
    %c0_167 = arith.constant 0 : index
    %228 = vector.load %arg3[%c1_164, %c8_165, %c0_166, %c0_167] : memref<12x9x1x128xf32, #tpu.memory_space<vmem>>, vector<1x1x1x128xf32>
    %229 = vector.shape_cast %228 : vector<1x1x1x128xf32> to vector<1x128xf32>
    %230 = vector.broadcast %229 : vector<1x128xf32> to vector<16x128xf32>
    %231 = arith.mulf %227, %230 : vector<16x128xf32>
    %232 = arith.addf %226, %231 : vector<16x128xf32>
    %233 = arith.addf %232, %122 : vector<16x128xf32>
    %cst_168 = arith.constant 0.000000e+00 : f32
    %234 = vector.broadcast %cst_168 : f32 to vector<16x128xf32>
    %235 = arith.maximumf %233, %234 : vector<16x128xf32>
    %c1_i32_169 = arith.constant 1 : i32
    %236 = tpu.dynamic_rotate %235 by %c1_i32_169 dim 0 : vector<16x128xf32>, i32 -> vector<16x128xf32>
    %237 = arith.mulf %236, %5 : vector<16x128xf32>
    %c15_i32_170 = arith.constant 15 : i32
    %238 = tpu.dynamic_rotate %235 by %c15_i32_170 dim 0 : vector<16x128xf32>, i32 -> vector<16x128xf32>
    %239 = arith.mulf %238, %9 : vector<16x128xf32>
    %c2_171 = arith.constant 2 : index
    %c4_172 = arith.constant 4 : index
    %c0_173 = arith.constant 0 : index
    %c0_174 = arith.constant 0 : index
    %240 = vector.load %arg2[%c2_171, %c4_172, %c0_173, %c0_174] : memref<12x9x1x128xf32, #tpu.memory_space<vmem>>, vector<1x1x1x128xf32>
    %241 = vector.shape_cast %240 : vector<1x1x1x128xf32> to vector<1x128xf32>
    %242 = vector.broadcast %241 : vector<1x128xf32> to vector<16x128xf32>
    %243 = arith.mulf %235, %242 : vector<16x128xf32>
    %c4_i32_175 = arith.constant 4 : i32
    %244 = tpu.dynamic_rotate %237 by %c4_i32_175 dim 1 : vector<16x128xf32>, i32 -> vector<16x128xf32>
    %c2_176 = arith.constant 2 : index
    %c0_177 = arith.constant 0 : index
    %c0_178 = arith.constant 0 : index
    %c0_179 = arith.constant 0 : index
    %245 = vector.load %arg2[%c2_176, %c0_177, %c0_178, %c0_179] : memref<12x9x1x128xf32, #tpu.memory_space<vmem>>, vector<1x1x1x128xf32>
    %246 = vector.shape_cast %245 : vector<1x1x1x128xf32> to vector<1x128xf32>
    %247 = vector.broadcast %246 : vector<1x128xf32> to vector<16x128xf32>
    %248 = arith.mulf %244, %247 : vector<16x128xf32>
    %249 = arith.addf %243, %248 : vector<16x128xf32>
    %c2_180 = arith.constant 2 : index
    %c1_181 = arith.constant 1 : index
    %c0_182 = arith.constant 0 : index
    %c0_183 = arith.constant 0 : index
    %250 = vector.load %arg2[%c2_180, %c1_181, %c0_182, %c0_183] : memref<12x9x1x128xf32, #tpu.memory_space<vmem>>, vector<1x1x1x128xf32>
    %251 = vector.shape_cast %250 : vector<1x1x1x128xf32> to vector<1x128xf32>
    %252 = vector.broadcast %251 : vector<1x128xf32> to vector<16x128xf32>
    %253 = arith.mulf %237, %252 : vector<16x128xf32>
    %254 = arith.addf %249, %253 : vector<16x128xf32>
    %c124_i32_184 = arith.constant 124 : i32
    %255 = tpu.dynamic_rotate %237 by %c124_i32_184 dim 1 : vector<16x128xf32>, i32 -> vector<16x128xf32>
    %c2_185 = arith.constant 2 : index
    %c2_186 = arith.constant 2 : index
    %c0_187 = arith.constant 0 : index
    %c0_188 = arith.constant 0 : index
    %256 = vector.load %arg2[%c2_185, %c2_186, %c0_187, %c0_188] : memref<12x9x1x128xf32, #tpu.memory_space<vmem>>, vector<1x1x1x128xf32>
    %257 = vector.shape_cast %256 : vector<1x1x1x128xf32> to vector<1x128xf32>
    %258 = vector.broadcast %257 : vector<1x128xf32> to vector<16x128xf32>
    %259 = arith.mulf %255, %258 : vector<16x128xf32>
    %260 = arith.addf %254, %259 : vector<16x128xf32>
    %c4_i32_189 = arith.constant 4 : i32
    %261 = tpu.dynamic_rotate %235 by %c4_i32_189 dim 1 : vector<16x128xf32>, i32 -> vector<16x128xf32>
    %c2_190 = arith.constant 2 : index
    %c3_191 = arith.constant 3 : index
    %c0_192 = arith.constant 0 : index
    %c0_193 = arith.constant 0 : index
    %262 = vector.load %arg2[%c2_190, %c3_191, %c0_192, %c0_193] : memref<12x9x1x128xf32, #tpu.memory_space<vmem>>, vector<1x1x1x128xf32>
    %263 = vector.shape_cast %262 : vector<1x1x1x128xf32> to vector<1x128xf32>
    %264 = vector.broadcast %263 : vector<1x128xf32> to vector<16x128xf32>
    %265 = arith.mulf %261, %264 : vector<16x128xf32>
    %266 = arith.addf %260, %265 : vector<16x128xf32>
    %c124_i32_194 = arith.constant 124 : i32
    %267 = tpu.dynamic_rotate %235 by %c124_i32_194 dim 1 : vector<16x128xf32>, i32 -> vector<16x128xf32>
    %c2_195 = arith.constant 2 : index
    %c5_196 = arith.constant 5 : index
    %c0_197 = arith.constant 0 : index
    %c0_198 = arith.constant 0 : index
    %268 = vector.load %arg2[%c2_195, %c5_196, %c0_197, %c0_198] : memref<12x9x1x128xf32, #tpu.memory_space<vmem>>, vector<1x1x1x128xf32>
    %269 = vector.shape_cast %268 : vector<1x1x1x128xf32> to vector<1x128xf32>
    %270 = vector.broadcast %269 : vector<1x128xf32> to vector<16x128xf32>
    %271 = arith.mulf %267, %270 : vector<16x128xf32>
    %272 = arith.addf %266, %271 : vector<16x128xf32>
    %c4_i32_199 = arith.constant 4 : i32
    %273 = tpu.dynamic_rotate %239 by %c4_i32_199 dim 1 : vector<16x128xf32>, i32 -> vector<16x128xf32>
    %c2_200 = arith.constant 2 : index
    %c6_201 = arith.constant 6 : index
    %c0_202 = arith.constant 0 : index
    %c0_203 = arith.constant 0 : index
    %274 = vector.load %arg2[%c2_200, %c6_201, %c0_202, %c0_203] : memref<12x9x1x128xf32, #tpu.memory_space<vmem>>, vector<1x1x1x128xf32>
    %275 = vector.shape_cast %274 : vector<1x1x1x128xf32> to vector<1x128xf32>
    %276 = vector.broadcast %275 : vector<1x128xf32> to vector<16x128xf32>
    %277 = arith.mulf %273, %276 : vector<16x128xf32>
    %278 = arith.addf %272, %277 : vector<16x128xf32>
    %c2_204 = arith.constant 2 : index
    %c7_205 = arith.constant 7 : index
    %c0_206 = arith.constant 0 : index
    %c0_207 = arith.constant 0 : index
    %279 = vector.load %arg2[%c2_204, %c7_205, %c0_206, %c0_207] : memref<12x9x1x128xf32, #tpu.memory_space<vmem>>, vector<1x1x1x128xf32>
    %280 = vector.shape_cast %279 : vector<1x1x1x128xf32> to vector<1x128xf32>
    %281 = vector.broadcast %280 : vector<1x128xf32> to vector<16x128xf32>
    %282 = arith.mulf %239, %281 : vector<16x128xf32>
    %283 = arith.addf %278, %282 : vector<16x128xf32>
    %c124_i32_208 = arith.constant 124 : i32
    %284 = tpu.dynamic_rotate %239 by %c124_i32_208 dim 1 : vector<16x128xf32>, i32 -> vector<16x128xf32>
    %c2_209 = arith.constant 2 : index
    %c8_210 = arith.constant 8 : index
    %c0_211 = arith.constant 0 : index
    %c0_212 = arith.constant 0 : index
    %285 = vector.load %arg2[%c2_209, %c8_210, %c0_211, %c0_212] : memref<12x9x1x128xf32, #tpu.memory_space<vmem>>, vector<1x1x1x128xf32>
    %286 = vector.shape_cast %285 : vector<1x1x1x128xf32> to vector<1x128xf32>
    %287 = vector.broadcast %286 : vector<1x128xf32> to vector<16x128xf32>
    %288 = arith.mulf %284, %287 : vector<16x128xf32>
    %289 = arith.addf %283, %288 : vector<16x128xf32>
    %cst_213 = arith.constant 0.000000e+00 : f32
    %290 = vector.broadcast %cst_213 : f32 to vector<16x128xf32>
    %291 = arith.maximumf %289, %290 : vector<16x128xf32>
    %c1_i32_214 = arith.constant 1 : i32
    %292 = tpu.dynamic_rotate %291 by %c1_i32_214 dim 0 : vector<16x128xf32>, i32 -> vector<16x128xf32>
    %293 = arith.mulf %292, %5 : vector<16x128xf32>
    %c15_i32_215 = arith.constant 15 : i32
    %294 = tpu.dynamic_rotate %291 by %c15_i32_215 dim 0 : vector<16x128xf32>, i32 -> vector<16x128xf32>
    %295 = arith.mulf %294, %9 : vector<16x128xf32>
    %c2_216 = arith.constant 2 : index
    %c4_217 = arith.constant 4 : index
    %c0_218 = arith.constant 0 : index
    %c0_219 = arith.constant 0 : index
    %296 = vector.load %arg3[%c2_216, %c4_217, %c0_218, %c0_219] : memref<12x9x1x128xf32, #tpu.memory_space<vmem>>, vector<1x1x1x128xf32>
    %297 = vector.shape_cast %296 : vector<1x1x1x128xf32> to vector<1x128xf32>
    %298 = vector.broadcast %297 : vector<1x128xf32> to vector<16x128xf32>
    %299 = arith.mulf %291, %298 : vector<16x128xf32>
    %c4_i32_220 = arith.constant 4 : i32
    %300 = tpu.dynamic_rotate %293 by %c4_i32_220 dim 1 : vector<16x128xf32>, i32 -> vector<16x128xf32>
    %c2_221 = arith.constant 2 : index
    %c0_222 = arith.constant 0 : index
    %c0_223 = arith.constant 0 : index
    %c0_224 = arith.constant 0 : index
    %301 = vector.load %arg3[%c2_221, %c0_222, %c0_223, %c0_224] : memref<12x9x1x128xf32, #tpu.memory_space<vmem>>, vector<1x1x1x128xf32>
    %302 = vector.shape_cast %301 : vector<1x1x1x128xf32> to vector<1x128xf32>
    %303 = vector.broadcast %302 : vector<1x128xf32> to vector<16x128xf32>
    %304 = arith.mulf %300, %303 : vector<16x128xf32>
    %305 = arith.addf %299, %304 : vector<16x128xf32>
    %c2_225 = arith.constant 2 : index
    %c1_226 = arith.constant 1 : index
    %c0_227 = arith.constant 0 : index
    %c0_228 = arith.constant 0 : index
    %306 = vector.load %arg3[%c2_225, %c1_226, %c0_227, %c0_228] : memref<12x9x1x128xf32, #tpu.memory_space<vmem>>, vector<1x1x1x128xf32>
    %307 = vector.shape_cast %306 : vector<1x1x1x128xf32> to vector<1x128xf32>
    %308 = vector.broadcast %307 : vector<1x128xf32> to vector<16x128xf32>
    %309 = arith.mulf %293, %308 : vector<16x128xf32>
    %310 = arith.addf %305, %309 : vector<16x128xf32>
    %c124_i32_229 = arith.constant 124 : i32
    %311 = tpu.dynamic_rotate %293 by %c124_i32_229 dim 1 : vector<16x128xf32>, i32 -> vector<16x128xf32>
    %c2_230 = arith.constant 2 : index
    %c2_231 = arith.constant 2 : index
    %c0_232 = arith.constant 0 : index
    %c0_233 = arith.constant 0 : index
    %312 = vector.load %arg3[%c2_230, %c2_231, %c0_232, %c0_233] : memref<12x9x1x128xf32, #tpu.memory_space<vmem>>, vector<1x1x1x128xf32>
    %313 = vector.shape_cast %312 : vector<1x1x1x128xf32> to vector<1x128xf32>
    %314 = vector.broadcast %313 : vector<1x128xf32> to vector<16x128xf32>
    %315 = arith.mulf %311, %314 : vector<16x128xf32>
    %316 = arith.addf %310, %315 : vector<16x128xf32>
    %c4_i32_234 = arith.constant 4 : i32
    %317 = tpu.dynamic_rotate %291 by %c4_i32_234 dim 1 : vector<16x128xf32>, i32 -> vector<16x128xf32>
    %c2_235 = arith.constant 2 : index
    %c3_236 = arith.constant 3 : index
    %c0_237 = arith.constant 0 : index
    %c0_238 = arith.constant 0 : index
    %318 = vector.load %arg3[%c2_235, %c3_236, %c0_237, %c0_238] : memref<12x9x1x128xf32, #tpu.memory_space<vmem>>, vector<1x1x1x128xf32>
    %319 = vector.shape_cast %318 : vector<1x1x1x128xf32> to vector<1x128xf32>
    %320 = vector.broadcast %319 : vector<1x128xf32> to vector<16x128xf32>
    %321 = arith.mulf %317, %320 : vector<16x128xf32>
    %322 = arith.addf %316, %321 : vector<16x128xf32>
    %c124_i32_239 = arith.constant 124 : i32
    %323 = tpu.dynamic_rotate %291 by %c124_i32_239 dim 1 : vector<16x128xf32>, i32 -> vector<16x128xf32>
    %c2_240 = arith.constant 2 : index
    %c5_241 = arith.constant 5 : index
    %c0_242 = arith.constant 0 : index
    %c0_243 = arith.constant 0 : index
    %324 = vector.load %arg3[%c2_240, %c5_241, %c0_242, %c0_243] : memref<12x9x1x128xf32, #tpu.memory_space<vmem>>, vector<1x1x1x128xf32>
    %325 = vector.shape_cast %324 : vector<1x1x1x128xf32> to vector<1x128xf32>
    %326 = vector.broadcast %325 : vector<1x128xf32> to vector<16x128xf32>
    %327 = arith.mulf %323, %326 : vector<16x128xf32>
    %328 = arith.addf %322, %327 : vector<16x128xf32>
    %c4_i32_244 = arith.constant 4 : i32
    %329 = tpu.dynamic_rotate %295 by %c4_i32_244 dim 1 : vector<16x128xf32>, i32 -> vector<16x128xf32>
    %c2_245 = arith.constant 2 : index
    %c6_246 = arith.constant 6 : index
    %c0_247 = arith.constant 0 : index
    %c0_248 = arith.constant 0 : index
    %330 = vector.load %arg3[%c2_245, %c6_246, %c0_247, %c0_248] : memref<12x9x1x128xf32, #tpu.memory_space<vmem>>, vector<1x1x1x128xf32>
    %331 = vector.shape_cast %330 : vector<1x1x1x128xf32> to vector<1x128xf32>
    %332 = vector.broadcast %331 : vector<1x128xf32> to vector<16x128xf32>
    %333 = arith.mulf %329, %332 : vector<16x128xf32>
    %334 = arith.addf %328, %333 : vector<16x128xf32>
    %c2_249 = arith.constant 2 : index
    %c7_250 = arith.constant 7 : index
    %c0_251 = arith.constant 0 : index
    %c0_252 = arith.constant 0 : index
    %335 = vector.load %arg3[%c2_249, %c7_250, %c0_251, %c0_252] : memref<12x9x1x128xf32, #tpu.memory_space<vmem>>, vector<1x1x1x128xf32>
    %336 = vector.shape_cast %335 : vector<1x1x1x128xf32> to vector<1x128xf32>
    %337 = vector.broadcast %336 : vector<1x128xf32> to vector<16x128xf32>
    %338 = arith.mulf %295, %337 : vector<16x128xf32>
    %339 = arith.addf %334, %338 : vector<16x128xf32>
    %c124_i32_253 = arith.constant 124 : i32
    %340 = tpu.dynamic_rotate %295 by %c124_i32_253 dim 1 : vector<16x128xf32>, i32 -> vector<16x128xf32>
    %c2_254 = arith.constant 2 : index
    %c8_255 = arith.constant 8 : index
    %c0_256 = arith.constant 0 : index
    %c0_257 = arith.constant 0 : index
    %341 = vector.load %arg3[%c2_254, %c8_255, %c0_256, %c0_257] : memref<12x9x1x128xf32, #tpu.memory_space<vmem>>, vector<1x1x1x128xf32>
    %342 = vector.shape_cast %341 : vector<1x1x1x128xf32> to vector<1x128xf32>
    %343 = vector.broadcast %342 : vector<1x128xf32> to vector<16x128xf32>
    %344 = arith.mulf %340, %343 : vector<16x128xf32>
    %345 = arith.addf %339, %344 : vector<16x128xf32>
    %346 = arith.addf %345, %235 : vector<16x128xf32>
    %cst_258 = arith.constant 0.000000e+00 : f32
    %347 = vector.broadcast %cst_258 : f32 to vector<16x128xf32>
    %348 = arith.maximumf %346, %347 : vector<16x128xf32>
    %c1_i32_259 = arith.constant 1 : i32
    %349 = tpu.dynamic_rotate %348 by %c1_i32_259 dim 0 : vector<16x128xf32>, i32 -> vector<16x128xf32>
    %350 = arith.mulf %349, %5 : vector<16x128xf32>
    %c15_i32_260 = arith.constant 15 : i32
    %351 = tpu.dynamic_rotate %348 by %c15_i32_260 dim 0 : vector<16x128xf32>, i32 -> vector<16x128xf32>
    %352 = arith.mulf %351, %9 : vector<16x128xf32>
    %c3_261 = arith.constant 3 : index
    %c4_262 = arith.constant 4 : index
    %c0_263 = arith.constant 0 : index
    %c0_264 = arith.constant 0 : index
    %353 = vector.load %arg2[%c3_261, %c4_262, %c0_263, %c0_264] : memref<12x9x1x128xf32, #tpu.memory_space<vmem>>, vector<1x1x1x128xf32>
    %354 = vector.shape_cast %353 : vector<1x1x1x128xf32> to vector<1x128xf32>
    %355 = vector.broadcast %354 : vector<1x128xf32> to vector<16x128xf32>
    %356 = arith.mulf %348, %355 : vector<16x128xf32>
    %c4_i32_265 = arith.constant 4 : i32
    %357 = tpu.dynamic_rotate %350 by %c4_i32_265 dim 1 : vector<16x128xf32>, i32 -> vector<16x128xf32>
    %c3_266 = arith.constant 3 : index
    %c0_267 = arith.constant 0 : index
    %c0_268 = arith.constant 0 : index
    %c0_269 = arith.constant 0 : index
    %358 = vector.load %arg2[%c3_266, %c0_267, %c0_268, %c0_269] : memref<12x9x1x128xf32, #tpu.memory_space<vmem>>, vector<1x1x1x128xf32>
    %359 = vector.shape_cast %358 : vector<1x1x1x128xf32> to vector<1x128xf32>
    %360 = vector.broadcast %359 : vector<1x128xf32> to vector<16x128xf32>
    %361 = arith.mulf %357, %360 : vector<16x128xf32>
    %362 = arith.addf %356, %361 : vector<16x128xf32>
    %c3_270 = arith.constant 3 : index
    %c1_271 = arith.constant 1 : index
    %c0_272 = arith.constant 0 : index
    %c0_273 = arith.constant 0 : index
    %363 = vector.load %arg2[%c3_270, %c1_271, %c0_272, %c0_273] : memref<12x9x1x128xf32, #tpu.memory_space<vmem>>, vector<1x1x1x128xf32>
    %364 = vector.shape_cast %363 : vector<1x1x1x128xf32> to vector<1x128xf32>
    %365 = vector.broadcast %364 : vector<1x128xf32> to vector<16x128xf32>
    %366 = arith.mulf %350, %365 : vector<16x128xf32>
    %367 = arith.addf %362, %366 : vector<16x128xf32>
    %c124_i32_274 = arith.constant 124 : i32
    %368 = tpu.dynamic_rotate %350 by %c124_i32_274 dim 1 : vector<16x128xf32>, i32 -> vector<16x128xf32>
    %c3_275 = arith.constant 3 : index
    %c2_276 = arith.constant 2 : index
    %c0_277 = arith.constant 0 : index
    %c0_278 = arith.constant 0 : index
    %369 = vector.load %arg2[%c3_275, %c2_276, %c0_277, %c0_278] : memref<12x9x1x128xf32, #tpu.memory_space<vmem>>, vector<1x1x1x128xf32>
    %370 = vector.shape_cast %369 : vector<1x1x1x128xf32> to vector<1x128xf32>
    %371 = vector.broadcast %370 : vector<1x128xf32> to vector<16x128xf32>
    %372 = arith.mulf %368, %371 : vector<16x128xf32>
    %373 = arith.addf %367, %372 : vector<16x128xf32>
    %c4_i32_279 = arith.constant 4 : i32
    %374 = tpu.dynamic_rotate %348 by %c4_i32_279 dim 1 : vector<16x128xf32>, i32 -> vector<16x128xf32>
    %c3_280 = arith.constant 3 : index
    %c3_281 = arith.constant 3 : index
    %c0_282 = arith.constant 0 : index
    %c0_283 = arith.constant 0 : index
    %375 = vector.load %arg2[%c3_280, %c3_281, %c0_282, %c0_283] : memref<12x9x1x128xf32, #tpu.memory_space<vmem>>, vector<1x1x1x128xf32>
    %376 = vector.shape_cast %375 : vector<1x1x1x128xf32> to vector<1x128xf32>
    %377 = vector.broadcast %376 : vector<1x128xf32> to vector<16x128xf32>
    %378 = arith.mulf %374, %377 : vector<16x128xf32>
    %379 = arith.addf %373, %378 : vector<16x128xf32>
    %c124_i32_284 = arith.constant 124 : i32
    %380 = tpu.dynamic_rotate %348 by %c124_i32_284 dim 1 : vector<16x128xf32>, i32 -> vector<16x128xf32>
    %c3_285 = arith.constant 3 : index
    %c5_286 = arith.constant 5 : index
    %c0_287 = arith.constant 0 : index
    %c0_288 = arith.constant 0 : index
    %381 = vector.load %arg2[%c3_285, %c5_286, %c0_287, %c0_288] : memref<12x9x1x128xf32, #tpu.memory_space<vmem>>, vector<1x1x1x128xf32>
    %382 = vector.shape_cast %381 : vector<1x1x1x128xf32> to vector<1x128xf32>
    %383 = vector.broadcast %382 : vector<1x128xf32> to vector<16x128xf32>
    %384 = arith.mulf %380, %383 : vector<16x128xf32>
    %385 = arith.addf %379, %384 : vector<16x128xf32>
    %c4_i32_289 = arith.constant 4 : i32
    %386 = tpu.dynamic_rotate %352 by %c4_i32_289 dim 1 : vector<16x128xf32>, i32 -> vector<16x128xf32>
    %c3_290 = arith.constant 3 : index
    %c6_291 = arith.constant 6 : index
    %c0_292 = arith.constant 0 : index
    %c0_293 = arith.constant 0 : index
    %387 = vector.load %arg2[%c3_290, %c6_291, %c0_292, %c0_293] : memref<12x9x1x128xf32, #tpu.memory_space<vmem>>, vector<1x1x1x128xf32>
    %388 = vector.shape_cast %387 : vector<1x1x1x128xf32> to vector<1x128xf32>
    %389 = vector.broadcast %388 : vector<1x128xf32> to vector<16x128xf32>
    %390 = arith.mulf %386, %389 : vector<16x128xf32>
    %391 = arith.addf %385, %390 : vector<16x128xf32>
    %c3_294 = arith.constant 3 : index
    %c7_295 = arith.constant 7 : index
    %c0_296 = arith.constant 0 : index
    %c0_297 = arith.constant 0 : index
    %392 = vector.load %arg2[%c3_294, %c7_295, %c0_296, %c0_297] : memref<12x9x1x128xf32, #tpu.memory_space<vmem>>, vector<1x1x1x128xf32>
    %393 = vector.shape_cast %392 : vector<1x1x1x128xf32> to vector<1x128xf32>
    %394 = vector.broadcast %393 : vector<1x128xf32> to vector<16x128xf32>
    %395 = arith.mulf %352, %394 : vector<16x128xf32>
    %396 = arith.addf %391, %395 : vector<16x128xf32>
    %c124_i32_298 = arith.constant 124 : i32
    %397 = tpu.dynamic_rotate %352 by %c124_i32_298 dim 1 : vector<16x128xf32>, i32 -> vector<16x128xf32>
    %c3_299 = arith.constant 3 : index
    %c8_300 = arith.constant 8 : index
    %c0_301 = arith.constant 0 : index
    %c0_302 = arith.constant 0 : index
    %398 = vector.load %arg2[%c3_299, %c8_300, %c0_301, %c0_302] : memref<12x9x1x128xf32, #tpu.memory_space<vmem>>, vector<1x1x1x128xf32>
    %399 = vector.shape_cast %398 : vector<1x1x1x128xf32> to vector<1x128xf32>
    %400 = vector.broadcast %399 : vector<1x128xf32> to vector<16x128xf32>
    %401 = arith.mulf %397, %400 : vector<16x128xf32>
    %402 = arith.addf %396, %401 : vector<16x128xf32>
    %cst_303 = arith.constant 0.000000e+00 : f32
    %403 = vector.broadcast %cst_303 : f32 to vector<16x128xf32>
    %404 = arith.maximumf %402, %403 : vector<16x128xf32>
    %c1_i32_304 = arith.constant 1 : i32
    %405 = tpu.dynamic_rotate %404 by %c1_i32_304 dim 0 : vector<16x128xf32>, i32 -> vector<16x128xf32>
    %406 = arith.mulf %405, %5 : vector<16x128xf32>
    %c15_i32_305 = arith.constant 15 : i32
    %407 = tpu.dynamic_rotate %404 by %c15_i32_305 dim 0 : vector<16x128xf32>, i32 -> vector<16x128xf32>
    %408 = arith.mulf %407, %9 : vector<16x128xf32>
    %c3_306 = arith.constant 3 : index
    %c4_307 = arith.constant 4 : index
    %c0_308 = arith.constant 0 : index
    %c0_309 = arith.constant 0 : index
    %409 = vector.load %arg3[%c3_306, %c4_307, %c0_308, %c0_309] : memref<12x9x1x128xf32, #tpu.memory_space<vmem>>, vector<1x1x1x128xf32>
    %410 = vector.shape_cast %409 : vector<1x1x1x128xf32> to vector<1x128xf32>
    %411 = vector.broadcast %410 : vector<1x128xf32> to vector<16x128xf32>
    %412 = arith.mulf %404, %411 : vector<16x128xf32>
    %c4_i32_310 = arith.constant 4 : i32
    %413 = tpu.dynamic_rotate %406 by %c4_i32_310 dim 1 : vector<16x128xf32>, i32 -> vector<16x128xf32>
    %c3_311 = arith.constant 3 : index
    %c0_312 = arith.constant 0 : index
    %c0_313 = arith.constant 0 : index
    %c0_314 = arith.constant 0 : index
    %414 = vector.load %arg3[%c3_311, %c0_312, %c0_313, %c0_314] : memref<12x9x1x128xf32, #tpu.memory_space<vmem>>, vector<1x1x1x128xf32>
    %415 = vector.shape_cast %414 : vector<1x1x1x128xf32> to vector<1x128xf32>
    %416 = vector.broadcast %415 : vector<1x128xf32> to vector<16x128xf32>
    %417 = arith.mulf %413, %416 : vector<16x128xf32>
    %418 = arith.addf %412, %417 : vector<16x128xf32>
    %c3_315 = arith.constant 3 : index
    %c1_316 = arith.constant 1 : index
    %c0_317 = arith.constant 0 : index
    %c0_318 = arith.constant 0 : index
    %419 = vector.load %arg3[%c3_315, %c1_316, %c0_317, %c0_318] : memref<12x9x1x128xf32, #tpu.memory_space<vmem>>, vector<1x1x1x128xf32>
    %420 = vector.shape_cast %419 : vector<1x1x1x128xf32> to vector<1x128xf32>
    %421 = vector.broadcast %420 : vector<1x128xf32> to vector<16x128xf32>
    %422 = arith.mulf %406, %421 : vector<16x128xf32>
    %423 = arith.addf %418, %422 : vector<16x128xf32>
    %c124_i32_319 = arith.constant 124 : i32
    %424 = tpu.dynamic_rotate %406 by %c124_i32_319 dim 1 : vector<16x128xf32>, i32 -> vector<16x128xf32>
    %c3_320 = arith.constant 3 : index
    %c2_321 = arith.constant 2 : index
    %c0_322 = arith.constant 0 : index
    %c0_323 = arith.constant 0 : index
    %425 = vector.load %arg3[%c3_320, %c2_321, %c0_322, %c0_323] : memref<12x9x1x128xf32, #tpu.memory_space<vmem>>, vector<1x1x1x128xf32>
    %426 = vector.shape_cast %425 : vector<1x1x1x128xf32> to vector<1x128xf32>
    %427 = vector.broadcast %426 : vector<1x128xf32> to vector<16x128xf32>
    %428 = arith.mulf %424, %427 : vector<16x128xf32>
    %429 = arith.addf %423, %428 : vector<16x128xf32>
    %c4_i32_324 = arith.constant 4 : i32
    %430 = tpu.dynamic_rotate %404 by %c4_i32_324 dim 1 : vector<16x128xf32>, i32 -> vector<16x128xf32>
    %c3_325 = arith.constant 3 : index
    %c3_326 = arith.constant 3 : index
    %c0_327 = arith.constant 0 : index
    %c0_328 = arith.constant 0 : index
    %431 = vector.load %arg3[%c3_325, %c3_326, %c0_327, %c0_328] : memref<12x9x1x128xf32, #tpu.memory_space<vmem>>, vector<1x1x1x128xf32>
    %432 = vector.shape_cast %431 : vector<1x1x1x128xf32> to vector<1x128xf32>
    %433 = vector.broadcast %432 : vector<1x128xf32> to vector<16x128xf32>
    %434 = arith.mulf %430, %433 : vector<16x128xf32>
    %435 = arith.addf %429, %434 : vector<16x128xf32>
    %c124_i32_329 = arith.constant 124 : i32
    %436 = tpu.dynamic_rotate %404 by %c124_i32_329 dim 1 : vector<16x128xf32>, i32 -> vector<16x128xf32>
    %c3_330 = arith.constant 3 : index
    %c5_331 = arith.constant 5 : index
    %c0_332 = arith.constant 0 : index
    %c0_333 = arith.constant 0 : index
    %437 = vector.load %arg3[%c3_330, %c5_331, %c0_332, %c0_333] : memref<12x9x1x128xf32, #tpu.memory_space<vmem>>, vector<1x1x1x128xf32>
    %438 = vector.shape_cast %437 : vector<1x1x1x128xf32> to vector<1x128xf32>
    %439 = vector.broadcast %438 : vector<1x128xf32> to vector<16x128xf32>
    %440 = arith.mulf %436, %439 : vector<16x128xf32>
    %441 = arith.addf %435, %440 : vector<16x128xf32>
    %c4_i32_334 = arith.constant 4 : i32
    %442 = tpu.dynamic_rotate %408 by %c4_i32_334 dim 1 : vector<16x128xf32>, i32 -> vector<16x128xf32>
    %c3_335 = arith.constant 3 : index
    %c6_336 = arith.constant 6 : index
    %c0_337 = arith.constant 0 : index
    %c0_338 = arith.constant 0 : index
    %443 = vector.load %arg3[%c3_335, %c6_336, %c0_337, %c0_338] : memref<12x9x1x128xf32, #tpu.memory_space<vmem>>, vector<1x1x1x128xf32>
    %444 = vector.shape_cast %443 : vector<1x1x1x128xf32> to vector<1x128xf32>
    %445 = vector.broadcast %444 : vector<1x128xf32> to vector<16x128xf32>
    %446 = arith.mulf %442, %445 : vector<16x128xf32>
    %447 = arith.addf %441, %446 : vector<16x128xf32>
    %c3_339 = arith.constant 3 : index
    %c7_340 = arith.constant 7 : index
    %c0_341 = arith.constant 0 : index
    %c0_342 = arith.constant 0 : index
    %448 = vector.load %arg3[%c3_339, %c7_340, %c0_341, %c0_342] : memref<12x9x1x128xf32, #tpu.memory_space<vmem>>, vector<1x1x1x128xf32>
    %449 = vector.shape_cast %448 : vector<1x1x1x128xf32> to vector<1x128xf32>
    %450 = vector.broadcast %449 : vector<1x128xf32> to vector<16x128xf32>
    %451 = arith.mulf %408, %450 : vector<16x128xf32>
    %452 = arith.addf %447, %451 : vector<16x128xf32>
    %c124_i32_343 = arith.constant 124 : i32
    %453 = tpu.dynamic_rotate %408 by %c124_i32_343 dim 1 : vector<16x128xf32>, i32 -> vector<16x128xf32>
    %c3_344 = arith.constant 3 : index
    %c8_345 = arith.constant 8 : index
    %c0_346 = arith.constant 0 : index
    %c0_347 = arith.constant 0 : index
    %454 = vector.load %arg3[%c3_344, %c8_345, %c0_346, %c0_347] : memref<12x9x1x128xf32, #tpu.memory_space<vmem>>, vector<1x1x1x128xf32>
    %455 = vector.shape_cast %454 : vector<1x1x1x128xf32> to vector<1x128xf32>
    %456 = vector.broadcast %455 : vector<1x128xf32> to vector<16x128xf32>
    %457 = arith.mulf %453, %456 : vector<16x128xf32>
    %458 = arith.addf %452, %457 : vector<16x128xf32>
    %459 = arith.addf %458, %348 : vector<16x128xf32>
    %cst_348 = arith.constant 0.000000e+00 : f32
    %460 = vector.broadcast %cst_348 : f32 to vector<16x128xf32>
    %461 = arith.maximumf %459, %460 : vector<16x128xf32>
    %c1_i32_349 = arith.constant 1 : i32
    %462 = tpu.dynamic_rotate %461 by %c1_i32_349 dim 0 : vector<16x128xf32>, i32 -> vector<16x128xf32>
    %463 = arith.mulf %462, %5 : vector<16x128xf32>
    %c15_i32_350 = arith.constant 15 : i32
    %464 = tpu.dynamic_rotate %461 by %c15_i32_350 dim 0 : vector<16x128xf32>, i32 -> vector<16x128xf32>
    %465 = arith.mulf %464, %9 : vector<16x128xf32>
    %c4_351 = arith.constant 4 : index
    %c4_352 = arith.constant 4 : index
    %c0_353 = arith.constant 0 : index
    %c0_354 = arith.constant 0 : index
    %466 = vector.load %arg2[%c4_351, %c4_352, %c0_353, %c0_354] : memref<12x9x1x128xf32, #tpu.memory_space<vmem>>, vector<1x1x1x128xf32>
    %467 = vector.shape_cast %466 : vector<1x1x1x128xf32> to vector<1x128xf32>
    %468 = vector.broadcast %467 : vector<1x128xf32> to vector<16x128xf32>
    %469 = arith.mulf %461, %468 : vector<16x128xf32>
    %c4_i32_355 = arith.constant 4 : i32
    %470 = tpu.dynamic_rotate %463 by %c4_i32_355 dim 1 : vector<16x128xf32>, i32 -> vector<16x128xf32>
    %c4_356 = arith.constant 4 : index
    %c0_357 = arith.constant 0 : index
    %c0_358 = arith.constant 0 : index
    %c0_359 = arith.constant 0 : index
    %471 = vector.load %arg2[%c4_356, %c0_357, %c0_358, %c0_359] : memref<12x9x1x128xf32, #tpu.memory_space<vmem>>, vector<1x1x1x128xf32>
    %472 = vector.shape_cast %471 : vector<1x1x1x128xf32> to vector<1x128xf32>
    %473 = vector.broadcast %472 : vector<1x128xf32> to vector<16x128xf32>
    %474 = arith.mulf %470, %473 : vector<16x128xf32>
    %475 = arith.addf %469, %474 : vector<16x128xf32>
    %c4_360 = arith.constant 4 : index
    %c1_361 = arith.constant 1 : index
    %c0_362 = arith.constant 0 : index
    %c0_363 = arith.constant 0 : index
    %476 = vector.load %arg2[%c4_360, %c1_361, %c0_362, %c0_363] : memref<12x9x1x128xf32, #tpu.memory_space<vmem>>, vector<1x1x1x128xf32>
    %477 = vector.shape_cast %476 : vector<1x1x1x128xf32> to vector<1x128xf32>
    %478 = vector.broadcast %477 : vector<1x128xf32> to vector<16x128xf32>
    %479 = arith.mulf %463, %478 : vector<16x128xf32>
    %480 = arith.addf %475, %479 : vector<16x128xf32>
    %c124_i32_364 = arith.constant 124 : i32
    %481 = tpu.dynamic_rotate %463 by %c124_i32_364 dim 1 : vector<16x128xf32>, i32 -> vector<16x128xf32>
    %c4_365 = arith.constant 4 : index
    %c2_366 = arith.constant 2 : index
    %c0_367 = arith.constant 0 : index
    %c0_368 = arith.constant 0 : index
    %482 = vector.load %arg2[%c4_365, %c2_366, %c0_367, %c0_368] : memref<12x9x1x128xf32, #tpu.memory_space<vmem>>, vector<1x1x1x128xf32>
    %483 = vector.shape_cast %482 : vector<1x1x1x128xf32> to vector<1x128xf32>
    %484 = vector.broadcast %483 : vector<1x128xf32> to vector<16x128xf32>
    %485 = arith.mulf %481, %484 : vector<16x128xf32>
    %486 = arith.addf %480, %485 : vector<16x128xf32>
    %c4_i32_369 = arith.constant 4 : i32
    %487 = tpu.dynamic_rotate %461 by %c4_i32_369 dim 1 : vector<16x128xf32>, i32 -> vector<16x128xf32>
    %c4_370 = arith.constant 4 : index
    %c3_371 = arith.constant 3 : index
    %c0_372 = arith.constant 0 : index
    %c0_373 = arith.constant 0 : index
    %488 = vector.load %arg2[%c4_370, %c3_371, %c0_372, %c0_373] : memref<12x9x1x128xf32, #tpu.memory_space<vmem>>, vector<1x1x1x128xf32>
    %489 = vector.shape_cast %488 : vector<1x1x1x128xf32> to vector<1x128xf32>
    %490 = vector.broadcast %489 : vector<1x128xf32> to vector<16x128xf32>
    %491 = arith.mulf %487, %490 : vector<16x128xf32>
    %492 = arith.addf %486, %491 : vector<16x128xf32>
    %c124_i32_374 = arith.constant 124 : i32
    %493 = tpu.dynamic_rotate %461 by %c124_i32_374 dim 1 : vector<16x128xf32>, i32 -> vector<16x128xf32>
    %c4_375 = arith.constant 4 : index
    %c5_376 = arith.constant 5 : index
    %c0_377 = arith.constant 0 : index
    %c0_378 = arith.constant 0 : index
    %494 = vector.load %arg2[%c4_375, %c5_376, %c0_377, %c0_378] : memref<12x9x1x128xf32, #tpu.memory_space<vmem>>, vector<1x1x1x128xf32>
    %495 = vector.shape_cast %494 : vector<1x1x1x128xf32> to vector<1x128xf32>
    %496 = vector.broadcast %495 : vector<1x128xf32> to vector<16x128xf32>
    %497 = arith.mulf %493, %496 : vector<16x128xf32>
    %498 = arith.addf %492, %497 : vector<16x128xf32>
    %c4_i32_379 = arith.constant 4 : i32
    %499 = tpu.dynamic_rotate %465 by %c4_i32_379 dim 1 : vector<16x128xf32>, i32 -> vector<16x128xf32>
    %c4_380 = arith.constant 4 : index
    %c6_381 = arith.constant 6 : index
    %c0_382 = arith.constant 0 : index
    %c0_383 = arith.constant 0 : index
    %500 = vector.load %arg2[%c4_380, %c6_381, %c0_382, %c0_383] : memref<12x9x1x128xf32, #tpu.memory_space<vmem>>, vector<1x1x1x128xf32>
    %501 = vector.shape_cast %500 : vector<1x1x1x128xf32> to vector<1x128xf32>
    %502 = vector.broadcast %501 : vector<1x128xf32> to vector<16x128xf32>
    %503 = arith.mulf %499, %502 : vector<16x128xf32>
    %504 = arith.addf %498, %503 : vector<16x128xf32>
    %c4_384 = arith.constant 4 : index
    %c7_385 = arith.constant 7 : index
    %c0_386 = arith.constant 0 : index
    %c0_387 = arith.constant 0 : index
    %505 = vector.load %arg2[%c4_384, %c7_385, %c0_386, %c0_387] : memref<12x9x1x128xf32, #tpu.memory_space<vmem>>, vector<1x1x1x128xf32>
    %506 = vector.shape_cast %505 : vector<1x1x1x128xf32> to vector<1x128xf32>
    %507 = vector.broadcast %506 : vector<1x128xf32> to vector<16x128xf32>
    %508 = arith.mulf %465, %507 : vector<16x128xf32>
    %509 = arith.addf %504, %508 : vector<16x128xf32>
    %c124_i32_388 = arith.constant 124 : i32
    %510 = tpu.dynamic_rotate %465 by %c124_i32_388 dim 1 : vector<16x128xf32>, i32 -> vector<16x128xf32>
    %c4_389 = arith.constant 4 : index
    %c8_390 = arith.constant 8 : index
    %c0_391 = arith.constant 0 : index
    %c0_392 = arith.constant 0 : index
    %511 = vector.load %arg2[%c4_389, %c8_390, %c0_391, %c0_392] : memref<12x9x1x128xf32, #tpu.memory_space<vmem>>, vector<1x1x1x128xf32>
    %512 = vector.shape_cast %511 : vector<1x1x1x128xf32> to vector<1x128xf32>
    %513 = vector.broadcast %512 : vector<1x128xf32> to vector<16x128xf32>
    %514 = arith.mulf %510, %513 : vector<16x128xf32>
    %515 = arith.addf %509, %514 : vector<16x128xf32>
    %cst_393 = arith.constant 0.000000e+00 : f32
    %516 = vector.broadcast %cst_393 : f32 to vector<16x128xf32>
    %517 = arith.maximumf %515, %516 : vector<16x128xf32>
    %c1_i32_394 = arith.constant 1 : i32
    %518 = tpu.dynamic_rotate %517 by %c1_i32_394 dim 0 : vector<16x128xf32>, i32 -> vector<16x128xf32>
    %519 = arith.mulf %518, %5 : vector<16x128xf32>
    %c15_i32_395 = arith.constant 15 : i32
    %520 = tpu.dynamic_rotate %517 by %c15_i32_395 dim 0 : vector<16x128xf32>, i32 -> vector<16x128xf32>
    %521 = arith.mulf %520, %9 : vector<16x128xf32>
    %c4_396 = arith.constant 4 : index
    %c4_397 = arith.constant 4 : index
    %c0_398 = arith.constant 0 : index
    %c0_399 = arith.constant 0 : index
    %522 = vector.load %arg3[%c4_396, %c4_397, %c0_398, %c0_399] : memref<12x9x1x128xf32, #tpu.memory_space<vmem>>, vector<1x1x1x128xf32>
    %523 = vector.shape_cast %522 : vector<1x1x1x128xf32> to vector<1x128xf32>
    %524 = vector.broadcast %523 : vector<1x128xf32> to vector<16x128xf32>
    %525 = arith.mulf %517, %524 : vector<16x128xf32>
    %c4_i32_400 = arith.constant 4 : i32
    %526 = tpu.dynamic_rotate %519 by %c4_i32_400 dim 1 : vector<16x128xf32>, i32 -> vector<16x128xf32>
    %c4_401 = arith.constant 4 : index
    %c0_402 = arith.constant 0 : index
    %c0_403 = arith.constant 0 : index
    %c0_404 = arith.constant 0 : index
    %527 = vector.load %arg3[%c4_401, %c0_402, %c0_403, %c0_404] : memref<12x9x1x128xf32, #tpu.memory_space<vmem>>, vector<1x1x1x128xf32>
    %528 = vector.shape_cast %527 : vector<1x1x1x128xf32> to vector<1x128xf32>
    %529 = vector.broadcast %528 : vector<1x128xf32> to vector<16x128xf32>
    %530 = arith.mulf %526, %529 : vector<16x128xf32>
    %531 = arith.addf %525, %530 : vector<16x128xf32>
    %c4_405 = arith.constant 4 : index
    %c1_406 = arith.constant 1 : index
    %c0_407 = arith.constant 0 : index
    %c0_408 = arith.constant 0 : index
    %532 = vector.load %arg3[%c4_405, %c1_406, %c0_407, %c0_408] : memref<12x9x1x128xf32, #tpu.memory_space<vmem>>, vector<1x1x1x128xf32>
    %533 = vector.shape_cast %532 : vector<1x1x1x128xf32> to vector<1x128xf32>
    %534 = vector.broadcast %533 : vector<1x128xf32> to vector<16x128xf32>
    %535 = arith.mulf %519, %534 : vector<16x128xf32>
    %536 = arith.addf %531, %535 : vector<16x128xf32>
    %c124_i32_409 = arith.constant 124 : i32
    %537 = tpu.dynamic_rotate %519 by %c124_i32_409 dim 1 : vector<16x128xf32>, i32 -> vector<16x128xf32>
    %c4_410 = arith.constant 4 : index
    %c2_411 = arith.constant 2 : index
    %c0_412 = arith.constant 0 : index
    %c0_413 = arith.constant 0 : index
    %538 = vector.load %arg3[%c4_410, %c2_411, %c0_412, %c0_413] : memref<12x9x1x128xf32, #tpu.memory_space<vmem>>, vector<1x1x1x128xf32>
    %539 = vector.shape_cast %538 : vector<1x1x1x128xf32> to vector<1x128xf32>
    %540 = vector.broadcast %539 : vector<1x128xf32> to vector<16x128xf32>
    %541 = arith.mulf %537, %540 : vector<16x128xf32>
    %542 = arith.addf %536, %541 : vector<16x128xf32>
    %c4_i32_414 = arith.constant 4 : i32
    %543 = tpu.dynamic_rotate %517 by %c4_i32_414 dim 1 : vector<16x128xf32>, i32 -> vector<16x128xf32>
    %c4_415 = arith.constant 4 : index
    %c3_416 = arith.constant 3 : index
    %c0_417 = arith.constant 0 : index
    %c0_418 = arith.constant 0 : index
    %544 = vector.load %arg3[%c4_415, %c3_416, %c0_417, %c0_418] : memref<12x9x1x128xf32, #tpu.memory_space<vmem>>, vector<1x1x1x128xf32>
    %545 = vector.shape_cast %544 : vector<1x1x1x128xf32> to vector<1x128xf32>
    %546 = vector.broadcast %545 : vector<1x128xf32> to vector<16x128xf32>
    %547 = arith.mulf %543, %546 : vector<16x128xf32>
    %548 = arith.addf %542, %547 : vector<16x128xf32>
    %c124_i32_419 = arith.constant 124 : i32
    %549 = tpu.dynamic_rotate %517 by %c124_i32_419 dim 1 : vector<16x128xf32>, i32 -> vector<16x128xf32>
    %c4_420 = arith.constant 4 : index
    %c5_421 = arith.constant 5 : index
    %c0_422 = arith.constant 0 : index
    %c0_423 = arith.constant 0 : index
    %550 = vector.load %arg3[%c4_420, %c5_421, %c0_422, %c0_423] : memref<12x9x1x128xf32, #tpu.memory_space<vmem>>, vector<1x1x1x128xf32>
    %551 = vector.shape_cast %550 : vector<1x1x1x128xf32> to vector<1x128xf32>
    %552 = vector.broadcast %551 : vector<1x128xf32> to vector<16x128xf32>
    %553 = arith.mulf %549, %552 : vector<16x128xf32>
    %554 = arith.addf %548, %553 : vector<16x128xf32>
    %c4_i32_424 = arith.constant 4 : i32
    %555 = tpu.dynamic_rotate %521 by %c4_i32_424 dim 1 : vector<16x128xf32>, i32 -> vector<16x128xf32>
    %c4_425 = arith.constant 4 : index
    %c6_426 = arith.constant 6 : index
    %c0_427 = arith.constant 0 : index
    %c0_428 = arith.constant 0 : index
    %556 = vector.load %arg3[%c4_425, %c6_426, %c0_427, %c0_428] : memref<12x9x1x128xf32, #tpu.memory_space<vmem>>, vector<1x1x1x128xf32>
    %557 = vector.shape_cast %556 : vector<1x1x1x128xf32> to vector<1x128xf32>
    %558 = vector.broadcast %557 : vector<1x128xf32> to vector<16x128xf32>
    %559 = arith.mulf %555, %558 : vector<16x128xf32>
    %560 = arith.addf %554, %559 : vector<16x128xf32>
    %c4_429 = arith.constant 4 : index
    %c7_430 = arith.constant 7 : index
    %c0_431 = arith.constant 0 : index
    %c0_432 = arith.constant 0 : index
    %561 = vector.load %arg3[%c4_429, %c7_430, %c0_431, %c0_432] : memref<12x9x1x128xf32, #tpu.memory_space<vmem>>, vector<1x1x1x128xf32>
    %562 = vector.shape_cast %561 : vector<1x1x1x128xf32> to vector<1x128xf32>
    %563 = vector.broadcast %562 : vector<1x128xf32> to vector<16x128xf32>
    %564 = arith.mulf %521, %563 : vector<16x128xf32>
    %565 = arith.addf %560, %564 : vector<16x128xf32>
    %c124_i32_433 = arith.constant 124 : i32
    %566 = tpu.dynamic_rotate %521 by %c124_i32_433 dim 1 : vector<16x128xf32>, i32 -> vector<16x128xf32>
    %c4_434 = arith.constant 4 : index
    %c8_435 = arith.constant 8 : index
    %c0_436 = arith.constant 0 : index
    %c0_437 = arith.constant 0 : index
    %567 = vector.load %arg3[%c4_434, %c8_435, %c0_436, %c0_437] : memref<12x9x1x128xf32, #tpu.memory_space<vmem>>, vector<1x1x1x128xf32>
    %568 = vector.shape_cast %567 : vector<1x1x1x128xf32> to vector<1x128xf32>
    %569 = vector.broadcast %568 : vector<1x128xf32> to vector<16x128xf32>
    %570 = arith.mulf %566, %569 : vector<16x128xf32>
    %571 = arith.addf %565, %570 : vector<16x128xf32>
    %572 = arith.addf %571, %461 : vector<16x128xf32>
    %cst_438 = arith.constant 0.000000e+00 : f32
    %573 = vector.broadcast %cst_438 : f32 to vector<16x128xf32>
    %574 = arith.maximumf %572, %573 : vector<16x128xf32>
    %c1_i32_439 = arith.constant 1 : i32
    %575 = tpu.dynamic_rotate %574 by %c1_i32_439 dim 0 : vector<16x128xf32>, i32 -> vector<16x128xf32>
    %576 = arith.mulf %575, %5 : vector<16x128xf32>
    %c15_i32_440 = arith.constant 15 : i32
    %577 = tpu.dynamic_rotate %574 by %c15_i32_440 dim 0 : vector<16x128xf32>, i32 -> vector<16x128xf32>
    %578 = arith.mulf %577, %9 : vector<16x128xf32>
    %c5_441 = arith.constant 5 : index
    %c4_442 = arith.constant 4 : index
    %c0_443 = arith.constant 0 : index
    %c0_444 = arith.constant 0 : index
    %579 = vector.load %arg2[%c5_441, %c4_442, %c0_443, %c0_444] : memref<12x9x1x128xf32, #tpu.memory_space<vmem>>, vector<1x1x1x128xf32>
    %580 = vector.shape_cast %579 : vector<1x1x1x128xf32> to vector<1x128xf32>
    %581 = vector.broadcast %580 : vector<1x128xf32> to vector<16x128xf32>
    %582 = arith.mulf %574, %581 : vector<16x128xf32>
    %c4_i32_445 = arith.constant 4 : i32
    %583 = tpu.dynamic_rotate %576 by %c4_i32_445 dim 1 : vector<16x128xf32>, i32 -> vector<16x128xf32>
    %c5_446 = arith.constant 5 : index
    %c0_447 = arith.constant 0 : index
    %c0_448 = arith.constant 0 : index
    %c0_449 = arith.constant 0 : index
    %584 = vector.load %arg2[%c5_446, %c0_447, %c0_448, %c0_449] : memref<12x9x1x128xf32, #tpu.memory_space<vmem>>, vector<1x1x1x128xf32>
    %585 = vector.shape_cast %584 : vector<1x1x1x128xf32> to vector<1x128xf32>
    %586 = vector.broadcast %585 : vector<1x128xf32> to vector<16x128xf32>
    %587 = arith.mulf %583, %586 : vector<16x128xf32>
    %588 = arith.addf %582, %587 : vector<16x128xf32>
    %c5_450 = arith.constant 5 : index
    %c1_451 = arith.constant 1 : index
    %c0_452 = arith.constant 0 : index
    %c0_453 = arith.constant 0 : index
    %589 = vector.load %arg2[%c5_450, %c1_451, %c0_452, %c0_453] : memref<12x9x1x128xf32, #tpu.memory_space<vmem>>, vector<1x1x1x128xf32>
    %590 = vector.shape_cast %589 : vector<1x1x1x128xf32> to vector<1x128xf32>
    %591 = vector.broadcast %590 : vector<1x128xf32> to vector<16x128xf32>
    %592 = arith.mulf %576, %591 : vector<16x128xf32>
    %593 = arith.addf %588, %592 : vector<16x128xf32>
    %c124_i32_454 = arith.constant 124 : i32
    %594 = tpu.dynamic_rotate %576 by %c124_i32_454 dim 1 : vector<16x128xf32>, i32 -> vector<16x128xf32>
    %c5_455 = arith.constant 5 : index
    %c2_456 = arith.constant 2 : index
    %c0_457 = arith.constant 0 : index
    %c0_458 = arith.constant 0 : index
    %595 = vector.load %arg2[%c5_455, %c2_456, %c0_457, %c0_458] : memref<12x9x1x128xf32, #tpu.memory_space<vmem>>, vector<1x1x1x128xf32>
    %596 = vector.shape_cast %595 : vector<1x1x1x128xf32> to vector<1x128xf32>
    %597 = vector.broadcast %596 : vector<1x128xf32> to vector<16x128xf32>
    %598 = arith.mulf %594, %597 : vector<16x128xf32>
    %599 = arith.addf %593, %598 : vector<16x128xf32>
    %c4_i32_459 = arith.constant 4 : i32
    %600 = tpu.dynamic_rotate %574 by %c4_i32_459 dim 1 : vector<16x128xf32>, i32 -> vector<16x128xf32>
    %c5_460 = arith.constant 5 : index
    %c3_461 = arith.constant 3 : index
    %c0_462 = arith.constant 0 : index
    %c0_463 = arith.constant 0 : index
    %601 = vector.load %arg2[%c5_460, %c3_461, %c0_462, %c0_463] : memref<12x9x1x128xf32, #tpu.memory_space<vmem>>, vector<1x1x1x128xf32>
    %602 = vector.shape_cast %601 : vector<1x1x1x128xf32> to vector<1x128xf32>
    %603 = vector.broadcast %602 : vector<1x128xf32> to vector<16x128xf32>
    %604 = arith.mulf %600, %603 : vector<16x128xf32>
    %605 = arith.addf %599, %604 : vector<16x128xf32>
    %c124_i32_464 = arith.constant 124 : i32
    %606 = tpu.dynamic_rotate %574 by %c124_i32_464 dim 1 : vector<16x128xf32>, i32 -> vector<16x128xf32>
    %c5_465 = arith.constant 5 : index
    %c5_466 = arith.constant 5 : index
    %c0_467 = arith.constant 0 : index
    %c0_468 = arith.constant 0 : index
    %607 = vector.load %arg2[%c5_465, %c5_466, %c0_467, %c0_468] : memref<12x9x1x128xf32, #tpu.memory_space<vmem>>, vector<1x1x1x128xf32>
    %608 = vector.shape_cast %607 : vector<1x1x1x128xf32> to vector<1x128xf32>
    %609 = vector.broadcast %608 : vector<1x128xf32> to vector<16x128xf32>
    %610 = arith.mulf %606, %609 : vector<16x128xf32>
    %611 = arith.addf %605, %610 : vector<16x128xf32>
    %c4_i32_469 = arith.constant 4 : i32
    %612 = tpu.dynamic_rotate %578 by %c4_i32_469 dim 1 : vector<16x128xf32>, i32 -> vector<16x128xf32>
    %c5_470 = arith.constant 5 : index
    %c6_471 = arith.constant 6 : index
    %c0_472 = arith.constant 0 : index
    %c0_473 = arith.constant 0 : index
    %613 = vector.load %arg2[%c5_470, %c6_471, %c0_472, %c0_473] : memref<12x9x1x128xf32, #tpu.memory_space<vmem>>, vector<1x1x1x128xf32>
    %614 = vector.shape_cast %613 : vector<1x1x1x128xf32> to vector<1x128xf32>
    %615 = vector.broadcast %614 : vector<1x128xf32> to vector<16x128xf32>
    %616 = arith.mulf %612, %615 : vector<16x128xf32>
    %617 = arith.addf %611, %616 : vector<16x128xf32>
    %c5_474 = arith.constant 5 : index
    %c7_475 = arith.constant 7 : index
    %c0_476 = arith.constant 0 : index
    %c0_477 = arith.constant 0 : index
    %618 = vector.load %arg2[%c5_474, %c7_475, %c0_476, %c0_477] : memref<12x9x1x128xf32, #tpu.memory_space<vmem>>, vector<1x1x1x128xf32>
    %619 = vector.shape_cast %618 : vector<1x1x1x128xf32> to vector<1x128xf32>
    %620 = vector.broadcast %619 : vector<1x128xf32> to vector<16x128xf32>
    %621 = arith.mulf %578, %620 : vector<16x128xf32>
    %622 = arith.addf %617, %621 : vector<16x128xf32>
    %c124_i32_478 = arith.constant 124 : i32
    %623 = tpu.dynamic_rotate %578 by %c124_i32_478 dim 1 : vector<16x128xf32>, i32 -> vector<16x128xf32>
    %c5_479 = arith.constant 5 : index
    %c8_480 = arith.constant 8 : index
    %c0_481 = arith.constant 0 : index
    %c0_482 = arith.constant 0 : index
    %624 = vector.load %arg2[%c5_479, %c8_480, %c0_481, %c0_482] : memref<12x9x1x128xf32, #tpu.memory_space<vmem>>, vector<1x1x1x128xf32>
    %625 = vector.shape_cast %624 : vector<1x1x1x128xf32> to vector<1x128xf32>
    %626 = vector.broadcast %625 : vector<1x128xf32> to vector<16x128xf32>
    %627 = arith.mulf %623, %626 : vector<16x128xf32>
    %628 = arith.addf %622, %627 : vector<16x128xf32>
    %cst_483 = arith.constant 0.000000e+00 : f32
    %629 = vector.broadcast %cst_483 : f32 to vector<16x128xf32>
    %630 = arith.maximumf %628, %629 : vector<16x128xf32>
    %c1_i32_484 = arith.constant 1 : i32
    %631 = tpu.dynamic_rotate %630 by %c1_i32_484 dim 0 : vector<16x128xf32>, i32 -> vector<16x128xf32>
    %632 = arith.mulf %631, %5 : vector<16x128xf32>
    %c15_i32_485 = arith.constant 15 : i32
    %633 = tpu.dynamic_rotate %630 by %c15_i32_485 dim 0 : vector<16x128xf32>, i32 -> vector<16x128xf32>
    %634 = arith.mulf %633, %9 : vector<16x128xf32>
    %c5_486 = arith.constant 5 : index
    %c4_487 = arith.constant 4 : index
    %c0_488 = arith.constant 0 : index
    %c0_489 = arith.constant 0 : index
    %635 = vector.load %arg3[%c5_486, %c4_487, %c0_488, %c0_489] : memref<12x9x1x128xf32, #tpu.memory_space<vmem>>, vector<1x1x1x128xf32>
    %636 = vector.shape_cast %635 : vector<1x1x1x128xf32> to vector<1x128xf32>
    %637 = vector.broadcast %636 : vector<1x128xf32> to vector<16x128xf32>
    %638 = arith.mulf %630, %637 : vector<16x128xf32>
    %c4_i32_490 = arith.constant 4 : i32
    %639 = tpu.dynamic_rotate %632 by %c4_i32_490 dim 1 : vector<16x128xf32>, i32 -> vector<16x128xf32>
    %c5_491 = arith.constant 5 : index
    %c0_492 = arith.constant 0 : index
    %c0_493 = arith.constant 0 : index
    %c0_494 = arith.constant 0 : index
    %640 = vector.load %arg3[%c5_491, %c0_492, %c0_493, %c0_494] : memref<12x9x1x128xf32, #tpu.memory_space<vmem>>, vector<1x1x1x128xf32>
    %641 = vector.shape_cast %640 : vector<1x1x1x128xf32> to vector<1x128xf32>
    %642 = vector.broadcast %641 : vector<1x128xf32> to vector<16x128xf32>
    %643 = arith.mulf %639, %642 : vector<16x128xf32>
    %644 = arith.addf %638, %643 : vector<16x128xf32>
    %c5_495 = arith.constant 5 : index
    %c1_496 = arith.constant 1 : index
    %c0_497 = arith.constant 0 : index
    %c0_498 = arith.constant 0 : index
    %645 = vector.load %arg3[%c5_495, %c1_496, %c0_497, %c0_498] : memref<12x9x1x128xf32, #tpu.memory_space<vmem>>, vector<1x1x1x128xf32>
    %646 = vector.shape_cast %645 : vector<1x1x1x128xf32> to vector<1x128xf32>
    %647 = vector.broadcast %646 : vector<1x128xf32> to vector<16x128xf32>
    %648 = arith.mulf %632, %647 : vector<16x128xf32>
    %649 = arith.addf %644, %648 : vector<16x128xf32>
    %c124_i32_499 = arith.constant 124 : i32
    %650 = tpu.dynamic_rotate %632 by %c124_i32_499 dim 1 : vector<16x128xf32>, i32 -> vector<16x128xf32>
    %c5_500 = arith.constant 5 : index
    %c2_501 = arith.constant 2 : index
    %c0_502 = arith.constant 0 : index
    %c0_503 = arith.constant 0 : index
    %651 = vector.load %arg3[%c5_500, %c2_501, %c0_502, %c0_503] : memref<12x9x1x128xf32, #tpu.memory_space<vmem>>, vector<1x1x1x128xf32>
    %652 = vector.shape_cast %651 : vector<1x1x1x128xf32> to vector<1x128xf32>
    %653 = vector.broadcast %652 : vector<1x128xf32> to vector<16x128xf32>
    %654 = arith.mulf %650, %653 : vector<16x128xf32>
    %655 = arith.addf %649, %654 : vector<16x128xf32>
    %c4_i32_504 = arith.constant 4 : i32
    %656 = tpu.dynamic_rotate %630 by %c4_i32_504 dim 1 : vector<16x128xf32>, i32 -> vector<16x128xf32>
    %c5_505 = arith.constant 5 : index
    %c3_506 = arith.constant 3 : index
    %c0_507 = arith.constant 0 : index
    %c0_508 = arith.constant 0 : index
    %657 = vector.load %arg3[%c5_505, %c3_506, %c0_507, %c0_508] : memref<12x9x1x128xf32, #tpu.memory_space<vmem>>, vector<1x1x1x128xf32>
    %658 = vector.shape_cast %657 : vector<1x1x1x128xf32> to vector<1x128xf32>
    %659 = vector.broadcast %658 : vector<1x128xf32> to vector<16x128xf32>
    %660 = arith.mulf %656, %659 : vector<16x128xf32>
    %661 = arith.addf %655, %660 : vector<16x128xf32>
    %c124_i32_509 = arith.constant 124 : i32
    %662 = tpu.dynamic_rotate %630 by %c124_i32_509 dim 1 : vector<16x128xf32>, i32 -> vector<16x128xf32>
    %c5_510 = arith.constant 5 : index
    %c5_511 = arith.constant 5 : index
    %c0_512 = arith.constant 0 : index
    %c0_513 = arith.constant 0 : index
    %663 = vector.load %arg3[%c5_510, %c5_511, %c0_512, %c0_513] : memref<12x9x1x128xf32, #tpu.memory_space<vmem>>, vector<1x1x1x128xf32>
    %664 = vector.shape_cast %663 : vector<1x1x1x128xf32> to vector<1x128xf32>
    %665 = vector.broadcast %664 : vector<1x128xf32> to vector<16x128xf32>
    %666 = arith.mulf %662, %665 : vector<16x128xf32>
    %667 = arith.addf %661, %666 : vector<16x128xf32>
    %c4_i32_514 = arith.constant 4 : i32
    %668 = tpu.dynamic_rotate %634 by %c4_i32_514 dim 1 : vector<16x128xf32>, i32 -> vector<16x128xf32>
    %c5_515 = arith.constant 5 : index
    %c6_516 = arith.constant 6 : index
    %c0_517 = arith.constant 0 : index
    %c0_518 = arith.constant 0 : index
    %669 = vector.load %arg3[%c5_515, %c6_516, %c0_517, %c0_518] : memref<12x9x1x128xf32, #tpu.memory_space<vmem>>, vector<1x1x1x128xf32>
    %670 = vector.shape_cast %669 : vector<1x1x1x128xf32> to vector<1x128xf32>
    %671 = vector.broadcast %670 : vector<1x128xf32> to vector<16x128xf32>
    %672 = arith.mulf %668, %671 : vector<16x128xf32>
    %673 = arith.addf %667, %672 : vector<16x128xf32>
    %c5_519 = arith.constant 5 : index
    %c7_520 = arith.constant 7 : index
    %c0_521 = arith.constant 0 : index
    %c0_522 = arith.constant 0 : index
    %674 = vector.load %arg3[%c5_519, %c7_520, %c0_521, %c0_522] : memref<12x9x1x128xf32, #tpu.memory_space<vmem>>, vector<1x1x1x128xf32>
    %675 = vector.shape_cast %674 : vector<1x1x1x128xf32> to vector<1x128xf32>
    %676 = vector.broadcast %675 : vector<1x128xf32> to vector<16x128xf32>
    %677 = arith.mulf %634, %676 : vector<16x128xf32>
    %678 = arith.addf %673, %677 : vector<16x128xf32>
    %c124_i32_523 = arith.constant 124 : i32
    %679 = tpu.dynamic_rotate %634 by %c124_i32_523 dim 1 : vector<16x128xf32>, i32 -> vector<16x128xf32>
    %c5_524 = arith.constant 5 : index
    %c8_525 = arith.constant 8 : index
    %c0_526 = arith.constant 0 : index
    %c0_527 = arith.constant 0 : index
    %680 = vector.load %arg3[%c5_524, %c8_525, %c0_526, %c0_527] : memref<12x9x1x128xf32, #tpu.memory_space<vmem>>, vector<1x1x1x128xf32>
    %681 = vector.shape_cast %680 : vector<1x1x1x128xf32> to vector<1x128xf32>
    %682 = vector.broadcast %681 : vector<1x128xf32> to vector<16x128xf32>
    %683 = arith.mulf %679, %682 : vector<16x128xf32>
    %684 = arith.addf %678, %683 : vector<16x128xf32>
    %685 = arith.addf %684, %574 : vector<16x128xf32>
    %cst_528 = arith.constant 0.000000e+00 : f32
    %686 = vector.broadcast %cst_528 : f32 to vector<16x128xf32>
    %687 = arith.maximumf %685, %686 : vector<16x128xf32>
    %c1_i32_529 = arith.constant 1 : i32
    %688 = tpu.dynamic_rotate %687 by %c1_i32_529 dim 0 : vector<16x128xf32>, i32 -> vector<16x128xf32>
    %689 = arith.mulf %688, %5 : vector<16x128xf32>
    %c15_i32_530 = arith.constant 15 : i32
    %690 = tpu.dynamic_rotate %687 by %c15_i32_530 dim 0 : vector<16x128xf32>, i32 -> vector<16x128xf32>
    %691 = arith.mulf %690, %9 : vector<16x128xf32>
    %c6_531 = arith.constant 6 : index
    %c4_532 = arith.constant 4 : index
    %c0_533 = arith.constant 0 : index
    %c0_534 = arith.constant 0 : index
    %692 = vector.load %arg2[%c6_531, %c4_532, %c0_533, %c0_534] : memref<12x9x1x128xf32, #tpu.memory_space<vmem>>, vector<1x1x1x128xf32>
    %693 = vector.shape_cast %692 : vector<1x1x1x128xf32> to vector<1x128xf32>
    %694 = vector.broadcast %693 : vector<1x128xf32> to vector<16x128xf32>
    %695 = arith.mulf %687, %694 : vector<16x128xf32>
    %c4_i32_535 = arith.constant 4 : i32
    %696 = tpu.dynamic_rotate %689 by %c4_i32_535 dim 1 : vector<16x128xf32>, i32 -> vector<16x128xf32>
    %c6_536 = arith.constant 6 : index
    %c0_537 = arith.constant 0 : index
    %c0_538 = arith.constant 0 : index
    %c0_539 = arith.constant 0 : index
    %697 = vector.load %arg2[%c6_536, %c0_537, %c0_538, %c0_539] : memref<12x9x1x128xf32, #tpu.memory_space<vmem>>, vector<1x1x1x128xf32>
    %698 = vector.shape_cast %697 : vector<1x1x1x128xf32> to vector<1x128xf32>
    %699 = vector.broadcast %698 : vector<1x128xf32> to vector<16x128xf32>
    %700 = arith.mulf %696, %699 : vector<16x128xf32>
    %701 = arith.addf %695, %700 : vector<16x128xf32>
    %c6_540 = arith.constant 6 : index
    %c1_541 = arith.constant 1 : index
    %c0_542 = arith.constant 0 : index
    %c0_543 = arith.constant 0 : index
    %702 = vector.load %arg2[%c6_540, %c1_541, %c0_542, %c0_543] : memref<12x9x1x128xf32, #tpu.memory_space<vmem>>, vector<1x1x1x128xf32>
    %703 = vector.shape_cast %702 : vector<1x1x1x128xf32> to vector<1x128xf32>
    %704 = vector.broadcast %703 : vector<1x128xf32> to vector<16x128xf32>
    %705 = arith.mulf %689, %704 : vector<16x128xf32>
    %706 = arith.addf %701, %705 : vector<16x128xf32>
    %c124_i32_544 = arith.constant 124 : i32
    %707 = tpu.dynamic_rotate %689 by %c124_i32_544 dim 1 : vector<16x128xf32>, i32 -> vector<16x128xf32>
    %c6_545 = arith.constant 6 : index
    %c2_546 = arith.constant 2 : index
    %c0_547 = arith.constant 0 : index
    %c0_548 = arith.constant 0 : index
    %708 = vector.load %arg2[%c6_545, %c2_546, %c0_547, %c0_548] : memref<12x9x1x128xf32, #tpu.memory_space<vmem>>, vector<1x1x1x128xf32>
    %709 = vector.shape_cast %708 : vector<1x1x1x128xf32> to vector<1x128xf32>
    %710 = vector.broadcast %709 : vector<1x128xf32> to vector<16x128xf32>
    %711 = arith.mulf %707, %710 : vector<16x128xf32>
    %712 = arith.addf %706, %711 : vector<16x128xf32>
    %c4_i32_549 = arith.constant 4 : i32
    %713 = tpu.dynamic_rotate %687 by %c4_i32_549 dim 1 : vector<16x128xf32>, i32 -> vector<16x128xf32>
    %c6_550 = arith.constant 6 : index
    %c3_551 = arith.constant 3 : index
    %c0_552 = arith.constant 0 : index
    %c0_553 = arith.constant 0 : index
    %714 = vector.load %arg2[%c6_550, %c3_551, %c0_552, %c0_553] : memref<12x9x1x128xf32, #tpu.memory_space<vmem>>, vector<1x1x1x128xf32>
    %715 = vector.shape_cast %714 : vector<1x1x1x128xf32> to vector<1x128xf32>
    %716 = vector.broadcast %715 : vector<1x128xf32> to vector<16x128xf32>
    %717 = arith.mulf %713, %716 : vector<16x128xf32>
    %718 = arith.addf %712, %717 : vector<16x128xf32>
    %c124_i32_554 = arith.constant 124 : i32
    %719 = tpu.dynamic_rotate %687 by %c124_i32_554 dim 1 : vector<16x128xf32>, i32 -> vector<16x128xf32>
    %c6_555 = arith.constant 6 : index
    %c5_556 = arith.constant 5 : index
    %c0_557 = arith.constant 0 : index
    %c0_558 = arith.constant 0 : index
    %720 = vector.load %arg2[%c6_555, %c5_556, %c0_557, %c0_558] : memref<12x9x1x128xf32, #tpu.memory_space<vmem>>, vector<1x1x1x128xf32>
    %721 = vector.shape_cast %720 : vector<1x1x1x128xf32> to vector<1x128xf32>
    %722 = vector.broadcast %721 : vector<1x128xf32> to vector<16x128xf32>
    %723 = arith.mulf %719, %722 : vector<16x128xf32>
    %724 = arith.addf %718, %723 : vector<16x128xf32>
    %c4_i32_559 = arith.constant 4 : i32
    %725 = tpu.dynamic_rotate %691 by %c4_i32_559 dim 1 : vector<16x128xf32>, i32 -> vector<16x128xf32>
    %c6_560 = arith.constant 6 : index
    %c6_561 = arith.constant 6 : index
    %c0_562 = arith.constant 0 : index
    %c0_563 = arith.constant 0 : index
    %726 = vector.load %arg2[%c6_560, %c6_561, %c0_562, %c0_563] : memref<12x9x1x128xf32, #tpu.memory_space<vmem>>, vector<1x1x1x128xf32>
    %727 = vector.shape_cast %726 : vector<1x1x1x128xf32> to vector<1x128xf32>
    %728 = vector.broadcast %727 : vector<1x128xf32> to vector<16x128xf32>
    %729 = arith.mulf %725, %728 : vector<16x128xf32>
    %730 = arith.addf %724, %729 : vector<16x128xf32>
    %c6_564 = arith.constant 6 : index
    %c7_565 = arith.constant 7 : index
    %c0_566 = arith.constant 0 : index
    %c0_567 = arith.constant 0 : index
    %731 = vector.load %arg2[%c6_564, %c7_565, %c0_566, %c0_567] : memref<12x9x1x128xf32, #tpu.memory_space<vmem>>, vector<1x1x1x128xf32>
    %732 = vector.shape_cast %731 : vector<1x1x1x128xf32> to vector<1x128xf32>
    %733 = vector.broadcast %732 : vector<1x128xf32> to vector<16x128xf32>
    %734 = arith.mulf %691, %733 : vector<16x128xf32>
    %735 = arith.addf %730, %734 : vector<16x128xf32>
    %c124_i32_568 = arith.constant 124 : i32
    %736 = tpu.dynamic_rotate %691 by %c124_i32_568 dim 1 : vector<16x128xf32>, i32 -> vector<16x128xf32>
    %c6_569 = arith.constant 6 : index
    %c8_570 = arith.constant 8 : index
    %c0_571 = arith.constant 0 : index
    %c0_572 = arith.constant 0 : index
    %737 = vector.load %arg2[%c6_569, %c8_570, %c0_571, %c0_572] : memref<12x9x1x128xf32, #tpu.memory_space<vmem>>, vector<1x1x1x128xf32>
    %738 = vector.shape_cast %737 : vector<1x1x1x128xf32> to vector<1x128xf32>
    %739 = vector.broadcast %738 : vector<1x128xf32> to vector<16x128xf32>
    %740 = arith.mulf %736, %739 : vector<16x128xf32>
    %741 = arith.addf %735, %740 : vector<16x128xf32>
    %cst_573 = arith.constant 0.000000e+00 : f32
    %742 = vector.broadcast %cst_573 : f32 to vector<16x128xf32>
    %743 = arith.maximumf %741, %742 : vector<16x128xf32>
    %c1_i32_574 = arith.constant 1 : i32
    %744 = tpu.dynamic_rotate %743 by %c1_i32_574 dim 0 : vector<16x128xf32>, i32 -> vector<16x128xf32>
    %745 = arith.mulf %744, %5 : vector<16x128xf32>
    %c15_i32_575 = arith.constant 15 : i32
    %746 = tpu.dynamic_rotate %743 by %c15_i32_575 dim 0 : vector<16x128xf32>, i32 -> vector<16x128xf32>
    %747 = arith.mulf %746, %9 : vector<16x128xf32>
    %c6_576 = arith.constant 6 : index
    %c4_577 = arith.constant 4 : index
    %c0_578 = arith.constant 0 : index
    %c0_579 = arith.constant 0 : index
    %748 = vector.load %arg3[%c6_576, %c4_577, %c0_578, %c0_579] : memref<12x9x1x128xf32, #tpu.memory_space<vmem>>, vector<1x1x1x128xf32>
    %749 = vector.shape_cast %748 : vector<1x1x1x128xf32> to vector<1x128xf32>
    %750 = vector.broadcast %749 : vector<1x128xf32> to vector<16x128xf32>
    %751 = arith.mulf %743, %750 : vector<16x128xf32>
    %c4_i32_580 = arith.constant 4 : i32
    %752 = tpu.dynamic_rotate %745 by %c4_i32_580 dim 1 : vector<16x128xf32>, i32 -> vector<16x128xf32>
    %c6_581 = arith.constant 6 : index
    %c0_582 = arith.constant 0 : index
    %c0_583 = arith.constant 0 : index
    %c0_584 = arith.constant 0 : index
    %753 = vector.load %arg3[%c6_581, %c0_582, %c0_583, %c0_584] : memref<12x9x1x128xf32, #tpu.memory_space<vmem>>, vector<1x1x1x128xf32>
    %754 = vector.shape_cast %753 : vector<1x1x1x128xf32> to vector<1x128xf32>
    %755 = vector.broadcast %754 : vector<1x128xf32> to vector<16x128xf32>
    %756 = arith.mulf %752, %755 : vector<16x128xf32>
    %757 = arith.addf %751, %756 : vector<16x128xf32>
    %c6_585 = arith.constant 6 : index
    %c1_586 = arith.constant 1 : index
    %c0_587 = arith.constant 0 : index
    %c0_588 = arith.constant 0 : index
    %758 = vector.load %arg3[%c6_585, %c1_586, %c0_587, %c0_588] : memref<12x9x1x128xf32, #tpu.memory_space<vmem>>, vector<1x1x1x128xf32>
    %759 = vector.shape_cast %758 : vector<1x1x1x128xf32> to vector<1x128xf32>
    %760 = vector.broadcast %759 : vector<1x128xf32> to vector<16x128xf32>
    %761 = arith.mulf %745, %760 : vector<16x128xf32>
    %762 = arith.addf %757, %761 : vector<16x128xf32>
    %c124_i32_589 = arith.constant 124 : i32
    %763 = tpu.dynamic_rotate %745 by %c124_i32_589 dim 1 : vector<16x128xf32>, i32 -> vector<16x128xf32>
    %c6_590 = arith.constant 6 : index
    %c2_591 = arith.constant 2 : index
    %c0_592 = arith.constant 0 : index
    %c0_593 = arith.constant 0 : index
    %764 = vector.load %arg3[%c6_590, %c2_591, %c0_592, %c0_593] : memref<12x9x1x128xf32, #tpu.memory_space<vmem>>, vector<1x1x1x128xf32>
    %765 = vector.shape_cast %764 : vector<1x1x1x128xf32> to vector<1x128xf32>
    %766 = vector.broadcast %765 : vector<1x128xf32> to vector<16x128xf32>
    %767 = arith.mulf %763, %766 : vector<16x128xf32>
    %768 = arith.addf %762, %767 : vector<16x128xf32>
    %c4_i32_594 = arith.constant 4 : i32
    %769 = tpu.dynamic_rotate %743 by %c4_i32_594 dim 1 : vector<16x128xf32>, i32 -> vector<16x128xf32>
    %c6_595 = arith.constant 6 : index
    %c3_596 = arith.constant 3 : index
    %c0_597 = arith.constant 0 : index
    %c0_598 = arith.constant 0 : index
    %770 = vector.load %arg3[%c6_595, %c3_596, %c0_597, %c0_598] : memref<12x9x1x128xf32, #tpu.memory_space<vmem>>, vector<1x1x1x128xf32>
    %771 = vector.shape_cast %770 : vector<1x1x1x128xf32> to vector<1x128xf32>
    %772 = vector.broadcast %771 : vector<1x128xf32> to vector<16x128xf32>
    %773 = arith.mulf %769, %772 : vector<16x128xf32>
    %774 = arith.addf %768, %773 : vector<16x128xf32>
    %c124_i32_599 = arith.constant 124 : i32
    %775 = tpu.dynamic_rotate %743 by %c124_i32_599 dim 1 : vector<16x128xf32>, i32 -> vector<16x128xf32>
    %c6_600 = arith.constant 6 : index
    %c5_601 = arith.constant 5 : index
    %c0_602 = arith.constant 0 : index
    %c0_603 = arith.constant 0 : index
    %776 = vector.load %arg3[%c6_600, %c5_601, %c0_602, %c0_603] : memref<12x9x1x128xf32, #tpu.memory_space<vmem>>, vector<1x1x1x128xf32>
    %777 = vector.shape_cast %776 : vector<1x1x1x128xf32> to vector<1x128xf32>
    %778 = vector.broadcast %777 : vector<1x128xf32> to vector<16x128xf32>
    %779 = arith.mulf %775, %778 : vector<16x128xf32>
    %780 = arith.addf %774, %779 : vector<16x128xf32>
    %c4_i32_604 = arith.constant 4 : i32
    %781 = tpu.dynamic_rotate %747 by %c4_i32_604 dim 1 : vector<16x128xf32>, i32 -> vector<16x128xf32>
    %c6_605 = arith.constant 6 : index
    %c6_606 = arith.constant 6 : index
    %c0_607 = arith.constant 0 : index
    %c0_608 = arith.constant 0 : index
    %782 = vector.load %arg3[%c6_605, %c6_606, %c0_607, %c0_608] : memref<12x9x1x128xf32, #tpu.memory_space<vmem>>, vector<1x1x1x128xf32>
    %783 = vector.shape_cast %782 : vector<1x1x1x128xf32> to vector<1x128xf32>
    %784 = vector.broadcast %783 : vector<1x128xf32> to vector<16x128xf32>
    %785 = arith.mulf %781, %784 : vector<16x128xf32>
    %786 = arith.addf %780, %785 : vector<16x128xf32>
    %c6_609 = arith.constant 6 : index
    %c7_610 = arith.constant 7 : index
    %c0_611 = arith.constant 0 : index
    %c0_612 = arith.constant 0 : index
    %787 = vector.load %arg3[%c6_609, %c7_610, %c0_611, %c0_612] : memref<12x9x1x128xf32, #tpu.memory_space<vmem>>, vector<1x1x1x128xf32>
    %788 = vector.shape_cast %787 : vector<1x1x1x128xf32> to vector<1x128xf32>
    %789 = vector.broadcast %788 : vector<1x128xf32> to vector<16x128xf32>
    %790 = arith.mulf %747, %789 : vector<16x128xf32>
    %791 = arith.addf %786, %790 : vector<16x128xf32>
    %c124_i32_613 = arith.constant 124 : i32
    %792 = tpu.dynamic_rotate %747 by %c124_i32_613 dim 1 : vector<16x128xf32>, i32 -> vector<16x128xf32>
    %c6_614 = arith.constant 6 : index
    %c8_615 = arith.constant 8 : index
    %c0_616 = arith.constant 0 : index
    %c0_617 = arith.constant 0 : index
    %793 = vector.load %arg3[%c6_614, %c8_615, %c0_616, %c0_617] : memref<12x9x1x128xf32, #tpu.memory_space<vmem>>, vector<1x1x1x128xf32>
    %794 = vector.shape_cast %793 : vector<1x1x1x128xf32> to vector<1x128xf32>
    %795 = vector.broadcast %794 : vector<1x128xf32> to vector<16x128xf32>
    %796 = arith.mulf %792, %795 : vector<16x128xf32>
    %797 = arith.addf %791, %796 : vector<16x128xf32>
    %798 = arith.addf %797, %687 : vector<16x128xf32>
    %cst_618 = arith.constant 0.000000e+00 : f32
    %799 = vector.broadcast %cst_618 : f32 to vector<16x128xf32>
    %800 = arith.maximumf %798, %799 : vector<16x128xf32>
    %c1_i32_619 = arith.constant 1 : i32
    %801 = tpu.dynamic_rotate %800 by %c1_i32_619 dim 0 : vector<16x128xf32>, i32 -> vector<16x128xf32>
    %802 = arith.mulf %801, %5 : vector<16x128xf32>
    %c15_i32_620 = arith.constant 15 : i32
    %803 = tpu.dynamic_rotate %800 by %c15_i32_620 dim 0 : vector<16x128xf32>, i32 -> vector<16x128xf32>
    %804 = arith.mulf %803, %9 : vector<16x128xf32>
    %c7_621 = arith.constant 7 : index
    %c4_622 = arith.constant 4 : index
    %c0_623 = arith.constant 0 : index
    %c0_624 = arith.constant 0 : index
    %805 = vector.load %arg2[%c7_621, %c4_622, %c0_623, %c0_624] : memref<12x9x1x128xf32, #tpu.memory_space<vmem>>, vector<1x1x1x128xf32>
    %806 = vector.shape_cast %805 : vector<1x1x1x128xf32> to vector<1x128xf32>
    %807 = vector.broadcast %806 : vector<1x128xf32> to vector<16x128xf32>
    %808 = arith.mulf %800, %807 : vector<16x128xf32>
    %c4_i32_625 = arith.constant 4 : i32
    %809 = tpu.dynamic_rotate %802 by %c4_i32_625 dim 1 : vector<16x128xf32>, i32 -> vector<16x128xf32>
    %c7_626 = arith.constant 7 : index
    %c0_627 = arith.constant 0 : index
    %c0_628 = arith.constant 0 : index
    %c0_629 = arith.constant 0 : index
    %810 = vector.load %arg2[%c7_626, %c0_627, %c0_628, %c0_629] : memref<12x9x1x128xf32, #tpu.memory_space<vmem>>, vector<1x1x1x128xf32>
    %811 = vector.shape_cast %810 : vector<1x1x1x128xf32> to vector<1x128xf32>
    %812 = vector.broadcast %811 : vector<1x128xf32> to vector<16x128xf32>
    %813 = arith.mulf %809, %812 : vector<16x128xf32>
    %814 = arith.addf %808, %813 : vector<16x128xf32>
    %c7_630 = arith.constant 7 : index
    %c1_631 = arith.constant 1 : index
    %c0_632 = arith.constant 0 : index
    %c0_633 = arith.constant 0 : index
    %815 = vector.load %arg2[%c7_630, %c1_631, %c0_632, %c0_633] : memref<12x9x1x128xf32, #tpu.memory_space<vmem>>, vector<1x1x1x128xf32>
    %816 = vector.shape_cast %815 : vector<1x1x1x128xf32> to vector<1x128xf32>
    %817 = vector.broadcast %816 : vector<1x128xf32> to vector<16x128xf32>
    %818 = arith.mulf %802, %817 : vector<16x128xf32>
    %819 = arith.addf %814, %818 : vector<16x128xf32>
    %c124_i32_634 = arith.constant 124 : i32
    %820 = tpu.dynamic_rotate %802 by %c124_i32_634 dim 1 : vector<16x128xf32>, i32 -> vector<16x128xf32>
    %c7_635 = arith.constant 7 : index
    %c2_636 = arith.constant 2 : index
    %c0_637 = arith.constant 0 : index
    %c0_638 = arith.constant 0 : index
    %821 = vector.load %arg2[%c7_635, %c2_636, %c0_637, %c0_638] : memref<12x9x1x128xf32, #tpu.memory_space<vmem>>, vector<1x1x1x128xf32>
    %822 = vector.shape_cast %821 : vector<1x1x1x128xf32> to vector<1x128xf32>
    %823 = vector.broadcast %822 : vector<1x128xf32> to vector<16x128xf32>
    %824 = arith.mulf %820, %823 : vector<16x128xf32>
    %825 = arith.addf %819, %824 : vector<16x128xf32>
    %c4_i32_639 = arith.constant 4 : i32
    %826 = tpu.dynamic_rotate %800 by %c4_i32_639 dim 1 : vector<16x128xf32>, i32 -> vector<16x128xf32>
    %c7_640 = arith.constant 7 : index
    %c3_641 = arith.constant 3 : index
    %c0_642 = arith.constant 0 : index
    %c0_643 = arith.constant 0 : index
    %827 = vector.load %arg2[%c7_640, %c3_641, %c0_642, %c0_643] : memref<12x9x1x128xf32, #tpu.memory_space<vmem>>, vector<1x1x1x128xf32>
    %828 = vector.shape_cast %827 : vector<1x1x1x128xf32> to vector<1x128xf32>
    %829 = vector.broadcast %828 : vector<1x128xf32> to vector<16x128xf32>
    %830 = arith.mulf %826, %829 : vector<16x128xf32>
    %831 = arith.addf %825, %830 : vector<16x128xf32>
    %c124_i32_644 = arith.constant 124 : i32
    %832 = tpu.dynamic_rotate %800 by %c124_i32_644 dim 1 : vector<16x128xf32>, i32 -> vector<16x128xf32>
    %c7_645 = arith.constant 7 : index
    %c5_646 = arith.constant 5 : index
    %c0_647 = arith.constant 0 : index
    %c0_648 = arith.constant 0 : index
    %833 = vector.load %arg2[%c7_645, %c5_646, %c0_647, %c0_648] : memref<12x9x1x128xf32, #tpu.memory_space<vmem>>, vector<1x1x1x128xf32>
    %834 = vector.shape_cast %833 : vector<1x1x1x128xf32> to vector<1x128xf32>
    %835 = vector.broadcast %834 : vector<1x128xf32> to vector<16x128xf32>
    %836 = arith.mulf %832, %835 : vector<16x128xf32>
    %837 = arith.addf %831, %836 : vector<16x128xf32>
    %c4_i32_649 = arith.constant 4 : i32
    %838 = tpu.dynamic_rotate %804 by %c4_i32_649 dim 1 : vector<16x128xf32>, i32 -> vector<16x128xf32>
    %c7_650 = arith.constant 7 : index
    %c6_651 = arith.constant 6 : index
    %c0_652 = arith.constant 0 : index
    %c0_653 = arith.constant 0 : index
    %839 = vector.load %arg2[%c7_650, %c6_651, %c0_652, %c0_653] : memref<12x9x1x128xf32, #tpu.memory_space<vmem>>, vector<1x1x1x128xf32>
    %840 = vector.shape_cast %839 : vector<1x1x1x128xf32> to vector<1x128xf32>
    %841 = vector.broadcast %840 : vector<1x128xf32> to vector<16x128xf32>
    %842 = arith.mulf %838, %841 : vector<16x128xf32>
    %843 = arith.addf %837, %842 : vector<16x128xf32>
    %c7_654 = arith.constant 7 : index
    %c7_655 = arith.constant 7 : index
    %c0_656 = arith.constant 0 : index
    %c0_657 = arith.constant 0 : index
    %844 = vector.load %arg2[%c7_654, %c7_655, %c0_656, %c0_657] : memref<12x9x1x128xf32, #tpu.memory_space<vmem>>, vector<1x1x1x128xf32>
    %845 = vector.shape_cast %844 : vector<1x1x1x128xf32> to vector<1x128xf32>
    %846 = vector.broadcast %845 : vector<1x128xf32> to vector<16x128xf32>
    %847 = arith.mulf %804, %846 : vector<16x128xf32>
    %848 = arith.addf %843, %847 : vector<16x128xf32>
    %c124_i32_658 = arith.constant 124 : i32
    %849 = tpu.dynamic_rotate %804 by %c124_i32_658 dim 1 : vector<16x128xf32>, i32 -> vector<16x128xf32>
    %c7_659 = arith.constant 7 : index
    %c8_660 = arith.constant 8 : index
    %c0_661 = arith.constant 0 : index
    %c0_662 = arith.constant 0 : index
    %850 = vector.load %arg2[%c7_659, %c8_660, %c0_661, %c0_662] : memref<12x9x1x128xf32, #tpu.memory_space<vmem>>, vector<1x1x1x128xf32>
    %851 = vector.shape_cast %850 : vector<1x1x1x128xf32> to vector<1x128xf32>
    %852 = vector.broadcast %851 : vector<1x128xf32> to vector<16x128xf32>
    %853 = arith.mulf %849, %852 : vector<16x128xf32>
    %854 = arith.addf %848, %853 : vector<16x128xf32>
    %cst_663 = arith.constant 0.000000e+00 : f32
    %855 = vector.broadcast %cst_663 : f32 to vector<16x128xf32>
    %856 = arith.maximumf %854, %855 : vector<16x128xf32>
    %c1_i32_664 = arith.constant 1 : i32
    %857 = tpu.dynamic_rotate %856 by %c1_i32_664 dim 0 : vector<16x128xf32>, i32 -> vector<16x128xf32>
    %858 = arith.mulf %857, %5 : vector<16x128xf32>
    %c15_i32_665 = arith.constant 15 : i32
    %859 = tpu.dynamic_rotate %856 by %c15_i32_665 dim 0 : vector<16x128xf32>, i32 -> vector<16x128xf32>
    %860 = arith.mulf %859, %9 : vector<16x128xf32>
    %c7_666 = arith.constant 7 : index
    %c4_667 = arith.constant 4 : index
    %c0_668 = arith.constant 0 : index
    %c0_669 = arith.constant 0 : index
    %861 = vector.load %arg3[%c7_666, %c4_667, %c0_668, %c0_669] : memref<12x9x1x128xf32, #tpu.memory_space<vmem>>, vector<1x1x1x128xf32>
    %862 = vector.shape_cast %861 : vector<1x1x1x128xf32> to vector<1x128xf32>
    %863 = vector.broadcast %862 : vector<1x128xf32> to vector<16x128xf32>
    %864 = arith.mulf %856, %863 : vector<16x128xf32>
    %c4_i32_670 = arith.constant 4 : i32
    %865 = tpu.dynamic_rotate %858 by %c4_i32_670 dim 1 : vector<16x128xf32>, i32 -> vector<16x128xf32>
    %c7_671 = arith.constant 7 : index
    %c0_672 = arith.constant 0 : index
    %c0_673 = arith.constant 0 : index
    %c0_674 = arith.constant 0 : index
    %866 = vector.load %arg3[%c7_671, %c0_672, %c0_673, %c0_674] : memref<12x9x1x128xf32, #tpu.memory_space<vmem>>, vector<1x1x1x128xf32>
    %867 = vector.shape_cast %866 : vector<1x1x1x128xf32> to vector<1x128xf32>
    %868 = vector.broadcast %867 : vector<1x128xf32> to vector<16x128xf32>
    %869 = arith.mulf %865, %868 : vector<16x128xf32>
    %870 = arith.addf %864, %869 : vector<16x128xf32>
    %c7_675 = arith.constant 7 : index
    %c1_676 = arith.constant 1 : index
    %c0_677 = arith.constant 0 : index
    %c0_678 = arith.constant 0 : index
    %871 = vector.load %arg3[%c7_675, %c1_676, %c0_677, %c0_678] : memref<12x9x1x128xf32, #tpu.memory_space<vmem>>, vector<1x1x1x128xf32>
    %872 = vector.shape_cast %871 : vector<1x1x1x128xf32> to vector<1x128xf32>
    %873 = vector.broadcast %872 : vector<1x128xf32> to vector<16x128xf32>
    %874 = arith.mulf %858, %873 : vector<16x128xf32>
    %875 = arith.addf %870, %874 : vector<16x128xf32>
    %c124_i32_679 = arith.constant 124 : i32
    %876 = tpu.dynamic_rotate %858 by %c124_i32_679 dim 1 : vector<16x128xf32>, i32 -> vector<16x128xf32>
    %c7_680 = arith.constant 7 : index
    %c2_681 = arith.constant 2 : index
    %c0_682 = arith.constant 0 : index
    %c0_683 = arith.constant 0 : index
    %877 = vector.load %arg3[%c7_680, %c2_681, %c0_682, %c0_683] : memref<12x9x1x128xf32, #tpu.memory_space<vmem>>, vector<1x1x1x128xf32>
    %878 = vector.shape_cast %877 : vector<1x1x1x128xf32> to vector<1x128xf32>
    %879 = vector.broadcast %878 : vector<1x128xf32> to vector<16x128xf32>
    %880 = arith.mulf %876, %879 : vector<16x128xf32>
    %881 = arith.addf %875, %880 : vector<16x128xf32>
    %c4_i32_684 = arith.constant 4 : i32
    %882 = tpu.dynamic_rotate %856 by %c4_i32_684 dim 1 : vector<16x128xf32>, i32 -> vector<16x128xf32>
    %c7_685 = arith.constant 7 : index
    %c3_686 = arith.constant 3 : index
    %c0_687 = arith.constant 0 : index
    %c0_688 = arith.constant 0 : index
    %883 = vector.load %arg3[%c7_685, %c3_686, %c0_687, %c0_688] : memref<12x9x1x128xf32, #tpu.memory_space<vmem>>, vector<1x1x1x128xf32>
    %884 = vector.shape_cast %883 : vector<1x1x1x128xf32> to vector<1x128xf32>
    %885 = vector.broadcast %884 : vector<1x128xf32> to vector<16x128xf32>
    %886 = arith.mulf %882, %885 : vector<16x128xf32>
    %887 = arith.addf %881, %886 : vector<16x128xf32>
    %c124_i32_689 = arith.constant 124 : i32
    %888 = tpu.dynamic_rotate %856 by %c124_i32_689 dim 1 : vector<16x128xf32>, i32 -> vector<16x128xf32>
    %c7_690 = arith.constant 7 : index
    %c5_691 = arith.constant 5 : index
    %c0_692 = arith.constant 0 : index
    %c0_693 = arith.constant 0 : index
    %889 = vector.load %arg3[%c7_690, %c5_691, %c0_692, %c0_693] : memref<12x9x1x128xf32, #tpu.memory_space<vmem>>, vector<1x1x1x128xf32>
    %890 = vector.shape_cast %889 : vector<1x1x1x128xf32> to vector<1x128xf32>
    %891 = vector.broadcast %890 : vector<1x128xf32> to vector<16x128xf32>
    %892 = arith.mulf %888, %891 : vector<16x128xf32>
    %893 = arith.addf %887, %892 : vector<16x128xf32>
    %c4_i32_694 = arith.constant 4 : i32
    %894 = tpu.dynamic_rotate %860 by %c4_i32_694 dim 1 : vector<16x128xf32>, i32 -> vector<16x128xf32>
    %c7_695 = arith.constant 7 : index
    %c6_696 = arith.constant 6 : index
    %c0_697 = arith.constant 0 : index
    %c0_698 = arith.constant 0 : index
    %895 = vector.load %arg3[%c7_695, %c6_696, %c0_697, %c0_698] : memref<12x9x1x128xf32, #tpu.memory_space<vmem>>, vector<1x1x1x128xf32>
    %896 = vector.shape_cast %895 : vector<1x1x1x128xf32> to vector<1x128xf32>
    %897 = vector.broadcast %896 : vector<1x128xf32> to vector<16x128xf32>
    %898 = arith.mulf %894, %897 : vector<16x128xf32>
    %899 = arith.addf %893, %898 : vector<16x128xf32>
    %c7_699 = arith.constant 7 : index
    %c7_700 = arith.constant 7 : index
    %c0_701 = arith.constant 0 : index
    %c0_702 = arith.constant 0 : index
    %900 = vector.load %arg3[%c7_699, %c7_700, %c0_701, %c0_702] : memref<12x9x1x128xf32, #tpu.memory_space<vmem>>, vector<1x1x1x128xf32>
    %901 = vector.shape_cast %900 : vector<1x1x1x128xf32> to vector<1x128xf32>
    %902 = vector.broadcast %901 : vector<1x128xf32> to vector<16x128xf32>
    %903 = arith.mulf %860, %902 : vector<16x128xf32>
    %904 = arith.addf %899, %903 : vector<16x128xf32>
    %c124_i32_703 = arith.constant 124 : i32
    %905 = tpu.dynamic_rotate %860 by %c124_i32_703 dim 1 : vector<16x128xf32>, i32 -> vector<16x128xf32>
    %c7_704 = arith.constant 7 : index
    %c8_705 = arith.constant 8 : index
    %c0_706 = arith.constant 0 : index
    %c0_707 = arith.constant 0 : index
    %906 = vector.load %arg3[%c7_704, %c8_705, %c0_706, %c0_707] : memref<12x9x1x128xf32, #tpu.memory_space<vmem>>, vector<1x1x1x128xf32>
    %907 = vector.shape_cast %906 : vector<1x1x1x128xf32> to vector<1x128xf32>
    %908 = vector.broadcast %907 : vector<1x128xf32> to vector<16x128xf32>
    %909 = arith.mulf %905, %908 : vector<16x128xf32>
    %910 = arith.addf %904, %909 : vector<16x128xf32>
    %911 = arith.addf %910, %800 : vector<16x128xf32>
    %cst_708 = arith.constant 0.000000e+00 : f32
    %912 = vector.broadcast %cst_708 : f32 to vector<16x128xf32>
    %913 = arith.maximumf %911, %912 : vector<16x128xf32>
    %c1_i32_709 = arith.constant 1 : i32
    %914 = tpu.dynamic_rotate %913 by %c1_i32_709 dim 0 : vector<16x128xf32>, i32 -> vector<16x128xf32>
    %915 = arith.mulf %914, %5 : vector<16x128xf32>
    %c15_i32_710 = arith.constant 15 : i32
    %916 = tpu.dynamic_rotate %913 by %c15_i32_710 dim 0 : vector<16x128xf32>, i32 -> vector<16x128xf32>
    %917 = arith.mulf %916, %9 : vector<16x128xf32>
    %c8_711 = arith.constant 8 : index
    %c4_712 = arith.constant 4 : index
    %c0_713 = arith.constant 0 : index
    %c0_714 = arith.constant 0 : index
    %918 = vector.load %arg2[%c8_711, %c4_712, %c0_713, %c0_714] : memref<12x9x1x128xf32, #tpu.memory_space<vmem>>, vector<1x1x1x128xf32>
    %919 = vector.shape_cast %918 : vector<1x1x1x128xf32> to vector<1x128xf32>
    %920 = vector.broadcast %919 : vector<1x128xf32> to vector<16x128xf32>
    %921 = arith.mulf %913, %920 : vector<16x128xf32>
    %c4_i32_715 = arith.constant 4 : i32
    %922 = tpu.dynamic_rotate %915 by %c4_i32_715 dim 1 : vector<16x128xf32>, i32 -> vector<16x128xf32>
    %c8_716 = arith.constant 8 : index
    %c0_717 = arith.constant 0 : index
    %c0_718 = arith.constant 0 : index
    %c0_719 = arith.constant 0 : index
    %923 = vector.load %arg2[%c8_716, %c0_717, %c0_718, %c0_719] : memref<12x9x1x128xf32, #tpu.memory_space<vmem>>, vector<1x1x1x128xf32>
    %924 = vector.shape_cast %923 : vector<1x1x1x128xf32> to vector<1x128xf32>
    %925 = vector.broadcast %924 : vector<1x128xf32> to vector<16x128xf32>
    %926 = arith.mulf %922, %925 : vector<16x128xf32>
    %927 = arith.addf %921, %926 : vector<16x128xf32>
    %c8_720 = arith.constant 8 : index
    %c1_721 = arith.constant 1 : index
    %c0_722 = arith.constant 0 : index
    %c0_723 = arith.constant 0 : index
    %928 = vector.load %arg2[%c8_720, %c1_721, %c0_722, %c0_723] : memref<12x9x1x128xf32, #tpu.memory_space<vmem>>, vector<1x1x1x128xf32>
    %929 = vector.shape_cast %928 : vector<1x1x1x128xf32> to vector<1x128xf32>
    %930 = vector.broadcast %929 : vector<1x128xf32> to vector<16x128xf32>
    %931 = arith.mulf %915, %930 : vector<16x128xf32>
    %932 = arith.addf %927, %931 : vector<16x128xf32>
    %c124_i32_724 = arith.constant 124 : i32
    %933 = tpu.dynamic_rotate %915 by %c124_i32_724 dim 1 : vector<16x128xf32>, i32 -> vector<16x128xf32>
    %c8_725 = arith.constant 8 : index
    %c2_726 = arith.constant 2 : index
    %c0_727 = arith.constant 0 : index
    %c0_728 = arith.constant 0 : index
    %934 = vector.load %arg2[%c8_725, %c2_726, %c0_727, %c0_728] : memref<12x9x1x128xf32, #tpu.memory_space<vmem>>, vector<1x1x1x128xf32>
    %935 = vector.shape_cast %934 : vector<1x1x1x128xf32> to vector<1x128xf32>
    %936 = vector.broadcast %935 : vector<1x128xf32> to vector<16x128xf32>
    %937 = arith.mulf %933, %936 : vector<16x128xf32>
    %938 = arith.addf %932, %937 : vector<16x128xf32>
    %c4_i32_729 = arith.constant 4 : i32
    %939 = tpu.dynamic_rotate %913 by %c4_i32_729 dim 1 : vector<16x128xf32>, i32 -> vector<16x128xf32>
    %c8_730 = arith.constant 8 : index
    %c3_731 = arith.constant 3 : index
    %c0_732 = arith.constant 0 : index
    %c0_733 = arith.constant 0 : index
    %940 = vector.load %arg2[%c8_730, %c3_731, %c0_732, %c0_733] : memref<12x9x1x128xf32, #tpu.memory_space<vmem>>, vector<1x1x1x128xf32>
    %941 = vector.shape_cast %940 : vector<1x1x1x128xf32> to vector<1x128xf32>
    %942 = vector.broadcast %941 : vector<1x128xf32> to vector<16x128xf32>
    %943 = arith.mulf %939, %942 : vector<16x128xf32>
    %944 = arith.addf %938, %943 : vector<16x128xf32>
    %c124_i32_734 = arith.constant 124 : i32
    %945 = tpu.dynamic_rotate %913 by %c124_i32_734 dim 1 : vector<16x128xf32>, i32 -> vector<16x128xf32>
    %c8_735 = arith.constant 8 : index
    %c5_736 = arith.constant 5 : index
    %c0_737 = arith.constant 0 : index
    %c0_738 = arith.constant 0 : index
    %946 = vector.load %arg2[%c8_735, %c5_736, %c0_737, %c0_738] : memref<12x9x1x128xf32, #tpu.memory_space<vmem>>, vector<1x1x1x128xf32>
    %947 = vector.shape_cast %946 : vector<1x1x1x128xf32> to vector<1x128xf32>
    %948 = vector.broadcast %947 : vector<1x128xf32> to vector<16x128xf32>
    %949 = arith.mulf %945, %948 : vector<16x128xf32>
    %950 = arith.addf %944, %949 : vector<16x128xf32>
    %c4_i32_739 = arith.constant 4 : i32
    %951 = tpu.dynamic_rotate %917 by %c4_i32_739 dim 1 : vector<16x128xf32>, i32 -> vector<16x128xf32>
    %c8_740 = arith.constant 8 : index
    %c6_741 = arith.constant 6 : index
    %c0_742 = arith.constant 0 : index
    %c0_743 = arith.constant 0 : index
    %952 = vector.load %arg2[%c8_740, %c6_741, %c0_742, %c0_743] : memref<12x9x1x128xf32, #tpu.memory_space<vmem>>, vector<1x1x1x128xf32>
    %953 = vector.shape_cast %952 : vector<1x1x1x128xf32> to vector<1x128xf32>
    %954 = vector.broadcast %953 : vector<1x128xf32> to vector<16x128xf32>
    %955 = arith.mulf %951, %954 : vector<16x128xf32>
    %956 = arith.addf %950, %955 : vector<16x128xf32>
    %c8_744 = arith.constant 8 : index
    %c7_745 = arith.constant 7 : index
    %c0_746 = arith.constant 0 : index
    %c0_747 = arith.constant 0 : index
    %957 = vector.load %arg2[%c8_744, %c7_745, %c0_746, %c0_747] : memref<12x9x1x128xf32, #tpu.memory_space<vmem>>, vector<1x1x1x128xf32>
    %958 = vector.shape_cast %957 : vector<1x1x1x128xf32> to vector<1x128xf32>
    %959 = vector.broadcast %958 : vector<1x128xf32> to vector<16x128xf32>
    %960 = arith.mulf %917, %959 : vector<16x128xf32>
    %961 = arith.addf %956, %960 : vector<16x128xf32>
    %c124_i32_748 = arith.constant 124 : i32
    %962 = tpu.dynamic_rotate %917 by %c124_i32_748 dim 1 : vector<16x128xf32>, i32 -> vector<16x128xf32>
    %c8_749 = arith.constant 8 : index
    %c8_750 = arith.constant 8 : index
    %c0_751 = arith.constant 0 : index
    %c0_752 = arith.constant 0 : index
    %963 = vector.load %arg2[%c8_749, %c8_750, %c0_751, %c0_752] : memref<12x9x1x128xf32, #tpu.memory_space<vmem>>, vector<1x1x1x128xf32>
    %964 = vector.shape_cast %963 : vector<1x1x1x128xf32> to vector<1x128xf32>
    %965 = vector.broadcast %964 : vector<1x128xf32> to vector<16x128xf32>
    %966 = arith.mulf %962, %965 : vector<16x128xf32>
    %967 = arith.addf %961, %966 : vector<16x128xf32>
    %cst_753 = arith.constant 0.000000e+00 : f32
    %968 = vector.broadcast %cst_753 : f32 to vector<16x128xf32>
    %969 = arith.maximumf %967, %968 : vector<16x128xf32>
    %c1_i32_754 = arith.constant 1 : i32
    %970 = tpu.dynamic_rotate %969 by %c1_i32_754 dim 0 : vector<16x128xf32>, i32 -> vector<16x128xf32>
    %971 = arith.mulf %970, %5 : vector<16x128xf32>
    %c15_i32_755 = arith.constant 15 : i32
    %972 = tpu.dynamic_rotate %969 by %c15_i32_755 dim 0 : vector<16x128xf32>, i32 -> vector<16x128xf32>
    %973 = arith.mulf %972, %9 : vector<16x128xf32>
    %c8_756 = arith.constant 8 : index
    %c4_757 = arith.constant 4 : index
    %c0_758 = arith.constant 0 : index
    %c0_759 = arith.constant 0 : index
    %974 = vector.load %arg3[%c8_756, %c4_757, %c0_758, %c0_759] : memref<12x9x1x128xf32, #tpu.memory_space<vmem>>, vector<1x1x1x128xf32>
    %975 = vector.shape_cast %974 : vector<1x1x1x128xf32> to vector<1x128xf32>
    %976 = vector.broadcast %975 : vector<1x128xf32> to vector<16x128xf32>
    %977 = arith.mulf %969, %976 : vector<16x128xf32>
    %c4_i32_760 = arith.constant 4 : i32
    %978 = tpu.dynamic_rotate %971 by %c4_i32_760 dim 1 : vector<16x128xf32>, i32 -> vector<16x128xf32>
    %c8_761 = arith.constant 8 : index
    %c0_762 = arith.constant 0 : index
    %c0_763 = arith.constant 0 : index
    %c0_764 = arith.constant 0 : index
    %979 = vector.load %arg3[%c8_761, %c0_762, %c0_763, %c0_764] : memref<12x9x1x128xf32, #tpu.memory_space<vmem>>, vector<1x1x1x128xf32>
    %980 = vector.shape_cast %979 : vector<1x1x1x128xf32> to vector<1x128xf32>
    %981 = vector.broadcast %980 : vector<1x128xf32> to vector<16x128xf32>
    %982 = arith.mulf %978, %981 : vector<16x128xf32>
    %983 = arith.addf %977, %982 : vector<16x128xf32>
    %c8_765 = arith.constant 8 : index
    %c1_766 = arith.constant 1 : index
    %c0_767 = arith.constant 0 : index
    %c0_768 = arith.constant 0 : index
    %984 = vector.load %arg3[%c8_765, %c1_766, %c0_767, %c0_768] : memref<12x9x1x128xf32, #tpu.memory_space<vmem>>, vector<1x1x1x128xf32>
    %985 = vector.shape_cast %984 : vector<1x1x1x128xf32> to vector<1x128xf32>
    %986 = vector.broadcast %985 : vector<1x128xf32> to vector<16x128xf32>
    %987 = arith.mulf %971, %986 : vector<16x128xf32>
    %988 = arith.addf %983, %987 : vector<16x128xf32>
    %c124_i32_769 = arith.constant 124 : i32
    %989 = tpu.dynamic_rotate %971 by %c124_i32_769 dim 1 : vector<16x128xf32>, i32 -> vector<16x128xf32>
    %c8_770 = arith.constant 8 : index
    %c2_771 = arith.constant 2 : index
    %c0_772 = arith.constant 0 : index
    %c0_773 = arith.constant 0 : index
    %990 = vector.load %arg3[%c8_770, %c2_771, %c0_772, %c0_773] : memref<12x9x1x128xf32, #tpu.memory_space<vmem>>, vector<1x1x1x128xf32>
    %991 = vector.shape_cast %990 : vector<1x1x1x128xf32> to vector<1x128xf32>
    %992 = vector.broadcast %991 : vector<1x128xf32> to vector<16x128xf32>
    %993 = arith.mulf %989, %992 : vector<16x128xf32>
    %994 = arith.addf %988, %993 : vector<16x128xf32>
    %c4_i32_774 = arith.constant 4 : i32
    %995 = tpu.dynamic_rotate %969 by %c4_i32_774 dim 1 : vector<16x128xf32>, i32 -> vector<16x128xf32>
    %c8_775 = arith.constant 8 : index
    %c3_776 = arith.constant 3 : index
    %c0_777 = arith.constant 0 : index
    %c0_778 = arith.constant 0 : index
    %996 = vector.load %arg3[%c8_775, %c3_776, %c0_777, %c0_778] : memref<12x9x1x128xf32, #tpu.memory_space<vmem>>, vector<1x1x1x128xf32>
    %997 = vector.shape_cast %996 : vector<1x1x1x128xf32> to vector<1x128xf32>
    %998 = vector.broadcast %997 : vector<1x128xf32> to vector<16x128xf32>
    %999 = arith.mulf %995, %998 : vector<16x128xf32>
    %1000 = arith.addf %994, %999 : vector<16x128xf32>
    %c124_i32_779 = arith.constant 124 : i32
    %1001 = tpu.dynamic_rotate %969 by %c124_i32_779 dim 1 : vector<16x128xf32>, i32 -> vector<16x128xf32>
    %c8_780 = arith.constant 8 : index
    %c5_781 = arith.constant 5 : index
    %c0_782 = arith.constant 0 : index
    %c0_783 = arith.constant 0 : index
    %1002 = vector.load %arg3[%c8_780, %c5_781, %c0_782, %c0_783] : memref<12x9x1x128xf32, #tpu.memory_space<vmem>>, vector<1x1x1x128xf32>
    %1003 = vector.shape_cast %1002 : vector<1x1x1x128xf32> to vector<1x128xf32>
    %1004 = vector.broadcast %1003 : vector<1x128xf32> to vector<16x128xf32>
    %1005 = arith.mulf %1001, %1004 : vector<16x128xf32>
    %1006 = arith.addf %1000, %1005 : vector<16x128xf32>
    %c4_i32_784 = arith.constant 4 : i32
    %1007 = tpu.dynamic_rotate %973 by %c4_i32_784 dim 1 : vector<16x128xf32>, i32 -> vector<16x128xf32>
    %c8_785 = arith.constant 8 : index
    %c6_786 = arith.constant 6 : index
    %c0_787 = arith.constant 0 : index
    %c0_788 = arith.constant 0 : index
    %1008 = vector.load %arg3[%c8_785, %c6_786, %c0_787, %c0_788] : memref<12x9x1x128xf32, #tpu.memory_space<vmem>>, vector<1x1x1x128xf32>
    %1009 = vector.shape_cast %1008 : vector<1x1x1x128xf32> to vector<1x128xf32>
    %1010 = vector.broadcast %1009 : vector<1x128xf32> to vector<16x128xf32>
    %1011 = arith.mulf %1007, %1010 : vector<16x128xf32>
    %1012 = arith.addf %1006, %1011 : vector<16x128xf32>
    %c8_789 = arith.constant 8 : index
    %c7_790 = arith.constant 7 : index
    %c0_791 = arith.constant 0 : index
    %c0_792 = arith.constant 0 : index
    %1013 = vector.load %arg3[%c8_789, %c7_790, %c0_791, %c0_792] : memref<12x9x1x128xf32, #tpu.memory_space<vmem>>, vector<1x1x1x128xf32>
    %1014 = vector.shape_cast %1013 : vector<1x1x1x128xf32> to vector<1x128xf32>
    %1015 = vector.broadcast %1014 : vector<1x128xf32> to vector<16x128xf32>
    %1016 = arith.mulf %973, %1015 : vector<16x128xf32>
    %1017 = arith.addf %1012, %1016 : vector<16x128xf32>
    %c124_i32_793 = arith.constant 124 : i32
    %1018 = tpu.dynamic_rotate %973 by %c124_i32_793 dim 1 : vector<16x128xf32>, i32 -> vector<16x128xf32>
    %c8_794 = arith.constant 8 : index
    %c8_795 = arith.constant 8 : index
    %c0_796 = arith.constant 0 : index
    %c0_797 = arith.constant 0 : index
    %1019 = vector.load %arg3[%c8_794, %c8_795, %c0_796, %c0_797] : memref<12x9x1x128xf32, #tpu.memory_space<vmem>>, vector<1x1x1x128xf32>
    %1020 = vector.shape_cast %1019 : vector<1x1x1x128xf32> to vector<1x128xf32>
    %1021 = vector.broadcast %1020 : vector<1x128xf32> to vector<16x128xf32>
    %1022 = arith.mulf %1018, %1021 : vector<16x128xf32>
    %1023 = arith.addf %1017, %1022 : vector<16x128xf32>
    %1024 = arith.addf %1023, %913 : vector<16x128xf32>
    %cst_798 = arith.constant 0.000000e+00 : f32
    %1025 = vector.broadcast %cst_798 : f32 to vector<16x128xf32>
    %1026 = arith.maximumf %1024, %1025 : vector<16x128xf32>
    %c1_i32_799 = arith.constant 1 : i32
    %1027 = tpu.dynamic_rotate %1026 by %c1_i32_799 dim 0 : vector<16x128xf32>, i32 -> vector<16x128xf32>
    %1028 = arith.mulf %1027, %5 : vector<16x128xf32>
    %c15_i32_800 = arith.constant 15 : i32
    %1029 = tpu.dynamic_rotate %1026 by %c15_i32_800 dim 0 : vector<16x128xf32>, i32 -> vector<16x128xf32>
    %1030 = arith.mulf %1029, %9 : vector<16x128xf32>
    %c9 = arith.constant 9 : index
    %c4_801 = arith.constant 4 : index
    %c0_802 = arith.constant 0 : index
    %c0_803 = arith.constant 0 : index
    %1031 = vector.load %arg2[%c9, %c4_801, %c0_802, %c0_803] : memref<12x9x1x128xf32, #tpu.memory_space<vmem>>, vector<1x1x1x128xf32>
    %1032 = vector.shape_cast %1031 : vector<1x1x1x128xf32> to vector<1x128xf32>
    %1033 = vector.broadcast %1032 : vector<1x128xf32> to vector<16x128xf32>
    %1034 = arith.mulf %1026, %1033 : vector<16x128xf32>
    %c4_i32_804 = arith.constant 4 : i32
    %1035 = tpu.dynamic_rotate %1028 by %c4_i32_804 dim 1 : vector<16x128xf32>, i32 -> vector<16x128xf32>
    %c9_805 = arith.constant 9 : index
    %c0_806 = arith.constant 0 : index
    %c0_807 = arith.constant 0 : index
    %c0_808 = arith.constant 0 : index
    %1036 = vector.load %arg2[%c9_805, %c0_806, %c0_807, %c0_808] : memref<12x9x1x128xf32, #tpu.memory_space<vmem>>, vector<1x1x1x128xf32>
    %1037 = vector.shape_cast %1036 : vector<1x1x1x128xf32> to vector<1x128xf32>
    %1038 = vector.broadcast %1037 : vector<1x128xf32> to vector<16x128xf32>
    %1039 = arith.mulf %1035, %1038 : vector<16x128xf32>
    %1040 = arith.addf %1034, %1039 : vector<16x128xf32>
    %c9_809 = arith.constant 9 : index
    %c1_810 = arith.constant 1 : index
    %c0_811 = arith.constant 0 : index
    %c0_812 = arith.constant 0 : index
    %1041 = vector.load %arg2[%c9_809, %c1_810, %c0_811, %c0_812] : memref<12x9x1x128xf32, #tpu.memory_space<vmem>>, vector<1x1x1x128xf32>
    %1042 = vector.shape_cast %1041 : vector<1x1x1x128xf32> to vector<1x128xf32>
    %1043 = vector.broadcast %1042 : vector<1x128xf32> to vector<16x128xf32>
    %1044 = arith.mulf %1028, %1043 : vector<16x128xf32>
    %1045 = arith.addf %1040, %1044 : vector<16x128xf32>
    %c124_i32_813 = arith.constant 124 : i32
    %1046 = tpu.dynamic_rotate %1028 by %c124_i32_813 dim 1 : vector<16x128xf32>, i32 -> vector<16x128xf32>
    %c9_814 = arith.constant 9 : index
    %c2_815 = arith.constant 2 : index
    %c0_816 = arith.constant 0 : index
    %c0_817 = arith.constant 0 : index
    %1047 = vector.load %arg2[%c9_814, %c2_815, %c0_816, %c0_817] : memref<12x9x1x128xf32, #tpu.memory_space<vmem>>, vector<1x1x1x128xf32>
    %1048 = vector.shape_cast %1047 : vector<1x1x1x128xf32> to vector<1x128xf32>
    %1049 = vector.broadcast %1048 : vector<1x128xf32> to vector<16x128xf32>
    %1050 = arith.mulf %1046, %1049 : vector<16x128xf32>
    %1051 = arith.addf %1045, %1050 : vector<16x128xf32>
    %c4_i32_818 = arith.constant 4 : i32
    %1052 = tpu.dynamic_rotate %1026 by %c4_i32_818 dim 1 : vector<16x128xf32>, i32 -> vector<16x128xf32>
    %c9_819 = arith.constant 9 : index
    %c3_820 = arith.constant 3 : index
    %c0_821 = arith.constant 0 : index
    %c0_822 = arith.constant 0 : index
    %1053 = vector.load %arg2[%c9_819, %c3_820, %c0_821, %c0_822] : memref<12x9x1x128xf32, #tpu.memory_space<vmem>>, vector<1x1x1x128xf32>
    %1054 = vector.shape_cast %1053 : vector<1x1x1x128xf32> to vector<1x128xf32>
    %1055 = vector.broadcast %1054 : vector<1x128xf32> to vector<16x128xf32>
    %1056 = arith.mulf %1052, %1055 : vector<16x128xf32>
    %1057 = arith.addf %1051, %1056 : vector<16x128xf32>
    %c124_i32_823 = arith.constant 124 : i32
    %1058 = tpu.dynamic_rotate %1026 by %c124_i32_823 dim 1 : vector<16x128xf32>, i32 -> vector<16x128xf32>
    %c9_824 = arith.constant 9 : index
    %c5_825 = arith.constant 5 : index
    %c0_826 = arith.constant 0 : index
    %c0_827 = arith.constant 0 : index
    %1059 = vector.load %arg2[%c9_824, %c5_825, %c0_826, %c0_827] : memref<12x9x1x128xf32, #tpu.memory_space<vmem>>, vector<1x1x1x128xf32>
    %1060 = vector.shape_cast %1059 : vector<1x1x1x128xf32> to vector<1x128xf32>
    %1061 = vector.broadcast %1060 : vector<1x128xf32> to vector<16x128xf32>
    %1062 = arith.mulf %1058, %1061 : vector<16x128xf32>
    %1063 = arith.addf %1057, %1062 : vector<16x128xf32>
    %c4_i32_828 = arith.constant 4 : i32
    %1064 = tpu.dynamic_rotate %1030 by %c4_i32_828 dim 1 : vector<16x128xf32>, i32 -> vector<16x128xf32>
    %c9_829 = arith.constant 9 : index
    %c6_830 = arith.constant 6 : index
    %c0_831 = arith.constant 0 : index
    %c0_832 = arith.constant 0 : index
    %1065 = vector.load %arg2[%c9_829, %c6_830, %c0_831, %c0_832] : memref<12x9x1x128xf32, #tpu.memory_space<vmem>>, vector<1x1x1x128xf32>
    %1066 = vector.shape_cast %1065 : vector<1x1x1x128xf32> to vector<1x128xf32>
    %1067 = vector.broadcast %1066 : vector<1x128xf32> to vector<16x128xf32>
    %1068 = arith.mulf %1064, %1067 : vector<16x128xf32>
    %1069 = arith.addf %1063, %1068 : vector<16x128xf32>
    %c9_833 = arith.constant 9 : index
    %c7_834 = arith.constant 7 : index
    %c0_835 = arith.constant 0 : index
    %c0_836 = arith.constant 0 : index
    %1070 = vector.load %arg2[%c9_833, %c7_834, %c0_835, %c0_836] : memref<12x9x1x128xf32, #tpu.memory_space<vmem>>, vector<1x1x1x128xf32>
    %1071 = vector.shape_cast %1070 : vector<1x1x1x128xf32> to vector<1x128xf32>
    %1072 = vector.broadcast %1071 : vector<1x128xf32> to vector<16x128xf32>
    %1073 = arith.mulf %1030, %1072 : vector<16x128xf32>
    %1074 = arith.addf %1069, %1073 : vector<16x128xf32>
    %c124_i32_837 = arith.constant 124 : i32
    %1075 = tpu.dynamic_rotate %1030 by %c124_i32_837 dim 1 : vector<16x128xf32>, i32 -> vector<16x128xf32>
    %c9_838 = arith.constant 9 : index
    %c8_839 = arith.constant 8 : index
    %c0_840 = arith.constant 0 : index
    %c0_841 = arith.constant 0 : index
    %1076 = vector.load %arg2[%c9_838, %c8_839, %c0_840, %c0_841] : memref<12x9x1x128xf32, #tpu.memory_space<vmem>>, vector<1x1x1x128xf32>
    %1077 = vector.shape_cast %1076 : vector<1x1x1x128xf32> to vector<1x128xf32>
    %1078 = vector.broadcast %1077 : vector<1x128xf32> to vector<16x128xf32>
    %1079 = arith.mulf %1075, %1078 : vector<16x128xf32>
    %1080 = arith.addf %1074, %1079 : vector<16x128xf32>
    %cst_842 = arith.constant 0.000000e+00 : f32
    %1081 = vector.broadcast %cst_842 : f32 to vector<16x128xf32>
    %1082 = arith.maximumf %1080, %1081 : vector<16x128xf32>
    %c1_i32_843 = arith.constant 1 : i32
    %1083 = tpu.dynamic_rotate %1082 by %c1_i32_843 dim 0 : vector<16x128xf32>, i32 -> vector<16x128xf32>
    %1084 = arith.mulf %1083, %5 : vector<16x128xf32>
    %c15_i32_844 = arith.constant 15 : i32
    %1085 = tpu.dynamic_rotate %1082 by %c15_i32_844 dim 0 : vector<16x128xf32>, i32 -> vector<16x128xf32>
    %1086 = arith.mulf %1085, %9 : vector<16x128xf32>
    %c9_845 = arith.constant 9 : index
    %c4_846 = arith.constant 4 : index
    %c0_847 = arith.constant 0 : index
    %c0_848 = arith.constant 0 : index
    %1087 = vector.load %arg3[%c9_845, %c4_846, %c0_847, %c0_848] : memref<12x9x1x128xf32, #tpu.memory_space<vmem>>, vector<1x1x1x128xf32>
    %1088 = vector.shape_cast %1087 : vector<1x1x1x128xf32> to vector<1x128xf32>
    %1089 = vector.broadcast %1088 : vector<1x128xf32> to vector<16x128xf32>
    %1090 = arith.mulf %1082, %1089 : vector<16x128xf32>
    %c4_i32_849 = arith.constant 4 : i32
    %1091 = tpu.dynamic_rotate %1084 by %c4_i32_849 dim 1 : vector<16x128xf32>, i32 -> vector<16x128xf32>
    %c9_850 = arith.constant 9 : index
    %c0_851 = arith.constant 0 : index
    %c0_852 = arith.constant 0 : index
    %c0_853 = arith.constant 0 : index
    %1092 = vector.load %arg3[%c9_850, %c0_851, %c0_852, %c0_853] : memref<12x9x1x128xf32, #tpu.memory_space<vmem>>, vector<1x1x1x128xf32>
    %1093 = vector.shape_cast %1092 : vector<1x1x1x128xf32> to vector<1x128xf32>
    %1094 = vector.broadcast %1093 : vector<1x128xf32> to vector<16x128xf32>
    %1095 = arith.mulf %1091, %1094 : vector<16x128xf32>
    %1096 = arith.addf %1090, %1095 : vector<16x128xf32>
    %c9_854 = arith.constant 9 : index
    %c1_855 = arith.constant 1 : index
    %c0_856 = arith.constant 0 : index
    %c0_857 = arith.constant 0 : index
    %1097 = vector.load %arg3[%c9_854, %c1_855, %c0_856, %c0_857] : memref<12x9x1x128xf32, #tpu.memory_space<vmem>>, vector<1x1x1x128xf32>
    %1098 = vector.shape_cast %1097 : vector<1x1x1x128xf32> to vector<1x128xf32>
    %1099 = vector.broadcast %1098 : vector<1x128xf32> to vector<16x128xf32>
    %1100 = arith.mulf %1084, %1099 : vector<16x128xf32>
    %1101 = arith.addf %1096, %1100 : vector<16x128xf32>
    %c124_i32_858 = arith.constant 124 : i32
    %1102 = tpu.dynamic_rotate %1084 by %c124_i32_858 dim 1 : vector<16x128xf32>, i32 -> vector<16x128xf32>
    %c9_859 = arith.constant 9 : index
    %c2_860 = arith.constant 2 : index
    %c0_861 = arith.constant 0 : index
    %c0_862 = arith.constant 0 : index
    %1103 = vector.load %arg3[%c9_859, %c2_860, %c0_861, %c0_862] : memref<12x9x1x128xf32, #tpu.memory_space<vmem>>, vector<1x1x1x128xf32>
    %1104 = vector.shape_cast %1103 : vector<1x1x1x128xf32> to vector<1x128xf32>
    %1105 = vector.broadcast %1104 : vector<1x128xf32> to vector<16x128xf32>
    %1106 = arith.mulf %1102, %1105 : vector<16x128xf32>
    %1107 = arith.addf %1101, %1106 : vector<16x128xf32>
    %c4_i32_863 = arith.constant 4 : i32
    %1108 = tpu.dynamic_rotate %1082 by %c4_i32_863 dim 1 : vector<16x128xf32>, i32 -> vector<16x128xf32>
    %c9_864 = arith.constant 9 : index
    %c3_865 = arith.constant 3 : index
    %c0_866 = arith.constant 0 : index
    %c0_867 = arith.constant 0 : index
    %1109 = vector.load %arg3[%c9_864, %c3_865, %c0_866, %c0_867] : memref<12x9x1x128xf32, #tpu.memory_space<vmem>>, vector<1x1x1x128xf32>
    %1110 = vector.shape_cast %1109 : vector<1x1x1x128xf32> to vector<1x128xf32>
    %1111 = vector.broadcast %1110 : vector<1x128xf32> to vector<16x128xf32>
    %1112 = arith.mulf %1108, %1111 : vector<16x128xf32>
    %1113 = arith.addf %1107, %1112 : vector<16x128xf32>
    %c124_i32_868 = arith.constant 124 : i32
    %1114 = tpu.dynamic_rotate %1082 by %c124_i32_868 dim 1 : vector<16x128xf32>, i32 -> vector<16x128xf32>
    %c9_869 = arith.constant 9 : index
    %c5_870 = arith.constant 5 : index
    %c0_871 = arith.constant 0 : index
    %c0_872 = arith.constant 0 : index
    %1115 = vector.load %arg3[%c9_869, %c5_870, %c0_871, %c0_872] : memref<12x9x1x128xf32, #tpu.memory_space<vmem>>, vector<1x1x1x128xf32>
    %1116 = vector.shape_cast %1115 : vector<1x1x1x128xf32> to vector<1x128xf32>
    %1117 = vector.broadcast %1116 : vector<1x128xf32> to vector<16x128xf32>
    %1118 = arith.mulf %1114, %1117 : vector<16x128xf32>
    %1119 = arith.addf %1113, %1118 : vector<16x128xf32>
    %c4_i32_873 = arith.constant 4 : i32
    %1120 = tpu.dynamic_rotate %1086 by %c4_i32_873 dim 1 : vector<16x128xf32>, i32 -> vector<16x128xf32>
    %c9_874 = arith.constant 9 : index
    %c6_875 = arith.constant 6 : index
    %c0_876 = arith.constant 0 : index
    %c0_877 = arith.constant 0 : index
    %1121 = vector.load %arg3[%c9_874, %c6_875, %c0_876, %c0_877] : memref<12x9x1x128xf32, #tpu.memory_space<vmem>>, vector<1x1x1x128xf32>
    %1122 = vector.shape_cast %1121 : vector<1x1x1x128xf32> to vector<1x128xf32>
    %1123 = vector.broadcast %1122 : vector<1x128xf32> to vector<16x128xf32>
    %1124 = arith.mulf %1120, %1123 : vector<16x128xf32>
    %1125 = arith.addf %1119, %1124 : vector<16x128xf32>
    %c9_878 = arith.constant 9 : index
    %c7_879 = arith.constant 7 : index
    %c0_880 = arith.constant 0 : index
    %c0_881 = arith.constant 0 : index
    %1126 = vector.load %arg3[%c9_878, %c7_879, %c0_880, %c0_881] : memref<12x9x1x128xf32, #tpu.memory_space<vmem>>, vector<1x1x1x128xf32>
    %1127 = vector.shape_cast %1126 : vector<1x1x1x128xf32> to vector<1x128xf32>
    %1128 = vector.broadcast %1127 : vector<1x128xf32> to vector<16x128xf32>
    %1129 = arith.mulf %1086, %1128 : vector<16x128xf32>
    %1130 = arith.addf %1125, %1129 : vector<16x128xf32>
    %c124_i32_882 = arith.constant 124 : i32
    %1131 = tpu.dynamic_rotate %1086 by %c124_i32_882 dim 1 : vector<16x128xf32>, i32 -> vector<16x128xf32>
    %c9_883 = arith.constant 9 : index
    %c8_884 = arith.constant 8 : index
    %c0_885 = arith.constant 0 : index
    %c0_886 = arith.constant 0 : index
    %1132 = vector.load %arg3[%c9_883, %c8_884, %c0_885, %c0_886] : memref<12x9x1x128xf32, #tpu.memory_space<vmem>>, vector<1x1x1x128xf32>
    %1133 = vector.shape_cast %1132 : vector<1x1x1x128xf32> to vector<1x128xf32>
    %1134 = vector.broadcast %1133 : vector<1x128xf32> to vector<16x128xf32>
    %1135 = arith.mulf %1131, %1134 : vector<16x128xf32>
    %1136 = arith.addf %1130, %1135 : vector<16x128xf32>
    %1137 = arith.addf %1136, %1026 : vector<16x128xf32>
    %cst_887 = arith.constant 0.000000e+00 : f32
    %1138 = vector.broadcast %cst_887 : f32 to vector<16x128xf32>
    %1139 = arith.maximumf %1137, %1138 : vector<16x128xf32>
    %c1_i32_888 = arith.constant 1 : i32
    %1140 = tpu.dynamic_rotate %1139 by %c1_i32_888 dim 0 : vector<16x128xf32>, i32 -> vector<16x128xf32>
    %1141 = arith.mulf %1140, %5 : vector<16x128xf32>
    %c15_i32_889 = arith.constant 15 : i32
    %1142 = tpu.dynamic_rotate %1139 by %c15_i32_889 dim 0 : vector<16x128xf32>, i32 -> vector<16x128xf32>
    %1143 = arith.mulf %1142, %9 : vector<16x128xf32>
    %c10 = arith.constant 10 : index
    %c4_890 = arith.constant 4 : index
    %c0_891 = arith.constant 0 : index
    %c0_892 = arith.constant 0 : index
    %1144 = vector.load %arg2[%c10, %c4_890, %c0_891, %c0_892] : memref<12x9x1x128xf32, #tpu.memory_space<vmem>>, vector<1x1x1x128xf32>
    %1145 = vector.shape_cast %1144 : vector<1x1x1x128xf32> to vector<1x128xf32>
    %1146 = vector.broadcast %1145 : vector<1x128xf32> to vector<16x128xf32>
    %1147 = arith.mulf %1139, %1146 : vector<16x128xf32>
    %c4_i32_893 = arith.constant 4 : i32
    %1148 = tpu.dynamic_rotate %1141 by %c4_i32_893 dim 1 : vector<16x128xf32>, i32 -> vector<16x128xf32>
    %c10_894 = arith.constant 10 : index
    %c0_895 = arith.constant 0 : index
    %c0_896 = arith.constant 0 : index
    %c0_897 = arith.constant 0 : index
    %1149 = vector.load %arg2[%c10_894, %c0_895, %c0_896, %c0_897] : memref<12x9x1x128xf32, #tpu.memory_space<vmem>>, vector<1x1x1x128xf32>
    %1150 = vector.shape_cast %1149 : vector<1x1x1x128xf32> to vector<1x128xf32>
    %1151 = vector.broadcast %1150 : vector<1x128xf32> to vector<16x128xf32>
    %1152 = arith.mulf %1148, %1151 : vector<16x128xf32>
    %1153 = arith.addf %1147, %1152 : vector<16x128xf32>
    %c10_898 = arith.constant 10 : index
    %c1_899 = arith.constant 1 : index
    %c0_900 = arith.constant 0 : index
    %c0_901 = arith.constant 0 : index
    %1154 = vector.load %arg2[%c10_898, %c1_899, %c0_900, %c0_901] : memref<12x9x1x128xf32, #tpu.memory_space<vmem>>, vector<1x1x1x128xf32>
    %1155 = vector.shape_cast %1154 : vector<1x1x1x128xf32> to vector<1x128xf32>
    %1156 = vector.broadcast %1155 : vector<1x128xf32> to vector<16x128xf32>
    %1157 = arith.mulf %1141, %1156 : vector<16x128xf32>
    %1158 = arith.addf %1153, %1157 : vector<16x128xf32>
    %c124_i32_902 = arith.constant 124 : i32
    %1159 = tpu.dynamic_rotate %1141 by %c124_i32_902 dim 1 : vector<16x128xf32>, i32 -> vector<16x128xf32>
    %c10_903 = arith.constant 10 : index
    %c2_904 = arith.constant 2 : index
    %c0_905 = arith.constant 0 : index
    %c0_906 = arith.constant 0 : index
    %1160 = vector.load %arg2[%c10_903, %c2_904, %c0_905, %c0_906] : memref<12x9x1x128xf32, #tpu.memory_space<vmem>>, vector<1x1x1x128xf32>
    %1161 = vector.shape_cast %1160 : vector<1x1x1x128xf32> to vector<1x128xf32>
    %1162 = vector.broadcast %1161 : vector<1x128xf32> to vector<16x128xf32>
    %1163 = arith.mulf %1159, %1162 : vector<16x128xf32>
    %1164 = arith.addf %1158, %1163 : vector<16x128xf32>
    %c4_i32_907 = arith.constant 4 : i32
    %1165 = tpu.dynamic_rotate %1139 by %c4_i32_907 dim 1 : vector<16x128xf32>, i32 -> vector<16x128xf32>
    %c10_908 = arith.constant 10 : index
    %c3_909 = arith.constant 3 : index
    %c0_910 = arith.constant 0 : index
    %c0_911 = arith.constant 0 : index
    %1166 = vector.load %arg2[%c10_908, %c3_909, %c0_910, %c0_911] : memref<12x9x1x128xf32, #tpu.memory_space<vmem>>, vector<1x1x1x128xf32>
    %1167 = vector.shape_cast %1166 : vector<1x1x1x128xf32> to vector<1x128xf32>
    %1168 = vector.broadcast %1167 : vector<1x128xf32> to vector<16x128xf32>
    %1169 = arith.mulf %1165, %1168 : vector<16x128xf32>
    %1170 = arith.addf %1164, %1169 : vector<16x128xf32>
    %c124_i32_912 = arith.constant 124 : i32
    %1171 = tpu.dynamic_rotate %1139 by %c124_i32_912 dim 1 : vector<16x128xf32>, i32 -> vector<16x128xf32>
    %c10_913 = arith.constant 10 : index
    %c5_914 = arith.constant 5 : index
    %c0_915 = arith.constant 0 : index
    %c0_916 = arith.constant 0 : index
    %1172 = vector.load %arg2[%c10_913, %c5_914, %c0_915, %c0_916] : memref<12x9x1x128xf32, #tpu.memory_space<vmem>>, vector<1x1x1x128xf32>
    %1173 = vector.shape_cast %1172 : vector<1x1x1x128xf32> to vector<1x128xf32>
    %1174 = vector.broadcast %1173 : vector<1x128xf32> to vector<16x128xf32>
    %1175 = arith.mulf %1171, %1174 : vector<16x128xf32>
    %1176 = arith.addf %1170, %1175 : vector<16x128xf32>
    %c4_i32_917 = arith.constant 4 : i32
    %1177 = tpu.dynamic_rotate %1143 by %c4_i32_917 dim 1 : vector<16x128xf32>, i32 -> vector<16x128xf32>
    %c10_918 = arith.constant 10 : index
    %c6_919 = arith.constant 6 : index
    %c0_920 = arith.constant 0 : index
    %c0_921 = arith.constant 0 : index
    %1178 = vector.load %arg2[%c10_918, %c6_919, %c0_920, %c0_921] : memref<12x9x1x128xf32, #tpu.memory_space<vmem>>, vector<1x1x1x128xf32>
    %1179 = vector.shape_cast %1178 : vector<1x1x1x128xf32> to vector<1x128xf32>
    %1180 = vector.broadcast %1179 : vector<1x128xf32> to vector<16x128xf32>
    %1181 = arith.mulf %1177, %1180 : vector<16x128xf32>
    %1182 = arith.addf %1176, %1181 : vector<16x128xf32>
    %c10_922 = arith.constant 10 : index
    %c7_923 = arith.constant 7 : index
    %c0_924 = arith.constant 0 : index
    %c0_925 = arith.constant 0 : index
    %1183 = vector.load %arg2[%c10_922, %c7_923, %c0_924, %c0_925] : memref<12x9x1x128xf32, #tpu.memory_space<vmem>>, vector<1x1x1x128xf32>
    %1184 = vector.shape_cast %1183 : vector<1x1x1x128xf32> to vector<1x128xf32>
    %1185 = vector.broadcast %1184 : vector<1x128xf32> to vector<16x128xf32>
    %1186 = arith.mulf %1143, %1185 : vector<16x128xf32>
    %1187 = arith.addf %1182, %1186 : vector<16x128xf32>
    %c124_i32_926 = arith.constant 124 : i32
    %1188 = tpu.dynamic_rotate %1143 by %c124_i32_926 dim 1 : vector<16x128xf32>, i32 -> vector<16x128xf32>
    %c10_927 = arith.constant 10 : index
    %c8_928 = arith.constant 8 : index
    %c0_929 = arith.constant 0 : index
    %c0_930 = arith.constant 0 : index
    %1189 = vector.load %arg2[%c10_927, %c8_928, %c0_929, %c0_930] : memref<12x9x1x128xf32, #tpu.memory_space<vmem>>, vector<1x1x1x128xf32>
    %1190 = vector.shape_cast %1189 : vector<1x1x1x128xf32> to vector<1x128xf32>
    %1191 = vector.broadcast %1190 : vector<1x128xf32> to vector<16x128xf32>
    %1192 = arith.mulf %1188, %1191 : vector<16x128xf32>
    %1193 = arith.addf %1187, %1192 : vector<16x128xf32>
    %cst_931 = arith.constant 0.000000e+00 : f32
    %1194 = vector.broadcast %cst_931 : f32 to vector<16x128xf32>
    %1195 = arith.maximumf %1193, %1194 : vector<16x128xf32>
    %c1_i32_932 = arith.constant 1 : i32
    %1196 = tpu.dynamic_rotate %1195 by %c1_i32_932 dim 0 : vector<16x128xf32>, i32 -> vector<16x128xf32>
    %1197 = arith.mulf %1196, %5 : vector<16x128xf32>
    %c15_i32_933 = arith.constant 15 : i32
    %1198 = tpu.dynamic_rotate %1195 by %c15_i32_933 dim 0 : vector<16x128xf32>, i32 -> vector<16x128xf32>
    %1199 = arith.mulf %1198, %9 : vector<16x128xf32>
    %c10_934 = arith.constant 10 : index
    %c4_935 = arith.constant 4 : index
    %c0_936 = arith.constant 0 : index
    %c0_937 = arith.constant 0 : index
    %1200 = vector.load %arg3[%c10_934, %c4_935, %c0_936, %c0_937] : memref<12x9x1x128xf32, #tpu.memory_space<vmem>>, vector<1x1x1x128xf32>
    %1201 = vector.shape_cast %1200 : vector<1x1x1x128xf32> to vector<1x128xf32>
    %1202 = vector.broadcast %1201 : vector<1x128xf32> to vector<16x128xf32>
    %1203 = arith.mulf %1195, %1202 : vector<16x128xf32>
    %c4_i32_938 = arith.constant 4 : i32
    %1204 = tpu.dynamic_rotate %1197 by %c4_i32_938 dim 1 : vector<16x128xf32>, i32 -> vector<16x128xf32>
    %c10_939 = arith.constant 10 : index
    %c0_940 = arith.constant 0 : index
    %c0_941 = arith.constant 0 : index
    %c0_942 = arith.constant 0 : index
    %1205 = vector.load %arg3[%c10_939, %c0_940, %c0_941, %c0_942] : memref<12x9x1x128xf32, #tpu.memory_space<vmem>>, vector<1x1x1x128xf32>
    %1206 = vector.shape_cast %1205 : vector<1x1x1x128xf32> to vector<1x128xf32>
    %1207 = vector.broadcast %1206 : vector<1x128xf32> to vector<16x128xf32>
    %1208 = arith.mulf %1204, %1207 : vector<16x128xf32>
    %1209 = arith.addf %1203, %1208 : vector<16x128xf32>
    %c10_943 = arith.constant 10 : index
    %c1_944 = arith.constant 1 : index
    %c0_945 = arith.constant 0 : index
    %c0_946 = arith.constant 0 : index
    %1210 = vector.load %arg3[%c10_943, %c1_944, %c0_945, %c0_946] : memref<12x9x1x128xf32, #tpu.memory_space<vmem>>, vector<1x1x1x128xf32>
    %1211 = vector.shape_cast %1210 : vector<1x1x1x128xf32> to vector<1x128xf32>
    %1212 = vector.broadcast %1211 : vector<1x128xf32> to vector<16x128xf32>
    %1213 = arith.mulf %1197, %1212 : vector<16x128xf32>
    %1214 = arith.addf %1209, %1213 : vector<16x128xf32>
    %c124_i32_947 = arith.constant 124 : i32
    %1215 = tpu.dynamic_rotate %1197 by %c124_i32_947 dim 1 : vector<16x128xf32>, i32 -> vector<16x128xf32>
    %c10_948 = arith.constant 10 : index
    %c2_949 = arith.constant 2 : index
    %c0_950 = arith.constant 0 : index
    %c0_951 = arith.constant 0 : index
    %1216 = vector.load %arg3[%c10_948, %c2_949, %c0_950, %c0_951] : memref<12x9x1x128xf32, #tpu.memory_space<vmem>>, vector<1x1x1x128xf32>
    %1217 = vector.shape_cast %1216 : vector<1x1x1x128xf32> to vector<1x128xf32>
    %1218 = vector.broadcast %1217 : vector<1x128xf32> to vector<16x128xf32>
    %1219 = arith.mulf %1215, %1218 : vector<16x128xf32>
    %1220 = arith.addf %1214, %1219 : vector<16x128xf32>
    %c4_i32_952 = arith.constant 4 : i32
    %1221 = tpu.dynamic_rotate %1195 by %c4_i32_952 dim 1 : vector<16x128xf32>, i32 -> vector<16x128xf32>
    %c10_953 = arith.constant 10 : index
    %c3_954 = arith.constant 3 : index
    %c0_955 = arith.constant 0 : index
    %c0_956 = arith.constant 0 : index
    %1222 = vector.load %arg3[%c10_953, %c3_954, %c0_955, %c0_956] : memref<12x9x1x128xf32, #tpu.memory_space<vmem>>, vector<1x1x1x128xf32>
    %1223 = vector.shape_cast %1222 : vector<1x1x1x128xf32> to vector<1x128xf32>
    %1224 = vector.broadcast %1223 : vector<1x128xf32> to vector<16x128xf32>
    %1225 = arith.mulf %1221, %1224 : vector<16x128xf32>
    %1226 = arith.addf %1220, %1225 : vector<16x128xf32>
    %c124_i32_957 = arith.constant 124 : i32
    %1227 = tpu.dynamic_rotate %1195 by %c124_i32_957 dim 1 : vector<16x128xf32>, i32 -> vector<16x128xf32>
    %c10_958 = arith.constant 10 : index
    %c5_959 = arith.constant 5 : index
    %c0_960 = arith.constant 0 : index
    %c0_961 = arith.constant 0 : index
    %1228 = vector.load %arg3[%c10_958, %c5_959, %c0_960, %c0_961] : memref<12x9x1x128xf32, #tpu.memory_space<vmem>>, vector<1x1x1x128xf32>
    %1229 = vector.shape_cast %1228 : vector<1x1x1x128xf32> to vector<1x128xf32>
    %1230 = vector.broadcast %1229 : vector<1x128xf32> to vector<16x128xf32>
    %1231 = arith.mulf %1227, %1230 : vector<16x128xf32>
    %1232 = arith.addf %1226, %1231 : vector<16x128xf32>
    %c4_i32_962 = arith.constant 4 : i32
    %1233 = tpu.dynamic_rotate %1199 by %c4_i32_962 dim 1 : vector<16x128xf32>, i32 -> vector<16x128xf32>
    %c10_963 = arith.constant 10 : index
    %c6_964 = arith.constant 6 : index
    %c0_965 = arith.constant 0 : index
    %c0_966 = arith.constant 0 : index
    %1234 = vector.load %arg3[%c10_963, %c6_964, %c0_965, %c0_966] : memref<12x9x1x128xf32, #tpu.memory_space<vmem>>, vector<1x1x1x128xf32>
    %1235 = vector.shape_cast %1234 : vector<1x1x1x128xf32> to vector<1x128xf32>
    %1236 = vector.broadcast %1235 : vector<1x128xf32> to vector<16x128xf32>
    %1237 = arith.mulf %1233, %1236 : vector<16x128xf32>
    %1238 = arith.addf %1232, %1237 : vector<16x128xf32>
    %c10_967 = arith.constant 10 : index
    %c7_968 = arith.constant 7 : index
    %c0_969 = arith.constant 0 : index
    %c0_970 = arith.constant 0 : index
    %1239 = vector.load %arg3[%c10_967, %c7_968, %c0_969, %c0_970] : memref<12x9x1x128xf32, #tpu.memory_space<vmem>>, vector<1x1x1x128xf32>
    %1240 = vector.shape_cast %1239 : vector<1x1x1x128xf32> to vector<1x128xf32>
    %1241 = vector.broadcast %1240 : vector<1x128xf32> to vector<16x128xf32>
    %1242 = arith.mulf %1199, %1241 : vector<16x128xf32>
    %1243 = arith.addf %1238, %1242 : vector<16x128xf32>
    %c124_i32_971 = arith.constant 124 : i32
    %1244 = tpu.dynamic_rotate %1199 by %c124_i32_971 dim 1 : vector<16x128xf32>, i32 -> vector<16x128xf32>
    %c10_972 = arith.constant 10 : index
    %c8_973 = arith.constant 8 : index
    %c0_974 = arith.constant 0 : index
    %c0_975 = arith.constant 0 : index
    %1245 = vector.load %arg3[%c10_972, %c8_973, %c0_974, %c0_975] : memref<12x9x1x128xf32, #tpu.memory_space<vmem>>, vector<1x1x1x128xf32>
    %1246 = vector.shape_cast %1245 : vector<1x1x1x128xf32> to vector<1x128xf32>
    %1247 = vector.broadcast %1246 : vector<1x128xf32> to vector<16x128xf32>
    %1248 = arith.mulf %1244, %1247 : vector<16x128xf32>
    %1249 = arith.addf %1243, %1248 : vector<16x128xf32>
    %1250 = arith.addf %1249, %1139 : vector<16x128xf32>
    %cst_976 = arith.constant 0.000000e+00 : f32
    %1251 = vector.broadcast %cst_976 : f32 to vector<16x128xf32>
    %1252 = arith.maximumf %1250, %1251 : vector<16x128xf32>
    %c1_i32_977 = arith.constant 1 : i32
    %1253 = tpu.dynamic_rotate %1252 by %c1_i32_977 dim 0 : vector<16x128xf32>, i32 -> vector<16x128xf32>
    %1254 = arith.mulf %1253, %5 : vector<16x128xf32>
    %c15_i32_978 = arith.constant 15 : i32
    %1255 = tpu.dynamic_rotate %1252 by %c15_i32_978 dim 0 : vector<16x128xf32>, i32 -> vector<16x128xf32>
    %1256 = arith.mulf %1255, %9 : vector<16x128xf32>
    %c11 = arith.constant 11 : index
    %c4_979 = arith.constant 4 : index
    %c0_980 = arith.constant 0 : index
    %c0_981 = arith.constant 0 : index
    %1257 = vector.load %arg2[%c11, %c4_979, %c0_980, %c0_981] : memref<12x9x1x128xf32, #tpu.memory_space<vmem>>, vector<1x1x1x128xf32>
    %1258 = vector.shape_cast %1257 : vector<1x1x1x128xf32> to vector<1x128xf32>
    %1259 = vector.broadcast %1258 : vector<1x128xf32> to vector<16x128xf32>
    %1260 = arith.mulf %1252, %1259 : vector<16x128xf32>
    %c4_i32_982 = arith.constant 4 : i32
    %1261 = tpu.dynamic_rotate %1254 by %c4_i32_982 dim 1 : vector<16x128xf32>, i32 -> vector<16x128xf32>
    %c11_983 = arith.constant 11 : index
    %c0_984 = arith.constant 0 : index
    %c0_985 = arith.constant 0 : index
    %c0_986 = arith.constant 0 : index
    %1262 = vector.load %arg2[%c11_983, %c0_984, %c0_985, %c0_986] : memref<12x9x1x128xf32, #tpu.memory_space<vmem>>, vector<1x1x1x128xf32>
    %1263 = vector.shape_cast %1262 : vector<1x1x1x128xf32> to vector<1x128xf32>
    %1264 = vector.broadcast %1263 : vector<1x128xf32> to vector<16x128xf32>
    %1265 = arith.mulf %1261, %1264 : vector<16x128xf32>
    %1266 = arith.addf %1260, %1265 : vector<16x128xf32>
    %c11_987 = arith.constant 11 : index
    %c1_988 = arith.constant 1 : index
    %c0_989 = arith.constant 0 : index
    %c0_990 = arith.constant 0 : index
    %1267 = vector.load %arg2[%c11_987, %c1_988, %c0_989, %c0_990] : memref<12x9x1x128xf32, #tpu.memory_space<vmem>>, vector<1x1x1x128xf32>
    %1268 = vector.shape_cast %1267 : vector<1x1x1x128xf32> to vector<1x128xf32>
    %1269 = vector.broadcast %1268 : vector<1x128xf32> to vector<16x128xf32>
    %1270 = arith.mulf %1254, %1269 : vector<16x128xf32>
    %1271 = arith.addf %1266, %1270 : vector<16x128xf32>
    %c124_i32_991 = arith.constant 124 : i32
    %1272 = tpu.dynamic_rotate %1254 by %c124_i32_991 dim 1 : vector<16x128xf32>, i32 -> vector<16x128xf32>
    %c11_992 = arith.constant 11 : index
    %c2_993 = arith.constant 2 : index
    %c0_994 = arith.constant 0 : index
    %c0_995 = arith.constant 0 : index
    %1273 = vector.load %arg2[%c11_992, %c2_993, %c0_994, %c0_995] : memref<12x9x1x128xf32, #tpu.memory_space<vmem>>, vector<1x1x1x128xf32>
    %1274 = vector.shape_cast %1273 : vector<1x1x1x128xf32> to vector<1x128xf32>
    %1275 = vector.broadcast %1274 : vector<1x128xf32> to vector<16x128xf32>
    %1276 = arith.mulf %1272, %1275 : vector<16x128xf32>
    %1277 = arith.addf %1271, %1276 : vector<16x128xf32>
    %c4_i32_996 = arith.constant 4 : i32
    %1278 = tpu.dynamic_rotate %1252 by %c4_i32_996 dim 1 : vector<16x128xf32>, i32 -> vector<16x128xf32>
    %c11_997 = arith.constant 11 : index
    %c3_998 = arith.constant 3 : index
    %c0_999 = arith.constant 0 : index
    %c0_1000 = arith.constant 0 : index
    %1279 = vector.load %arg2[%c11_997, %c3_998, %c0_999, %c0_1000] : memref<12x9x1x128xf32, #tpu.memory_space<vmem>>, vector<1x1x1x128xf32>
    %1280 = vector.shape_cast %1279 : vector<1x1x1x128xf32> to vector<1x128xf32>
    %1281 = vector.broadcast %1280 : vector<1x128xf32> to vector<16x128xf32>
    %1282 = arith.mulf %1278, %1281 : vector<16x128xf32>
    %1283 = arith.addf %1277, %1282 : vector<16x128xf32>
    %c124_i32_1001 = arith.constant 124 : i32
    %1284 = tpu.dynamic_rotate %1252 by %c124_i32_1001 dim 1 : vector<16x128xf32>, i32 -> vector<16x128xf32>
    %c11_1002 = arith.constant 11 : index
    %c5_1003 = arith.constant 5 : index
    %c0_1004 = arith.constant 0 : index
    %c0_1005 = arith.constant 0 : index
    %1285 = vector.load %arg2[%c11_1002, %c5_1003, %c0_1004, %c0_1005] : memref<12x9x1x128xf32, #tpu.memory_space<vmem>>, vector<1x1x1x128xf32>
    %1286 = vector.shape_cast %1285 : vector<1x1x1x128xf32> to vector<1x128xf32>
    %1287 = vector.broadcast %1286 : vector<1x128xf32> to vector<16x128xf32>
    %1288 = arith.mulf %1284, %1287 : vector<16x128xf32>
    %1289 = arith.addf %1283, %1288 : vector<16x128xf32>
    %c4_i32_1006 = arith.constant 4 : i32
    %1290 = tpu.dynamic_rotate %1256 by %c4_i32_1006 dim 1 : vector<16x128xf32>, i32 -> vector<16x128xf32>
    %c11_1007 = arith.constant 11 : index
    %c6_1008 = arith.constant 6 : index
    %c0_1009 = arith.constant 0 : index
    %c0_1010 = arith.constant 0 : index
    %1291 = vector.load %arg2[%c11_1007, %c6_1008, %c0_1009, %c0_1010] : memref<12x9x1x128xf32, #tpu.memory_space<vmem>>, vector<1x1x1x128xf32>
    %1292 = vector.shape_cast %1291 : vector<1x1x1x128xf32> to vector<1x128xf32>
    %1293 = vector.broadcast %1292 : vector<1x128xf32> to vector<16x128xf32>
    %1294 = arith.mulf %1290, %1293 : vector<16x128xf32>
    %1295 = arith.addf %1289, %1294 : vector<16x128xf32>
    %c11_1011 = arith.constant 11 : index
    %c7_1012 = arith.constant 7 : index
    %c0_1013 = arith.constant 0 : index
    %c0_1014 = arith.constant 0 : index
    %1296 = vector.load %arg2[%c11_1011, %c7_1012, %c0_1013, %c0_1014] : memref<12x9x1x128xf32, #tpu.memory_space<vmem>>, vector<1x1x1x128xf32>
    %1297 = vector.shape_cast %1296 : vector<1x1x1x128xf32> to vector<1x128xf32>
    %1298 = vector.broadcast %1297 : vector<1x128xf32> to vector<16x128xf32>
    %1299 = arith.mulf %1256, %1298 : vector<16x128xf32>
    %1300 = arith.addf %1295, %1299 : vector<16x128xf32>
    %c124_i32_1015 = arith.constant 124 : i32
    %1301 = tpu.dynamic_rotate %1256 by %c124_i32_1015 dim 1 : vector<16x128xf32>, i32 -> vector<16x128xf32>
    %c11_1016 = arith.constant 11 : index
    %c8_1017 = arith.constant 8 : index
    %c0_1018 = arith.constant 0 : index
    %c0_1019 = arith.constant 0 : index
    %1302 = vector.load %arg2[%c11_1016, %c8_1017, %c0_1018, %c0_1019] : memref<12x9x1x128xf32, #tpu.memory_space<vmem>>, vector<1x1x1x128xf32>
    %1303 = vector.shape_cast %1302 : vector<1x1x1x128xf32> to vector<1x128xf32>
    %1304 = vector.broadcast %1303 : vector<1x128xf32> to vector<16x128xf32>
    %1305 = arith.mulf %1301, %1304 : vector<16x128xf32>
    %1306 = arith.addf %1300, %1305 : vector<16x128xf32>
    %cst_1020 = arith.constant 0.000000e+00 : f32
    %1307 = vector.broadcast %cst_1020 : f32 to vector<16x128xf32>
    %1308 = arith.maximumf %1306, %1307 : vector<16x128xf32>
    %c1_i32_1021 = arith.constant 1 : i32
    %1309 = tpu.dynamic_rotate %1308 by %c1_i32_1021 dim 0 : vector<16x128xf32>, i32 -> vector<16x128xf32>
    %1310 = arith.mulf %1309, %5 : vector<16x128xf32>
    %c15_i32_1022 = arith.constant 15 : i32
    %1311 = tpu.dynamic_rotate %1308 by %c15_i32_1022 dim 0 : vector<16x128xf32>, i32 -> vector<16x128xf32>
    %1312 = arith.mulf %1311, %9 : vector<16x128xf32>
    %c11_1023 = arith.constant 11 : index
    %c4_1024 = arith.constant 4 : index
    %c0_1025 = arith.constant 0 : index
    %c0_1026 = arith.constant 0 : index
    %1313 = vector.load %arg3[%c11_1023, %c4_1024, %c0_1025, %c0_1026] : memref<12x9x1x128xf32, #tpu.memory_space<vmem>>, vector<1x1x1x128xf32>
    %1314 = vector.shape_cast %1313 : vector<1x1x1x128xf32> to vector<1x128xf32>
    %1315 = vector.broadcast %1314 : vector<1x128xf32> to vector<16x128xf32>
    %1316 = arith.mulf %1308, %1315 : vector<16x128xf32>
    %c4_i32_1027 = arith.constant 4 : i32
    %1317 = tpu.dynamic_rotate %1310 by %c4_i32_1027 dim 1 : vector<16x128xf32>, i32 -> vector<16x128xf32>
    %c11_1028 = arith.constant 11 : index
    %c0_1029 = arith.constant 0 : index
    %c0_1030 = arith.constant 0 : index
    %c0_1031 = arith.constant 0 : index
    %1318 = vector.load %arg3[%c11_1028, %c0_1029, %c0_1030, %c0_1031] : memref<12x9x1x128xf32, #tpu.memory_space<vmem>>, vector<1x1x1x128xf32>
    %1319 = vector.shape_cast %1318 : vector<1x1x1x128xf32> to vector<1x128xf32>
    %1320 = vector.broadcast %1319 : vector<1x128xf32> to vector<16x128xf32>
    %1321 = arith.mulf %1317, %1320 : vector<16x128xf32>
    %1322 = arith.addf %1316, %1321 : vector<16x128xf32>
    %c11_1032 = arith.constant 11 : index
    %c1_1033 = arith.constant 1 : index
    %c0_1034 = arith.constant 0 : index
    %c0_1035 = arith.constant 0 : index
    %1323 = vector.load %arg3[%c11_1032, %c1_1033, %c0_1034, %c0_1035] : memref<12x9x1x128xf32, #tpu.memory_space<vmem>>, vector<1x1x1x128xf32>
    %1324 = vector.shape_cast %1323 : vector<1x1x1x128xf32> to vector<1x128xf32>
    %1325 = vector.broadcast %1324 : vector<1x128xf32> to vector<16x128xf32>
    %1326 = arith.mulf %1310, %1325 : vector<16x128xf32>
    %1327 = arith.addf %1322, %1326 : vector<16x128xf32>
    %c124_i32_1036 = arith.constant 124 : i32
    %1328 = tpu.dynamic_rotate %1310 by %c124_i32_1036 dim 1 : vector<16x128xf32>, i32 -> vector<16x128xf32>
    %c11_1037 = arith.constant 11 : index
    %c2_1038 = arith.constant 2 : index
    %c0_1039 = arith.constant 0 : index
    %c0_1040 = arith.constant 0 : index
    %1329 = vector.load %arg3[%c11_1037, %c2_1038, %c0_1039, %c0_1040] : memref<12x9x1x128xf32, #tpu.memory_space<vmem>>, vector<1x1x1x128xf32>
    %1330 = vector.shape_cast %1329 : vector<1x1x1x128xf32> to vector<1x128xf32>
    %1331 = vector.broadcast %1330 : vector<1x128xf32> to vector<16x128xf32>
    %1332 = arith.mulf %1328, %1331 : vector<16x128xf32>
    %1333 = arith.addf %1327, %1332 : vector<16x128xf32>
    %c4_i32_1041 = arith.constant 4 : i32
    %1334 = tpu.dynamic_rotate %1308 by %c4_i32_1041 dim 1 : vector<16x128xf32>, i32 -> vector<16x128xf32>
    %c11_1042 = arith.constant 11 : index
    %c3_1043 = arith.constant 3 : index
    %c0_1044 = arith.constant 0 : index
    %c0_1045 = arith.constant 0 : index
    %1335 = vector.load %arg3[%c11_1042, %c3_1043, %c0_1044, %c0_1045] : memref<12x9x1x128xf32, #tpu.memory_space<vmem>>, vector<1x1x1x128xf32>
    %1336 = vector.shape_cast %1335 : vector<1x1x1x128xf32> to vector<1x128xf32>
    %1337 = vector.broadcast %1336 : vector<1x128xf32> to vector<16x128xf32>
    %1338 = arith.mulf %1334, %1337 : vector<16x128xf32>
    %1339 = arith.addf %1333, %1338 : vector<16x128xf32>
    %c124_i32_1046 = arith.constant 124 : i32
    %1340 = tpu.dynamic_rotate %1308 by %c124_i32_1046 dim 1 : vector<16x128xf32>, i32 -> vector<16x128xf32>
    %c11_1047 = arith.constant 11 : index
    %c5_1048 = arith.constant 5 : index
    %c0_1049 = arith.constant 0 : index
    %c0_1050 = arith.constant 0 : index
    %1341 = vector.load %arg3[%c11_1047, %c5_1048, %c0_1049, %c0_1050] : memref<12x9x1x128xf32, #tpu.memory_space<vmem>>, vector<1x1x1x128xf32>
    %1342 = vector.shape_cast %1341 : vector<1x1x1x128xf32> to vector<1x128xf32>
    %1343 = vector.broadcast %1342 : vector<1x128xf32> to vector<16x128xf32>
    %1344 = arith.mulf %1340, %1343 : vector<16x128xf32>
    %1345 = arith.addf %1339, %1344 : vector<16x128xf32>
    %c4_i32_1051 = arith.constant 4 : i32
    %1346 = tpu.dynamic_rotate %1312 by %c4_i32_1051 dim 1 : vector<16x128xf32>, i32 -> vector<16x128xf32>
    %c11_1052 = arith.constant 11 : index
    %c6_1053 = arith.constant 6 : index
    %c0_1054 = arith.constant 0 : index
    %c0_1055 = arith.constant 0 : index
    %1347 = vector.load %arg3[%c11_1052, %c6_1053, %c0_1054, %c0_1055] : memref<12x9x1x128xf32, #tpu.memory_space<vmem>>, vector<1x1x1x128xf32>
    %1348 = vector.shape_cast %1347 : vector<1x1x1x128xf32> to vector<1x128xf32>
    %1349 = vector.broadcast %1348 : vector<1x128xf32> to vector<16x128xf32>
    %1350 = arith.mulf %1346, %1349 : vector<16x128xf32>
    %1351 = arith.addf %1345, %1350 : vector<16x128xf32>
    %c11_1056 = arith.constant 11 : index
    %c7_1057 = arith.constant 7 : index
    %c0_1058 = arith.constant 0 : index
    %c0_1059 = arith.constant 0 : index
    %1352 = vector.load %arg3[%c11_1056, %c7_1057, %c0_1058, %c0_1059] : memref<12x9x1x128xf32, #tpu.memory_space<vmem>>, vector<1x1x1x128xf32>
    %1353 = vector.shape_cast %1352 : vector<1x1x1x128xf32> to vector<1x128xf32>
    %1354 = vector.broadcast %1353 : vector<1x128xf32> to vector<16x128xf32>
    %1355 = arith.mulf %1312, %1354 : vector<16x128xf32>
    %1356 = arith.addf %1351, %1355 : vector<16x128xf32>
    %c124_i32_1060 = arith.constant 124 : i32
    %1357 = tpu.dynamic_rotate %1312 by %c124_i32_1060 dim 1 : vector<16x128xf32>, i32 -> vector<16x128xf32>
    %c11_1061 = arith.constant 11 : index
    %c8_1062 = arith.constant 8 : index
    %c0_1063 = arith.constant 0 : index
    %c0_1064 = arith.constant 0 : index
    %1358 = vector.load %arg3[%c11_1061, %c8_1062, %c0_1063, %c0_1064] : memref<12x9x1x128xf32, #tpu.memory_space<vmem>>, vector<1x1x1x128xf32>
    %1359 = vector.shape_cast %1358 : vector<1x1x1x128xf32> to vector<1x128xf32>
    %1360 = vector.broadcast %1359 : vector<1x128xf32> to vector<16x128xf32>
    %1361 = arith.mulf %1357, %1360 : vector<16x128xf32>
    %1362 = arith.addf %1356, %1361 : vector<16x128xf32>
    %1363 = arith.addf %1362, %1252 : vector<16x128xf32>
    %cst_1065 = arith.constant 0.000000e+00 : f32
    %1364 = vector.broadcast %cst_1065 : f32 to vector<16x128xf32>
    %1365 = arith.maximumf %1363, %1364 : vector<16x128xf32>
    %1366 = arith.addf %1365, %0 : vector<16x128xf32>
    %c0_1066 = arith.constant 0 : index
    %c0_1067 = arith.constant 0 : index
    %1367 = vector.load %arg4[%c0_1066, %c0_1067] : memref<16x128xf32, #tpu.memory_space<vmem>>, vector<16x128xf32>
    tpu.vector_store %arg4[%c0_1066, %c0_1067], %1366 {strides = array<i32>} : memref<16x128xf32, #tpu.memory_space<vmem>>, vector<16x128xf32>,
    return
  }
  func.func @transform_0(%arg0: i32) -> (i32, i32) {
    %c0_i32 = arith.constant 0 : i32
    %c0_i32_0 = arith.constant 0 : i32
    %c0_i32_1 = arith.constant 0 : i32
    return %c0_i32, %c0_i32_0 : i32, i32
  }
  func.func @transform_1(%arg0: i32) -> (i32, i32, i32, i32) {
    %c0_i32 = arith.constant 0 : i32
    %c0_i32_0 = arith.constant 0 : i32
    %c0_i32_1 = arith.constant 0 : i32
    %c0_i32_2 = arith.constant 0 : i32
    %c0_i32_3 = arith.constant 0 : i32
    return %c0_i32, %c0_i32_0, %c0_i32_1, %c0_i32_2 : i32, i32, i32, i32
  }
  func.func @transform_2(%arg0: i32) -> (i32, i32, i32, i32) {
    %c0_i32 = arith.constant 0 : i32
    %c0_i32_0 = arith.constant 0 : i32
    %c0_i32_1 = arith.constant 0 : i32
    %c0_i32_2 = arith.constant 0 : i32
    %c0_i32_3 = arith.constant 0 : i32
    return %c0_i32, %c0_i32_0, %c0_i32_1, %c0_i32_2 : i32, i32, i32, i32
  }
  func.func @transform_3(%arg0: i32) -> (i32, i32) {
    %c0_i32 = arith.constant 0 : i32
    %c0_i32_0 = arith.constant 0 : i32
    %c0_i32_1 = arith.constant 0 : i32
    return %c0_i32, %c0_i32_0 : i32, i32
  }
}

</mosaic_0001>

<bundles_post_ra>
// kernel: tpu_custom_call.1
= control target key start
LH: loop header
LB: loop body
LE: loop exit
PB: predicated region body
PF: predicated region fallthrough
CT: control target
= control target key end

     0   :  { %8 = vsyncpa [#allocation3], 0  ;;  %s4721_s0 = inlined_call_operand.hbm [shape: f32[16,128], index: 0, kind: input, shape index: {}]   ;;  %s4722_s1 = inlined_call_operand.hbm [shape: f32[12,9,1,128], index: 1, kind: input, shape index: {}]   ;;  %s4723_s2 = inlined_call_operand.hbm [shape: f32[12,9,1,128], index: 2, kind: input, shape index: {}]   ;;  %s4724_s3 = inlined_call_operand.hbm [shape: f32[16,128], index: 3, kind: output, shape index: {}]  }
   0x1   :  { %9 = vsyncpa [#allocation6], 0 }
   0x2   :  { %10 = vsyncpa [#allocation4], 0  ;;  %s3900_s12 = smov [#allocation5]   ;;  %s3806_s16 = scalar_lea.hbm %s4722_s1, 1728 }
   0x3   :  { %s28_s13 = sshll.u32 %s3900_s12, 4  ;;  %p3807_p0 = scmp.ne.s32.totalorder %s4722_s1, %s3806_s16  ;;  %s29_s13 = int_to_ptr.vmem [resolvable:$true] %s28_s13 }
   0x4   :  { %p3810_p1 = scmp.lt.u32.totalorder %s3806_s16, %s4722_s1 }
   0x6   :  { %p3812_p2 = pnand %p3810_p1, %p3807_p0 }
   0x8   :  { %3815 = shalt.err (!%p3812_p2)
}
   0x9   :  { %s3816_s21 = scalar_lea.vmem %s29_s13, 1728  ;;  %p3821_p4 = scmp.lt.s32.totalorder %s29_s13, %s29_s13 }
   0xa   :  { %p3817_p3 = scmp.ne.s32.totalorder %s29_s13, %s3816_s21  ;;  %p3822_p5 = scmp.lt.s32.totalorder %s3816_s21, %s3816_s21 }
   0xc   :  { %p3823_p6 = por %p3822_p5, %p3821_p4 }
   0xe   :  { %p3824_p7 = pnand %p3823_p6, %p3817_p3 }
  0x10   :  { %3827 = shalt.err (!%p3824_p7)
}
  0x11   :  { %s3901_s22 = smov 16   ;;  %s3902_s23 = smov 1  }
  0x12   :  { %34 = dma.hbm_to_vmem [thread:$0]  %s4722_s1, 1728, %s29_s13, [#allocation6], %s3901_s22, %s3901_s22, %s3902_s23  }
  0x13   :  { %s3903_s26 = smov [#allocation2]   ;;  %s3828_s30 = scalar_lea.hbm %s4721_s0, 256 }
  0x14   :  { %s16_s27 = sshll.u32 %s3903_s26, 4  ;;  %p3829_p8 = scmp.ne.s32.totalorder %s4721_s0, %s3828_s30  ;;  %s17_s27 = int_to_ptr.vmem [resolvable:$true] %s16_s27 }
  0x15   :  { %p3832_p9 = scmp.lt.u32.totalorder %s3828_s30, %s4721_s0 }
  0x17   :  { %p3834_p10 = pnand %p3832_p9, %p3829_p8 }
  0x19   :  { %3837 = shalt.err (!%p3834_p10)
}
  0x1a   :  { %s3838_s8 = scalar_lea.vmem %s17_s27, 256  ;;  %p3843_p12 = scmp.lt.s32.totalorder %s17_s27, %s17_s27 }
  0x1b   :  { %p3839_p11 = scmp.ne.s32.totalorder %s17_s27, %s3838_s8  ;;  %p3844_p13 = scmp.lt.s32.totalorder %s3838_s8, %s3838_s8 }
  0x1d   :  { %p3845_p0 = por %p3844_p13, %p3843_p12 }
  0x1f   :  { %p3846_p1 = pnand %p3845_p0, %p3839_p11 }
  0x21   :  { %3849 = shalt.err (!%p3846_p1)
}
  0x22   :  { %s3904_s1 = smov 128   ;;  %s3905_s9 = smov 8  }
  0x23   :  { %22 = dma.hbm_to_vmem [thread:$0]  %s4721_s0, 256, %s17_s27, [#allocation3], %s3904_s1, %s3904_s1, %s3905_s9  }
  0x24   :  { %s3906_s12 = smov [#allocation7]   ;;  %s3850_s16 = scalar_lea.hbm %s4723_s2, 1728 }
  0x25   :  { %s40_s13 = sshll.u32 %s3906_s12, 4  ;;  %p3851_p2 = scmp.ne.s32.totalorder %s4723_s2, %s3850_s16  ;;  %s41_s13 = int_to_ptr.vmem [resolvable:$true] %s40_s13 }
  0x26   :  { %p3854_p3 = scmp.lt.u32.totalorder %s3850_s16, %s4723_s2 }
  0x28   :  { %p3856_p4 = pnand %p3854_p3, %p3851_p2 }
  0x2a   :  { %3859 = shalt.err (!%p3856_p4)
}
  0x2b   :  { %s3860_s21 = scalar_lea.vmem %s41_s13, 1728  ;;  %p3865_p6 = scmp.lt.s32.totalorder %s41_s13, %s41_s13 }
  0x2c   :  { %p3861_p5 = scmp.ne.s32.totalorder %s41_s13, %s3860_s21  ;;  %p3866_p7 = scmp.lt.s32.totalorder %s3860_s21, %s3860_s21 }
  0x2e   :  { %p3867_p8 = por %p3866_p7, %p3865_p6 }
  0x30   :  { %p3868_p9 = pnand %p3867_p8, %p3861_p5 }
  0x32   :  { %3871 = shalt.err (!%p3868_p9)
}
  0x33   :  { %46 = dma.hbm_to_vmem [thread:$0]  %s4723_s2, 1728, %s41_s13, [#allocation6], %s3901_s22, %s3901_s22, %s3902_s23  }
  0x34   :  { %3894 = dma.done.wait [#allocation3], 256  }
  0x35   :  { %3895 = vsyncadd [#allocation3], 4294967040 }
  0x36   :  { %3896 = dma.done.wait [#allocation6], 3456  }
  0x37   :  { %3897 = vsyncadd [#allocation6], 4294963840  ;;  %v58_v0 = vlaneseq  ;;  %v3979_v2 = vld [vmem:[#allocation2] sm:$0xff]  ;;  %v3981_v3 = vld [vmem:[#allocation2 + $0x8] sm:$0xff]  ;;  %v3907_v6 = vmov 0.0   ;;  %s3908_s2 = smov 124  }
  0x38   :  { %v73_v4 = vrot.slane %v3979_v2, 7  ;;  %v74_v5 = vrot.slane %v3981_v3, 7  ;;  %s3909_s22 = smov 4   ;;  %v80_v12 = vrot.slane %v3979_v2, 1  ;;  %v81_v13 = vrot.slane %v3981_v3, 1  ;;  %s3910_s23 = smov [#allocation8]  }
  0x39   :  { %v3976_v1 = vshrl.u32 %v58_v0, 7  ;;  %v3577_v18 = vld [vmem:[#allocation5 + $0x4] ss:$0 sm:$0xff]  ;;  %v3578_v19 = vld [vmem:[#allocation5] ss:$0 sm:$0xff]  ;;  %s3562_s25 = sshll.u32 %s3910_s23, 4  ;;  %s3563_s25 = int_to_ptr.vmem [resolvable:$true] %s3562_s25 }
  0x3a   :  { %v96_v20 = vmul.f32 %v3577_v18, %v3981_v3  ;;  %v3579_v21 = vld [vmem:[#allocation5 + $0x1] ss:$0 sm:$0xff]  ;;  %v95_v27 = vmul.f32 %v3577_v18, %v3979_v2  ;;  %v3580_v32 = vld [vmem:[#allocation5 + $0x2] ss:$0 sm:$0xff]  ;;  %v3581_v40 = vld [vmem:[#allocation5 + $0x3] ss:$0 sm:$0xff]  ;;  %p3877_p11 = scmp.lt.s32.totalorder %s3563_s25, %s3563_s25 }
  0x3b   :  { %vm61_vm0 = vcmp.gt.s32.totalorder %v3976_v1, 0  ;;  %vm75_vm1 = vcmp.lt.s32.totalorder %v3976_v1, 1  ;;  %v60_v11 = vadd.s32 8, %v3976_v1  ;;  %vm82_vm3 = vcmp.lt.s32.totalorder %v3976_v1, 7  ;;  %v3582_v41 = vld [vmem:[#allocation5 + $0x5] ss:$0 sm:$0xff] }
  0x3c   :  { %v3986_v7 = vsel %vm61_vm0, 1.0, %v3907_v6  ;;  %v76_v8 = vsel %vm75_vm1, %v73_v4, %v74_v5  ;;  %v77_v9 = vsel %vm75_vm1, %v74_v5, %v73_v4  ;;  %v84_v15 = vsel %vm82_vm3, %v81_v13, %v80_v12  ;;  %v3584_v47 = vld [vmem:[#allocation5 + $0x7] ss:$0 sm:$0xff]  ;;  %v3583_v52 = vld [vmem:[#allocation5 + $0x6] ss:$0 sm:$0xff]  ;;  %s3872_s26 = scalar_lea.vmem %s3563_s25, 256 }
  0x3d   :  { %126 = vrot.lane.b32.xlu1 %v76_v8, %s3908_s2  ;;  %99 = vrot.lane.b32.xlu0 %v76_v8, %s3909_s22  ;;  %v78_v10 = vmul.f32 %v3986_v7, %v77_v9  ;;  %vm68_vm2 = vcmp.lt.s32.totalorder %v60_v11, 15  ;;  %v83_v17 = vsel %vm82_vm3, %v80_v12, %v81_v13  ;;  %v121_v25 = vmul.f32 %v3579_v21, %v76_v8  ;;  %v3585_v62 = vld [vmem:[#allocation5 + $0x8] ss:$0 sm:$0xff]  ;;  %p3873_p10 = scmp.ne.s32.totalorder %s3563_s25, %s3872_s26  ;;  %p3878_p12 = scmp.lt.s32.totalorder %s3872_s26, %s3872_s26 }
  0x3e   :  { %v4005_v14 = vsel %vm68_vm2, 1.0, %v3907_v6  ;;  %v196_v54 = vmul.f32 %v3584_v47, %v83_v17 }
  0x3f   :  { %v86_v16 = vmul.f32 %v4005_v14, %v84_v15  ;;  %v120_v31 = vmul.f32 %v3579_v21, %v78_v10  ;;  %p3879_p13 = por %p3878_p12, %p3877_p11 }
  0x41   :  { %142 = vrot.lane.b32.xlu1 %v3981_v3, %s3909_s22  ;;  %97 = vrot.lane.b32.xlu0 %v78_v10, %s3909_s22  ;;  %v197_v55 = vmul.f32 %v3584_v47, %v86_v16  ;;  %p3880_p0 = pnand %p3879_p13, %p3873_p10 }
  0x45   :  { %124 = vrot.lane.b32.xlu1 %v78_v10, %s3908_s2  ;;  %140 = vrot.lane.b32.xlu0 %v3979_v2, %s3909_s22 }
  0x49   :  { %158 = vrot.lane.b32.xlu1 %v3981_v3, %s3908_s2  ;;  %156 = vrot.lane.b32.xlu0 %v3979_v2, %s3908_s2 }
  0x4d   :  { %174 = vrot.lane.b32.xlu1 %v86_v16, %s3909_s22  ;;  %172 = vrot.lane.b32.xlu0 %v83_v17, %s3909_s22 }
  0x51   :  { %202 = vrot.lane.b32.xlu1 %v86_v16, %s3908_s2  ;;  %200 = vrot.lane.b32.xlu0 %v83_v17, %s3908_s2 }
  0xaf   :  { %v127_v22 = vpop.permute.xlu1 %126  ;;  %v100_v23 = vpop.permute.xlu0 %99 }
  0xb0   :  { %v109_v24 = vmul.f32 %v3578_v19, %v100_v23  ;;  %v137_v37 = vmul.f32 %v3580_v32, %v127_v22 }
  0xb2   :  { %v111_v26 = vadd.f32 %v109_v24, %v96_v20 }
  0xb3   :  { %v143_v28 = vpop.permute.xlu1 %142  ;;  %v98_v29 = vpop.permute.xlu0 %97 }
  0xb4   :  { %v108_v30 = vmul.f32 %v3578_v19, %v98_v29  ;;  %v123_v33 = vadd.f32 %v121_v25, %v111_v26  ;;  %v153_v48 = vmul.f32 %v3581_v40, %v143_v28  ;;  %v3586_v28 = vld [vmem:[#allocation7 + $0x4] ss:$0 sm:$0xff]  ;;  %v3587_v29 = vld [vmem:[#allocation7] ss:$0 sm:$0xff] }
  0xb6   :  { %v110_v34 = vadd.f32 %v108_v30, %v95_v27  ;;  %v139_v42 = vadd.f32 %v137_v37, %v123_v33  ;;  %v3588_v30 = vld [vmem:[#allocation7 + $0x1] ss:$0 sm:$0xff]  ;;  %v3589_v37 = vld [vmem:[#allocation7 + $0x2] ss:$0 sm:$0xff] }
  0xb7   :  { %v125_v35 = vpop.permute.xlu1 %124  ;;  %v141_v36 = vpop.permute.xlu0 %140 }
  0xb8   :  { %v122_v38 = vadd.f32 %v120_v31, %v110_v34  ;;  %v136_v39 = vmul.f32 %v3580_v32, %v125_v35  ;;  %v152_v44 = vmul.f32 %v3581_v40, %v141_v36  ;;  %v155_v53 = vadd.f32 %v153_v48, %v139_v42  ;;  %v3590_v40 = vld [vmem:[#allocation7 + $0x3] ss:$0 sm:$0xff] }
  0xba   :  { %v138_v43 = vadd.f32 %v136_v39, %v122_v38 }
  0xbb   :  { %v159_v45 = vpop.permute.xlu1 %158  ;;  %v157_v46 = vpop.permute.xlu0 %156 }
  0xbc   :  { %v154_v49 = vadd.f32 %v152_v44, %v138_v43  ;;  %v169_v50 = vmul.f32 %v3582_v41, %v159_v45  ;;  %v168_v51 = vmul.f32 %v3582_v41, %v157_v46 }
  0xbe   :  { %v171_v58 = vadd.f32 %v169_v50, %v155_v53  ;;  %v170_v59 = vadd.f32 %v168_v51, %v154_v49  ;;  %v3591_v49 = vld [vmem:[#allocation7 + $0x5] ss:$0 sm:$0xff] }
  0xbf   :  { %v175_v56 = vpop.permute.xlu1 %174  ;;  %v173_v57 = vpop.permute.xlu0 %172 }
  0xc0   :  { %v185_v60 = vmul.f32 %v3583_v52, %v175_v56  ;;  %v184_v61 = vmul.f32 %v3583_v52, %v173_v57 }
  0xc2   :  { %v187_v63 = vadd.f32 %v185_v60, %v171_v58  ;;  %v186_v0 = vadd.f32 %v184_v61, %v170_v59  ;;  %v3592_v60 = vld [vmem:[#allocation7 + $0x6] ss:$0 sm:$0xff] }
  0xc3   :  { %v203_v4 = vpop.permute.xlu1 %202  ;;  %v201_v5 = vpop.permute.xlu0 %200 }
  0xc4   :  { %v199_v6 = vadd.f32 %v197_v55, %v187_v63  ;;  %v213_v8 = vmul.f32 %v3585_v62, %v203_v4  ;;  %v198_v9 = vadd.f32 %v196_v54, %v186_v0  ;;  %v212_v10 = vmul.f32 %v3585_v62, %v201_v5  ;;  %v3593_v62 = vld [vmem:[#allocation7 + $0x7] ss:$0 sm:$0xff] }
  0xc6   :  { %v215_v11 = vadd.f32 %v213_v8, %v199_v6  ;;  %v214_v12 = vadd.f32 %v212_v10, %v198_v9  ;;  %v3594_v8 = vld [vmem:[#allocation7 + $0x8] ss:$0 sm:$0xff] }
  0xc8   :  { %v217_v13 = vmax.f32 %v215_v11, 0.0  ;;  %v216_v15 = vmax.f32 %v214_v12, 0.0 }
  0xca   :  { %283 = vrot.lane.b32.xlu0 %v216_v15, %s3909_s22  ;;  %285 = vrot.lane.b32.xlu1 %v217_v13, %s3909_s22  ;;  %v218_v16 = vrot.slane %v216_v15, 7  ;;  %v219_v17 = vrot.slane %v217_v13, 7  ;;  %v224_v18 = vrot.slane %v216_v15, 1  ;;  %v225_v19 = vrot.slane %v217_v13, 1 }
  0xcb   :  { %v239_v32 = vmul.f32 %v3586_v28, %v217_v13  ;;  %v238_v35 = vmul.f32 %v3586_v28, %v216_v15 }
  0xcc   :  { %v220_v20 = vsel %vm75_vm1, %v218_v16, %v219_v17  ;;  %v221_v21 = vsel %vm75_vm1, %v219_v17, %v218_v16  ;;  %v227_v22 = vsel %vm82_vm3, %v225_v19, %v224_v18  ;;  %v226_v23 = vsel %vm82_vm3, %v224_v18, %v225_v19 }
  0xcd   :  { %v222_v24 = vmul.f32 %v3986_v7, %v221_v21  ;;  %v229_v25 = vmul.f32 %v4005_v14, %v227_v22  ;;  %v264_v38 = vmul.f32 %v3588_v30, %v220_v20  ;;  %v339_v11 = vmul.f32 %v3593_v62, %v226_v23 }
  0xce   :  { %242 = vrot.lane.b32.xlu1 %v220_v20, %s3909_s22 }
  0xcf   :  { %240 = vrot.lane.b32.xlu0 %v222_v24, %s3909_s22  ;;  %v263_v43 = vmul.f32 %v3588_v30, %v222_v24  ;;  %v340_v9 = vmul.f32 %v3593_v62, %v229_v25 }
  0xd2   :  { %269 = vrot.lane.b32.xlu1 %v220_v20, %s3908_s2 }
  0xd3   :  { %267 = vrot.lane.b32.xlu0 %v222_v24, %s3908_s2 }
  0xd6   :  { %301 = vrot.lane.b32.xlu1 %v217_v13, %s3908_s2 }
  0xd7   :  { %299 = vrot.lane.b32.xlu0 %v216_v15, %s3908_s2 }
  0xda   :  { %317 = vrot.lane.b32.xlu1 %v229_v25, %s3909_s22 }
  0xdb   :  { %315 = vrot.lane.b32.xlu0 %v226_v23, %s3909_s22 }
  0xde   :  { %345 = vrot.lane.b32.xlu1 %v229_v25, %s3908_s2 }
  0xdf   :  { %343 = vrot.lane.b32.xlu0 %v226_v23, %s3908_s2 }
 0x13c   :  { %v284_v26 = vpop.permute.xlu0 %283  ;;  %v286_v27 = vpop.permute.xlu1 %285 }
 0x13d   :  { %v296_v50 = vmul.f32 %v3590_v40, %v286_v27  ;;  %v295_v52 = vmul.f32 %v3590_v40, %v284_v26 }
 0x140   :  { %v243_v31 = vpop.permute.xlu1 %242 }
 0x141   :  { %v252_v33 = vmul.f32 %v3587_v29, %v243_v31  ;;  %v241_v34 = vpop.permute.xlu0 %240 }
 0x142   :  { %v251_v36 = vmul.f32 %v3587_v29, %v241_v34 }
 0x143   :  { %v254_v39 = vadd.f32 %v252_v33, %v239_v32 }
 0x144   :  { %v253_v41 = vadd.f32 %v251_v36, %v238_v35  ;;  %v270_v42 = vpop.permute.xlu1 %269  ;;  %v3595_v36 = vld [vmem:[#allocation5 + $0xd] ss:$0 sm:$0xff] }
 0x145   :  { %v266_v44 = vadd.f32 %v264_v38, %v254_v39  ;;  %v280_v45 = vmul.f32 %v3589_v37, %v270_v42  ;;  %v268_v46 = vpop.permute.xlu0 %267  ;;  %v3597_v38 = vld [vmem:[#allocation5 + $0xa] ss:$0 sm:$0xff] }
 0x146   :  { %v265_v47 = vadd.f32 %v263_v43, %v253_v41  ;;  %v279_v48 = vmul.f32 %v3589_v37, %v268_v46  ;;  %v3596_v37 = vld [vmem:[#allocation5 + $0x9] ss:$0 sm:$0xff]  ;;  %v3598_v43 = vld [vmem:[#allocation5 + $0xb] ss:$0 sm:$0xff] }
 0x147   :  { %v282_v51 = vadd.f32 %v280_v45, %v266_v44 }
 0x148   :  { %v281_v53 = vadd.f32 %v279_v48, %v265_v47  ;;  %v302_v54 = vpop.permute.xlu1 %301  ;;  %v3599_v48 = vld [vmem:[#allocation5 + $0xc] ss:$0 sm:$0xff] }
 0x149   :  { %v298_v55 = vadd.f32 %v296_v50, %v282_v51  ;;  %v312_v56 = vmul.f32 %v3591_v49, %v302_v54  ;;  %v300_v57 = vpop.permute.xlu0 %299 }
 0x14a   :  { %v297_v58 = vadd.f32 %v295_v52, %v281_v53  ;;  %v311_v59 = vmul.f32 %v3591_v49, %v300_v57 }
 0x14b   :  { %v314_v63 = vadd.f32 %v312_v56, %v298_v55  ;;  %v3600_v55 = vld [vmem:[#allocation5 + $0xe] ss:$0 sm:$0xff] }
 0x14c   :  { %v318_v61 = vpop.permute.xlu1 %317  ;;  %v313_v5 = vadd.f32 %v311_v59, %v297_v58 }
 0x14d   :  { %v328_v0 = vmul.f32 %v3592_v60, %v318_v61  ;;  %v316_v4 = vpop.permute.xlu0 %315 }
 0x14e   :  { %v327_v6 = vmul.f32 %v3592_v60, %v316_v4 }
 0x14f   :  { %v330_v10 = vadd.f32 %v328_v0, %v314_v63 }
 0x150   :  { %v329_v12 = vadd.f32 %v327_v6, %v313_v5  ;;  %v346_v13 = vpop.permute.xlu1 %345  ;;  %v3601_v5 = vld [vmem:[#allocation5 + $0xf] ss:$0 sm:$0xff] }
 0x151   :  { %v342_v15 = vadd.f32 %v340_v9, %v330_v10  ;;  %v356_v16 = vmul.f32 %v3594_v8, %v346_v13  ;;  %v344_v17 = vpop.permute.xlu0 %343 }
 0x152   :  { %v341_v18 = vadd.f32 %v339_v11, %v329_v12  ;;  %v355_v19 = vmul.f32 %v3594_v8, %v344_v17  ;;  %v3602_v12 = vld [vmem:[#allocation5 + $0x10] ss:$0 sm:$0xff] }
 0x153   :  { %v358_v20 = vadd.f32 %v356_v16, %v342_v15  ;;  %v3603_v15 = vld [vmem:[#allocation5 + $0x11] ss:$0 sm:$0xff] }
 0x154   :  { %v357_v21 = vadd.f32 %v355_v19, %v341_v18 }
 0x155   :  { %v360_v22 = vadd.f32 %v358_v20, %v3981_v3 }
 0x156   :  { %v359_v24 = vadd.f32 %v357_v21, %v3979_v2 }
 0x157   :  { %v4046_v26 = vmax.f32 %v360_v22, 0.0 }
 0x158   :  { %v4048_v27 = vmax.f32 %v359_v24, 0.0 }
 0x159   :  { %431 = vrot.lane.b32.xlu1 %v4046_v26, %s3909_s22  ;;  %v364_v23 = vrot.slane %v4046_v26, 7  ;;  %v370_v30 = vrot.slane %v4046_v26, 1  ;;  %v384_v40 = vmul.f32 %v3595_v36, %v4046_v26 }
 0x15a   :  { %429 = vrot.lane.b32.xlu0 %v4048_v27, %s3909_s22  ;;  %v363_v25 = vrot.slane %v4048_v27, 7  ;;  %v369_v29 = vrot.slane %v4048_v27, 1  ;;  %v383_v46 = vmul.f32 %v3595_v36, %v4048_v27 }
 0x15c   :  { %v365_v28 = vsel %vm75_vm1, %v363_v25, %v364_v23  ;;  %v366_v2 = vsel %vm75_vm1, %v364_v23, %v363_v25  ;;  %v372_v31 = vsel %vm82_vm3, %v370_v30, %v369_v29  ;;  %v371_v33 = vsel %vm82_vm3, %v369_v29, %v370_v30 }
 0x15d   :  { %387 = vrot.lane.b32.xlu1 %v365_v28, %s3909_s22  ;;  %v367_v3 = vmul.f32 %v3986_v7, %v366_v2  ;;  %v374_v32 = vmul.f32 %v4005_v14, %v372_v31  ;;  %v410_v44 = vmul.f32 %v3597_v38, %v365_v28  ;;  %v485_v21 = vmul.f32 %v3602_v12, %v371_v33 }
 0x15f   :  { %385 = vrot.lane.b32.xlu0 %v367_v3, %s3909_s22  ;;  %v409_v53 = vmul.f32 %v3597_v38, %v367_v3  ;;  %v486_v16 = vmul.f32 %v3602_v12, %v374_v32 }
 0x161   :  { %415 = vrot.lane.b32.xlu1 %v365_v28, %s3908_s2 }
 0x163   :  { %413 = vrot.lane.b32.xlu0 %v367_v3, %s3908_s2 }
 0x165   :  { %447 = vrot.lane.b32.xlu1 %v4046_v26, %s3908_s2 }
 0x167   :  { %445 = vrot.lane.b32.xlu0 %v4048_v27, %s3908_s2 }
 0x169   :  { %463 = vrot.lane.b32.xlu1 %v374_v32, %s3909_s22 }
 0x16b   :  { %461 = vrot.lane.b32.xlu0 %v371_v33, %s3909_s22 }
 0x16d   :  { %491 = vrot.lane.b32.xlu1 %v374_v32, %s3908_s2 }
 0x16f   :  { %489 = vrot.lane.b32.xlu0 %v371_v33, %s3908_s2 }
 0x1cb   :  { %v432_v34 = vpop.permute.xlu1 %431 }
 0x1cc   :  { %v430_v35 = vpop.permute.xlu0 %429  ;;  %v442_v56 = vmul.f32 %v3599_v48, %v432_v34 }
 0x1cd   :  { %v441_v61 = vmul.f32 %v3599_v48, %v430_v35 }
 0x1cf   :  { %v388_v39 = vpop.permute.xlu1 %387 }
 0x1d0   :  { %v398_v41 = vmul.f32 %v3596_v37, %v388_v39 }
 0x1d1   :  { %v386_v42 = vpop.permute.xlu0 %385 }
 0x1d2   :  { %v400_v45 = vadd.f32 %v398_v41, %v384_v40  ;;  %v397_v47 = vmul.f32 %v3596_v37, %v386_v42 }
 0x1d3   :  { %v416_v49 = vpop.permute.xlu1 %415 }
 0x1d4   :  { %v399_v50 = vadd.f32 %v397_v47, %v383_v46  ;;  %v412_v51 = vadd.f32 %v410_v44, %v400_v45  ;;  %v426_v52 = vmul.f32 %v3598_v43, %v416_v49  ;;  %v3604_v44 = vld [vmem:[#allocation7 + $0xd] ss:$0 sm:$0xff]  ;;  %v3605_v45 = vld [vmem:[#allocation7 + $0x9] ss:$0 sm:$0xff]  ;;  %v3606_v46 = vld [vmem:[#allocation7 + $0xa] ss:$0 sm:$0xff] }
 0x1d5   :  { %v414_v54 = vpop.permute.xlu0 %413 }
 0x1d6   :  { %v428_v57 = vadd.f32 %v426_v52, %v412_v51  ;;  %v411_v58 = vadd.f32 %v409_v53, %v399_v50  ;;  %v425_v59 = vmul.f32 %v3598_v43, %v414_v54  ;;  %v3607_v51 = vld [vmem:[#allocation7 + $0xb] ss:$0 sm:$0xff] }
 0x1d7   :  { %v448_v60 = vpop.permute.xlu1 %447 }
 0x1d8   :  { %v427_v62 = vadd.f32 %v425_v59, %v411_v58  ;;  %v444_v63 = vadd.f32 %v442_v56, %v428_v57  ;;  %v458_v0 = vmul.f32 %v3600_v55, %v448_v60  ;;  %v3608_v56 = vld [vmem:[#allocation7 + $0xc] ss:$0 sm:$0xff] }
 0x1d9   :  { %v446_v4 = vpop.permute.xlu0 %445 }
 0x1da   :  { %v443_v6 = vadd.f32 %v441_v61, %v427_v62  ;;  %v457_v8 = vmul.f32 %v3600_v55, %v446_v4  ;;  %v460_v10 = vadd.f32 %v458_v0, %v444_v63  ;;  %v3609_v63 = vld [vmem:[#allocation7 + $0xe] ss:$0 sm:$0xff] }
 0x1db   :  { %v464_v9 = vpop.permute.xlu1 %463 }
 0x1dc   :  { %v474_v11 = vmul.f32 %v3601_v5, %v464_v9  ;;  %v459_v17 = vadd.f32 %v457_v8, %v443_v6 }
 0x1dd   :  { %v462_v13 = vpop.permute.xlu0 %461 }
 0x1de   :  { %v476_v18 = vadd.f32 %v474_v11, %v460_v10  ;;  %v473_v19 = vmul.f32 %v3601_v5, %v462_v13 }
 0x1df   :  { %v492_v20 = vpop.permute.xlu1 %491 }
 0x1e0   :  { %v475_v22 = vadd.f32 %v473_v19, %v459_v17  ;;  %v488_v24 = vadd.f32 %v486_v16, %v476_v18  ;;  %v502_v23 = vmul.f32 %v3603_v15, %v492_v20 }
 0x1e1   :  { %v490_v25 = vpop.permute.xlu0 %489 }
 0x1e2   :  { %v504_v28 = vadd.f32 %v502_v23, %v488_v24  ;;  %v487_v2 = vadd.f32 %v485_v21, %v475_v22  ;;  %v501_v3 = vmul.f32 %v3603_v15, %v490_v25  ;;  %v3610_v15 = vld [vmem:[#allocation7 + $0xf] ss:$0 sm:$0xff]  ;;  %v3611_v21 = vld [vmem:[#allocation7 + $0x10] ss:$0 sm:$0xff]  ;;  %v3612_v24 = vld [vmem:[#allocation7 + $0x11] ss:$0 sm:$0xff] }
 0x1e4   :  { %v506_v29 = vmax.f32 %v504_v28, 0.0  ;;  %v503_v30 = vadd.f32 %v501_v3, %v487_v2 }
 0x1e6   :  { %v505_v31 = vmax.f32 %v503_v30, 0.0  ;;  %575 = vrot.lane.b32.xlu1 %v506_v29, %s3909_s22  ;;  %v508_v34 = vrot.slane %v506_v29, 7  ;;  %v514_v36 = vrot.slane %v506_v29, 1  ;;  %v528_v48 = vmul.f32 %v3604_v44, %v506_v29 }
 0x1e8   :  { %573 = vrot.lane.b32.xlu0 %v505_v31, %s3909_s22  ;;  %v507_v32 = vrot.slane %v505_v31, 7  ;;  %v513_v35 = vrot.slane %v505_v31, 1  ;;  %v527_v54 = vmul.f32 %v3604_v44, %v505_v31 }
 0x1ea   :  { %v509_v33 = vsel %vm75_vm1, %v507_v32, %v508_v34  ;;  %v510_v37 = vsel %vm75_vm1, %v508_v34, %v507_v32  ;;  %v516_v38 = vsel %vm82_vm3, %v514_v36, %v513_v35  ;;  %v515_v39 = vsel %vm82_vm3, %v513_v35, %v514_v36 }
 0x1eb   :  { %531 = vrot.lane.b32.xlu1 %v509_v33, %s3909_s22  ;;  %v511_v40 = vmul.f32 %v3986_v7, %v510_v37  ;;  %v518_v41 = vmul.f32 %v4005_v14, %v516_v38  ;;  %v554_v52 = vmul.f32 %v3606_v46, %v509_v33 }
 0x1ed   :  { %529 = vrot.lane.b32.xlu0 %v511_v40, %s3909_s22  ;;  %v553_v61 = vmul.f32 %v3606_v46, %v511_v40  ;;  %v630_v23 = vmul.f32 %v3611_v21, %v518_v41 }
 0x1ef   :  { %559 = vrot.lane.b32.xlu1 %v509_v33, %s3908_s2 }
 0x1f1   :  { %557 = vrot.lane.b32.xlu0 %v511_v40, %s3908_s2 }
 0x1f3   :  { %591 = vrot.lane.b32.xlu1 %v506_v29, %s3908_s2  ;;  %v629_v29 = vmul.f32 %v3611_v21, %v515_v39 }
 0x1f5   :  { %589 = vrot.lane.b32.xlu0 %v505_v31, %s3908_s2 }
 0x1f7   :  { %607 = vrot.lane.b32.xlu1 %v518_v41, %s3909_s22 }
 0x1f9   :  { %605 = vrot.lane.b32.xlu0 %v515_v39, %s3909_s22 }
 0x1fb   :  { %635 = vrot.lane.b32.xlu1 %v518_v41, %s3908_s2 }
 0x1fd   :  { %633 = vrot.lane.b32.xlu0 %v515_v39, %s3908_s2 }
 0x258   :  { %v576_v42 = vpop.permute.xlu1 %575 }
 0x259   :  { %v586_v0 = vmul.f32 %v3608_v56, %v576_v42 }
 0x25a   :  { %v574_v43 = vpop.permute.xlu0 %573 }
 0x25b   :  { %v585_v9 = vmul.f32 %v3608_v56, %v574_v43 }
 0x25d   :  { %v532_v47 = vpop.permute.xlu1 %531 }
 0x25e   :  { %v542_v49 = vmul.f32 %v3605_v45, %v532_v47 }
 0x25f   :  { %v530_v50 = vpop.permute.xlu0 %529 }
 0x260   :  { %v544_v53 = vadd.f32 %v542_v49, %v528_v48  ;;  %v541_v55 = vmul.f32 %v3605_v45, %v530_v50 }
 0x261   :  { %v560_v57 = vpop.permute.xlu1 %559 }
 0x262   :  { %v543_v58 = vadd.f32 %v541_v55, %v527_v54  ;;  %v556_v59 = vadd.f32 %v554_v52, %v544_v53  ;;  %v570_v60 = vmul.f32 %v3607_v51, %v560_v57  ;;  %v3613_v52 = vld [vmem:[#allocation5 + $0x16] ss:$0 sm:$0xff]  ;;  %v3614_v53 = vld [vmem:[#allocation5 + $0x12] ss:$0 sm:$0xff]  ;;  %v3615_v54 = vld [vmem:[#allocation5 + $0x13] ss:$0 sm:$0xff] }
 0x263   :  { %v558_v62 = vpop.permute.xlu0 %557 }
 0x264   :  { %v572_v4 = vadd.f32 %v570_v60, %v556_v59  ;;  %v555_v5 = vadd.f32 %v553_v61, %v543_v58  ;;  %v569_v6 = vmul.f32 %v3607_v51, %v558_v62  ;;  %v3616_v59 = vld [vmem:[#allocation5 + $0x14] ss:$0 sm:$0xff] }
 0x265   :  { %v592_v8 = vpop.permute.xlu1 %591 }
 0x266   :  { %v571_v10 = vadd.f32 %v569_v6, %v555_v5  ;;  %v588_v11 = vadd.f32 %v586_v0, %v572_v4  ;;  %v602_v12 = vmul.f32 %v3609_v63, %v592_v8  ;;  %v3617_v0 = vld [vmem:[#allocation5 + $0x15] ss:$0 sm:$0xff] }
 0x267   :  { %v590_v13 = vpop.permute.xlu0 %589 }
 0x268   :  { %v587_v16 = vadd.f32 %v585_v9, %v571_v10  ;;  %v601_v17 = vmul.f32 %v3609_v63, %v590_v13  ;;  %v604_v19 = vadd.f32 %v602_v12, %v588_v11  ;;  %v3618_v11 = vld [vmem:[#allocation5 + $0x17] ss:$0 sm:$0xff] }
 0x269   :  { %v608_v18 = vpop.permute.xlu1 %607 }
 0x26a   :  { %v618_v20 = vmul.f32 %v3610_v15, %v608_v18  ;;  %v603_v25 = vadd.f32 %v601_v17, %v587_v16 }
 0x26b   :  { %v606_v22 = vpop.permute.xlu0 %605 }
 0x26c   :  { %v620_v28 = vadd.f32 %v618_v20, %v604_v19  ;;  %v617_v2 = vmul.f32 %v3610_v15, %v606_v22 }
 0x26d   :  { %v636_v3 = vpop.permute.xlu1 %635 }
 0x26e   :  { %v619_v30 = vadd.f32 %v617_v2, %v603_v25  ;;  %v632_v31 = vadd.f32 %v630_v23, %v620_v28  ;;  %v646_v32 = vmul.f32 %v3612_v24, %v636_v3 }
 0x26f   :  { %v634_v34 = vpop.permute.xlu0 %633 }
 0x270   :  { %v648_v35 = vadd.f32 %v646_v32, %v632_v31  ;;  %v631_v36 = vadd.f32 %v629_v29, %v619_v30  ;;  %v645_v33 = vmul.f32 %v3612_v24, %v634_v34  ;;  %v3619_v24 = vld [vmem:[#allocation5 + $0x18] ss:$0 sm:$0xff]  ;;  %v3620_v29 = vld [vmem:[#allocation5 + $0x19] ss:$0 sm:$0xff]  ;;  %v3621_v31 = vld [vmem:[#allocation5 + $0x1a] ss:$0 sm:$0xff] }
 0x272   :  { %v650_v37 = vadd.f32 %v648_v35, %v4046_v26  ;;  %v647_v38 = vadd.f32 %v645_v33, %v631_v36 }
 0x274   :  { %v4105_v40 = vmax.f32 %v650_v37, 0.0  ;;  %v649_v42 = vadd.f32 %v647_v38, %v4048_v27 }
 0x276   :  { %v4108_v41 = vmax.f32 %v649_v42, 0.0  ;;  %721 = vrot.lane.b32.xlu1 %v4105_v40, %s3909_s22  ;;  %v654_v43 = vrot.slane %v4105_v40, 7  ;;  %v660_v46 = vrot.slane %v4105_v40, 1  ;;  %v674_v56 = vmul.f32 %v3613_v52, %v4105_v40 }
 0x278   :  { %719 = vrot.lane.b32.xlu0 %v4108_v41, %s3909_s22  ;;  %v653_v39 = vrot.slane %v4108_v41, 7  ;;  %v659_v45 = vrot.slane %v4108_v41, 1  ;;  %v673_v62 = vmul.f32 %v3613_v52, %v4108_v41 }
 0x27a   :  { %v655_v26 = vsel %vm75_vm1, %v653_v39, %v654_v43  ;;  %v656_v44 = vsel %vm75_vm1, %v654_v43, %v653_v39  ;;  %v662_v47 = vsel %vm82_vm3, %v660_v46, %v659_v45  ;;  %v661_v49 = vsel %vm82_vm3, %v659_v45, %v660_v46 }
 0x27b   :  { %677 = vrot.lane.b32.xlu1 %v655_v26, %s3909_s22  ;;  %v657_v27 = vmul.f32 %v3986_v7, %v656_v44  ;;  %v664_v48 = vmul.f32 %v4005_v14, %v662_v47  ;;  %v700_v60 = vmul.f32 %v3615_v54, %v655_v26  ;;  %v775_v37 = vmul.f32 %v3620_v29, %v661_v49 }
 0x27d   :  { %675 = vrot.lane.b32.xlu0 %v657_v27, %s3909_s22  ;;  %v699_v9 = vmul.f32 %v3615_v54, %v657_v27  ;;  %v776_v32 = vmul.f32 %v3620_v29, %v664_v48 }
 0x27f   :  { %705 = vrot.lane.b32.xlu1 %v655_v26, %s3908_s2 }
 0x281   :  { %703 = vrot.lane.b32.xlu0 %v657_v27, %s3908_s2 }
 0x283   :  { %737 = vrot.lane.b32.xlu1 %v4105_v40, %s3908_s2 }
 0x285   :  { %735 = vrot.lane.b32.xlu0 %v4108_v41, %s3908_s2 }
 0x287   :  { %753 = vrot.lane.b32.xlu1 %v664_v48, %s3909_s22 }
 0x289   :  { %751 = vrot.lane.b32.xlu0 %v661_v49, %s3909_s22 }
 0x28b   :  { %781 = vrot.lane.b32.xlu1 %v664_v48, %s3908_s2 }
 0x28d   :  { %779 = vrot.lane.b32.xlu0 %v661_v49, %s3908_s2 }
 0x2e8   :  { %v722_v50 = vpop.permute.xlu1 %721 }
 0x2e9   :  { %v732_v12 = vmul.f32 %v3617_v0, %v722_v50 }
 0x2ea   :  { %v720_v51 = vpop.permute.xlu0 %719 }
 0x2eb   :  { %v731_v18 = vmul.f32 %v3617_v0, %v720_v51 }
 0x2ed   :  { %v678_v55 = vpop.permute.xlu1 %677 }
 0x2ee   :  { %v688_v57 = vmul.f32 %v3614_v53, %v678_v55 }
 0x2ef   :  { %v676_v58 = vpop.permute.xlu0 %675 }
 0x2f0   :  { %v690_v61 = vadd.f32 %v688_v57, %v674_v56  ;;  %v687_v63 = vmul.f32 %v3614_v53, %v676_v58 }
 0x2f1   :  { %v706_v4 = vpop.permute.xlu1 %705 }
 0x2f2   :  { %v689_v5 = vadd.f32 %v687_v63, %v673_v62  ;;  %v702_v6 = vadd.f32 %v700_v60, %v690_v61  ;;  %v716_v8 = vmul.f32 %v3616_v59, %v706_v4  ;;  %v3622_v60 = vld [vmem:[#allocation7 + $0x16] ss:$0 sm:$0xff]  ;;  %v3623_v61 = vld [vmem:[#allocation7 + $0x12] ss:$0 sm:$0xff]  ;;  %v3624_v62 = vld [vmem:[#allocation7 + $0x13] ss:$0 sm:$0xff] }
 0x2f3   :  { %v704_v10 = vpop.permute.xlu0 %703 }
 0x2f4   :  { %v718_v13 = vadd.f32 %v716_v8, %v702_v6  ;;  %v701_v15 = vadd.f32 %v699_v9, %v689_v5  ;;  %v715_v16 = vmul.f32 %v3616_v59, %v704_v10  ;;  %v3625_v6 = vld [vmem:[#allocation7 + $0x14] ss:$0 sm:$0xff] }
 0x2f5   :  { %v738_v17 = vpop.permute.xlu1 %737 }
 0x2f6   :  { %v717_v19 = vadd.f32 %v715_v16, %v701_v15  ;;  %v734_v20 = vadd.f32 %v732_v12, %v718_v13  ;;  %v748_v21 = vmul.f32 %v3618_v11, %v738_v17  ;;  %v3626_v12 = vld [vmem:[#allocation7 + $0x15] ss:$0 sm:$0xff] }
 0x2f7   :  { %v736_v22 = vpop.permute.xlu0 %735 }
 0x2f8   :  { %v733_v23 = vadd.f32 %v731_v18, %v717_v19  ;;  %v747_v25 = vmul.f32 %v3618_v11, %v736_v22  ;;  %v750_v2 = vadd.f32 %v748_v21, %v734_v20  ;;  %v3627_v20 = vld [vmem:[#allocation7 + $0x17] ss:$0 sm:$0xff] }
 0x2f9   :  { %v754_v28 = vpop.permute.xlu1 %753 }
 0x2fa   :  { %v764_v3 = vmul.f32 %v3619_v24, %v754_v28  ;;  %v749_v34 = vadd.f32 %v747_v25, %v733_v23 }
 0x2fb   :  { %v752_v30 = vpop.permute.xlu0 %751 }
 0x2fc   :  { %v766_v35 = vadd.f32 %v764_v3, %v750_v2  ;;  %v763_v36 = vmul.f32 %v3619_v24, %v752_v30 }
 0x2fd   :  { %v782_v33 = vpop.permute.xlu1 %781 }
 0x2fe   :  { %v765_v38 = vadd.f32 %v763_v36, %v749_v34  ;;  %v778_v42 = vadd.f32 %v776_v32, %v766_v35  ;;  %v792_v39 = vmul.f32 %v3621_v31, %v782_v33 }
 0x2ff   :  { %v780_v43 = vpop.permute.xlu0 %779 }
 0x300   :  { %v794_v26 = vadd.f32 %v792_v39, %v778_v42  ;;  %v777_v44 = vadd.f32 %v775_v37, %v765_v38  ;;  %v791_v27 = vmul.f32 %v3621_v31, %v780_v43  ;;  %v3628_v31 = vld [vmem:[#allocation7 + $0x18] ss:$0 sm:$0xff]  ;;  %v3629_v37 = vld [vmem:[#allocation7 + $0x19] ss:$0 sm:$0xff]  ;;  %v3630_v42 = vld [vmem:[#allocation7 + $0x1a] ss:$0 sm:$0xff] }
 0x302   :  { %v796_v45 = vmax.f32 %v794_v26, 0.0  ;;  %v793_v46 = vadd.f32 %v791_v27, %v777_v44 }
 0x304   :  { %v795_v47 = vmax.f32 %v793_v46, 0.0  ;;  %865 = vrot.lane.b32.xlu1 %v796_v45, %s3909_s22  ;;  %v798_v50 = vrot.slane %v796_v45, 7  ;;  %v804_v52 = vrot.slane %v796_v45, 1  ;;  %v818_v0 = vmul.f32 %v3622_v60, %v796_v45 }
 0x306   :  { %863 = vrot.lane.b32.xlu0 %v795_v47, %s3909_s22  ;;  %v797_v48 = vrot.slane %v795_v47, 7  ;;  %v803_v51 = vrot.slane %v795_v47, 1  ;;  %v817_v10 = vmul.f32 %v3622_v60, %v795_v47 }
 0x308   :  { %v799_v49 = vsel %vm75_vm1, %v797_v48, %v798_v50  ;;  %v800_v53 = vsel %vm75_vm1, %v798_v50, %v797_v48  ;;  %v806_v54 = vsel %vm82_vm3, %v804_v52, %v803_v51  ;;  %v805_v55 = vsel %vm82_vm3, %v803_v51, %v804_v52 }
 0x309   :  { %821 = vrot.lane.b32.xlu1 %v799_v49, %s3909_s22  ;;  %v801_v56 = vmul.f32 %v3986_v7, %v800_v53  ;;  %v808_v57 = vmul.f32 %v4005_v14, %v806_v54  ;;  %v844_v8 = vmul.f32 %v3624_v62, %v799_v49 }
 0x30b   :  { %819 = vrot.lane.b32.xlu0 %v801_v56, %s3909_s22  ;;  %v843_v18 = vmul.f32 %v3624_v62, %v801_v56  ;;  %v920_v39 = vmul.f32 %v3629_v37, %v808_v57 }
 0x30d   :  { %849 = vrot.lane.b32.xlu1 %v799_v49, %s3908_s2 }
 0x30f   :  { %847 = vrot.lane.b32.xlu0 %v801_v56, %s3908_s2 }
 0x311   :  { %881 = vrot.lane.b32.xlu1 %v796_v45, %s3908_s2  ;;  %v919_v45 = vmul.f32 %v3629_v37, %v805_v55 }
 0x313   :  { %879 = vrot.lane.b32.xlu0 %v795_v47, %s3908_s2 }
 0x315   :  { %897 = vrot.lane.b32.xlu1 %v808_v57, %s3909_s22 }
 0x317   :  { %895 = vrot.lane.b32.xlu0 %v805_v55, %s3909_s22 }
 0x319   :  { %925 = vrot.lane.b32.xlu1 %v808_v57, %s3908_s2 }
 0x31b   :  { %923 = vrot.lane.b32.xlu0 %v805_v55, %s3908_s2 }
 0x376   :  { %v866_v58 = vpop.permute.xlu1 %865 }
 0x377   :  { %v876_v21 = vmul.f32 %v3626_v12, %v866_v58 }
 0x378   :  { %v864_v59 = vpop.permute.xlu0 %863 }
 0x379   :  { %v875_v28 = vmul.f32 %v3626_v12, %v864_v59 }
 0x37b   :  { %v822_v63 = vpop.permute.xlu1 %821 }
 0x37c   :  { %v832_v4 = vmul.f32 %v3623_v61, %v822_v63 }
 0x37d   :  { %v820_v5 = vpop.permute.xlu0 %819 }
 0x37e   :  { %v834_v9 = vadd.f32 %v832_v4, %v818_v0  ;;  %v831_v11 = vmul.f32 %v3623_v61, %v820_v5 }
 0x37f   :  { %v850_v13 = vpop.permute.xlu1 %849 }
 0x380   :  { %v833_v15 = vadd.f32 %v831_v11, %v817_v10  ;;  %v846_v16 = vadd.f32 %v844_v8, %v834_v9  ;;  %v860_v17 = vmul.f32 %v3625_v6, %v850_v13  ;;  %v3631_v8 = vld [vmem:[#allocation5 + $0x1f] ss:$0 sm:$0xff]  ;;  %v3632_v9 = vld [vmem:[#allocation5 + $0x1b] ss:$0 sm:$0xff]  ;;  %v3633_v10 = vld [vmem:[#allocation5 + $0x1c] ss:$0 sm:$0xff] }
 0x381   :  { %v848_v19 = vpop.permute.xlu0 %847 }
 0x382   :  { %v862_v22 = vadd.f32 %v860_v17, %v846_v16  ;;  %v845_v24 = vadd.f32 %v843_v18, %v833_v15  ;;  %v859_v23 = vmul.f32 %v3625_v6, %v848_v19  ;;  %v3634_v16 = vld [vmem:[#allocation5 + $0x1d] ss:$0 sm:$0xff] }
 0x383   :  { %v882_v25 = vpop.permute.xlu1 %881 }
 0x384   :  { %v861_v2 = vadd.f32 %v859_v23, %v845_v24  ;;  %v878_v3 = vadd.f32 %v876_v21, %v862_v22  ;;  %v892_v29 = vmul.f32 %v3627_v20, %v882_v25  ;;  %v3635_v21 = vld [vmem:[#allocation5 + $0x1e] ss:$0 sm:$0xff] }
 0x385   :  { %v880_v30 = vpop.permute.xlu0 %879 }
 0x386   :  { %v877_v32 = vadd.f32 %v875_v28, %v861_v2  ;;  %v891_v34 = vmul.f32 %v3627_v20, %v880_v30  ;;  %v894_v36 = vadd.f32 %v892_v29, %v878_v3  ;;  %v3636_v3 = vld [vmem:[#allocation5 + $0x20] ss:$0 sm:$0xff] }
 0x387   :  { %v898_v35 = vpop.permute.xlu1 %897 }
 0x388   :  { %v908_v33 = vmul.f32 %v3628_v31, %v898_v35  ;;  %v893_v43 = vadd.f32 %v891_v34, %v877_v32 }
 0x389   :  { %v896_v38 = vpop.permute.xlu0 %895 }
 0x38a   :  { %v910_v26 = vadd.f32 %v908_v33, %v894_v36  ;;  %v907_v44 = vmul.f32 %v3628_v31, %v896_v38 }
 0x38b   :  { %v926_v27 = vpop.permute.xlu1 %925 }
 0x38c   :  { %v909_v46 = vadd.f32 %v907_v44, %v893_v43  ;;  %v922_v47 = vadd.f32 %v920_v39, %v910_v26  ;;  %v936_v48 = vmul.f32 %v3630_v42, %v926_v27 }
 0x38d   :  { %v924_v50 = vpop.permute.xlu0 %923 }
 0x38e   :  { %v938_v51 = vadd.f32 %v936_v48, %v922_v47  ;;  %v921_v52 = vadd.f32 %v919_v45, %v909_v46  ;;  %v935_v49 = vmul.f32 %v3630_v42, %v924_v50  ;;  %v3637_v42 = vld [vmem:[#allocation5 + $0x21] ss:$0 sm:$0xff]  ;;  %v3638_v45 = vld [vmem:[#allocation5 + $0x22] ss:$0 sm:$0xff]  ;;  %v3639_v47 = vld [vmem:[#allocation5 + $0x23] ss:$0 sm:$0xff] }
 0x390   :  { %v940_v53 = vadd.f32 %v938_v51, %v4105_v40  ;;  %v937_v54 = vadd.f32 %v935_v49, %v921_v52 }
 0x392   :  { %v4165_v56 = vmax.f32 %v940_v53, 0.0  ;;  %v939_v58 = vadd.f32 %v937_v54, %v4108_v41 }
 0x394   :  { %v4168_v57 = vmax.f32 %v939_v58, 0.0  ;;  %1011 = vrot.lane.b32.xlu1 %v4165_v56, %s3909_s22  ;;  %v944_v59 = vrot.slane %v4165_v56, 7  ;;  %v950_v62 = vrot.slane %v4165_v56, 1  ;;  %v964_v12 = vmul.f32 %v3631_v8, %v4165_v56 }
 0x396   :  { %1009 = vrot.lane.b32.xlu0 %v4168_v57, %s3909_s22  ;;  %v943_v55 = vrot.slane %v4168_v57, 7  ;;  %v949_v61 = vrot.slane %v4168_v57, 1  ;;  %v963_v19 = vmul.f32 %v3631_v8, %v4168_v57 }
 0x398   :  { %v945_v40 = vsel %vm75_vm1, %v943_v55, %v944_v59  ;;  %v946_v60 = vsel %vm75_vm1, %v944_v59, %v943_v55  ;;  %v952_v63 = vsel %vm82_vm3, %v950_v62, %v949_v61  ;;  %v951_v4 = vsel %vm82_vm3, %v949_v61, %v950_v62 }
 0x399   :  { %967 = vrot.lane.b32.xlu1 %v945_v40, %s3909_s22  ;;  %v947_v41 = vmul.f32 %v3986_v7, %v946_v60  ;;  %v954_v0 = vmul.f32 %v4005_v14, %v952_v63  ;;  %v990_v17 = vmul.f32 %v3633_v10, %v945_v40  ;;  %v1065_v53 = vmul.f32 %v3638_v45, %v951_v4 }
 0x39b   :  { %965 = vrot.lane.b32.xlu0 %v947_v41, %s3909_s22  ;;  %v989_v28 = vmul.f32 %v3633_v10, %v947_v41  ;;  %v1066_v48 = vmul.f32 %v3638_v45, %v954_v0 }
 0x39d   :  { %995 = vrot.lane.b32.xlu1 %v945_v40, %s3908_s2 }
 0x39f   :  { %993 = vrot.lane.b32.xlu0 %v947_v41, %s3908_s2 }
 0x3a1   :  { %1027 = vrot.lane.b32.xlu1 %v4165_v56, %s3908_s2 }
 0x3a3   :  { %1025 = vrot.lane.b32.xlu0 %v4168_v57, %s3908_s2 }
 0x3a5   :  { %1043 = vrot.lane.b32.xlu1 %v954_v0, %s3909_s22 }
 0x3a7   :  { %1041 = vrot.lane.b32.xlu0 %v951_v4, %s3909_s22 }
 0x3a9   :  { %1071 = vrot.lane.b32.xlu1 %v954_v0, %s3908_s2 }
 0x3ab   :  { %1069 = vrot.lane.b32.xlu0 %v951_v4, %s3908_s2 }
 0x406   :  { %v1012_v5 = vpop.permute.xlu1 %1011 }
 0x407   :  { %v1022_v29 = vmul.f32 %v3635_v21, %v1012_v5 }
 0x408   :  { %v1010_v6 = vpop.permute.xlu0 %1009 }
 0x409   :  { %v1021_v35 = vmul.f32 %v3635_v21, %v1010_v6 }
 0x40b   :  { %v968_v11 = vpop.permute.xlu1 %967 }
 0x40c   :  { %v978_v13 = vmul.f32 %v3632_v9, %v968_v11 }
 0x40d   :  { %v966_v15 = vpop.permute.xlu0 %965 }
 0x40e   :  { %v980_v18 = vadd.f32 %v978_v13, %v964_v12  ;;  %v977_v20 = vmul.f32 %v3632_v9, %v966_v15 }
 0x40f   :  { %v996_v22 = vpop.permute.xlu1 %995 }
 0x410   :  { %v979_v24 = vadd.f32 %v977_v20, %v963_v19  ;;  %v992_v23 = vadd.f32 %v990_v17, %v980_v18  ;;  %v1006_v25 = vmul.f32 %v3634_v16, %v996_v22  ;;  %v3640_v17 = vld [vmem:[#allocation7 + $0x1f] ss:$0 sm:$0xff]  ;;  %v3641_v18 = vld [vmem:[#allocation7 + $0x1b] ss:$0 sm:$0xff]  ;;  %v3642_v19 = vld [vmem:[#allocation7 + $0x1c] ss:$0 sm:$0xff] }
 0x411   :  { %v994_v2 = vpop.permute.xlu0 %993 }
 0x412   :  { %v1008_v30 = vadd.f32 %v1006_v25, %v992_v23  ;;  %v991_v31 = vadd.f32 %v989_v28, %v979_v24  ;;  %v1005_v32 = vmul.f32 %v3634_v16, %v994_v2  ;;  %v3643_v23 = vld [vmem:[#allocation7 + $0x1d] ss:$0 sm:$0xff] }
 0x413   :  { %v1028_v34 = vpop.permute.xlu1 %1027 }
 0x414   :  { %v1007_v36 = vadd.f32 %v1005_v32, %v991_v31  ;;  %v1024_v33 = vadd.f32 %v1022_v29, %v1008_v30  ;;  %v1038_v37 = vmul.f32 %v3636_v3, %v1028_v34  ;;  %v3644_v29 = vld [vmem:[#allocation7 + $0x1e] ss:$0 sm:$0xff] }
 0x415   :  { %v1026_v38 = vpop.permute.xlu0 %1025 }
 0x416   :  { %v1023_v39 = vadd.f32 %v1021_v35, %v1007_v36  ;;  %v1037_v43 = vmul.f32 %v3636_v3, %v1026_v38  ;;  %v1040_v44 = vadd.f32 %v1038_v37, %v1024_v33  ;;  %v3645_v33 = vld [vmem:[#allocation7 + $0x20] ss:$0 sm:$0xff] }
 0x417   :  { %v1044_v26 = vpop.permute.xlu1 %1043 }
 0x418   :  { %v1054_v27 = vmul.f32 %v3637_v42, %v1044_v26  ;;  %v1039_v50 = vadd.f32 %v1037_v43, %v1023_v39 }
 0x419   :  { %v1042_v46 = vpop.permute.xlu0 %1041 }
 0x41a   :  { %v1056_v51 = vadd.f32 %v1054_v27, %v1040_v44  ;;  %v1053_v52 = vmul.f32 %v3637_v42, %v1042_v46 }
 0x41b   :  { %v1072_v49 = vpop.permute.xlu1 %1071 }
 0x41c   :  { %v1055_v54 = vadd.f32 %v1053_v52, %v1039_v50  ;;  %v1068_v58 = vadd.f32 %v1066_v48, %v1056_v51  ;;  %v1082_v55 = vmul.f32 %v3639_v47, %v1072_v49 }
 0x41d   :  { %v1070_v59 = vpop.permute.xlu0 %1069 }
 0x41e   :  { %v1084_v40 = vadd.f32 %v1082_v55, %v1068_v58  ;;  %v1067_v60 = vadd.f32 %v1065_v53, %v1055_v54  ;;  %v1081_v41 = vmul.f32 %v3639_v47, %v1070_v59  ;;  %v3646_v47 = vld [vmem:[#allocation7 + $0x21] ss:$0 sm:$0xff]  ;;  %v3647_v53 = vld [vmem:[#allocation7 + $0x22] ss:$0 sm:$0xff]  ;;  %v3648_v58 = vld [vmem:[#allocation7 + $0x23] ss:$0 sm:$0xff] }
 0x420   :  { %v1086_v61 = vmax.f32 %v1084_v40, 0.0  ;;  %v1083_v62 = vadd.f32 %v1081_v41, %v1067_v60 }
 0x422   :  { %v1085_v63 = vmax.f32 %v1083_v62, 0.0  ;;  %1155 = vrot.lane.b32.xlu1 %v1086_v61, %s3909_s22  ;;  %v1088_v5 = vrot.slane %v1086_v61, 7  ;;  %v1094_v8 = vrot.slane %v1086_v61, 1  ;;  %v1108_v21 = vmul.f32 %v3640_v17, %v1086_v61 }
 0x424   :  { %1153 = vrot.lane.b32.xlu0 %v1085_v63, %s3909_s22  ;;  %v1087_v0 = vrot.slane %v1085_v63, 7  ;;  %v1093_v6 = vrot.slane %v1085_v63, 1  ;;  %v1107_v2 = vmul.f32 %v3640_v17, %v1085_v63 }
 0x426   :  { %v1089_v4 = vsel %vm75_vm1, %v1087_v0, %v1088_v5  ;;  %v1090_v9 = vsel %vm75_vm1, %v1088_v5, %v1087_v0  ;;  %v1096_v10 = vsel %vm82_vm3, %v1094_v8, %v1093_v6  ;;  %v1095_v11 = vsel %vm82_vm3, %v1093_v6, %v1094_v8 }
 0x427   :  { %1111 = vrot.lane.b32.xlu1 %v1089_v4, %s3909_s22  ;;  %v1091_v12 = vmul.f32 %v3986_v7, %v1090_v9  ;;  %v1098_v13 = vmul.f32 %v4005_v14, %v1096_v10  ;;  %v1134_v25 = vmul.f32 %v3642_v19, %v1089_v4 }
 0x429   :  { %1109 = vrot.lane.b32.xlu0 %v1091_v12, %s3909_s22  ;;  %v1133_v35 = vmul.f32 %v3642_v19, %v1091_v12  ;;  %v1210_v55 = vmul.f32 %v3647_v53, %v1098_v13 }
 0x42b   :  { %1139 = vrot.lane.b32.xlu1 %v1089_v4, %s3908_s2 }
 0x42d   :  { %1137 = vrot.lane.b32.xlu0 %v1091_v12, %s3908_s2 }
 0x42f   :  { %1171 = vrot.lane.b32.xlu1 %v1086_v61, %s3908_s2  ;;  %v1209_v61 = vmul.f32 %v3647_v53, %v1095_v11 }
 0x431   :  { %1169 = vrot.lane.b32.xlu0 %v1085_v63, %s3908_s2 }
 0x433   :  { %1187 = vrot.lane.b32.xlu1 %v1098_v13, %s3909_s22 }
 0x435   :  { %1185 = vrot.lane.b32.xlu0 %v1095_v11, %s3909_s22 }
 0x437   :  { %1215 = vrot.lane.b32.xlu1 %v1098_v13, %s3908_s2 }
 0x439   :  { %1213 = vrot.lane.b32.xlu0 %v1095_v11, %s3908_s2 }
 0x494   :  { %v1156_v15 = vpop.permute.xlu1 %1155 }
 0x495   :  { %v1166_v37 = vmul.f32 %v3644_v29, %v1156_v15 }
 0x496   :  { %v1154_v16 = vpop.permute.xlu0 %1153 }
 0x497   :  { %v1165_v26 = vmul.f32 %v3644_v29, %v1154_v16 }
 0x499   :  { %v1112_v20 = vpop.permute.xlu1 %1111 }
 0x49a   :  { %v1122_v22 = vmul.f32 %v3641_v18, %v1112_v20 }
 0x49b   :  { %v1110_v24 = vpop.permute.xlu0 %1109 }
 0x49c   :  { %v1124_v28 = vadd.f32 %v1122_v22, %v1108_v21  ;;  %v1121_v3 = vmul.f32 %v3641_v18, %v1110_v24 }
 0x49d   :  { %v1140_v30 = vpop.permute.xlu1 %1139 }
 0x49e   :  { %v1123_v31 = vadd.f32 %v1121_v3, %v1107_v2  ;;  %v1136_v32 = vadd.f32 %v1134_v25, %v1124_v28  ;;  %v1150_v34 = vmul.f32 %v3643_v23, %v1140_v30  ;;  %v3649_v25 = vld [vmem:[#allocation5 + $0x28] ss:$0 sm:$0xff]  ;;  %v3650_v28 = vld [vmem:[#allocation5 + $0x24] ss:$0 sm:$0xff]  ;;  %v3651_v2 = vld [vmem:[#allocation5 + $0x25] ss:$0 sm:$0xff] }
 0x49f   :  { %v1138_v36 = vpop.permute.xlu0 %1137 }
 0x4a0   :  { %v1152_v38 = vadd.f32 %v1150_v34, %v1136_v32  ;;  %v1135_v42 = vadd.f32 %v1133_v35, %v1123_v31  ;;  %v1149_v39 = vmul.f32 %v3643_v23, %v1138_v36  ;;  %v3652_v32 = vld [vmem:[#allocation5 + $0x26] ss:$0 sm:$0xff] }
 0x4a1   :  { %v1172_v43 = vpop.permute.xlu1 %1171 }
 0x4a2   :  { %v1151_v44 = vadd.f32 %v1149_v39, %v1135_v42  ;;  %v1168_v27 = vadd.f32 %v1166_v37, %v1152_v38  ;;  %v1182_v45 = vmul.f32 %v3645_v33, %v1172_v43  ;;  %v3653_v37 = vld [vmem:[#allocation5 + $0x27] ss:$0 sm:$0xff] }
 0x4a3   :  { %v1170_v46 = vpop.permute.xlu0 %1169 }
 0x4a4   :  { %v1167_v48 = vadd.f32 %v1165_v26, %v1151_v44  ;;  %v1181_v50 = vmul.f32 %v3645_v33, %v1170_v46  ;;  %v1184_v52 = vadd.f32 %v1182_v45, %v1168_v27  ;;  %v3654_v27 = vld [vmem:[#allocation5 + $0x29] ss:$0 sm:$0xff] }
 0x4a5   :  { %v1188_v51 = vpop.permute.xlu1 %1187 }
 0x4a6   :  { %v1198_v49 = vmul.f32 %v3646_v47, %v1188_v51  ;;  %v1183_v59 = vadd.f32 %v1181_v50, %v1167_v48 }
 0x4a7   :  { %v1186_v54 = vpop.permute.xlu0 %1185 }
 0x4a8   :  { %v1200_v40 = vadd.f32 %v1198_v49, %v1184_v52  ;;  %v1197_v60 = vmul.f32 %v3646_v47, %v1186_v54 }
 0x4a9   :  { %v1216_v41 = vpop.permute.xlu1 %1215 }
 0x4aa   :  { %v1199_v62 = vadd.f32 %v1197_v60, %v1183_v59  ;;  %v1212_v63 = vadd.f32 %v1210_v55, %v1200_v40  ;;  %v1226_v0 = vmul.f32 %v3648_v58, %v1216_v41 }
 0x4ab   :  { %v1214_v5 = vpop.permute.xlu0 %1213 }
 0x4ac   :  { %v1228_v6 = vadd.f32 %v1226_v0, %v1212_v63  ;;  %v1211_v8 = vadd.f32 %v1209_v61, %v1199_v62  ;;  %v1225_v4 = vmul.f32 %v3648_v58, %v1214_v5  ;;  %v3655_v58 = vld [vmem:[#allocation5 + $0x2a] ss:$0 sm:$0xff]  ;;  %v3656_v61 = vld [vmem:[#allocation5 + $0x2b] ss:$0 sm:$0xff]  ;;  %v3657_v63 = vld [vmem:[#allocation5 + $0x2c] ss:$0 sm:$0xff] }
 0x4ae   :  { %v1230_v9 = vadd.f32 %v1228_v6, %v4165_v56  ;;  %v1227_v10 = vadd.f32 %v1225_v4, %v1211_v8 }
 0x4b0   :  { %v4225_v12 = vmax.f32 %v1230_v9, 0.0  ;;  %v1229_v15 = vadd.f32 %v1227_v10, %v4168_v57 }
 0x4b2   :  { %v4228_v13 = vmax.f32 %v1229_v15, 0.0  ;;  %1301 = vrot.lane.b32.xlu1 %v4225_v12, %s3909_s22  ;;  %v1234_v16 = vrot.slane %v4225_v12, 7  ;;  %v1240_v19 = vrot.slane %v4225_v12, 1  ;;  %v1254_v29 = vmul.f32 %v3649_v25, %v4225_v12 }
 0x4b4   :  { %1299 = vrot.lane.b32.xlu0 %v4228_v13, %s3909_s22  ;;  %v1233_v11 = vrot.slane %v4228_v13, 7  ;;  %v1239_v18 = vrot.slane %v4228_v13, 1  ;;  %v1253_v36 = vmul.f32 %v3649_v25, %v4228_v13 }
 0x4b6   :  { %v1235_v56 = vsel %vm75_vm1, %v1233_v11, %v1234_v16  ;;  %v1236_v17 = vsel %vm75_vm1, %v1234_v16, %v1233_v11  ;;  %v1242_v20 = vsel %vm82_vm3, %v1240_v19, %v1239_v18  ;;  %v1241_v22 = vsel %vm82_vm3, %v1239_v18, %v1240_v19 }
 0x4b7   :  { %1257 = vrot.lane.b32.xlu1 %v1235_v56, %s3909_s22  ;;  %v1237_v57 = vmul.f32 %v3986_v7, %v1236_v17  ;;  %v1244_v21 = vmul.f32 %v4005_v14, %v1242_v20  ;;  %v1280_v34 = vmul.f32 %v3651_v2, %v1235_v56  ;;  %v1355_v9 = vmul.f32 %v3656_v61, %v1241_v22 }
 0x4b9   :  { %1255 = vrot.lane.b32.xlu0 %v1237_v57, %s3909_s22  ;;  %v1279_v26 = vmul.f32 %v3651_v2, %v1237_v57  ;;  %v1356_v8 = vmul.f32 %v3656_v61, %v1244_v21 }
 0x4bb   :  { %1285 = vrot.lane.b32.xlu1 %v1235_v56, %s3908_s2 }
 0x4bd   :  { %1283 = vrot.lane.b32.xlu0 %v1237_v57, %s3908_s2 }
 0x4bf   :  { %1317 = vrot.lane.b32.xlu1 %v4225_v12, %s3908_s2 }
 0x4c1   :  { %1315 = vrot.lane.b32.xlu0 %v4228_v13, %s3908_s2 }
 0x4c3   :  { %1333 = vrot.lane.b32.xlu1 %v1244_v21, %s3909_s22 }
 0x4c5   :  { %1331 = vrot.lane.b32.xlu0 %v1241_v22, %s3909_s22 }
 0x4c7   :  { %1361 = vrot.lane.b32.xlu1 %v1244_v21, %s3908_s2 }
 0x4c9   :  { %1359 = vrot.lane.b32.xlu0 %v1241_v22, %s3908_s2 }
 0x524   :  { %v1302_v24 = vpop.permute.xlu1 %1301 }
 0x525   :  { %v1312_v45 = vmul.f32 %v3653_v37, %v1302_v24 }
 0x526   :  { %v1300_v23 = vpop.permute.xlu0 %1299 }
 0x527   :  { %v1311_v51 = vmul.f32 %v3653_v37, %v1300_v23 }
 0x529   :  { %v1258_v3 = vpop.permute.xlu1 %1257 }
 0x52a   :  { %v1268_v30 = vmul.f32 %v3650_v28, %v1258_v3 }
 0x52b   :  { %v1256_v31 = vpop.permute.xlu0 %1255 }
 0x52c   :  { %v1270_v35 = vadd.f32 %v1268_v30, %v1254_v29  ;;  %v1267_v33 = vmul.f32 %v3650_v28, %v1256_v31 }
 0x52d   :  { %v1286_v38 = vpop.permute.xlu1 %1285 }
 0x52e   :  { %v1269_v42 = vadd.f32 %v1267_v33, %v1253_v36  ;;  %v1282_v39 = vadd.f32 %v1280_v34, %v1270_v35  ;;  %v1296_v43 = vmul.f32 %v3652_v32, %v1286_v38  ;;  %v3658_v34 = vld [vmem:[#allocation7 + $0x28] ss:$0 sm:$0xff]  ;;  %v3659_v35 = vld [vmem:[#allocation7 + $0x24] ss:$0 sm:$0xff]  ;;  %v3660_v36 = vld [vmem:[#allocation7 + $0x25] ss:$0 sm:$0xff] }
 0x52f   :  { %v1284_v44 = vpop.permute.xlu0 %1283 }
 0x530   :  { %v1298_v46 = vadd.f32 %v1296_v43, %v1282_v39  ;;  %v1281_v47 = vadd.f32 %v1279_v26, %v1269_v42  ;;  %v1295_v48 = vmul.f32 %v3652_v32, %v1284_v44  ;;  %v3661_v39 = vld [vmem:[#allocation7 + $0x26] ss:$0 sm:$0xff] }
 0x531   :  { %v1318_v50 = vpop.permute.xlu1 %1317 }
 0x532   :  { %v1297_v52 = vadd.f32 %v1295_v48, %v1281_v47  ;;  %v1314_v49 = vadd.f32 %v1312_v45, %v1298_v46  ;;  %v1328_v53 = vmul.f32 %v3654_v27, %v1318_v50  ;;  %v3662_v45 = vld [vmem:[#allocation7 + $0x27] ss:$0 sm:$0xff] }
 0x533   :  { %v1316_v54 = vpop.permute.xlu0 %1315 }
 0x534   :  { %v1313_v55 = vadd.f32 %v1311_v51, %v1297_v52  ;;  %v1327_v59 = vmul.f32 %v3654_v27, %v1316_v54  ;;  %v1330_v60 = vadd.f32 %v1328_v53, %v1314_v49  ;;  %v3663_v49 = vld [vmem:[#allocation7 + $0x29] ss:$0 sm:$0xff] }
 0x535   :  { %v1334_v40 = vpop.permute.xlu1 %1333 }
 0x536   :  { %v1344_v41 = vmul.f32 %v3655_v58, %v1334_v40  ;;  %v1329_v0 = vadd.f32 %v1327_v59, %v1313_v55 }
 0x537   :  { %v1332_v62 = vpop.permute.xlu0 %1331 }
 0x538   :  { %v1346_v5 = vadd.f32 %v1344_v41, %v1330_v60  ;;  %v1343_v6 = vmul.f32 %v3655_v58, %v1332_v62 }
 0x539   :  { %v1362_v4 = vpop.permute.xlu1 %1361 }
 0x53a   :  { %v1345_v10 = vadd.f32 %v1343_v6, %v1329_v0  ;;  %v1358_v15 = vadd.f32 %v1356_v8, %v1346_v5  ;;  %v1372_v11 = vmul.f32 %v3657_v63, %v1362_v4 }
 0x53b   :  { %v1360_v16 = vpop.permute.xlu0 %1359 }
 0x53c   :  { %v1374_v56 = vadd.f32 %v1372_v11, %v1358_v15  ;;  %v1357_v17 = vadd.f32 %v1355_v9, %v1345_v10  ;;  %v1371_v57 = vmul.f32 %v3657_v63, %v1360_v16  ;;  %v3664_v63 = vld [vmem:[#allocation7 + $0x2a] ss:$0 sm:$0xff]  ;;  %v3665_v9 = vld [vmem:[#allocation7 + $0x2b] ss:$0 sm:$0xff]  ;;  %v3666_v15 = vld [vmem:[#allocation7 + $0x2c] ss:$0 sm:$0xff] }
 0x53e   :  { %v1376_v18 = vmax.f32 %v1374_v56, 0.0  ;;  %v1373_v19 = vadd.f32 %v1371_v57, %v1357_v17 }
 0x540   :  { %v1375_v20 = vmax.f32 %v1373_v19, 0.0  ;;  %1445 = vrot.lane.b32.xlu1 %v1376_v18, %s3909_s22  ;;  %v1378_v23 = vrot.slane %v1376_v18, 7  ;;  %v1384_v21 = vrot.slane %v1376_v18, 1  ;;  %v1398_v37 = vmul.f32 %v3658_v34, %v1376_v18 }
 0x542   :  { %1443 = vrot.lane.b32.xlu0 %v1375_v20, %s3909_s22  ;;  %v1377_v24 = vrot.slane %v1375_v20, 7  ;;  %v1383_v25 = vrot.slane %v1375_v20, 1  ;;  %v1397_v44 = vmul.f32 %v3658_v34, %v1375_v20 }
 0x544   :  { %v1379_v22 = vsel %vm75_vm1, %v1377_v24, %v1378_v23  ;;  %v1380_v28 = vsel %vm75_vm1, %v1378_v23, %v1377_v24  ;;  %v1386_v2 = vsel %vm82_vm3, %v1384_v21, %v1383_v25  ;;  %v1385_v3 = vsel %vm82_vm3, %v1383_v25, %v1384_v21 }
 0x545   :  { %1401 = vrot.lane.b32.xlu1 %v1379_v22, %s3909_s22  ;;  %v1381_v29 = vmul.f32 %v3986_v7, %v1380_v28  ;;  %v1388_v30 = vmul.f32 %v4005_v14, %v1386_v2  ;;  %v1424_v43 = vmul.f32 %v3660_v36, %v1379_v22 }
 0x547   :  { %1399 = vrot.lane.b32.xlu0 %v1381_v29, %s3909_s22  ;;  %v1423_v51 = vmul.f32 %v3660_v36, %v1381_v29  ;;  %v1500_v17 = vmul.f32 %v3665_v9, %v1388_v30 }
 0x549   :  { %1429 = vrot.lane.b32.xlu1 %v1379_v22, %s3908_s2 }
 0x54b   :  { %1427 = vrot.lane.b32.xlu0 %v1381_v29, %s3908_s2 }
 0x54d   :  { %1461 = vrot.lane.b32.xlu1 %v1376_v18, %s3908_s2  ;;  %v1499_v18 = vmul.f32 %v3665_v9, %v1385_v3 }
 0x54f   :  { %1459 = vrot.lane.b32.xlu0 %v1375_v20, %s3908_s2 }
 0x551   :  { %1477 = vrot.lane.b32.xlu1 %v1388_v30, %s3909_s22 }
 0x553   :  { %1475 = vrot.lane.b32.xlu0 %v1385_v3, %s3909_s22 }
 0x555   :  { %1505 = vrot.lane.b32.xlu1 %v1388_v30, %s3908_s2 }
 0x557   :  { %1503 = vrot.lane.b32.xlu0 %v1385_v3, %s3908_s2 }
 0x5b2   :  { %v1446_v31 = vpop.permute.xlu1 %1445 }
 0x5b3   :  { %v1456_v53 = vmul.f32 %v3662_v45, %v1446_v31 }
 0x5b4   :  { %v1444_v32 = vpop.permute.xlu0 %1443 }
 0x5b5   :  { %v1455_v40 = vmul.f32 %v3662_v45, %v1444_v32 }
 0x5b7   :  { %v1402_v33 = vpop.permute.xlu1 %1401 }
 0x5b8   :  { %v1412_v38 = vmul.f32 %v3659_v35, %v1402_v33 }
 0x5b9   :  { %v1400_v42 = vpop.permute.xlu0 %1399 }
 0x5ba   :  { %v1414_v26 = vadd.f32 %v1412_v38, %v1398_v37  ;;  %v1411_v27 = vmul.f32 %v3659_v35, %v1400_v42 }
 0x5bb   :  { %v1430_v46 = vpop.permute.xlu1 %1429 }
 0x5bc   :  { %v1413_v47 = vadd.f32 %v1411_v27, %v1397_v44  ;;  %v1426_v48 = vadd.f32 %v1424_v43, %v1414_v26  ;;  %v1440_v50 = vmul.f32 %v3661_v39, %v1430_v46  ;;  %v3667_v43 = vld [vmem:[#allocation5 + $0x31] ss:$0 sm:$0xff]  ;;  %v3668_v26 = vld [vmem:[#allocation5 + $0x2d] ss:$0 sm:$0xff]  ;;  %v3669_v44 = vld [vmem:[#allocation5 + $0x2e] ss:$0 sm:$0xff] }
 0x5bd   :  { %v1428_v52 = vpop.permute.xlu0 %1427 }
 0x5be   :  { %v1442_v54 = vadd.f32 %v1440_v50, %v1426_v48  ;;  %v1425_v58 = vadd.f32 %v1423_v51, %v1413_v47  ;;  %v1439_v55 = vmul.f32 %v3661_v39, %v1428_v52  ;;  %v3670_v48 = vld [vmem:[#allocation5 + $0x2f] ss:$0 sm:$0xff] }
 0x5bf   :  { %v1462_v59 = vpop.permute.xlu1 %1461 }
 0x5c0   :  { %v1441_v60 = vadd.f32 %v1439_v55, %v1425_v58  ;;  %v1458_v41 = vadd.f32 %v1456_v53, %v1442_v54  ;;  %v1472_v61 = vmul.f32 %v3663_v49, %v1462_v59  ;;  %v3671_v53 = vld [vmem:[#allocation5 + $0x30] ss:$0 sm:$0xff] }
 0x5c1   :  { %v1460_v62 = vpop.permute.xlu0 %1459 }
 0x5c2   :  { %v1457_v0 = vadd.f32 %v1455_v40, %v1441_v60  ;;  %v1471_v5 = vmul.f32 %v3663_v49, %v1460_v62  ;;  %v1474_v8 = vadd.f32 %v1472_v61, %v1458_v41  ;;  %v3672_v41 = vld [vmem:[#allocation5 + $0x32] ss:$0 sm:$0xff] }
 0x5c3   :  { %v1478_v6 = vpop.permute.xlu1 %1477 }
 0x5c4   :  { %v1488_v4 = vmul.f32 %v3664_v63, %v1478_v6  ;;  %v1473_v11 = vadd.f32 %v1471_v5, %v1457_v0 }
 0x5c5   :  { %v1476_v10 = vpop.permute.xlu0 %1475 }
 0x5c6   :  { %v1490_v16 = vadd.f32 %v1488_v4, %v1474_v8  ;;  %v1487_v56 = vmul.f32 %v3664_v63, %v1476_v10 }
 0x5c7   :  { %v1506_v57 = vpop.permute.xlu1 %1505 }
 0x5c8   :  { %v1489_v19 = vadd.f32 %v1487_v56, %v1473_v11  ;;  %v1502_v20 = vadd.f32 %v1500_v17, %v1490_v16  ;;  %v1516_v24 = vmul.f32 %v3666_v15, %v1506_v57 }
 0x5c9   :  { %v1504_v23 = vpop.permute.xlu0 %1503 }
 0x5ca   :  { %v1518_v25 = vadd.f32 %v1516_v24, %v1502_v20  ;;  %v1501_v21 = vadd.f32 %v1499_v18, %v1489_v19  ;;  %v1515_v22 = vmul.f32 %v3666_v15, %v1504_v23  ;;  %v3673_v15 = vld [vmem:[#allocation5 + $0x33] ss:$0 sm:$0xff]  ;;  %v3674_v18 = vld [vmem:[#allocation5 + $0x34] ss:$0 sm:$0xff]  ;;  %v3675_v20 = vld [vmem:[#allocation5 + $0x35] ss:$0 sm:$0xff] }
 0x5cc   :  { %v1520_v28 = vadd.f32 %v1518_v25, %v4225_v12  ;;  %v1517_v2 = vadd.f32 %v1515_v22, %v1501_v21 }
 0x5ce   :  { %v4285_v29 = vmax.f32 %v1520_v28, 0.0  ;;  %v1519_v31 = vadd.f32 %v1517_v2, %v4228_v13 }
 0x5d0   :  { %v4288_v32 = vmax.f32 %v1519_v31, 0.0  ;;  %1591 = vrot.lane.b32.xlu1 %v4285_v29, %s3909_s22  ;;  %v1524_v30 = vrot.slane %v4285_v29, 7  ;;  %v1530_v36 = vrot.slane %v4285_v29, 1  ;;  %v1544_v45 = vmul.f32 %v3667_v43, %v4285_v29 }
 0x5d2   :  { %1589 = vrot.lane.b32.xlu0 %v4288_v32, %s3909_s22  ;;  %v1523_v3 = vrot.slane %v4288_v32, 7  ;;  %v1529_v35 = vrot.slane %v4288_v32, 1  ;;  %v1543_v52 = vmul.f32 %v3667_v43, %v4288_v32 }
 0x5d4   :  { %v1525_v12 = vsel %vm75_vm1, %v1523_v3, %v1524_v30  ;;  %v1526_v34 = vsel %vm75_vm1, %v1524_v30, %v1523_v3  ;;  %v1532_v33 = vsel %vm82_vm3, %v1530_v36, %v1529_v35  ;;  %v1531_v38 = vsel %vm82_vm3, %v1529_v35, %v1530_v36 }
 0x5d5   :  { %1547 = vrot.lane.b32.xlu1 %v1525_v12, %s3909_s22  ;;  %v1527_v13 = vmul.f32 %v3986_v7, %v1526_v34  ;;  %v1534_v37 = vmul.f32 %v4005_v14, %v1532_v33  ;;  %v1570_v50 = vmul.f32 %v3669_v44, %v1525_v12  ;;  %v1645_v28 = vmul.f32 %v3674_v18, %v1531_v38 }
 0x5d7   :  { %1545 = vrot.lane.b32.xlu0 %v1527_v13, %s3909_s22  ;;  %v1569_v40 = vmul.f32 %v3669_v44, %v1527_v13  ;;  %v1646_v21 = vmul.f32 %v3674_v18, %v1534_v37 }
 0x5d9   :  { %1575 = vrot.lane.b32.xlu1 %v1525_v12, %s3908_s2 }
 0x5db   :  { %1573 = vrot.lane.b32.xlu0 %v1527_v13, %s3908_s2 }
 0x5dd   :  { %1607 = vrot.lane.b32.xlu1 %v4285_v29, %s3908_s2 }
 0x5df   :  { %1605 = vrot.lane.b32.xlu0 %v4288_v32, %s3908_s2 }
 0x5e1   :  { %1623 = vrot.lane.b32.xlu1 %v1534_v37, %s3909_s22 }
 0x5e3   :  { %1621 = vrot.lane.b32.xlu0 %v1531_v38, %s3909_s22 }
 0x5e5   :  { %1651 = vrot.lane.b32.xlu1 %v1534_v37, %s3908_s2 }
 0x5e7   :  { %1649 = vrot.lane.b32.xlu0 %v1531_v38, %s3908_s2 }
 0x642   :  { %v1592_v42 = vpop.permute.xlu1 %1591 }
 0x643   :  { %v1602_v61 = vmul.f32 %v3671_v53, %v1592_v42 }
 0x644   :  { %v1590_v39 = vpop.permute.xlu0 %1589 }
 0x645   :  { %v1601_v6 = vmul.f32 %v3671_v53, %v1590_v39 }
 0x647   :  { %v1548_v27 = vpop.permute.xlu1 %1547 }
 0x648   :  { %v1558_v46 = vmul.f32 %v3668_v26, %v1548_v27 }
 0x649   :  { %v1546_v47 = vpop.permute.xlu0 %1545 }
 0x64a   :  { %v1560_v51 = vadd.f32 %v1558_v46, %v1544_v45  ;;  %v1557_v49 = vmul.f32 %v3668_v26, %v1546_v47 }
 0x64b   :  { %v1576_v54 = vpop.permute.xlu1 %1575 }
 0x64c   :  { %v1559_v58 = vadd.f32 %v1557_v49, %v1543_v52  ;;  %v1572_v55 = vadd.f32 %v1570_v50, %v1560_v51  ;;  %v1586_v59 = vmul.f32 %v3670_v48, %v1576_v54  ;;  %v3676_v50 = vld [vmem:[#allocation7 + $0x31] ss:$0 sm:$0xff]  ;;  %v3677_v51 = vld [vmem:[#allocation7 + $0x2d] ss:$0 sm:$0xff]  ;;  %v3678_v52 = vld [vmem:[#allocation7 + $0x2e] ss:$0 sm:$0xff] }
 0x64d   :  { %v1574_v60 = vpop.permute.xlu0 %1573 }
 0x64e   :  { %v1588_v62 = vadd.f32 %v1586_v59, %v1572_v55  ;;  %v1571_v63 = vadd.f32 %v1569_v40, %v1559_v58  ;;  %v1585_v0 = vmul.f32 %v3670_v48, %v1574_v60  ;;  %v3679_v55 = vld [vmem:[#allocation7 + $0x2f] ss:$0 sm:$0xff] }
 0x64f   :  { %v1608_v5 = vpop.permute.xlu1 %1607 }
 0x650   :  { %v1587_v8 = vadd.f32 %v1585_v0, %v1571_v63  ;;  %v1604_v4 = vadd.f32 %v1602_v61, %v1588_v62  ;;  %v1618_v9 = vmul.f32 %v3672_v41, %v1608_v5  ;;  %v3680_v61 = vld [vmem:[#allocation7 + $0x30] ss:$0 sm:$0xff] }
 0x651   :  { %v1606_v10 = vpop.permute.xlu0 %1605 }
 0x652   :  { %v1603_v11 = vadd.f32 %v1601_v6, %v1587_v8  ;;  %v1617_v16 = vmul.f32 %v3672_v41, %v1606_v10  ;;  %v1620_v17 = vadd.f32 %v1618_v9, %v1604_v4  ;;  %v3681_v4 = vld [vmem:[#allocation7 + $0x32] ss:$0 sm:$0xff] }
 0x653   :  { %v1624_v56 = vpop.permute.xlu1 %1623 }
 0x654   :  { %v1634_v57 = vmul.f32 %v3673_v15, %v1624_v56  ;;  %v1619_v24 = vadd.f32 %v1617_v16, %v1603_v11 }
 0x655   :  { %v1622_v19 = vpop.permute.xlu0 %1621 }
 0x656   :  { %v1636_v23 = vadd.f32 %v1634_v57, %v1620_v17  ;;  %v1633_v25 = vmul.f32 %v3673_v15, %v1622_v19 }
 0x657   :  { %v1652_v22 = vpop.permute.xlu1 %1651 }
 0x658   :  { %v1635_v2 = vadd.f32 %v1633_v25, %v1619_v24  ;;  %v1648_v31 = vadd.f32 %v1646_v21, %v1636_v23  ;;  %v1662_v3 = vmul.f32 %v3675_v20, %v1652_v22 }
 0x659   :  { %v1650_v30 = vpop.permute.xlu0 %1649 }
 0x65a   :  { %v1664_v12 = vadd.f32 %v1662_v3, %v1648_v31  ;;  %v1647_v34 = vadd.f32 %v1645_v28, %v1635_v2  ;;  %v1661_v13 = vmul.f32 %v3675_v20, %v1650_v30  ;;  %v3682_v20 = vld [vmem:[#allocation7 + $0x33] ss:$0 sm:$0xff]  ;;  %v3683_v28 = vld [vmem:[#allocation7 + $0x34] ss:$0 sm:$0xff]  ;;  %v3684_v31 = vld [vmem:[#allocation7 + $0x35] ss:$0 sm:$0xff] }
 0x65c   :  { %v1666_v35 = vmax.f32 %v1664_v12, 0.0  ;;  %v1663_v36 = vadd.f32 %v1661_v13, %v1647_v34 }
 0x65e   :  { %v1665_v33 = vmax.f32 %v1663_v36, 0.0  ;;  %1735 = vrot.lane.b32.xlu1 %v1666_v35, %s3909_s22  ;;  %v1668_v39 = vrot.slane %v1666_v35, 7  ;;  %v1674_v37 = vrot.slane %v1666_v35, 1  ;;  %v1688_v53 = vmul.f32 %v3676_v50, %v1666_v35 }
 0x660   :  { %1733 = vrot.lane.b32.xlu0 %v1665_v33, %s3909_s22  ;;  %v1667_v42 = vrot.slane %v1665_v33, 7  ;;  %v1673_v43 = vrot.slane %v1665_v33, 1  ;;  %v1687_v60 = vmul.f32 %v3676_v50, %v1665_v33 }
 0x662   :  { %v1669_v38 = vsel %vm75_vm1, %v1667_v42, %v1668_v39  ;;  %v1670_v26 = vsel %vm75_vm1, %v1668_v39, %v1667_v42  ;;  %v1676_v44 = vsel %vm82_vm3, %v1674_v37, %v1673_v43  ;;  %v1675_v27 = vsel %vm82_vm3, %v1673_v43, %v1674_v37 }
 0x663   :  { %1691 = vrot.lane.b32.xlu1 %v1669_v38, %s3909_s22  ;;  %v1671_v45 = vmul.f32 %v3986_v7, %v1670_v26  ;;  %v1678_v46 = vmul.f32 %v4005_v14, %v1676_v44  ;;  %v1714_v59 = vmul.f32 %v3678_v52, %v1669_v38 }
 0x665   :  { %1689 = vrot.lane.b32.xlu0 %v1671_v45, %s3909_s22  ;;  %v1713_v6 = vmul.f32 %v3678_v52, %v1671_v45  ;;  %v1790_v34 = vmul.f32 %v3683_v28, %v1678_v46 }
 0x667   :  { %1719 = vrot.lane.b32.xlu1 %v1669_v38, %s3908_s2 }
 0x669   :  { %1717 = vrot.lane.b32.xlu0 %v1671_v45, %s3908_s2 }
 0x66b   :  { %1751 = vrot.lane.b32.xlu1 %v1666_v35, %s3908_s2  ;;  %v1789_v35 = vmul.f32 %v3683_v28, %v1675_v27 }
 0x66d   :  { %1749 = vrot.lane.b32.xlu0 %v1665_v33, %s3908_s2 }
 0x66f   :  { %1767 = vrot.lane.b32.xlu1 %v1678_v46, %s3909_s22 }
 0x671   :  { %1765 = vrot.lane.b32.xlu0 %v1675_v27, %s3909_s22 }
 0x673   :  { %1795 = vrot.lane.b32.xlu1 %v1678_v46, %s3908_s2 }
 0x675   :  { %1793 = vrot.lane.b32.xlu0 %v1675_v27, %s3908_s2 }
 0x6d0   :  { %v1736_v47 = vpop.permute.xlu1 %1735 }
 0x6d1   :  { %v1746_v9 = vmul.f32 %v3680_v61, %v1736_v47 }
 0x6d2   :  { %v1734_v48 = vpop.permute.xlu0 %1733 }
 0x6d3   :  { %v1745_v56 = vmul.f32 %v3680_v61, %v1734_v48 }
 0x6d5   :  { %v1692_v49 = vpop.permute.xlu1 %1691 }
 0x6d6   :  { %v1702_v54 = vmul.f32 %v3677_v51, %v1692_v49 }
 0x6d7   :  { %v1690_v58 = vpop.permute.xlu0 %1689 }
 0x6d8   :  { %v1704_v40 = vadd.f32 %v1702_v54, %v1688_v53  ;;  %v1701_v41 = vmul.f32 %v3677_v51, %v1690_v58 }
 0x6d9   :  { %v1720_v62 = vpop.permute.xlu1 %1719 }
 0x6da   :  { %v1703_v63 = vadd.f32 %v1701_v41, %v1687_v60  ;;  %v1716_v0 = vadd.f32 %v1714_v59, %v1704_v40  ;;  %v1730_v5 = vmul.f32 %v3679_v55, %v1720_v62  ;;  %v3685_v59 = vld [vmem:[#allocation5 + $0x3a] ss:$0 sm:$0xff]  ;;  %v3686_v40 = vld [vmem:[#allocation5 + $0x36] ss:$0 sm:$0xff]  ;;  %v3687_v60 = vld [vmem:[#allocation5 + $0x37] ss:$0 sm:$0xff] }
 0x6db   :  { %v1718_v8 = vpop.permute.xlu0 %1717 }
 0x6dc   :  { %v1732_v10 = vadd.f32 %v1730_v5, %v1716_v0  ;;  %v1715_v15 = vadd.f32 %v1713_v6, %v1703_v63  ;;  %v1729_v11 = vmul.f32 %v3679_v55, %v1718_v8  ;;  %v3688_v0 = vld [vmem:[#allocation5 + $0x38] ss:$0 sm:$0xff] }
 0x6dd   :  { %v1752_v16 = vpop.permute.xlu1 %1751 }
 0x6de   :  { %v1731_v17 = vadd.f32 %v1729_v11, %v1715_v15  ;;  %v1748_v57 = vadd.f32 %v1746_v9, %v1732_v10  ;;  %v1762_v18 = vmul.f32 %v3681_v4, %v1752_v16  ;;  %v3689_v9 = vld [vmem:[#allocation5 + $0x39] ss:$0 sm:$0xff] }
 0x6df   :  { %v1750_v19 = vpop.permute.xlu0 %1749 }
 0x6e0   :  { %v1747_v24 = vadd.f32 %v1745_v56, %v1731_v17  ;;  %v1761_v23 = vmul.f32 %v3681_v4, %v1750_v19  ;;  %v1764_v21 = vadd.f32 %v1762_v18, %v1748_v57  ;;  %v3690_v57 = vld [vmem:[#allocation5 + $0x3b] ss:$0 sm:$0xff] }
 0x6e1   :  { %v1768_v25 = vpop.permute.xlu1 %1767 }
 0x6e2   :  { %v1778_v22 = vmul.f32 %v3682_v20, %v1768_v25  ;;  %v1763_v3 = vadd.f32 %v1761_v23, %v1747_v24 }
 0x6e3   :  { %v1766_v2 = vpop.permute.xlu0 %1765 }
 0x6e4   :  { %v1780_v30 = vadd.f32 %v1778_v22, %v1764_v21  ;;  %v1777_v12 = vmul.f32 %v3682_v20, %v1766_v2 }
 0x6e5   :  { %v1796_v13 = vpop.permute.xlu1 %1795 }
 0x6e6   :  { %v1779_v36 = vadd.f32 %v1777_v12, %v1763_v3  ;;  %v1792_v33 = vadd.f32 %v1790_v34, %v1780_v30  ;;  %v1806_v42 = vmul.f32 %v3684_v31, %v1796_v13 }
 0x6e7   :  { %v1794_v39 = vpop.permute.xlu0 %1793 }
 0x6e8   :  { %v1808_v43 = vadd.f32 %v1806_v42, %v1792_v33  ;;  %v1791_v37 = vadd.f32 %v1789_v35, %v1779_v36  ;;  %v1805_v38 = vmul.f32 %v3684_v31, %v1794_v39  ;;  %v3691_v31 = vld [vmem:[#allocation5 + $0x3c] ss:$0 sm:$0xff]  ;;  %v3692_v35 = vld [vmem:[#allocation5 + $0x3d] ss:$0 sm:$0xff]  ;;  %v3693_v33 = vld [vmem:[#allocation5 + $0x3e] ss:$0 sm:$0xff] }
 0x6ea   :  { %v1810_v26 = vadd.f32 %v1808_v43, %v4285_v29  ;;  %v1807_v44 = vadd.f32 %v1805_v38, %v1791_v37 }
 0x6ec   :  { %v4345_v45 = vmax.f32 %v1810_v26, 0.0  ;;  %v1809_v47 = vadd.f32 %v1807_v44, %v4288_v32 }
 0x6ee   :  { %v4348_v48 = vmax.f32 %v1809_v47, 0.0  ;;  %1881 = vrot.lane.b32.xlu1 %v4345_v45, %s3909_s22  ;;  %v1814_v46 = vrot.slane %v4345_v45, 7  ;;  %v1820_v52 = vrot.slane %v4345_v45, 1  ;;  %v1834_v61 = vmul.f32 %v3685_v59, %v4345_v45 }
 0x6f0   :  { %1879 = vrot.lane.b32.xlu0 %v4348_v48, %s3909_s22  ;;  %v1813_v27 = vrot.slane %v4348_v48, 7  ;;  %v1819_v51 = vrot.slane %v4348_v48, 1  ;;  %v1833_v8 = vmul.f32 %v3685_v59, %v4348_v48 }
 0x6f2   :  { %v1815_v29 = vsel %vm75_vm1, %v1813_v27, %v1814_v46  ;;  %v1816_v50 = vsel %vm75_vm1, %v1814_v46, %v1813_v27  ;;  %v1822_v49 = vsel %vm82_vm3, %v1820_v52, %v1819_v51  ;;  %v1821_v54 = vsel %vm82_vm3, %v1819_v51, %v1820_v52 }
 0x6f3   :  { %1837 = vrot.lane.b32.xlu1 %v1815_v29, %s3909_s22  ;;  %v1817_v32 = vmul.f32 %v3986_v7, %v1816_v50  ;;  %v1824_v53 = vmul.f32 %v4005_v14, %v1822_v49  ;;  %v1860_v5 = vmul.f32 %v3687_v60, %v1815_v29  ;;  %v1935_v26 = vmul.f32 %v3692_v35, %v1821_v54 }
 0x6f5   :  { %1835 = vrot.lane.b32.xlu0 %v1817_v32, %s3909_s22  ;;  %v1859_v56 = vmul.f32 %v3687_v60, %v1817_v32  ;;  %v1936_v37 = vmul.f32 %v3692_v35, %v1824_v53 }
 0x6f7   :  { %1865 = vrot.lane.b32.xlu1 %v1815_v29, %s3908_s2 }
 0x6f9   :  { %1863 = vrot.lane.b32.xlu0 %v1817_v32, %s3908_s2 }
 0x6fb   :  { %1897 = vrot.lane.b32.xlu1 %v4345_v45, %s3908_s2 }
 0x6fd   :  { %1895 = vrot.lane.b32.xlu0 %v4348_v48, %s3908_s2 }
 0x6ff   :  { %1913 = vrot.lane.b32.xlu1 %v1824_v53, %s3909_s22 }
 0x701   :  { %1911 = vrot.lane.b32.xlu0 %v1821_v54, %s3909_s22 }
 0x703   :  { %1941 = vrot.lane.b32.xlu1 %v1824_v53, %s3908_s2 }
 0x705   :  { %1939 = vrot.lane.b32.xlu0 %v1821_v54, %s3908_s2 }
 0x760   :  { %v1882_v58 = vpop.permute.xlu1 %1881 }
 0x761   :  { %v1892_v18 = vmul.f32 %v3689_v9, %v1882_v58 }
 0x762   :  { %v1880_v55 = vpop.permute.xlu0 %1879 }
 0x763   :  { %v1891_v25 = vmul.f32 %v3689_v9, %v1880_v55 }
 0x765   :  { %v1838_v41 = vpop.permute.xlu1 %1837 }
 0x766   :  { %v1848_v62 = vmul.f32 %v3686_v40, %v1838_v41 }
 0x767   :  { %v1836_v63 = vpop.permute.xlu0 %1835 }
 0x768   :  { %v1850_v6 = vadd.f32 %v1848_v62, %v1834_v61  ;;  %v1847_v4 = vmul.f32 %v3686_v40, %v1836_v63 }
 0x769   :  { %v1866_v10 = vpop.permute.xlu1 %1865 }
 0x76a   :  { %v1849_v15 = vadd.f32 %v1847_v4, %v1833_v8  ;;  %v1862_v11 = vadd.f32 %v1860_v5, %v1850_v6  ;;  %v1876_v16 = vmul.f32 %v3688_v0, %v1866_v10  ;;  %v3694_v5 = vld [vmem:[#allocation7 + $0x3a] ss:$0 sm:$0xff]  ;;  %v3695_v6 = vld [vmem:[#allocation7 + $0x36] ss:$0 sm:$0xff]  ;;  %v3696_v8 = vld [vmem:[#allocation7 + $0x37] ss:$0 sm:$0xff] }
 0x76b   :  { %v1864_v17 = vpop.permute.xlu0 %1863 }
 0x76c   :  { %v1878_v19 = vadd.f32 %v1876_v16, %v1862_v11  ;;  %v1861_v20 = vadd.f32 %v1859_v56, %v1849_v15  ;;  %v1875_v24 = vmul.f32 %v3688_v0, %v1864_v17  ;;  %v3697_v11 = vld [vmem:[#allocation7 + $0x38] ss:$0 sm:$0xff] }
 0x76d   :  { %v1898_v23 = vpop.permute.xlu1 %1897 }
 0x76e   :  { %v1877_v21 = vadd.f32 %v1875_v24, %v1861_v20  ;;  %v1894_v22 = vadd.f32 %v1892_v18, %v1878_v19  ;;  %v1908_v28 = vmul.f32 %v3690_v57, %v1898_v23  ;;  %v3698_v18 = vld [vmem:[#allocation7 + $0x39] ss:$0 sm:$0xff] }
 0x76f   :  { %v1896_v2 = vpop.permute.xlu0 %1895 }
 0x770   :  { %v1893_v3 = vadd.f32 %v1891_v25, %v1877_v21  ;;  %v1907_v30 = vmul.f32 %v3690_v57, %v1896_v2  ;;  %v1910_v34 = vadd.f32 %v1908_v28, %v1894_v22  ;;  %v3699_v22 = vld [vmem:[#allocation7 + $0x3b] ss:$0 sm:$0xff] }
 0x771   :  { %v1914_v12 = vpop.permute.xlu1 %1913 }
 0x772   :  { %v1924_v13 = vmul.f32 %v3691_v31, %v1914_v12  ;;  %v1909_v42 = vadd.f32 %v1907_v30, %v1893_v3 }
 0x773   :  { %v1912_v36 = vpop.permute.xlu0 %1911 }
 0x774   :  { %v1926_v39 = vadd.f32 %v1924_v13, %v1910_v34  ;;  %v1923_v43 = vmul.f32 %v3691_v31, %v1912_v36 }
 0x775   :  { %v1942_v38 = vpop.permute.xlu1 %1941 }
 0x776   :  { %v1925_v44 = vadd.f32 %v1923_v43, %v1909_v42  ;;  %v1938_v47 = vadd.f32 %v1936_v37, %v1926_v39  ;;  %v1952_v27 = vmul.f32 %v3693_v33, %v1942_v38 }
 0x777   :  { %v1940_v46 = vpop.permute.xlu0 %1939 }
 0x778   :  { %v1954_v29 = vadd.f32 %v1952_v27, %v1938_v47  ;;  %v1937_v50 = vadd.f32 %v1935_v26, %v1925_v44  ;;  %v1951_v32 = vmul.f32 %v3693_v33, %v1940_v46  ;;  %v3700_v33 = vld [vmem:[#allocation7 + $0x3c] ss:$0 sm:$0xff]  ;;  %v3701_v26 = vld [vmem:[#allocation7 + $0x3d] ss:$0 sm:$0xff]  ;;  %v3702_v47 = vld [vmem:[#allocation7 + $0x3e] ss:$0 sm:$0xff] }
 0x77a   :  { %v1956_v51 = vmax.f32 %v1954_v29, 0.0  ;;  %v1953_v52 = vadd.f32 %v1951_v32, %v1937_v50 }
 0x77c   :  { %v1955_v49 = vmax.f32 %v1953_v52, 0.0  ;;  %2025 = vrot.lane.b32.xlu1 %v1956_v51, %s3909_s22  ;;  %v1958_v55 = vrot.slane %v1956_v51, 7  ;;  %v1964_v53 = vrot.slane %v1956_v51, 1  ;;  %v1978_v9 = vmul.f32 %v3694_v5, %v1956_v51 }
 0x77e   :  { %2023 = vrot.lane.b32.xlu0 %v1955_v49, %s3909_s22  ;;  %v1957_v58 = vrot.slane %v1955_v49, 7  ;;  %v1963_v59 = vrot.slane %v1955_v49, 1  ;;  %v1977_v17 = vmul.f32 %v3694_v5, %v1955_v49 }
 0x780   :  { %v1959_v54 = vsel %vm75_vm1, %v1957_v58, %v1958_v55  ;;  %v1960_v40 = vsel %vm75_vm1, %v1958_v55, %v1957_v58  ;;  %v1966_v60 = vsel %vm82_vm3, %v1964_v53, %v1963_v59  ;;  %v1965_v41 = vsel %vm82_vm3, %v1963_v59, %v1964_v53 }
 0x781   :  { %1981 = vrot.lane.b32.xlu1 %v1959_v54, %s3909_s22  ;;  %v1961_v61 = vmul.f32 %v3986_v7, %v1960_v40  ;;  %v1968_v62 = vmul.f32 %v4005_v14, %v1966_v60  ;;  %v2004_v16 = vmul.f32 %v3696_v8, %v1959_v54 }
 0x783   :  { %1979 = vrot.lane.b32.xlu0 %v1961_v61, %s3909_s22  ;;  %v2003_v25 = vmul.f32 %v3696_v8, %v1961_v61  ;;  %v2080_v50 = vmul.f32 %v3701_v26, %v1968_v62 }
 0x785   :  { %2009 = vrot.lane.b32.xlu1 %v1959_v54, %s3908_s2 }
 0x787   :  { %2007 = vrot.lane.b32.xlu0 %v1961_v61, %s3908_s2 }
 0x789   :  { %2041 = vrot.lane.b32.xlu1 %v1956_v51, %s3908_s2  ;;  %v2079_v51 = vmul.f32 %v3701_v26, %v1965_v41 }
 0x78b   :  { %2039 = vrot.lane.b32.xlu0 %v1955_v49, %s3908_s2 }
 0x78d   :  { %2057 = vrot.lane.b32.xlu1 %v1968_v62, %s3909_s22 }
 0x78f   :  { %2055 = vrot.lane.b32.xlu0 %v1965_v41, %s3909_s22 }
 0x791   :  { %2085 = vrot.lane.b32.xlu1 %v1968_v62, %s3908_s2 }
 0x793   :  { %2083 = vrot.lane.b32.xlu0 %v1965_v41, %s3908_s2 }
 0x7ee   :  { %v2026_v63 = vpop.permute.xlu1 %2025 }
 0x7ef   :  { %v2036_v28 = vmul.f32 %v3698_v18, %v2026_v63 }
 0x7f0   :  { %v2024_v0 = vpop.permute.xlu0 %2023 }
 0x7f1   :  { %v2035_v12 = vmul.f32 %v3698_v18, %v2024_v0 }
 0x7f3   :  { %v1982_v4 = vpop.permute.xlu1 %1981 }
 0x7f4   :  { %v1992_v10 = vmul.f32 %v3695_v6, %v1982_v4 }
 0x7f5   :  { %v1980_v15 = vpop.permute.xlu0 %1979 }
 0x7f6   :  { %v1994_v56 = vadd.f32 %v1992_v10, %v1978_v9  ;;  %v1991_v57 = vmul.f32 %v3695_v6, %v1980_v15 }
 0x7f7   :  { %v2010_v19 = vpop.permute.xlu1 %2009 }
 0x7f8   :  { %v1993_v20 = vadd.f32 %v1991_v57, %v1977_v17  ;;  %v2006_v24 = vadd.f32 %v2004_v16, %v1994_v56  ;;  %v2020_v23 = vmul.f32 %v3697_v11, %v2010_v19  ;;  %v3703_v16 = vld [vmem:[#allocation5 + $0x43] ss:$0 sm:$0xff]  ;;  %v3704_v56 = vld [vmem:[#allocation5 + $0x3f] ss:$0 sm:$0xff]  ;;  %v3705_v17 = vld [vmem:[#allocation5 + $0x40] ss:$0 sm:$0xff] }
 0x7f9   :  { %v2008_v21 = vpop.permute.xlu0 %2007 }
 0x7fa   :  { %v2022_v2 = vadd.f32 %v2020_v23, %v2006_v24  ;;  %v2005_v31 = vadd.f32 %v2003_v25, %v1993_v20  ;;  %v2019_v3 = vmul.f32 %v3697_v11, %v2008_v21  ;;  %v3706_v24 = vld [vmem:[#allocation5 + $0x41] ss:$0 sm:$0xff] }
 0x7fb   :  { %v2042_v30 = vpop.permute.xlu1 %2041 }
 0x7fc   :  { %v2021_v34 = vadd.f32 %v2019_v3, %v2005_v31  ;;  %v2038_v13 = vadd.f32 %v2036_v28, %v2022_v2  ;;  %v2052_v35 = vmul.f32 %v3699_v22, %v2042_v30  ;;  %v3707_v28 = vld [vmem:[#allocation5 + $0x42] ss:$0 sm:$0xff] }
 0x7fd   :  { %v2040_v36 = vpop.permute.xlu0 %2039 }
 0x7fe   :  { %v2037_v42 = vadd.f32 %v2035_v12, %v2021_v34  ;;  %v2051_v39 = vmul.f32 %v3699_v22, %v2040_v36  ;;  %v2054_v37 = vadd.f32 %v2052_v35, %v2038_v13  ;;  %v3708_v13 = vld [vmem:[#allocation5 + $0x44] ss:$0 sm:$0xff] }
 0x7ff   :  { %v2058_v43 = vpop.permute.xlu1 %2057 }
 0x800   :  { %v2068_v38 = vmul.f32 %v3700_v33, %v2058_v43  ;;  %v2053_v27 = vadd.f32 %v2051_v39, %v2037_v42 }
 0x801   :  { %v2056_v44 = vpop.permute.xlu0 %2055 }
 0x802   :  { %v2070_v46 = vadd.f32 %v2068_v38, %v2054_v37  ;;  %v2067_v29 = vmul.f32 %v3700_v33, %v2056_v44 }
 0x803   :  { %v2086_v32 = vpop.permute.xlu1 %2085 }
 0x804   :  { %v2069_v52 = vadd.f32 %v2067_v29, %v2053_v27  ;;  %v2082_v49 = vadd.f32 %v2080_v50, %v2070_v46  ;;  %v2096_v58 = vmul.f32 %v3702_v47, %v2086_v32 }
 0x805   :  { %v2084_v55 = vpop.permute.xlu0 %2083 }
 0x806   :  { %v2098_v59 = vadd.f32 %v2096_v58, %v2082_v49  ;;  %v2081_v53 = vadd.f32 %v2079_v51, %v2069_v52  ;;  %v2095_v54 = vmul.f32 %v3702_v47, %v2084_v55  ;;  %v3709_v47 = vld [vmem:[#allocation5 + $0x45] ss:$0 sm:$0xff]  ;;  %v3710_v51 = vld [vmem:[#allocation5 + $0x46] ss:$0 sm:$0xff]  ;;  %v3711_v49 = vld [vmem:[#allocation5 + $0x47] ss:$0 sm:$0xff] }
 0x808   :  { %v2100_v40 = vadd.f32 %v2098_v59, %v4345_v45  ;;  %v2097_v60 = vadd.f32 %v2095_v54, %v2081_v53 }
 0x80a   :  { %v4405_v61 = vmax.f32 %v2100_v40, 0.0  ;;  %v2099_v63 = vadd.f32 %v2097_v60, %v4348_v48 }
 0x80c   :  { %v4408_v0 = vmax.f32 %v2099_v63, 0.0  ;;  %2171 = vrot.lane.b32.xlu1 %v4405_v61, %s3909_s22  ;;  %v2104_v62 = vrot.slane %v4405_v61, 7  ;;  %v2110_v8 = vrot.slane %v4405_v61, 1  ;;  %v2124_v18 = vmul.f32 %v3703_v16, %v4405_v61 }
 0x80e   :  { %2169 = vrot.lane.b32.xlu0 %v4408_v0, %s3909_s22  ;;  %v2103_v41 = vrot.slane %v4408_v0, 7  ;;  %v2109_v6 = vrot.slane %v4408_v0, 1  ;;  %v2123_v21 = vmul.f32 %v3703_v16, %v4408_v0 }
 0x810   :  { %v2105_v45 = vsel %vm75_vm1, %v2103_v41, %v2104_v62  ;;  %v2106_v5 = vsel %vm75_vm1, %v2104_v62, %v2103_v41  ;;  %v2112_v4 = vsel %vm82_vm3, %v2110_v8, %v2109_v6  ;;  %v2111_v10 = vsel %vm82_vm3, %v2109_v6, %v2110_v8 }
 0x811   :  { %2127 = vrot.lane.b32.xlu1 %v2105_v45, %s3909_s22  ;;  %v2107_v48 = vmul.f32 %v3986_v7, %v2106_v5  ;;  %v2114_v9 = vmul.f32 %v4005_v14, %v2112_v4  ;;  %v2150_v23 = vmul.f32 %v3705_v17, %v2105_v45  ;;  %v2225_v40 = vmul.f32 %v3710_v51, %v2111_v10 }
 0x813   :  { %2125 = vrot.lane.b32.xlu0 %v2107_v48, %s3909_s22  ;;  %v2149_v12 = vmul.f32 %v3705_v17, %v2107_v48  ;;  %v2226_v53 = vmul.f32 %v3710_v51, %v2114_v9 }
 0x815   :  { %2155 = vrot.lane.b32.xlu1 %v2105_v45, %s3908_s2 }
 0x817   :  { %2153 = vrot.lane.b32.xlu0 %v2107_v48, %s3908_s2 }
 0x819   :  { %2187 = vrot.lane.b32.xlu1 %v4405_v61, %s3908_s2 }
 0x81b   :  { %2185 = vrot.lane.b32.xlu0 %v4408_v0, %s3908_s2 }
 0x81d   :  { %2203 = vrot.lane.b32.xlu1 %v2114_v9, %s3909_s22 }
 0x81f   :  { %2201 = vrot.lane.b32.xlu0 %v2111_v10, %s3909_s22 }
 0x821   :  { %2231 = vrot.lane.b32.xlu1 %v2114_v9, %s3908_s2 }
 0x823   :  { %2229 = vrot.lane.b32.xlu0 %v2111_v10, %s3908_s2 }
 0x87e   :  { %v2172_v15 = vpop.permute.xlu1 %2171 }
 0x87f   :  { %v2182_v35 = vmul.f32 %v3707_v28, %v2172_v15 }
 0x880   :  { %v2170_v11 = vpop.permute.xlu0 %2169 }
 0x881   :  { %v2181_v43 = vmul.f32 %v3707_v28, %v2170_v11 }
 0x883   :  { %v2128_v57 = vpop.permute.xlu1 %2127 }
 0x884   :  { %v2138_v19 = vmul.f32 %v3704_v56, %v2128_v57 }
 0x885   :  { %v2126_v20 = vpop.permute.xlu0 %2125 }
 0x886   :  { %v2140_v25 = vadd.f32 %v2138_v19, %v2124_v18  ;;  %v2137_v22 = vmul.f32 %v3704_v56, %v2126_v20 }
 0x887   :  { %v2156_v2 = vpop.permute.xlu1 %2155 }
 0x888   :  { %v2139_v31 = vadd.f32 %v2137_v22, %v2123_v21  ;;  %v2152_v3 = vadd.f32 %v2150_v23, %v2140_v25  ;;  %v2166_v30 = vmul.f32 %v3706_v24, %v2156_v2  ;;  %v3712_v23 = vld [vmem:[#allocation7 + $0x43] ss:$0 sm:$0xff]  ;;  %v3713_v25 = vld [vmem:[#allocation7 + $0x3f] ss:$0 sm:$0xff]  ;;  %v3714_v21 = vld [vmem:[#allocation7 + $0x40] ss:$0 sm:$0xff] }
 0x889   :  { %v2154_v34 = vpop.permute.xlu0 %2153 }
 0x88a   :  { %v2168_v36 = vadd.f32 %v2166_v30, %v2152_v3  ;;  %v2151_v33 = vadd.f32 %v2149_v12, %v2139_v31  ;;  %v2165_v42 = vmul.f32 %v3706_v24, %v2154_v34  ;;  %v3715_v3 = vld [vmem:[#allocation7 + $0x41] ss:$0 sm:$0xff] }
 0x88b   :  { %v2188_v39 = vpop.permute.xlu1 %2187 }
 0x88c   :  { %v2167_v37 = vadd.f32 %v2165_v42, %v2151_v33  ;;  %v2184_v38 = vadd.f32 %v2182_v35, %v2168_v36  ;;  %v2198_v26 = vmul.f32 %v3708_v13, %v2188_v39  ;;  %v3716_v35 = vld [vmem:[#allocation7 + $0x42] ss:$0 sm:$0xff] }
 0x88d   :  { %v2186_v44 = vpop.permute.xlu0 %2185 }
 0x88e   :  { %v2183_v27 = vadd.f32 %v2181_v43, %v2167_v37  ;;  %v2197_v46 = vmul.f32 %v3708_v13, %v2186_v44  ;;  %v2200_v50 = vadd.f32 %v2198_v26, %v2184_v38  ;;  %v3717_v38 = vld [vmem:[#allocation7 + $0x44] ss:$0 sm:$0xff] }
 0x88f   :  { %v2204_v29 = vpop.permute.xlu1 %2203 }
 0x890   :  { %v2214_v32 = vmul.f32 %v3709_v47, %v2204_v29  ;;  %v2199_v58 = vadd.f32 %v2197_v46, %v2183_v27 }
 0x891   :  { %v2202_v52 = vpop.permute.xlu0 %2201 }
 0x892   :  { %v2216_v55 = vadd.f32 %v2214_v32, %v2200_v50  ;;  %v2213_v59 = vmul.f32 %v3709_v47, %v2202_v52 }
 0x893   :  { %v2232_v54 = vpop.permute.xlu1 %2231 }
 0x894   :  { %v2215_v60 = vadd.f32 %v2213_v59, %v2199_v58  ;;  %v2228_v63 = vadd.f32 %v2226_v53, %v2216_v55  ;;  %v2242_v41 = vmul.f32 %v3711_v49, %v2232_v54 }
 0x895   :  { %v2230_v62 = vpop.permute.xlu0 %2229 }
 0x896   :  { %v2244_v45 = vadd.f32 %v2242_v41, %v2228_v63  ;;  %v2227_v5 = vadd.f32 %v2225_v40, %v2215_v60  ;;  %v2241_v48 = vmul.f32 %v3711_v49, %v2230_v62  ;;  %v3718_v49 = vld [vmem:[#allocation7 + $0x45] ss:$0 sm:$0xff]  ;;  %v3719_v40 = vld [vmem:[#allocation7 + $0x46] ss:$0 sm:$0xff]  ;;  %v3720_v63 = vld [vmem:[#allocation7 + $0x47] ss:$0 sm:$0xff] }
 0x898   :  { %v2246_v6 = vmax.f32 %v2244_v45, 0.0  ;;  %v2243_v8 = vadd.f32 %v2241_v48, %v2227_v5 }
 0x89a   :  { %v2245_v4 = vmax.f32 %v2243_v8, 0.0  ;;  %2315 = vrot.lane.b32.xlu1 %v2246_v6, %s3909_s22  ;;  %v2248_v11 = vrot.slane %v2246_v6, 7  ;;  %v2254_v9 = vrot.slane %v2246_v6, 1  ;;  %v2268_v28 = vmul.f32 %v3712_v23, %v2246_v6 }
 0x89c   :  { %2313 = vrot.lane.b32.xlu0 %v2245_v4, %s3909_s22  ;;  %v2247_v15 = vrot.slane %v2245_v4, 7  ;;  %v2253_v16 = vrot.slane %v2245_v4, 1  ;;  %v2267_v34 = vmul.f32 %v3712_v23, %v2245_v4 }
 0x89e   :  { %v2249_v10 = vsel %vm75_vm1, %v2247_v15, %v2248_v11  ;;  %v2250_v56 = vsel %vm75_vm1, %v2248_v11, %v2247_v15  ;;  %v2256_v17 = vsel %vm82_vm3, %v2254_v9, %v2253_v16  ;;  %v2255_v57 = vsel %vm82_vm3, %v2253_v16, %v2254_v9 }
 0x89f   :  { %2271 = vrot.lane.b32.xlu1 %v2249_v10, %s3909_s22  ;;  %v2251_v18 = vmul.f32 %v3986_v7, %v2250_v56  ;;  %v2258_v19 = vmul.f32 %v4005_v14, %v2256_v17  ;;  %v2294_v30 = vmul.f32 %v3714_v21, %v2249_v10 }
 0x8a1   :  { %2269 = vrot.lane.b32.xlu0 %v2251_v18, %s3909_s22  ;;  %v2293_v43 = vmul.f32 %v3714_v21, %v2251_v18  ;;  %v2370_v5 = vmul.f32 %v3719_v40, %v2258_v19 }
 0x8a3   :  { %2299 = vrot.lane.b32.xlu1 %v2249_v10, %s3908_s2 }
 0x8a5   :  { %2297 = vrot.lane.b32.xlu0 %v2251_v18, %s3908_s2 }
 0x8a7   :  { %2331 = vrot.lane.b32.xlu1 %v2246_v6, %s3908_s2  ;;  %v2369_v6 = vmul.f32 %v3719_v40, %v2255_v57 }
 0x8a9   :  { %2329 = vrot.lane.b32.xlu0 %v2245_v4, %s3908_s2 }
 0x8ab   :  { %2347 = vrot.lane.b32.xlu1 %v2258_v19, %s3909_s22 }
 0x8ad   :  { %2345 = vrot.lane.b32.xlu0 %v2255_v57, %s3909_s22 }
 0x8af   :  { %2375 = vrot.lane.b32.xlu1 %v2258_v19, %s3908_s2 }
 0x8b1   :  { %2373 = vrot.lane.b32.xlu0 %v2255_v57, %s3908_s2 }
 0x90c   :  { %v2316_v20 = vpop.permute.xlu1 %2315 }
 0x90d   :  { %v2326_v26 = vmul.f32 %v3716_v35, %v2316_v20 }
 0x90e   :  { %v2314_v24 = vpop.permute.xlu0 %2313 }
 0x90f   :  { %v2325_v29 = vmul.f32 %v3716_v35, %v2314_v24 }
 0x911   :  { %v2272_v22 = vpop.permute.xlu1 %2271 }
 0x912   :  { %v2282_v2 = vmul.f32 %v3713_v25, %v2272_v22 }
 0x913   :  { %v2270_v31 = vpop.permute.xlu0 %2269 }
 0x914   :  { %v2284_v12 = vadd.f32 %v2282_v2, %v2268_v28  ;;  %v2281_v13 = vmul.f32 %v3713_v25, %v2270_v31 }
 0x915   :  { %v2300_v36 = vpop.permute.xlu1 %2299 }
 0x916   :  { %v2283_v33 = vadd.f32 %v2281_v13, %v2267_v34  ;;  %v2296_v42 = vadd.f32 %v2294_v30, %v2284_v12  ;;  %v2310_v39 = vmul.f32 %v3715_v3, %v2300_v36  ;;  %v3721_v30 = vld [vmem:[#allocation5 + $0x4c] ss:$0 sm:$0xff]  ;;  %v3722_v12 = vld [vmem:[#allocation5 + $0x48] ss:$0 sm:$0xff]  ;;  %v3723_v34 = vld [vmem:[#allocation5 + $0x49] ss:$0 sm:$0xff] }
 0x917   :  { %v2298_v37 = vpop.permute.xlu0 %2297 }
 0x918   :  { %v2312_v44 = vadd.f32 %v2310_v39, %v2296_v42  ;;  %v2295_v47 = vadd.f32 %v2293_v43, %v2283_v33  ;;  %v2309_v27 = vmul.f32 %v3715_v3, %v2298_v37  ;;  %v3724_v42 = vld [vmem:[#allocation5 + $0x4a] ss:$0 sm:$0xff] }
 0x919   :  { %v2332_v46 = vpop.permute.xlu1 %2331 }
 0x91a   :  { %v2311_v50 = vadd.f32 %v2309_v27, %v2295_v47  ;;  %v2328_v32 = vadd.f32 %v2326_v26, %v2312_v44  ;;  %v2342_v51 = vmul.f32 %v3717_v38, %v2332_v46  ;;  %v3725_v26 = vld [vmem:[#allocation5 + $0x4b] ss:$0 sm:$0xff] }
 0x91b   :  { %v2330_v52 = vpop.permute.xlu0 %2329 }
 0x91c   :  { %v2327_v58 = vadd.f32 %v2325_v29, %v2311_v50  ;;  %v2341_v55 = vmul.f32 %v3717_v38, %v2330_v52  ;;  %v2344_v53 = vadd.f32 %v2342_v51, %v2328_v32  ;;  %v3726_v32 = vld [vmem:[#allocation5 + $0x4d] ss:$0 sm:$0xff] }
 0x91d   :  { %v2348_v59 = vpop.permute.xlu1 %2347 }
 0x91e   :  { %v2358_v54 = vmul.f32 %v3718_v49, %v2348_v59  ;;  %v2343_v41 = vadd.f32 %v2341_v55, %v2327_v58 }
 0x91f   :  { %v2346_v60 = vpop.permute.xlu0 %2345 }
 0x920   :  { %v2360_v62 = vadd.f32 %v2358_v54, %v2344_v53  ;;  %v2357_v45 = vmul.f32 %v3718_v49, %v2346_v60 }
 0x921   :  { %v2376_v48 = vpop.permute.xlu1 %2375 }
 0x922   :  { %v2359_v8 = vadd.f32 %v2357_v45, %v2343_v41  ;;  %v2372_v4 = vadd.f32 %v2370_v5, %v2360_v62  ;;  %v2386_v15 = vmul.f32 %v3720_v63, %v2376_v48 }
 0x923   :  { %v2374_v11 = vpop.permute.xlu0 %2373 }
 0x924   :  { %v2388_v16 = vadd.f32 %v2386_v15, %v2372_v4  ;;  %v2371_v9 = vadd.f32 %v2369_v6, %v2359_v8  ;;  %v2385_v10 = vmul.f32 %v3720_v63, %v2374_v11  ;;  %v3727_v63 = vld [vmem:[#allocation5 + $0x4e] ss:$0 sm:$0xff]  ;;  %v3728_v6 = vld [vmem:[#allocation5 + $0x4f] ss:$0 sm:$0xff]  ;;  %v3729_v4 = vld [vmem:[#allocation5 + $0x50] ss:$0 sm:$0xff] }
 0x926   :  { %v2390_v56 = vadd.f32 %v2388_v16, %v4405_v61  ;;  %v2387_v17 = vadd.f32 %v2385_v10, %v2371_v9 }
 0x928   :  { %v4465_v18 = vmax.f32 %v2390_v56, 0.0  ;;  %v2389_v20 = vadd.f32 %v2387_v17, %v4408_v0 }
 0x92a   :  { %v4468_v24 = vmax.f32 %v2389_v20, 0.0  ;;  %2461 = vrot.lane.b32.xlu1 %v4465_v18, %s3909_s22  ;;  %v2394_v19 = vrot.slane %v4465_v18, 7  ;;  %v2400_v21 = vrot.slane %v4465_v18, 1  ;;  %v2414_v35 = vmul.f32 %v3721_v30, %v4465_v18 }
 0x92c   :  { %2459 = vrot.lane.b32.xlu0 %v4468_v24, %s3909_s22  ;;  %v2393_v57 = vrot.slane %v4468_v24, 7  ;;  %v2399_v25 = vrot.slane %v4468_v24, 1  ;;  %v2413_v37 = vmul.f32 %v3721_v30, %v4468_v24 }
 0x92e   :  { %v2395_v61 = vsel %vm75_vm1, %v2393_v57, %v2394_v19  ;;  %v2396_v23 = vsel %vm75_vm1, %v2394_v19, %v2393_v57  ;;  %v2402_v22 = vsel %vm82_vm3, %v2400_v21, %v2399_v25  ;;  %v2401_v2 = vsel %vm82_vm3, %v2399_v25, %v2400_v21 }
 0x92f   :  { %2417 = vrot.lane.b32.xlu1 %v2395_v61, %s3909_s22  ;;  %v2397_v0 = vmul.f32 %v3986_v7, %v2396_v23  ;;  %v2404_v28 = vmul.f32 %v4005_v14, %v2402_v22  ;;  %v2440_v39 = vmul.f32 %v3723_v34, %v2395_v61  ;;  %v2515_v56 = vmul.f32 %v3728_v6, %v2401_v2 }
 0x931   :  { %2415 = vrot.lane.b32.xlu0 %v2397_v0, %s3909_s22  ;;  %v2439_v29 = vmul.f32 %v3723_v34, %v2397_v0  ;;  %v2516_v9 = vmul.f32 %v3728_v6, %v2404_v28 }
 0x933   :  { %2445 = vrot.lane.b32.xlu1 %v2395_v61, %s3908_s2 }
 0x935   :  { %2443 = vrot.lane.b32.xlu0 %v2397_v0, %s3908_s2 }
 0x937   :  { %2477 = vrot.lane.b32.xlu1 %v4465_v18, %s3908_s2 }
 0x939   :  { %2475 = vrot.lane.b32.xlu0 %v4468_v24, %s3908_s2 }
 0x93b   :  { %2493 = vrot.lane.b32.xlu1 %v2404_v28, %s3909_s22 }
 0x93d   :  { %2491 = vrot.lane.b32.xlu0 %v2401_v2, %s3909_s22 }
 0x93f   :  { %2521 = vrot.lane.b32.xlu1 %v2404_v28, %s3908_s2 }
 0x941   :  { %2519 = vrot.lane.b32.xlu0 %v2401_v2, %s3908_s2 }
 0x99c   :  { %v2462_v31 = vpop.permute.xlu1 %2461 }
 0x99d   :  { %v2472_v51 = vmul.f32 %v3725_v26, %v2462_v31 }
 0x99e   :  { %v2460_v3 = vpop.permute.xlu0 %2459 }
 0x99f   :  { %v2471_v59 = vmul.f32 %v3725_v26, %v2460_v3 }
 0x9a1   :  { %v2418_v13 = vpop.permute.xlu1 %2417 }
 0x9a2   :  { %v2428_v36 = vmul.f32 %v3722_v12, %v2418_v13 }
 0x9a3   :  { %v2416_v33 = vpop.permute.xlu0 %2415 }
 0x9a4   :  { %v2430_v43 = vadd.f32 %v2428_v36, %v2414_v35  ;;  %v2427_v38 = vmul.f32 %v3722_v12, %v2416_v33 }
 0x9a5   :  { %v2446_v44 = vpop.permute.xlu1 %2445 }
 0x9a6   :  { %v2429_v47 = vadd.f32 %v2427_v38, %v2413_v37  ;;  %v2442_v27 = vadd.f32 %v2440_v39, %v2430_v43  ;;  %v2456_v46 = vmul.f32 %v3724_v42, %v2446_v44  ;;  %v3730_v39 = vld [vmem:[#allocation7 + $0x4c] ss:$0 sm:$0xff]  ;;  %v3731_v43 = vld [vmem:[#allocation7 + $0x48] ss:$0 sm:$0xff]  ;;  %v3732_v37 = vld [vmem:[#allocation7 + $0x49] ss:$0 sm:$0xff] }
 0x9a7   :  { %v2444_v50 = vpop.permute.xlu0 %2443 }
 0x9a8   :  { %v2458_v52 = vadd.f32 %v2456_v46, %v2442_v27  ;;  %v2441_v49 = vadd.f32 %v2439_v29, %v2429_v47  ;;  %v2455_v58 = vmul.f32 %v3724_v42, %v2444_v50  ;;  %v3733_v27 = vld [vmem:[#allocation7 + $0x4a] ss:$0 sm:$0xff] }
 0x9a9   :  { %v2478_v55 = vpop.permute.xlu1 %2477 }
 0x9aa   :  { %v2457_v53 = vadd.f32 %v2455_v58, %v2441_v49  ;;  %v2474_v54 = vadd.f32 %v2472_v51, %v2458_v52  ;;  %v2488_v40 = vmul.f32 %v3726_v32, %v2478_v55  ;;  %v3734_v51 = vld [vmem:[#allocation7 + $0x4b] ss:$0 sm:$0xff] }
 0x9ab   :  { %v2476_v60 = vpop.permute.xlu0 %2475 }
 0x9ac   :  { %v2473_v41 = vadd.f32 %v2471_v59, %v2457_v53  ;;  %v2487_v62 = vmul.f32 %v3726_v32, %v2476_v60  ;;  %v2490_v5 = vadd.f32 %v2488_v40, %v2474_v54  ;;  %v3735_v54 = vld [vmem:[#allocation7 + $0x4d] ss:$0 sm:$0xff] }
 0x9ad   :  { %v2494_v45 = vpop.permute.xlu1 %2493 }
 0x9ae   :  { %v2504_v48 = vmul.f32 %v3727_v63, %v2494_v45  ;;  %v2489_v15 = vadd.f32 %v2487_v62, %v2473_v41 }
 0x9af   :  { %v2492_v8 = vpop.permute.xlu0 %2491 }
 0x9b0   :  { %v2506_v11 = vadd.f32 %v2504_v48, %v2490_v5  ;;  %v2503_v16 = vmul.f32 %v3727_v63, %v2492_v8 }
 0x9b1   :  { %v2522_v10 = vpop.permute.xlu1 %2521 }
 0x9b2   :  { %v2505_v17 = vadd.f32 %v2503_v16, %v2489_v15  ;;  %v2518_v20 = vadd.f32 %v2516_v9, %v2506_v11  ;;  %v2532_v57 = vmul.f32 %v3729_v4, %v2522_v10 }
 0x9b3   :  { %v2520_v19 = vpop.permute.xlu0 %2519 }
 0x9b4   :  { %v2534_v61 = vadd.f32 %v2532_v57, %v2518_v20  ;;  %v2517_v23 = vadd.f32 %v2515_v56, %v2505_v17  ;;  %v2531_v0 = vmul.f32 %v3729_v4, %v2520_v19  ;;  %v3736_v4 = vld [vmem:[#allocation7 + $0x4e] ss:$0 sm:$0xff]  ;;  %v3737_v56 = vld [vmem:[#allocation7 + $0x4f] ss:$0 sm:$0xff]  ;;  %v3738_v20 = vld [vmem:[#allocation7 + $0x50] ss:$0 sm:$0xff] }
 0x9b6   :  { %v2536_v25 = vmax.f32 %v2534_v61, 0.0  ;;  %v2533_v21 = vadd.f32 %v2531_v0, %v2517_v23 }
 0x9b8   :  { %v2535_v22 = vmax.f32 %v2533_v21, 0.0  ;;  %2605 = vrot.lane.b32.xlu1 %v2536_v25, %s3909_s22  ;;  %v2538_v3 = vrot.slane %v2536_v25, 7  ;;  %v2544_v28 = vrot.slane %v2536_v25, 1  ;;  %v2558_v26 = vmul.f32 %v3730_v39, %v2536_v25 }
 0x9ba   :  { %2603 = vrot.lane.b32.xlu0 %v2535_v22, %s3909_s22  ;;  %v2537_v31 = vrot.slane %v2535_v22, 7  ;;  %v2543_v30 = vrot.slane %v2535_v22, 1  ;;  %v2557_v50 = vmul.f32 %v3730_v39, %v2535_v22 }
 0x9bc   :  { %v2539_v2 = vsel %vm75_vm1, %v2537_v31, %v2538_v3  ;;  %v2540_v12 = vsel %vm75_vm1, %v2538_v3, %v2537_v31  ;;  %v2546_v34 = vsel %vm82_vm3, %v2544_v28, %v2543_v30  ;;  %v2545_v13 = vsel %vm82_vm3, %v2543_v30, %v2544_v28 }
 0x9bd   :  { %2561 = vrot.lane.b32.xlu1 %v2539_v2, %s3909_s22  ;;  %v2541_v35 = vmul.f32 %v3986_v7, %v2540_v12  ;;  %v2548_v36 = vmul.f32 %v4005_v14, %v2546_v34  ;;  %v2584_v46 = vmul.f32 %v3732_v37, %v2539_v2 }
 0x9bf   :  { %2559 = vrot.lane.b32.xlu0 %v2541_v35, %s3909_s22  ;;  %v2583_v59 = vmul.f32 %v3732_v37, %v2541_v35  ;;  %v2660_v23 = vmul.f32 %v3737_v56, %v2548_v36 }
 0x9c1   :  { %2589 = vrot.lane.b32.xlu1 %v2539_v2, %s3908_s2 }
 0x9c3   :  { %2587 = vrot.lane.b32.xlu0 %v2541_v35, %s3908_s2 }
 0x9c5   :  { %2621 = vrot.lane.b32.xlu1 %v2536_v25, %s3908_s2  ;;  %v2659_v25 = vmul.f32 %v3737_v56, %v2545_v13 }
 0x9c7   :  { %2619 = vrot.lane.b32.xlu0 %v2535_v22, %s3908_s2 }
 0x9c9   :  { %2637 = vrot.lane.b32.xlu1 %v2548_v36, %s3909_s22 }
 0x9cb   :  { %2635 = vrot.lane.b32.xlu0 %v2545_v13, %s3909_s22 }
 0x9cd   :  { %2665 = vrot.lane.b32.xlu1 %v2548_v36, %s3908_s2 }
 0x9cf   :  { %2663 = vrot.lane.b32.xlu0 %v2545_v13, %s3908_s2 }
 0xa2a   :  { %v2606_v33 = vpop.permute.xlu1 %2605 }
 0xa2b   :  { %v2616_v40 = vmul.f32 %v3734_v51, %v2606_v33 }
 0xa2c   :  { %v2604_v42 = vpop.permute.xlu0 %2603 }
 0xa2d   :  { %v2615_v45 = vmul.f32 %v3734_v51, %v2604_v42 }
 0xa2f   :  { %v2562_v38 = vpop.permute.xlu1 %2561 }
 0xa30   :  { %v2572_v44 = vmul.f32 %v3731_v43, %v2562_v38 }
 0xa31   :  { %v2560_v47 = vpop.permute.xlu0 %2559 }
 0xa32   :  { %v2574_v29 = vadd.f32 %v2572_v44, %v2558_v26  ;;  %v2571_v32 = vmul.f32 %v3731_v43, %v2560_v47 }
 0xa33   :  { %v2590_v52 = vpop.permute.xlu1 %2589 }
 0xa34   :  { %v2573_v49 = vadd.f32 %v2571_v32, %v2557_v50  ;;  %v2586_v58 = vadd.f32 %v2584_v46, %v2574_v29  ;;  %v2600_v55 = vmul.f32 %v3733_v27, %v2590_v52  ;;  %v3739_v46 = vld [vmem:[#allocation5 + $0x55] ss:$0 sm:$0xff]  ;;  %v3740_v29 = vld [vmem:[#allocation5 + $0x51] ss:$0 sm:$0xff]  ;;  %v3741_v50 = vld [vmem:[#allocation5 + $0x52] ss:$0 sm:$0xff] }
 0xa35   :  { %v2588_v53 = vpop.permute.xlu0 %2587 }
 0xa36   :  { %v2602_v60 = vadd.f32 %v2600_v55, %v2586_v58  ;;  %v2585_v63 = vadd.f32 %v2583_v59, %v2573_v49  ;;  %v2599_v41 = vmul.f32 %v3733_v27, %v2588_v53  ;;  %v3742_v58 = vld [vmem:[#allocation5 + $0x53] ss:$0 sm:$0xff] }
 0xa37   :  { %v2622_v62 = vpop.permute.xlu1 %2621 }
 0xa38   :  { %v2601_v5 = vadd.f32 %v2599_v41, %v2585_v63  ;;  %v2618_v48 = vadd.f32 %v2616_v40, %v2602_v60  ;;  %v2632_v6 = vmul.f32 %v3735_v54, %v2622_v62  ;;  %v3743_v40 = vld [vmem:[#allocation5 + $0x54] ss:$0 sm:$0xff] }
 0xa39   :  { %v2620_v8 = vpop.permute.xlu0 %2619 }
 0xa3a   :  { %v2617_v15 = vadd.f32 %v2615_v45, %v2601_v5  ;;  %v2631_v11 = vmul.f32 %v3735_v54, %v2620_v8  ;;  %v2634_v9 = vadd.f32 %v2632_v6, %v2618_v48  ;;  %v3744_v48 = vld [vmem:[#allocation5 + $0x56] ss:$0 sm:$0xff] }
 0xa3b   :  { %v2638_v16 = vpop.permute.xlu1 %2637 }
 0xa3c   :  { %v2648_v10 = vmul.f32 %v3736_v4, %v2638_v16  ;;  %v2633_v57 = vadd.f32 %v2631_v11, %v2617_v15 }
 0xa3d   :  { %v2636_v17 = vpop.permute.xlu0 %2635 }
 0xa3e   :  { %v2650_v19 = vadd.f32 %v2648_v10, %v2634_v9  ;;  %v2647_v61 = vmul.f32 %v3736_v4, %v2636_v17 }
 0xa3f   :  { %v2666_v0 = vpop.permute.xlu1 %2665 }
 0xa40   :  { %v2649_v21 = vadd.f32 %v2647_v61, %v2633_v57  ;;  %v2662_v22 = vadd.f32 %v2660_v23, %v2650_v19  ;;  %v2676_v31 = vmul.f32 %v3738_v20, %v2666_v0 }
 0xa41   :  { %v2664_v3 = vpop.permute.xlu0 %2663 }
 0xa42   :  { %v2678_v30 = vadd.f32 %v2676_v31, %v2662_v22  ;;  %v2661_v28 = vadd.f32 %v2659_v25, %v2649_v21  ;;  %v2675_v2 = vmul.f32 %v3738_v20, %v2664_v3  ;;  %v3745_v20 = vld [vmem:[#allocation5 + $0x57] ss:$0 sm:$0xff]  ;;  %v3746_v25 = vld [vmem:[#allocation5 + $0x58] ss:$0 sm:$0xff]  ;;  %v3747_v22 = vld [vmem:[#allocation5 + $0x59] ss:$0 sm:$0xff] }
 0xa44   :  { %v2680_v12 = vadd.f32 %v2678_v30, %v4465_v18  ;;  %v2677_v34 = vadd.f32 %v2675_v2, %v2661_v28 }
 0xa46   :  { %v4525_v35 = vmax.f32 %v2680_v12, 0.0  ;;  %v2679_v33 = vadd.f32 %v2677_v34, %v4468_v24 }
 0xa48   :  { %v4528_v42 = vmax.f32 %v2679_v33, 0.0  ;;  %2751 = vrot.lane.b32.xlu1 %v4525_v35, %s3909_s22  ;;  %v2684_v36 = vrot.slane %v4525_v35, 7  ;;  %v2690_v37 = vrot.slane %v4525_v35, 1  ;;  %v2704_v51 = vmul.f32 %v3739_v46, %v4525_v35 }
 0xa4a   :  { %2749 = vrot.lane.b32.xlu0 %v4528_v42, %s3909_s22  ;;  %v2683_v13 = vrot.slane %v4528_v42, 7  ;;  %v2689_v43 = vrot.slane %v4528_v42, 1  ;;  %v2703_v53 = vmul.f32 %v3739_v46, %v4528_v42 }
 0xa4c   :  { %v2685_v18 = vsel %vm75_vm1, %v2683_v13, %v2684_v36  ;;  %v2686_v39 = vsel %vm75_vm1, %v2684_v36, %v2683_v13  ;;  %v2692_v38 = vsel %vm82_vm3, %v2690_v37, %v2689_v43  ;;  %v2691_v44 = vsel %vm82_vm3, %v2689_v43, %v2690_v37 }
 0xa4d   :  { %2707 = vrot.lane.b32.xlu1 %v2685_v18, %s3909_s22  ;;  %v2687_v24 = vmul.f32 %v3986_v7, %v2686_v39  ;;  %v2694_v26 = vmul.f32 %v4005_v14, %v2692_v38  ;;  %v2730_v55 = vmul.f32 %v3741_v50, %v2685_v18  ;;  %v2805_v12 = vmul.f32 %v3746_v25, %v2691_v44 }
 0xa4f   :  { %2705 = vrot.lane.b32.xlu0 %v2687_v24, %s3909_s22  ;;  %v2729_v45 = vmul.f32 %v3741_v50, %v2687_v24  ;;  %v2806_v28 = vmul.f32 %v3746_v25, %v2694_v26 }
 0xa51   :  { %2735 = vrot.lane.b32.xlu1 %v2685_v18, %s3908_s2 }
 0xa53   :  { %2733 = vrot.lane.b32.xlu0 %v2687_v24, %s3908_s2 }
 0xa55   :  { %2767 = vrot.lane.b32.xlu1 %v4525_v35, %s3908_s2 }
 0xa57   :  { %2765 = vrot.lane.b32.xlu0 %v4528_v42, %s3908_s2 }
 0xa59   :  { %2783 = vrot.lane.b32.xlu1 %v2694_v26, %s3909_s22 }
 0xa5b   :  { %2781 = vrot.lane.b32.xlu0 %v2691_v44, %s3909_s22 }
 0xa5d   :  { %2811 = vrot.lane.b32.xlu1 %v2694_v26, %s3908_s2 }
 0xa5f   :  { %2809 = vrot.lane.b32.xlu0 %v2691_v44, %s3908_s2 }
 0xaba   :  { %v2752_v47 = vpop.permute.xlu1 %2751 }
 0xabb   :  { %v2762_v6 = vmul.f32 %v3743_v40, %v2752_v47 }
 0xabc   :  { %v2750_v27 = vpop.permute.xlu0 %2749 }
 0xabd   :  { %v2761_v16 = vmul.f32 %v3743_v40, %v2750_v27 }
 0xabf   :  { %v2708_v32 = vpop.permute.xlu1 %2707 }
 0xac0   :  { %v2718_v52 = vmul.f32 %v3740_v29, %v2708_v32 }
 0xac1   :  { %v2706_v49 = vpop.permute.xlu0 %2705 }
 0xac2   :  { %v2720_v59 = vadd.f32 %v2718_v52, %v2704_v51  ;;  %v2717_v54 = vmul.f32 %v3740_v29, %v2706_v49 }
 0xac3   :  { %v2736_v60 = vpop.permute.xlu1 %2735 }
 0xac4   :  { %v2719_v63 = vadd.f32 %v2717_v54, %v2703_v53  ;;  %v2732_v41 = vadd.f32 %v2730_v55, %v2720_v59  ;;  %v2746_v62 = vmul.f32 %v3742_v58, %v2736_v60  ;;  %v3748_v55 = vld [vmem:[#allocation7 + $0x55] ss:$0 sm:$0xff]  ;;  %v3749_v59 = vld [vmem:[#allocation7 + $0x51] ss:$0 sm:$0xff]  ;;  %v3750_v53 = vld [vmem:[#allocation7 + $0x52] ss:$0 sm:$0xff] }
 0xac5   :  { %v2734_v5 = vpop.permute.xlu0 %2733 }
 0xac6   :  { %v2748_v8 = vadd.f32 %v2746_v62, %v2732_v41  ;;  %v2731_v4 = vadd.f32 %v2729_v45, %v2719_v63  ;;  %v2745_v15 = vmul.f32 %v3742_v58, %v2734_v5  ;;  %v3751_v41 = vld [vmem:[#allocation7 + $0x53] ss:$0 sm:$0xff] }
 0xac7   :  { %v2768_v11 = vpop.permute.xlu1 %2767 }
 0xac8   :  { %v2747_v9 = vadd.f32 %v2745_v15, %v2731_v4  ;;  %v2764_v10 = vadd.f32 %v2762_v6, %v2748_v8  ;;  %v2778_v56 = vmul.f32 %v3744_v48, %v2768_v11  ;;  %v3752_v6 = vld [vmem:[#allocation7 + $0x54] ss:$0 sm:$0xff] }
 0xac9   :  { %v2766_v17 = vpop.permute.xlu0 %2765 }
 0xaca   :  { %v2763_v57 = vadd.f32 %v2761_v16, %v2747_v9  ;;  %v2777_v19 = vmul.f32 %v3744_v48, %v2766_v17  ;;  %v2780_v23 = vadd.f32 %v2778_v56, %v2764_v10  ;;  %v3753_v10 = vld [vmem:[#allocation7 + $0x56] ss:$0 sm:$0xff] }
 0xacb   :  { %v2784_v61 = vpop.permute.xlu1 %2783 }
 0xacc   :  { %v2794_v0 = vmul.f32 %v3745_v20, %v2784_v61  ;;  %v2779_v31 = vadd.f32 %v2777_v19, %v2763_v57 }
 0xacd   :  { %v2782_v21 = vpop.permute.xlu0 %2781 }
 0xace   :  { %v2796_v3 = vadd.f32 %v2794_v0, %v2780_v23  ;;  %v2793_v30 = vmul.f32 %v3745_v20, %v2782_v21 }
 0xacf   :  { %v2812_v2 = vpop.permute.xlu1 %2811 }
 0xad0   :  { %v2795_v34 = vadd.f32 %v2793_v30, %v2779_v31  ;;  %v2808_v33 = vadd.f32 %v2806_v28, %v2796_v3  ;;  %v2822_v13 = vmul.f32 %v3747_v22, %v2812_v2 }
 0xad1   :  { %v2810_v36 = vpop.permute.xlu0 %2809 }
 0xad2   :  { %v2824_v18 = vadd.f32 %v2822_v13, %v2808_v33  ;;  %v2807_v39 = vadd.f32 %v2805_v12, %v2795_v34  ;;  %v2821_v24 = vmul.f32 %v3747_v22, %v2810_v36  ;;  %v3754_v22 = vld [vmem:[#allocation7 + $0x57] ss:$0 sm:$0xff]  ;;  %v3755_v12 = vld [vmem:[#allocation7 + $0x58] ss:$0 sm:$0xff]  ;;  %v3756_v33 = vld [vmem:[#allocation7 + $0x59] ss:$0 sm:$0xff] }
 0xad4   :  { %v2826_v43 = vmax.f32 %v2824_v18, 0.0  ;;  %v2823_v37 = vadd.f32 %v2821_v24, %v2807_v39 }
 0xad6   :  { %v2825_v38 = vmax.f32 %v2823_v37, 0.0  ;;  %2895 = vrot.lane.b32.xlu1 %v2826_v43, %s3909_s22  ;;  %v2828_v27 = vrot.slane %v2826_v43, 7  ;;  %v2834_v26 = vrot.slane %v2826_v43, 1  ;;  %v2848_v40 = vmul.f32 %v3748_v55, %v2826_v43 }
 0xad8   :  { %2893 = vrot.lane.b32.xlu0 %v2825_v38, %s3909_s22  ;;  %v2827_v47 = vrot.slane %v2825_v38, 7  ;;  %v2833_v46 = vrot.slane %v2825_v38, 1  ;;  %v2847_v5 = vmul.f32 %v3748_v55, %v2825_v38 }
 0xada   :  { %v2829_v44 = vsel %vm75_vm1, %v2827_v47, %v2828_v27  ;;  %v2830_v29 = vsel %vm75_vm1, %v2828_v27, %v2827_v47  ;;  %v2836_v50 = vsel %vm82_vm3, %v2834_v26, %v2833_v46  ;;  %v2835_v32 = vsel %vm82_vm3, %v2833_v46, %v2834_v26 }
 0xadb   :  { %2851 = vrot.lane.b32.xlu1 %v2829_v44, %s3909_s22  ;;  %v2831_v51 = vmul.f32 %v3986_v7, %v2830_v29  ;;  %v2838_v52 = vmul.f32 %v4005_v14, %v2836_v50  ;;  %v2874_v62 = vmul.f32 %v3750_v53, %v2829_v44 }
 0xadd   :  { %2849 = vrot.lane.b32.xlu0 %v2831_v51, %s3909_s22  ;;  %v2873_v16 = vmul.f32 %v3750_v53, %v2831_v51  ;;  %v2950_v39 = vmul.f32 %v3755_v12, %v2838_v52 }
 0xadf   :  { %2879 = vrot.lane.b32.xlu1 %v2829_v44, %s3908_s2 }
 0xae1   :  { %2877 = vrot.lane.b32.xlu0 %v2831_v51, %s3908_s2 }
 0xae3   :  { %2911 = vrot.lane.b32.xlu1 %v2826_v43, %s3908_s2  ;;  %v2949_v43 = vmul.f32 %v3755_v12, %v2835_v32 }
 0xae5   :  { %2909 = vrot.lane.b32.xlu0 %v2825_v38, %s3908_s2 }
 0xae7   :  { %2927 = vrot.lane.b32.xlu1 %v2838_v52, %s3909_s22 }
 0xae9   :  { %2925 = vrot.lane.b32.xlu0 %v2835_v32, %s3909_s22 }
 0xaeb   :  { %2955 = vrot.lane.b32.xlu1 %v2838_v52, %s3908_s2 }
 0xaed   :  { %2953 = vrot.lane.b32.xlu0 %v2835_v32, %s3908_s2 }
 0xb48   :  { %v2896_v49 = vpop.permute.xlu1 %2895 }
 0xb49   :  { %v2906_v56 = vmul.f32 %v3752_v6, %v2896_v49 }
 0xb4a   :  { %v2894_v58 = vpop.permute.xlu0 %2893 }
 0xb4b   :  { %v2905_v61 = vmul.f32 %v3752_v6, %v2894_v58 }
 0xb4d   :  { %v2852_v54 = vpop.permute.xlu1 %2851 }
 0xb4e   :  { %v2862_v60 = vmul.f32 %v3749_v59, %v2852_v54 }
 0xb4f   :  { %v2850_v63 = vpop.permute.xlu0 %2849 }
 0xb50   :  { %v2864_v45 = vadd.f32 %v2862_v60, %v2848_v40  ;;  %v2861_v48 = vmul.f32 %v3749_v59, %v2850_v63 }
 0xb51   :  { %v2880_v8 = vpop.permute.xlu1 %2879 }
 0xb52   :  { %v2863_v4 = vadd.f32 %v2861_v48, %v2847_v5  ;;  %v2876_v15 = vadd.f32 %v2874_v62, %v2864_v45  ;;  %v2890_v11 = vmul.f32 %v3751_v41, %v2880_v8  ;;  %v3757_v62 = vld [vmem:[#allocation5 + $0x5e] ss:$0 sm:$0xff]  ;;  %v3758_v45 = vld [vmem:[#allocation5 + $0x5a] ss:$0 sm:$0xff]  ;;  %v3759_v5 = vld [vmem:[#allocation5 + $0x5b] ss:$0 sm:$0xff] }
 0xb53   :  { %v2878_v9 = vpop.permute.xlu0 %2877 }
 0xb54   :  { %v2892_v17 = vadd.f32 %v2890_v11, %v2876_v15  ;;  %v2875_v20 = vadd.f32 %v2873_v16, %v2863_v4  ;;  %v2889_v57 = vmul.f32 %v3751_v41, %v2878_v9  ;;  %v3760_v15 = vld [vmem:[#allocation5 + $0x5c] ss:$0 sm:$0xff] }
 0xb55   :  { %v2912_v19 = vpop.permute.xlu1 %2911 }
 0xb56   :  { %v2891_v23 = vadd.f32 %v2889_v57, %v2875_v20  ;;  %v2908_v0 = vadd.f32 %v2906_v56, %v2892_v17  ;;  %v2922_v25 = vmul.f32 %v3753_v10, %v2912_v19  ;;  %v3761_v56 = vld [vmem:[#allocation5 + $0x5d] ss:$0 sm:$0xff] }
 0xb57   :  { %v2910_v21 = vpop.permute.xlu0 %2909 }
 0xb58   :  { %v2907_v31 = vadd.f32 %v2905_v61, %v2891_v23  ;;  %v2921_v3 = vmul.f32 %v3753_v10, %v2910_v21  ;;  %v2924_v28 = vadd.f32 %v2922_v25, %v2908_v0  ;;  %v3762_v0 = vld [vmem:[#allocation5 + $0x5f] ss:$0 sm:$0xff] }
 0xb59   :  { %v2928_v30 = vpop.permute.xlu1 %2927 }
 0xb5a   :  { %v2938_v2 = vmul.f32 %v3754_v22, %v2928_v30  ;;  %v2923_v13 = vadd.f32 %v2921_v3, %v2907_v31 }
 0xb5b   :  { %v2926_v34 = vpop.permute.xlu0 %2925 }
 0xb5c   :  { %v2940_v36 = vadd.f32 %v2938_v2, %v2924_v28  ;;  %v2937_v18 = vmul.f32 %v3754_v22, %v2926_v34 }
 0xb5d   :  { %v2956_v24 = vpop.permute.xlu1 %2955 }
 0xb5e   :  { %v2939_v37 = vadd.f32 %v2937_v18, %v2923_v13  ;;  %v2952_v38 = vadd.f32 %v2950_v39, %v2940_v36  ;;  %v2966_v47 = vmul.f32 %v3756_v33, %v2956_v24 }
 0xb5f   :  { %v2954_v27 = vpop.permute.xlu0 %2953 }
 0xb60   :  { %v2968_v46 = vadd.f32 %v2966_v47, %v2952_v38  ;;  %v2951_v26 = vadd.f32 %v2949_v43, %v2939_v37  ;;  %v2965_v44 = vmul.f32 %v3756_v33, %v2954_v27  ;;  %v3763_v33 = vld [vmem:[#allocation5 + $0x60] ss:$0 sm:$0xff]  ;;  %v3764_v43 = vld [vmem:[#allocation5 + $0x61] ss:$0 sm:$0xff]  ;;  %v3765_v38 = vld [vmem:[#allocation5 + $0x62] ss:$0 sm:$0xff] }
 0xb62   :  { %v2970_v29 = vadd.f32 %v2968_v46, %v4525_v35  ;;  %v2967_v50 = vadd.f32 %v2965_v44, %v2951_v26 }
 0xb64   :  { %v4585_v51 = vmax.f32 %v2970_v29, 0.0  ;;  %v2969_v49 = vadd.f32 %v2967_v50, %v4528_v42 }
 0xb66   :  { %v4588_v58 = vmax.f32 %v2969_v49, 0.0  ;;  %3041 = vrot.lane.b32.xlu1 %v4585_v51, %s3909_s22  ;;  %v2974_v52 = vrot.slane %v4585_v51, 7  ;;  %v2980_v53 = vrot.slane %v4585_v51, 1  ;;  %v2994_v6 = vmul.f32 %v3757_v62, %v4585_v51 }
 0xb68   :  { %3039 = vrot.lane.b32.xlu0 %v4588_v58, %s3909_s22  ;;  %v2973_v32 = vrot.slane %v4588_v58, 7  ;;  %v2979_v59 = vrot.slane %v4588_v58, 1  ;;  %v2993_v9 = vmul.f32 %v3757_v62, %v4588_v58 }
 0xb6a   :  { %v2975_v35 = vsel %vm75_vm1, %v2973_v32, %v2974_v52  ;;  %v2976_v55 = vsel %vm75_vm1, %v2974_v52, %v2973_v32  ;;  %v2982_v54 = vsel %vm82_vm3, %v2980_v53, %v2979_v59  ;;  %v2981_v60 = vsel %vm82_vm3, %v2979_v59, %v2980_v53 }
 0xb6b   :  { %2997 = vrot.lane.b32.xlu1 %v2975_v35, %s3909_s22  ;;  %v2977_v42 = vmul.f32 %v3986_v7, %v2976_v55  ;;  %v2984_v40 = vmul.f32 %v4005_v14, %v2982_v54  ;;  %v3020_v11 = vmul.f32 %v3759_v5, %v2975_v35  ;;  %v3095_v29 = vmul.f32 %v3764_v43, %v2981_v60 }
 0xb6d   :  { %2995 = vrot.lane.b32.xlu0 %v2977_v42, %s3909_s22  ;;  %v3019_v61 = vmul.f32 %v3759_v5, %v2977_v42  ;;  %v3096_v26 = vmul.f32 %v3764_v43, %v2984_v40 }
 0xb6f   :  { %3025 = vrot.lane.b32.xlu1 %v2975_v35, %s3908_s2 }
 0xb71   :  { %3023 = vrot.lane.b32.xlu0 %v2977_v42, %s3908_s2 }
 0xb73   :  { %3057 = vrot.lane.b32.xlu1 %v4585_v51, %s3908_s2 }
 0xb75   :  { %3055 = vrot.lane.b32.xlu0 %v4588_v58, %s3908_s2 }
 0xb77   :  { %3073 = vrot.lane.b32.xlu1 %v2984_v40, %s3909_s22 }
 0xb79   :  { %3071 = vrot.lane.b32.xlu0 %v2981_v60, %s3909_s22 }
 0xb7b   :  { %3101 = vrot.lane.b32.xlu1 %v2984_v40, %s3908_s2 }
 0xb7d   :  { %3099 = vrot.lane.b32.xlu0 %v2981_v60, %s3908_s2 }
 0xbd8   :  { %v3042_v63 = vpop.permute.xlu1 %3041 }
 0xbd9   :  { %v3052_v25 = vmul.f32 %v3761_v56, %v3042_v63 }
 0xbda   :  { %v3040_v41 = vpop.permute.xlu0 %3039 }
 0xbdb   :  { %v3051_v30 = vmul.f32 %v3761_v56, %v3040_v41 }
 0xbdd   :  { %v2998_v48 = vpop.permute.xlu1 %2997 }
 0xbde   :  { %v3008_v8 = vmul.f32 %v3758_v45, %v2998_v48 }
 0xbdf   :  { %v2996_v4 = vpop.permute.xlu0 %2995 }
 0xbe0   :  { %v3010_v16 = vadd.f32 %v3008_v8, %v2994_v6  ;;  %v3007_v10 = vmul.f32 %v3758_v45, %v2996_v4 }
 0xbe1   :  { %v3026_v17 = vpop.permute.xlu1 %3025 }
 0xbe2   :  { %v3009_v20 = vadd.f32 %v3007_v10, %v2993_v9  ;;  %v3022_v57 = vadd.f32 %v3020_v11, %v3010_v16  ;;  %v3036_v19 = vmul.f32 %v3760_v15, %v3026_v17  ;;  %v3766_v11 = vld [vmem:[#allocation7 + $0x5e] ss:$0 sm:$0xff]  ;;  %v3767_v16 = vld [vmem:[#allocation7 + $0x5a] ss:$0 sm:$0xff]  ;;  %v3768_v9 = vld [vmem:[#allocation7 + $0x5b] ss:$0 sm:$0xff] }
 0xbe3   :  { %v3024_v23 = vpop.permute.xlu0 %3023 }
 0xbe4   :  { %v3038_v21 = vadd.f32 %v3036_v19, %v3022_v57  ;;  %v3021_v22 = vadd.f32 %v3019_v61, %v3009_v20  ;;  %v3035_v31 = vmul.f32 %v3760_v15, %v3024_v23  ;;  %v3769_v57 = vld [vmem:[#allocation7 + $0x5c] ss:$0 sm:$0xff] }
 0xbe5   :  { %v3058_v3 = vpop.permute.xlu1 %3057 }
 0xbe6   :  { %v3037_v28 = vadd.f32 %v3035_v31, %v3021_v22  ;;  %v3054_v2 = vadd.f32 %v3052_v25, %v3038_v21  ;;  %v3068_v12 = vmul.f32 %v3762_v0, %v3058_v3  ;;  %v3770_v25 = vld [vmem:[#allocation7 + $0x5d] ss:$0 sm:$0xff] }
 0xbe7   :  { %v3056_v34 = vpop.permute.xlu0 %3055 }
 0xbe8   :  { %v3053_v13 = vadd.f32 %v3051_v30, %v3037_v28  ;;  %v3067_v36 = vmul.f32 %v3762_v0, %v3056_v34  ;;  %v3070_v39 = vadd.f32 %v3068_v12, %v3054_v2  ;;  %v3771_v2 = vld [vmem:[#allocation7 + $0x5f] ss:$0 sm:$0xff] }
 0xbe9   :  { %v3074_v18 = vpop.permute.xlu1 %3073 }
 0xbea   :  { %v3084_v24 = vmul.f32 %v3763_v33, %v3074_v18  ;;  %v3069_v47 = vadd.f32 %v3067_v36, %v3053_v13 }
 0xbeb   :  { %v3072_v37 = vpop.permute.xlu0 %3071 }
 0xbec   :  { %v3086_v27 = vadd.f32 %v3084_v24, %v3070_v39  ;;  %v3083_v46 = vmul.f32 %v3763_v33, %v3072_v37 }
 0xbed   :  { %v3102_v44 = vpop.permute.xlu1 %3101 }
 0xbee   :  { %v3085_v50 = vadd.f32 %v3083_v46, %v3069_v47  ;;  %v3098_v49 = vadd.f32 %v3096_v26, %v3086_v27  ;;  %v3112_v32 = vmul.f32 %v3765_v38, %v3102_v44 }
 0xbef   :  { %v3100_v52 = vpop.permute.xlu0 %3099 }
 0xbf0   :  { %v3114_v35 = vadd.f32 %v3112_v32, %v3098_v49  ;;  %v3097_v55 = vadd.f32 %v3095_v29, %v3085_v50  ;;  %v3111_v42 = vmul.f32 %v3765_v38, %v3100_v52  ;;  %v3772_v38 = vld [vmem:[#allocation7 + $0x60] ss:$0 sm:$0xff]  ;;  %v3773_v29 = vld [vmem:[#allocation7 + $0x61] ss:$0 sm:$0xff]  ;;  %v3774_v49 = vld [vmem:[#allocation7 + $0x62] ss:$0 sm:$0xff] }
 0xbf2   :  { %v3116_v59 = vmax.f32 %v3114_v35, 0.0  ;;  %v3113_v53 = vadd.f32 %v3111_v42, %v3097_v55 }
 0xbf4   :  { %v3115_v54 = vmax.f32 %v3113_v53, 0.0  ;;  %3185 = vrot.lane.b32.xlu1 %v3116_v59, %s3909_s22  ;;  %v3118_v41 = vrot.slane %v3116_v59, 7  ;;  %v3124_v40 = vrot.slane %v3116_v59, 1  ;;  %v3138_v56 = vmul.f32 %v3766_v11, %v3116_v59 }
 0xbf6   :  { %3183 = vrot.lane.b32.xlu0 %v3115_v54, %s3909_s22  ;;  %v3117_v63 = vrot.slane %v3115_v54, 7  ;;  %v3123_v62 = vrot.slane %v3115_v54, 1  ;;  %v3137_v23 = vmul.f32 %v3766_v11, %v3115_v54 }
 0xbf8   :  { %v3119_v60 = vsel %vm75_vm1, %v3117_v63, %v3118_v41  ;;  %v3120_v45 = vsel %vm75_vm1, %v3118_v41, %v3117_v63  ;;  %v3126_v5 = vsel %vm82_vm3, %v3124_v40, %v3123_v62  ;;  %v3125_v48 = vsel %vm82_vm3, %v3123_v62, %v3124_v40 }
 0xbf9   :  { %3141 = vrot.lane.b32.xlu1 %v3119_v60, %s3909_s22  ;;  %v3121_v6 = vmul.f32 %v3986_v7, %v3120_v45  ;;  %v3128_v8 = vmul.f32 %v4005_v14, %v3126_v5  ;;  %v3164_v19 = vmul.f32 %v3768_v9, %v3119_v60 }
 0xbfb   :  { %3139 = vrot.lane.b32.xlu0 %v3121_v6, %s3909_s22  ;;  %v3163_v30 = vmul.f32 %v3768_v9, %v3121_v6  ;;  %v3240_v55 = vmul.f32 %v3773_v29, %v3128_v8 }
 0xbfd   :  { %3169 = vrot.lane.b32.xlu1 %v3119_v60, %s3908_s2 }
 0xbff   :  { %3167 = vrot.lane.b32.xlu0 %v3121_v6, %s3908_s2 }
 0xc01   :  { %3201 = vrot.lane.b32.xlu1 %v3116_v59, %s3908_s2  ;;  %v3239_v59 = vmul.f32 %v3773_v29, %v3125_v48 }
 0xc03   :  { %3199 = vrot.lane.b32.xlu0 %v3115_v54, %s3908_s2 }
 0xc05   :  { %3217 = vrot.lane.b32.xlu1 %v3128_v8, %s3909_s22 }
 0xc07   :  { %3215 = vrot.lane.b32.xlu0 %v3125_v48, %s3909_s22 }
 0xc09   :  { %3245 = vrot.lane.b32.xlu1 %v3128_v8, %s3908_s2 }
 0xc0b   :  { %3243 = vrot.lane.b32.xlu0 %v3125_v48, %s3908_s2 }
 0xc66   :  { %v3186_v4 = vpop.permute.xlu1 %3185 }
 0xc67   :  { %v3196_v12 = vmul.f32 %v3770_v25, %v3186_v4 }
 0xc68   :  { %v3184_v15 = vpop.permute.xlu0 %3183 }
 0xc69   :  { %v3195_v18 = vmul.f32 %v3770_v25, %v3184_v15 }
 0xc6b   :  { %v3142_v10 = vpop.permute.xlu1 %3141 }
 0xc6c   :  { %v3152_v17 = vmul.f32 %v3767_v16, %v3142_v10 }
 0xc6d   :  { %v3140_v20 = vpop.permute.xlu0 %3139 }
 0xc6e   :  { %v3154_v61 = vadd.f32 %v3152_v17, %v3138_v56  ;;  %v3151_v0 = vmul.f32 %v3767_v16, %v3140_v20 }
 0xc6f   :  { %v3170_v21 = vpop.permute.xlu1 %3169 }
 0xc70   :  { %v3153_v22 = vadd.f32 %v3151_v0, %v3137_v23  ;;  %v3166_v31 = vadd.f32 %v3164_v19, %v3154_v61  ;;  %v3180_v3 = vmul.f32 %v3769_v57, %v3170_v21  ;;  %v3775_v19 = vld [vmem:[#allocation5 + $0x67] ss:$0 sm:$0xff]  ;;  %v3776_v61 = vld [vmem:[#allocation5 + $0x63] ss:$0 sm:$0xff]  ;;  %v3777_v23 = vld [vmem:[#allocation5 + $0x64] ss:$0 sm:$0xff] }
 0xc71   :  { %v3168_v28 = vpop.permute.xlu0 %3167 }
 0xc72   :  { %v3182_v34 = vadd.f32 %v3180_v3, %v3166_v31  ;;  %v3165_v33 = vadd.f32 %v3163_v30, %v3153_v22  ;;  %v3179_v13 = vmul.f32 %v3769_v57, %v3168_v28  ;;  %v3778_v31 = vld [vmem:[#allocation5 + $0x65] ss:$0 sm:$0xff] }
 0xc73   :  { %v3202_v36 = vpop.permute.xlu1 %3201 }
 0xc74   :  { %v3181_v39 = vadd.f32 %v3179_v13, %v3165_v33  ;;  %v3198_v24 = vadd.f32 %v3196_v12, %v3182_v34  ;;  %v3212_v43 = vmul.f32 %v3771_v2, %v3202_v36  ;;  %v3779_v12 = vld [vmem:[#allocation5 + $0x66] ss:$0 sm:$0xff] }
 0xc75   :  { %v3200_v37 = vpop.permute.xlu0 %3199 }
 0xc76   :  { %v3197_v47 = vadd.f32 %v3195_v18, %v3181_v39  ;;  %v3211_v27 = vmul.f32 %v3771_v2, %v3200_v37  ;;  %v3214_v26 = vadd.f32 %v3212_v43, %v3198_v24  ;;  %v3780_v24 = vld [vmem:[#allocation5 + $0x68] ss:$0 sm:$0xff] }
 0xc77   :  { %v3218_v46 = vpop.permute.xlu1 %3217 }
 0xc78   :  { %v3228_v44 = vmul.f32 %v3772_v38, %v3218_v46  ;;  %v3213_v32 = vadd.f32 %v3211_v27, %v3197_v47 }
 0xc79   :  { %v3216_v50 = vpop.permute.xlu0 %3215 }
 0xc7a   :  { %v3230_v52 = vadd.f32 %v3228_v44, %v3214_v26  ;;  %v3227_v35 = vmul.f32 %v3772_v38, %v3216_v50 }
 0xc7b   :  { %v3246_v42 = vpop.permute.xlu1 %3245 }
 0xc7c   :  { %v3229_v53 = vadd.f32 %v3227_v35, %v3213_v32  ;;  %v3242_v54 = vadd.f32 %v3240_v55, %v3230_v52  ;;  %v3256_v63 = vmul.f32 %v3774_v49, %v3246_v42 }
 0xc7d   :  { %v3244_v41 = vpop.permute.xlu0 %3243 }
 0xc7e   :  { %v3258_v62 = vadd.f32 %v3256_v63, %v3242_v54  ;;  %v3241_v40 = vadd.f32 %v3239_v59, %v3229_v53  ;;  %v3255_v60 = vmul.f32 %v3774_v49, %v3244_v41  ;;  %v3781_v49 = vld [vmem:[#allocation5 + $0x69] ss:$0 sm:$0xff]  ;;  %v3782_v59 = vld [vmem:[#allocation5 + $0x6a] ss:$0 sm:$0xff]  ;;  %v3783_v54 = vld [vmem:[#allocation5 + $0x6b] ss:$0 sm:$0xff] }
 0xc80   :  { %v3260_v45 = vadd.f32 %v3258_v62, %v4585_v51  ;;  %v3257_v5 = vadd.f32 %v3255_v60, %v3241_v40 }
 0xc82   :  { %v4645_v6 = vmax.f32 %v3260_v45, 0.0  ;;  %v3259_v4 = vadd.f32 %v3257_v5, %v4588_v58 }
 0xc84   :  { %v4648_v15 = vmax.f32 %v3259_v4, 0.0  ;;  %3331 = vrot.lane.b32.xlu1 %v4645_v6, %s3909_s22  ;;  %v3264_v8 = vrot.slane %v4645_v6, 7  ;;  %v3270_v9 = vrot.slane %v4645_v6, 1  ;;  %v3284_v25 = vmul.f32 %v3775_v19, %v4645_v6 }
 0xc86   :  { %3329 = vrot.lane.b32.xlu0 %v4648_v15, %s3909_s22  ;;  %v3263_v48 = vrot.slane %v4648_v15, 7  ;;  %v3269_v16 = vrot.slane %v4648_v15, 1  ;;  %v3283_v28 = vmul.f32 %v3775_v19, %v4648_v15 }
 0xc88   :  { %v3265_v51 = vsel %vm75_vm1, %v3263_v48, %v3264_v8  ;;  %v3266_v11 = vsel %vm75_vm1, %v3264_v8, %v3263_v48  ;;  %v3272_v10 = vsel %vm82_vm3, %v3270_v9, %v3269_v16  ;;  %v3271_v17 = vsel %vm82_vm3, %v3269_v16, %v3270_v9 }
 0xc89   :  { %3287 = vrot.lane.b32.xlu1 %v3265_v51, %s3909_s22  ;;  %v3267_v58 = vmul.f32 %v3986_v7, %v3266_v11  ;;  %v3274_v56 = vmul.f32 %v4005_v14, %v3272_v10  ;;  %v3310_v3 = vmul.f32 %v3777_v23, %v3265_v51  ;;  %v3385_v45 = vmul.f32 %v3782_v59, %v3271_v17 }
 0xc8b   :  { %3285 = vrot.lane.b32.xlu0 %v3267_v58, %s3909_s22  ;;  %v3309_v18 = vmul.f32 %v3777_v23, %v3267_v58  ;;  %v3386_v40 = vmul.f32 %v3782_v59, %v3274_v56 }
 0xc8d   :  { %3315 = vrot.lane.b32.xlu1 %v3265_v51, %s3908_s2 }
 0xc8f   :  { %3313 = vrot.lane.b32.xlu0 %v3267_v58, %s3908_s2 }
 0xc91   :  { %3347 = vrot.lane.b32.xlu1 %v4645_v6, %s3908_s2 }
 0xc93   :  { %3345 = vrot.lane.b32.xlu0 %v4648_v15, %s3908_s2 }
 0xc95   :  { %3363 = vrot.lane.b32.xlu1 %v3274_v56, %s3909_s22 }
 0xc97   :  { %3361 = vrot.lane.b32.xlu0 %v3271_v17, %s3909_s22 }
 0xc99   :  { %3391 = vrot.lane.b32.xlu1 %v3274_v56, %s3908_s2 }
 0xc9b   :  { %3389 = vrot.lane.b32.xlu0 %v3271_v17, %s3908_s2 }
 0xcf6   :  { %v3332_v20 = vpop.permute.xlu1 %3331 }
 0xcf7   :  { %v3342_v43 = vmul.f32 %v3779_v12, %v3332_v20 }
 0xcf8   :  { %v3330_v57 = vpop.permute.xlu0 %3329 }
 0xcf9   :  { %v3341_v46 = vmul.f32 %v3779_v12, %v3330_v57 }
 0xcfb   :  { %v3288_v0 = vpop.permute.xlu1 %3287 }
 0xcfc   :  { %v3298_v21 = vmul.f32 %v3776_v61, %v3288_v0 }
 0xcfd   :  { %v3286_v22 = vpop.permute.xlu0 %3285 }
 0xcfe   :  { %v3300_v30 = vadd.f32 %v3298_v21, %v3284_v25  ;;  %v3297_v2 = vmul.f32 %v3776_v61, %v3286_v22  ;;  %v3784_v22 = vld [vmem:[#allocation7 + $0x67] ss:$0 sm:$0xff] }
 0xcff   :  { %v3316_v34 = vpop.permute.xlu1 %3315 }
 0xd00   :  { %v3299_v33 = vadd.f32 %v3297_v2, %v3283_v28  ;;  %v3312_v13 = vadd.f32 %v3310_v3, %v3300_v30  ;;  %v3326_v36 = vmul.f32 %v3778_v31, %v3316_v34  ;;  %v3786_v3 = vld [vmem:[#allocation7 + $0x64] ss:$0 sm:$0xff]  ;;  %v3787_v34 = vld [vmem:[#allocation7 + $0x65] ss:$0 sm:$0xff] }
 0xd01   :  { %v3314_v39 = vpop.permute.xlu0 %3313 }
 0xd02   :  { %v3328_v37 = vadd.f32 %v3326_v36, %v3312_v13  ;;  %v3311_v38 = vadd.f32 %v3309_v18, %v3299_v33  ;;  %v3325_v47 = vmul.f32 %v3778_v31, %v3314_v39  ;;  %v3785_v31 = vld [vmem:[#allocation7 + $0x63] ss:$0 sm:$0xff]  ;;  %v3788_v18 = vld [vmem:[#allocation7 + $0x66] ss:$0 sm:$0xff] }
 0xd03   :  { %v3348_v27 = vpop.permute.xlu1 %3347 }
 0xd04   :  { %v3327_v26 = vadd.f32 %v3325_v47, %v3311_v38  ;;  %v3344_v44 = vadd.f32 %v3342_v43, %v3328_v37  ;;  %v3358_v29 = vmul.f32 %v3780_v24, %v3348_v27  ;;  %v3789_v27 = vld [vmem:[#allocation7 + $0x68] ss:$0 sm:$0xff] }
 0xd05   :  { %v3346_v50 = vpop.permute.xlu0 %3345 }
 0xd06   :  { %v3343_v32 = vadd.f32 %v3341_v46, %v3327_v26  ;;  %v3357_v52 = vmul.f32 %v3780_v24, %v3346_v50  ;;  %v3360_v55 = vadd.f32 %v3358_v29, %v3344_v44 }
 0xd07   :  { %v3364_v35 = vpop.permute.xlu1 %3363 }
 0xd08   :  { %v3374_v42 = vmul.f32 %v3781_v49, %v3364_v35  ;;  %v3359_v63 = vadd.f32 %v3357_v52, %v3343_v32 }
 0xd09   :  { %v3362_v53 = vpop.permute.xlu0 %3361 }
 0xd0a   :  { %v3376_v41 = vadd.f32 %v3374_v42, %v3360_v55  ;;  %v3373_v62 = vmul.f32 %v3781_v49, %v3362_v53  ;;  %v3790_v42 = vld [vmem:[#allocation7 + $0x69] ss:$0 sm:$0xff] }
 0xd0b   :  { %v3392_v60 = vpop.permute.xlu1 %3391 }
 0xd0c   :  { %v3375_v5 = vadd.f32 %v3373_v62, %v3359_v63  ;;  %v3388_v4 = vadd.f32 %v3386_v40, %v3376_v41  ;;  %v3402_v48 = vmul.f32 %v3783_v54, %v3392_v60  ;;  %v3791_v62 = vld [vmem:[#allocation7 + $0x6a] ss:$0 sm:$0xff]  ;;  %v3792_v60 = vld [vmem:[#allocation7 + $0x6b] ss:$0 sm:$0xff] }
 0xd0d   :  { %v3390_v8 = vpop.permute.xlu0 %3389 }
 0xd0e   :  { %v3404_v51 = vadd.f32 %v3402_v48, %v3388_v4  ;;  %v3387_v11 = vadd.f32 %v3385_v45, %v3375_v5  ;;  %v3401_v58 = vmul.f32 %v3783_v54, %v3390_v8 }
 0xd10   :  { %v3406_v16 = vmax.f32 %v3404_v51, 0.0  ;;  %v3403_v9 = vadd.f32 %v3401_v58, %v3387_v11 }
 0xd12   :  { %v3405_v10 = vmax.f32 %v3403_v9, 0.0  ;;  %3475 = vrot.lane.b32.xlu1 %v3406_v16, %s3909_s22  ;;  %v3408_v57 = vrot.slane %v3406_v16, 7  ;;  %v3414_v56 = vrot.slane %v3406_v16, 1  ;;  %v3428_v28 = vmul.f32 %v3784_v22, %v3406_v16 }
 0xd14   :  { %3473 = vrot.lane.b32.xlu0 %v3405_v10, %s3909_s22  ;;  %v3407_v20 = vrot.slane %v3405_v10, 7  ;;  %v3413_v19 = vrot.slane %v3405_v10, 1  ;;  %v3427_v13 = vmul.f32 %v3784_v22, %v3405_v10 }
 0xd16   :  { %v3409_v17 = vsel %vm75_vm1, %v3407_v20, %v3408_v57  ;;  %v3410_v61 = vsel %vm75_vm1, %v3408_v57, %v3407_v20  ;;  %v3416_v23 = vsel %vm82_vm3, %v3414_v56, %v3413_v19  ;;  %v3415_v0 = vsel %vm82_vm3, %v3413_v19, %v3414_v56 }
 0xd17   :  { %3431 = vrot.lane.b32.xlu1 %v3409_v17, %s3909_s22  ;;  %v3411_v25 = vmul.f32 %v3986_v7, %v3410_v61  ;;  %v3418_v21 = vmul.f32 %v4005_v14, %v3416_v23  ;;  %v3454_v33 = vmul.f32 %v3786_v3, %v3409_v17  ;;  %v3529_v51 = vmul.f32 %v3791_v62, %v3415_v0 }
 0xd19   :  { %3429 = vrot.lane.b32.xlu0 %v3411_v25, %s3909_s22  ;;  %v3453_v38 = vmul.f32 %v3786_v3, %v3411_v25  ;;  %v3530_v48 = vmul.f32 %v3791_v62, %v3418_v21 }
 0xd1b   :  { %3459 = vrot.lane.b32.xlu1 %v3409_v17, %s3908_s2 }
 0xd1d   :  { %3457 = vrot.lane.b32.xlu0 %v3411_v25, %s3908_s2  ;;  %v3804_v25 = vld [vmem:[#allocation2 + $0x8] sm:$0xff] }
 0xd1f   :  { %3491 = vrot.lane.b32.xlu1 %v3406_v16, %s3908_s2 }
 0xd21   :  { %3489 = vrot.lane.b32.xlu0 %v3405_v10, %s3908_s2 }
 0xd23   :  { %3507 = vrot.lane.b32.xlu1 %v3418_v21, %s3909_s22 }
 0xd25   :  { %3505 = vrot.lane.b32.xlu0 %v3415_v0, %s3909_s22 }
 0xd27   :  { %3535 = vrot.lane.b32.xlu1 %v3418_v21, %s3908_s2 }
 0xd29   :  { %3533 = vrot.lane.b32.xlu0 %v3415_v0, %s3908_s2 }
 0xd84   :  { %v3476_v1 = vpop.permute.xlu1 %3475 }
 0xd85   :  { %v3486_v46 = vmul.f32 %v3788_v18, %v3476_v1  ;;  %v3805_v1 = vld [vmem:[#allocation2] sm:$0xff] }
 0xd86   :  { %v3474_v7 = vpop.permute.xlu0 %3473 }
 0xd87   :  { %v3485_v49 = vmul.f32 %v3788_v18, %v3474_v7 }
 0xd89   :  { %v3432_v30 = vpop.permute.xlu1 %3431 }
 0xd8a   :  { %v3442_v2 = vmul.f32 %v3785_v31, %v3432_v30 }
 0xd8b   :  { %v3430_v12 = vpop.permute.xlu0 %3429 }
 0xd8c   :  { %v3444_v14 = vadd.f32 %v3442_v2, %v3428_v28  ;;  %v3441_v36 = vmul.f32 %v3785_v31, %v3430_v12 }
 0xd8d   :  { %v3460_v39 = vpop.permute.xlu1 %3459 }
 0xd8e   :  { %v3443_v24 = vadd.f32 %v3441_v36, %v3427_v13  ;;  %v3456_v43 = vadd.f32 %v3454_v33, %v3444_v14  ;;  %v3470_v37 = vmul.f32 %v3787_v34, %v3460_v39 }
 0xd8f   :  { %v3458_v47 = vpop.permute.xlu0 %3457 }
 0xd90   :  { %v3472_v26 = vadd.f32 %v3470_v37, %v3456_v43  ;;  %v3455_v44 = vadd.f32 %v3453_v38, %v3443_v24  ;;  %v3469_v29 = vmul.f32 %v3787_v34, %v3458_v47 }
 0xd91   :  { %v3492_v50 = vpop.permute.xlu1 %3491 }
 0xd92   :  { %v3471_v32 = vadd.f32 %v3469_v29, %v3455_v44  ;;  %v3488_v52 = vadd.f32 %v3486_v46, %v3472_v26  ;;  %v3502_v35 = vmul.f32 %v3789_v27, %v3492_v50 }
 0xd93   :  { %v3490_v55 = vpop.permute.xlu0 %3489 }
 0xd94   :  { %v3487_v59 = vadd.f32 %v3485_v49, %v3471_v32  ;;  %v3501_v53 = vmul.f32 %v3789_v27, %v3490_v55  ;;  %v3504_v63 = vadd.f32 %v3502_v35, %v3488_v52 }
 0xd95   :  { %v3508_v54 = vpop.permute.xlu1 %3507 }
 0xd96   :  { %v3518_v41 = vmul.f32 %v3790_v42, %v3508_v54  ;;  %v3503_v45 = vadd.f32 %v3501_v53, %v3487_v59 }
 0xd97   :  { %v3506_v40 = vpop.permute.xlu0 %3505 }
 0xd98   :  { %v3520_v5 = vadd.f32 %v3518_v41, %v3504_v63  ;;  %v3517_v4 = vmul.f32 %v3790_v42, %v3506_v40 }
 0xd99   :  { %v3536_v8 = vpop.permute.xlu1 %3535 }
 0xd9a   :  { %v3519_v11 = vadd.f32 %v3517_v4, %v3503_v45  ;;  %v3532_v58 = vadd.f32 %v3530_v48, %v3520_v5  ;;  %v3546_v16 = vmul.f32 %v3792_v60, %v3536_v8 }
 0xd9b   :  { %v3534_v9 = vpop.permute.xlu0 %3533 }
 0xd9c   :  { %v3548_v10 = vadd.f32 %v3546_v16, %v3532_v58  ;;  %v3531_v20 = vadd.f32 %v3529_v51, %v3519_v11  ;;  %v3545_v57 = vmul.f32 %v3792_v60, %v3534_v9 }
 0xd9e   :  { %v3550_v19 = vadd.f32 %v3548_v10, %v4645_v6  ;;  %v3547_v56 = vadd.f32 %v3545_v57, %v3531_v20 }
 0xda0   :  { %v3552_v17 = vmax.f32 %v3550_v19, 0.0  ;;  %v3549_v61 = vadd.f32 %v3547_v56, %v4648_v15 }
 0xda2   :  { %v3551_v23 = vmax.f32 %v3549_v61, 0.0  ;;  %v3554_v21 = vadd.f32 %v3804_v25, %v3552_v17 }
 0xda4   :  { %v3553_v0 = vadd.f32 %v3805_v1, %v3551_v23  ;;  %3556 = vst [vmem:[#allocation8 + $0x8] sm:$0xff] %v3554_v21 }
 0xda6   :  { %3555 = vst [vmem:[#allocation8] sm:$0xff] %v3553_v0 }
 0xda7   :  { %3883 = shalt.err (!%p3880_p0)
}
 0xda8   :  { %s3884_s29 = scalar_lea.hbm %s4724_s3, 256 }
 0xda9   :  { %p3885_p1 = scmp.ne.s32.totalorder %s4724_s3, %s3884_s29  ;;  %p3888_p2 = scmp.lt.u32.totalorder %s3884_s29, %s4724_s3 }
 0xdab   :  { %p3890_p3 = pnand %p3888_p2, %p3885_p1 }
 0xdad   :  { %3893 = shalt.err (!%p3890_p3)
}
 0xdae   :  { %3568 = dma.vmem_to_hbm [thread:$0]  %s3563_s25, 256, %s4724_s3, [#allocation4], %s3904_s1, %s3904_s1, %s3905_s9  }
 0xdaf   :  { %3898 = dma.done.wait [#allocation4], 256  }
 0xdb0   :  { %3899 = vsyncadd [#allocation4], 4294967040 }
 0xdb1   :  { %3572 = vsyncpa [#allocation3], 1 }
 0xdb2   :  { %3573 = vsyncpa [#allocation6], 1 }
 0xdb3   :  { %3574 = vsyncpa [#allocation4], 1 }

</bundles_post_ra>
